<compile_context>
chip_gen: v7x
topology: tpu7x:2x2x1
jax: 0.10.0
libtpu: 0.0.40
codegen_flags: <defaults>
</compile_context>

<pallas_src>
from functools import partial

import numpy as np
import jax
import jax.numpy as jnp
from jax import lax
from jax.experimental import pallas as pl
from jax.experimental.pallas import tpu as pltpu


# ---- tile sizes ----------------------------------------------------------------------
_TM = 256          # node-row tile for the adjacency matmuls
_TK = 256          # node-column (K) tile for the adjacency matmuls
_TB = 256          # masked-node row tile (SCE loss)
_TE = 256          # edge-row tile (KL loss)
_VMEM_LIMIT = 48 * 1024 * 1024   # safe on v5e/v6e (128 MiB) and v7x (64 MiB per TC)


def _round_up(a, b):
    return ((a + b - 1) // b) * b


def _cparams(sem):
    return pltpu.CompilerParams(dimension_semantics=sem,
                                vmem_limit_bytes=_VMEM_LIMIT)


# ----------------------------- Pallas kernels -----------------------------------------

def _hw_prep_kernel(h_ref, w_ref, dinv_ref, o_ref):
    # hw_scaled[i] = dinv[i] * (H @ W)[i]   (folds the right D^-1/2 of the GCN norm)
    hw = jnp.dot(h_ref[...].astype(jnp.bfloat16), w_ref[...],
                 preferred_element_type=jnp.float32)
    o_ref[...] = (hw * dinv_ref[...]).astype(jnp.bfloat16)


def hw_prep(h, w_bf, dinv, tm):
    n_pad, f_in = h.shape
    f_out = w_bf.shape[1]
    return pl.pallas_call(
        _hw_prep_kernel,
        out_shape=jax.ShapeDtypeStruct((n_pad, f_out), jnp.bfloat16),
        grid=(n_pad // tm,),
        in_specs=[pl.BlockSpec((tm, f_in), lambda i: (i, 0)),
                  pl.BlockSpec((f_in, f_out), lambda i: (0, 0)),
                  pl.BlockSpec((tm, 1), lambda i: (i, 0))],
        out_specs=pl.BlockSpec((tm, f_out), lambda i: (i, 0)),
        compiler_params=_cparams(("parallel",)),
    )(h, w_bf, dinv)


def _dec_hw_prep_kernel(h_ref, e2d_ref, keep_ref, w_ref, dinv_ref, o_ref):
    # Fused encoder_to_decoder (bias-free linear) + re-mask + decoder H@W + dinv scale.
    rep = jnp.dot(h_ref[...].astype(jnp.bfloat16), e2d_ref[...],
                  preferred_element_type=jnp.float32)
    rep = rep * keep_ref[...]                      # rep[mask_nodes] = 0
    hw = jnp.dot(rep.astype(jnp.bfloat16), w_ref[...],
                 preferred_element_type=jnp.float32)
    o_ref[...] = (hw * dinv_ref[...]).astype(jnp.bfloat16)


def dec_hw_prep(h, e2d_bf, keep, w_bf, dinv, tm):
    n_pad, hdim = h.shape
    f_out = w_bf.shape[1]
    return pl.pallas_call(
        _dec_hw_prep_kernel,
        out_shape=jax.ShapeDtypeStruct((n_pad, f_out), jnp.bfloat16),
        grid=(n_pad // tm,),
        in_specs=[pl.BlockSpec((tm, hdim), lambda i: (i, 0)),
                  pl.BlockSpec((hdim, hdim), lambda i: (0, 0)),
                  pl.BlockSpec((tm, 1), lambda i: (i, 0)),
                  pl.BlockSpec((hdim, f_out), lambda i: (0, 0)),
                  pl.BlockSpec((tm, 1), lambda i: (i, 0))],
        out_specs=pl.BlockSpec((tm, f_out), lambda i: (i, 0)),
        compiler_params=_cparams(("parallel",)),
    )(h, e2d_bf, keep, w_bf, dinv)


def _gcn_agg_kernel(a_ref, hw_ref, hwblk_ref, dinv_ref, b_ref, o_ref, acc_ref, *, relu):
    # out[i] = act( dinv[i] * ( sum_j A[i,j] * hw_scaled[j] + hw_scaled[i] ) + b )
    # K-tiled: accumulate A-block @ hw-block into an f32 VMEM accumulator.
    k = pl.program_id(1)

    @pl.when(k == 0)
    def _init():
        acc_ref[...] = jnp.zeros_like(acc_ref)

    acc_ref[...] += jnp.dot(a_ref[...], hw_ref[...], preferred_element_type=jnp.float32)

    @pl.when(k == pl.num_programs(1) - 1)
    def _fin():
        out = (acc_ref[...] + hwblk_ref[...].astype(jnp.float32)) * dinv_ref[...] + b_ref[...]
        if relu:
            out = jnp.maximum(out, 0.0)
        o_ref[...] = out.astype(o_ref.dtype)


def gcn_aggregate(a_bf, hw_bf, dinv, b, *, relu, out_dtype, tm, tk):
    n_pad = a_bf.shape[0]
    f_out = hw_bf.shape[1]
    flops = 2 * n_pad * n_pad * f_out
    bytes_acc = (n_pad * n_pad * 2 + 2 * n_pad * f_out * 2
                 + n_pad * f_out * np.dtype(out_dtype).itemsize + n_pad * 4)
    return pl.pallas_call(
        partial(_gcn_agg_kernel, relu=relu),
        out_shape=jax.ShapeDtypeStruct((n_pad, f_out), out_dtype),
        grid=(n_pad // tm, n_pad // tk),
        in_specs=[pl.BlockSpec((tm, tk), lambda i, k: (i, k)),
                  pl.BlockSpec((tk, f_out), lambda i, k: (k, 0)),
                  pl.BlockSpec((tm, f_out), lambda i, k: (i, 0)),    # self-loop rows
                  pl.BlockSpec((tm, 1), lambda i, k: (i, 0)),
                  pl.BlockSpec((1, f_out), lambda i, k: (0, 0))],
        out_specs=pl.BlockSpec((tm, f_out), lambda i, k: (i, 0)),
        scratch_shapes=[pltpu.VMEM((tm, f_out), jnp.float32)],
        compiler_params=_cparams(("parallel", "arbitrary")),
        cost_estimate=pl.CostEstimate(flops=int(flops), transcendentals=0,
                                      bytes_accessed=int(bytes_acc)),
    )(a_bf, hw_bf, hw_bf, dinv, b)


def _dec_neigh_kernel(a_ref, hwdec_ref, z_ref, hwdecblk_ref, zblk_ref,
                      dinv_ref, decb_ref, deg_ref, valid_ref,
                      recon_ref, szz_ref, szy_ref, sz_ref, sy_ref,
                      acc_rec, acc_nb):
    # Fused decoder GCN aggregation + neighbor-mean statistics: each A block is streamed
    # once and feeds both A@hw_dec (recon accumulator) and A@z (neighbor-sum accumulator).
    # At the last K step of a row slab: write recon rows and accumulate the global
    # covariance sums S_zz = sum z z^T, S_zy = sum z y^T, column sums of z and y.
    i = pl.program_id(0)
    k = pl.program_id(1)
    nk = pl.num_programs(1)

    @pl.when(jnp.logical_and(i == 0, k == 0))
    def _init_global():
        szz_ref[...] = jnp.zeros_like(szz_ref)
        szy_ref[...] = jnp.zeros_like(szy_ref)
        sz_ref[...] = jnp.zeros_like(sz_ref)
        sy_ref[...] = jnp.zeros_like(sy_ref)

    @pl.when(k == 0)
    def _init_row():
        acc_rec[...] = jnp.zeros_like(acc_rec)
        acc_nb[...] = jnp.zeros_like(acc_nb)

    a = a_ref[...]
    acc_rec[...] += jnp.dot(a, hwdec_ref[...], preferred_element_type=jnp.float32)
    acc_nb[...] += jnp.dot(a, z_ref[...], preferred_element_type=jnp.float32)

    @pl.when(k == nk - 1)
    def _row_fin():
        # decoder output (single GCN layer in decoding mode -> no activation)
        recon_ref[...] = (acc_rec[...] + hwdecblk_ref[...].astype(jnp.float32)) \
            * dinv_ref[...] + decb_ref[...]

        valid = valid_ref[...]
        z = zblk_ref[...].astype(jnp.float32) * valid
        deg = deg_ref[...]
        y = jnp.where(deg > 0.0,
                      acc_nb[...] / jnp.where(deg > 0.0, deg, 1.0),
                      0.0) * valid
        sz_ref[...] += jnp.sum(z, axis=0, keepdims=True)
        sy_ref[...] += jnp.sum(y, axis=0, keepdims=True)
        dn = (((0,), (0,)), ((), ()))          # contract node dim -> (H, H), no transpose op
        szz_ref[...] += lax.dot_general(z, z, dn, preferred_element_type=jnp.float32)
        szy_ref[...] += lax.dot_general(z, y, dn, preferred_element_type=jnp.float32)


def decoder_and_neighbor(a_bf, hw_dec, z, dinv, dec_b, deg, valid, tm, tk):
    n_pad = a_bf.shape[0]
    f_out = hw_dec.shape[1]
    hp = z.shape[1]
    flops = 2 * n_pad * n_pad * (f_out + hp) + 2 * n_pad * hp * hp
    bytes_acc = (n_pad * n_pad * 2 + 2 * n_pad * (f_out + hp) * 2
                 + n_pad * f_out * 4 + 2 * hp * hp * 4 + n_pad * 12)
    return pl.pallas_call(
        _dec_neigh_kernel,
        out_shape=(jax.ShapeDtypeStruct((n_pad, f_out), jnp.float32),   # recon
                   jax.ShapeDtypeStruct((hp, hp), jnp.float32),         # S_zz
                   jax.ShapeDtypeStruct((hp, hp), jnp.float32),         # S_zy
                   jax.ShapeDtypeStruct((1, hp), jnp.float32),          # col sum z
                   jax.ShapeDtypeStruct((1, hp), jnp.float32)),         # col sum y
        grid=(n_pad // tm, n_pad // tk),
        in_specs=[pl.BlockSpec((tm, tk), lambda i, k: (i, k)),
                  pl.BlockSpec((tk, f_out), lambda i, k: (k, 0)),
                  pl.BlockSpec((tk, hp), lambda i, k: (k, 0)),
                  pl.BlockSpec((tm, f_out), lambda i, k: (i, 0)),       # self-loop rows
                  pl.BlockSpec((tm, hp), lambda i, k: (i, 0)),          # z row slab
                  pl.BlockSpec((tm, 1), lambda i, k: (i, 0)),
                  pl.BlockSpec((1, f_out), lambda i, k: (0, 0)),
                  pl.BlockSpec((tm, 1), lambda i, k: (i, 0)),
                  pl.BlockSpec((tm, 1), lambda i, k: (i, 0))],
        out_specs=(pl.BlockSpec((tm, f_out), lambda i, k: (i, 0)),
                   pl.BlockSpec((hp, hp), lambda i, k: (0, 0)),
                   pl.BlockSpec((hp, hp), lambda i, k: (0, 0)),
                   pl.BlockSpec((1, hp), lambda i, k: (0, 0)),
                   pl.BlockSpec((1, hp), lambda i, k: (0, 0))),
        scratch_shapes=[pltpu.VMEM((tm, f_out), jnp.float32),
                        pltpu.VMEM((tm, hp), jnp.float32)],
        compiler_params=_cparams(("arbitrary", "arbitrary")),
        cost_estimate=pl.CostEstimate(flops=int(flops), transcendentals=0,
                                      bytes_accessed=int(bytes_acc)),
    )(a_bf, hw_dec, z, hw_dec, z, dinv, dec_b, deg, valid)


def _sce_kernel(x_ref, y_ref, valid_ref, o_ref, *, alpha, count):
    # sce_loss: mean over valid rows of (1 - cos(x_i, y_i))^alpha, rows l2-normalized.
    i = pl.program_id(0)

    @pl.when(i == 0)
    def _init():
        o_ref[...] = jnp.zeros_like(o_ref)

    x = x_ref[...]
    y = y_ref[...]
    xn = x / jnp.maximum(jnp.sqrt(jnp.sum(x * x, axis=-1, keepdims=True)), 1e-12)
    yn = y / jnp.maximum(jnp.sqrt(jnp.sum(y * y, axis=-1, keepdims=True)), 1e-12)
    cos = jnp.sum(xn * yn, axis=-1, keepdims=True)
    contrib = jnp.sum(valid_ref[...] * (1.0 - cos) ** alpha)
    o_ref[...] = o_ref[...] + contrib

    @pl.when(i == pl.num_programs(0) - 1)
    def _fin():
        o_ref[...] = o_ref[...] / float(count)


def sce_loss(x, y, valid, *, alpha, count, tb):
    m_pad, f_pad = x.shape
    return pl.pallas_call(
        partial(_sce_kernel, alpha=int(alpha), count=int(max(count, 1))),
        out_shape=jax.ShapeDtypeStruct((1, 1), jnp.float32),
        grid=(m_pad // tb,),
        in_specs=[pl.BlockSpec((tb, f_pad), lambda i: (i, 0)),
                  pl.BlockSpec((tb, f_pad), lambda i: (i, 0)),
                  pl.BlockSpec((tb, 1), lambda i: (i, 0))],
        out_specs=pl.BlockSpec((1, 1), lambda i: (0, 0)),
        compiler_params=_cparams(("arbitrary",)),
    )(x, y, valid)[0, 0]


def _kl_kernel(xs_ref, xd_ref, rs_ref, rd_ref, evalid_ref, fmask_ref, o_ref,
               *, tau, num_edges):
    # KLDiv(log_target=True, batchmean): sum(exp(t) * (t - q)) / E, with
    # t = log_softmax(|x[s]-x[d]|/tau), q = log_softmax(|recon[s]-recon[d]|/tau).
    # The abs-diffs are computed on-chip; padded edges are masked explicitly.
    i = pl.program_id(0)

    @pl.when(i == 0)
    def _init():
        o_ref[...] = jnp.zeros_like(o_ref)

    fmask = fmask_ref[...] > 0.0
    neg = jnp.float32(-1e30)

    def log_softmax(z):
        z = jnp.where(fmask, z, neg)
        m = jnp.max(z, axis=-1, keepdims=True)
        zs = z - m
        return zs - jnp.log(jnp.sum(jnp.where(fmask, jnp.exp(zs), 0.0),
                                    axis=-1, keepdims=True))

    di = jnp.abs(xs_ref[...] - xd_ref[...])
    dr = jnp.abs(rs_ref[...] - rd_ref[...])
    t = log_softmax(di / tau)
    q = log_softmax(dr / tau)
    contrib = jnp.sum(evalid_ref[...] * jnp.where(fmask, jnp.exp(t) * (t - q), 0.0))
    o_ref[...] = o_ref[...] + contrib

    @pl.when(i == pl.num_programs(0) - 1)
    def _fin():
        o_ref[...] = o_ref[...] / float(num_edges)


def kl_edge_loss(xs, xd, rs, rd, edge_valid, feat_valid, *, tau, num_edges, te):
    e_pad, f_pad = xs.shape
    return pl.pallas_call(
        partial(_kl_kernel, tau=float(tau), num_edges=int(max(num_edges, 1))),
        out_shape=jax.ShapeDtypeStruct((1, 1), jnp.float32),
        grid=(e_pad // te,),
        in_specs=[pl.BlockSpec((te, f_pad), lambda i: (i, 0)),
                  pl.BlockSpec((te, f_pad), lambda i: (i, 0)),
                  pl.BlockSpec((te, f_pad), lambda i: (i, 0)),
                  pl.BlockSpec((te, f_pad), lambda i: (i, 0)),
                  pl.BlockSpec((te, 1), lambda i: (i, 0)),
                  pl.BlockSpec((1, f_pad), lambda i: (0, 0))],
        out_specs=pl.BlockSpec((1, 1), lambda i: (0, 0)),
        compiler_params=_cparams(("arbitrary",)),
    )(xs, xd, rs, rd, edge_valid, feat_valid)[0, 0]


# ----------------------------- Parameters (deterministic) -----------------------------

def _glorot(key, shape):
    lim = float(np.sqrt(6.0 / (shape[0] + shape[1])))
    return jax.random.uniform(key, shape, jnp.float32, -lim, lim)


def init_params(key, in_dim, num_hidden, num_layers):
    keys = jax.random.split(key, num_layers + 2)
    enc_w, enc_b = [], []
    d_in = in_dim
    for l in range(num_layers):
        enc_w.append(_glorot(keys[l], (d_in, num_hidden)))
        enc_b.append(jnp.zeros((1, num_hidden), jnp.float32))
        d_in = num_hidden
    dec_w = _glorot(keys[num_layers], (num_hidden, in_dim))
    dec_b = jnp.zeros((1, in_dim), jnp.float32)
    e2d_w = _glorot(keys[num_layers + 1], (num_hidden, num_hidden))   # encoder_to_decoder
    # enc_mask_token is zeros(1, in_dim); masking sets masked rows to 0 directly.
    return dict(enc_w=enc_w, enc_b=enc_b, dec_w=dec_w, dec_b=dec_b, e2d_w=e2d_w)


# ----------------------------- Forward (mask_attr_prediction) -----------------------------

def premodel_forward(params, A_np, x, cfg, seed=0):
    N, in_dim = x.shape
    num_hidden = params["enc_w"][-1].shape[1]
    rng = np.random.RandomState(seed)

    # ---- encoding_mask_noise (host-side random permutations, as in torch.randperm) ----
    mask_rate = cfg["mask_rate"]
    replace_rate = cfg["replace_rate"]
    mask_token_rate = 1.0 - replace_rate
    perm = rng.permutation(N)
    num_mask = int(mask_rate * N)
    mask_nodes = perm[:num_mask]
    if replace_rate > 0 and num_mask > 0:
        num_noise = int(replace_rate * num_mask)
        perm_mask = rng.permutation(num_mask)
        token_nodes = mask_nodes[perm_mask[: int(mask_token_rate * num_mask)]]
        noise_nodes = mask_nodes[perm_mask[num_mask - num_noise:]] if num_noise > 0 \
            else mask_nodes[:0]
        noise_src = rng.permutation(N)[:num_noise]
    else:
        num_noise = 0
        token_nodes = mask_nodes
        noise_nodes = mask_nodes[:0]
        noise_src = mask_nodes[:0]

    # ---- padded sizes (lane-dense features, tileable node/edge/mask dims) ----
    Np = _round_up(_round_up(max(N, 1), _TM), _TK)
    Fp = _round_up(in_dim, 128)
    Hp = _round_up(num_hidden, 128)
    Mp = _round_up(max(num_mask, 1), _TB)
    src, dst = np.nonzero(A_np)                       # extract_indices(g)
    E = int(src.shape[0])
    Ep = _round_up(max(E, 1), _TE)

    # ---- host-side per-node vectors (no normalized (N,N) matrix is ever materialized) ----
    deg_np = A_np.sum(axis=1).astype(np.float32)      # degrees without self-loops
    dinv = np.ones((Np, 1), np.float32)
    dinv[:N, 0] = 1.0 / np.sqrt(deg_np + 1.0)         # D^-1/2 of (A + I)
    deg = np.zeros((Np, 1), np.float32)
    deg[:N, 0] = deg_np
    keep = np.ones((Np, 1), np.float32)               # re-mask multiplier for the decoder
    keep[mask_nodes, 0] = 0.0
    keep[N:, 0] = 0.0
    node_valid = np.zeros((Np, 1), np.float32)
    node_valid[:N, 0] = 1.0

    A_pad = np.zeros((Np, Np), np.float32)
    A_pad[:N, :N] = A_np
    # TODO(synk): on v7x the 0/1 adjacency could be stored as float8_e4m3 (still exact)
    # to halve the dominant N^2 HBM stream; kept bf16 here for v5e/v6e portability.
    A_bf = jnp.asarray(A_pad, jnp.bfloat16)           # 0/1 adjacency is exact in bf16

    mask_idx = np.zeros((Mp,), np.int32)
    mask_idx[:num_mask] = mask_nodes
    mask_valid = np.zeros((Mp, 1), np.float32)
    mask_valid[:num_mask, 0] = 1.0
    # TODO(synk): the x[src]-x[dst] row gather is still an XLA-level gather; a
    # PrefetchScalarGridSpec kernel with in-kernel row DMA would avoid materializing the
    # four gathered (E, F) arrays entirely.
    src_pad = np.zeros((Ep,), np.int32)
    src_pad[:E] = src
    dst_pad = np.zeros((Ep,), np.int32)
    dst_pad[:E] = dst
    edge_valid = np.zeros((Ep, 1), np.float32)
    edge_valid[:E, 0] = 1.0
    feat_valid = np.zeros((1, Fp), np.float32)
    feat_valid[0, :in_dim] = 1.0

    token_idx = jnp.asarray(token_nodes.astype(np.int32))
    noise_idx = jnp.asarray(noise_nodes.astype(np.int32))
    noise_src_idx = jnp.asarray(noise_src.astype(np.int32))

    alpha_l = cfg["alpha_l"]
    tau = cfg["tau"]
    differ = cfg["differ"]
    norm_enc = cfg["norm_enc"]

    @jax.jit
    def _device_forward(params, A_bf, xj, dinv_j, deg_j, keep_j, valid_j,
                        token_idx, noise_idx, noise_src_idx,
                        mask_idx_j, mask_valid_j, src_j, dst_j,
                        edge_valid_j, feat_valid_j):
        x_pad = jnp.pad(xj, ((0, Np - N), (0, Fp - in_dim)))

        # ---- apply masking / noise replacement ----
        use_x = x_pad
        if token_idx.shape[0] > 0:
            use_x = use_x.at[token_idx].set(0.0)
        if num_noise > 0:
            use_x = use_x.at[noise_idx].set(x_pad[noise_src_idx])

        # ---- pad + bf16-cast weights (fused by XLA inside the jit) ----
        def pad_w(w, r, c):
            return jnp.pad(w, ((0, r - w.shape[0]), (0, c - w.shape[1])))

        enc_w = [pad_w(w, Fp if l == 0 else Hp, Hp).astype(jnp.bfloat16)
                 for l, w in enumerate(params["enc_w"])]
        enc_b = [pad_w(b, 1, Hp) for b in params["enc_b"]]
        dec_w = pad_w(params["dec_w"], Hp, Fp).astype(jnp.bfloat16)
        dec_b = pad_w(params["dec_b"], 1, Fp)
        e2d_w = pad_w(params["e2d_w"], Hp, Hp).astype(jnp.bfloat16)

        # ---- encoder (GCN, ReLU on every layer when encoding); hidden states in bf16 ----
        h = use_x
        for w, b in zip(enc_w, enc_b):
            hw = hw_prep(h, w, dinv_j, _TM)
            h = gcn_aggregate(A_bf, hw, dinv_j, b, relu=True,
                              out_dtype=jnp.bfloat16, tm=_TM, tk=_TK)
        enc_rep = h                                    # bf16 (Np, Hp)

        # TODO(synk): tokenizer_nonpara(g, x) is computed in the reference but its output
        # is never used in the loss; omitted here.

        # ---- fused encoder_to_decoder + re-mask + decoder H@W ----
        hw_dec = dec_hw_prep(enc_rep, e2d_w, keep_j, dec_w, dinv_j, _TM)

        # ---- fused decoder aggregation + neighbor-mean/covariance stats (A streamed once) ----
        recon, szz, szy, sz, sy = decoder_and_neighbor(
            A_bf, hw_dec, enc_rep, dinv_j, dec_b, deg_j, valid_j, _TM, _TK)

        # covariance finalize: tiny (H, H) mean-correction math done in XLA.
        n_f = jnp.float32(N)
        mz = sz / n_f                                  # (1, Hp)
        my = sy / n_f
        cov_x = (szz - n_f * (mz.T @ mz)) / (n_f - 1.0)
        con_xy = (szy - n_f * (mz.T @ my)) / (n_f - 1.0)
        cov_x = cov_x[:num_hidden, :num_hidden]
        con_xy = con_xy[:num_hidden, :num_hidden]
        off = 1.0 - jnp.eye(num_hidden, dtype=jnp.float32)
        loss_x = jnp.sum((cov_x * off) ** 2) / float(num_hidden * num_hidden - num_hidden)
        loss_xy = jnp.sum(con_xy ** 2) / float(num_hidden * num_hidden)
        loss_neig = loss_x + loss_xy

        # ---- SCE reconstruction loss on masked nodes ----
        recon_m = recon[mask_idx_j]
        x_m = x_pad[mask_idx_j]
        loss_rec = sce_loss(recon_m, x_m, mask_valid_j,
                            alpha=alpha_l, count=num_mask, tb=_TB)

        # ---- edge_distribution_high + KLDiv(log_target, batchmean) ----
        xs = x_pad[src_j]
        xd = x_pad[dst_j]
        rs = recon[src_j]
        rd = recon[dst_j]
        loss_s = kl_edge_loss(xs, xd, rs, rd, edge_valid_j, feat_valid_j,
                              tau=tau, num_edges=E, te=_TE)

        loss = loss_rec + differ * loss_s + norm_enc * loss_neig
        return loss, differ * loss_s, norm_enc * loss_neig, recon[:N, :in_dim]

    loss, loss_s_w, loss_neig_w, recon = _device_forward(
        params, A_bf, jnp.asarray(x, jnp.float32),
        jnp.asarray(dinv), jnp.asarray(deg), jnp.asarray(keep), jnp.asarray(node_valid),
        token_idx, noise_idx, noise_src_idx,
        jnp.asarray(mask_idx), jnp.asarray(mask_valid),
        jnp.asarray(src_pad), jnp.asarray(dst_pad),
        jnp.asarray(edge_valid), jnp.asarray(feat_valid))

    loss_item = {"loss": float(loss)}      # host sync only after the whole device graph
    return loss, loss_item, loss_s_w, loss_neig_w, recon


# ----------------------------- Example run -----------------------------

if __name__ == "__main__":
    N, in_dim, num_hidden, num_layers = 64, 16, 32, 2
    cfg = dict(mask_rate=0.3, replace_rate=0.1, tau=1.0, differ=0.5,
               norm_enc=0.1, alpha_l=2)

    key = jax.random.PRNGKey(0)
    kx, kp = jax.random.split(key)
    x = jax.random.normal(kx, (N, in_dim), jnp.float32)

    # deterministic symmetric adjacency, no self-loops
    arng = np.random.RandomState(1)
    upper = np.triu((arng.rand(N, N) < 0.15).astype(np.float32), 1)
    A_np = upper + upper.T

    params = init_params(kp, in_dim, num_hidden, num_layers)

    loss, loss_item, loss_s, loss_test, recon = premodel_forward(params, A_np, x, cfg)
    jax.block_until_ready((loss, loss_s, loss_test, recon))
    print("KERNEL_OK")
</pallas_src>

<mosaic_0001>
module attributes {stable_mosaic.version = 11 : i64} {
  func.func @_hw_prep_kernel(%arg0: i32, %arg1: memref<256x128xf32, #tpu.memory_space<vmem>>, %arg2: memref<128x128xbf16, #tpu.memory_space<vmem>>, %arg3: memref<256x1xf32, #tpu.memory_space<vmem>>, %arg4: memref<256x128xbf16, #tpu.memory_space<vmem>>) attributes {dimension_semantics = [#tpu.dimension_semantics<parallel>], iteration_bounds = array<i64: 1>, scalar_prefetch = 0 : i64, scratch_operands = 0 : i64, tpu.core_type = #tpu.core_type<tc>, window_params = [{transform_indices = @transform_0, window_bounds = array<i64: 256, 128>}, {pipeline_mode = #tpu.pipeline_mode<synchronous>, transform_indices = @transform_1, window_bounds = array<i64: 128, 128>}, {transform_indices = @transform_2, window_bounds = array<i64: 256, 1>}, {transform_indices = @transform_3, window_bounds = array<i64: 256, 128>}]} {
    %c0 = arith.constant 0 : index
    %c0_0 = arith.constant 0 : index
    %0 = vector.load %arg1[%c0, %c0_0] : memref<256x128xf32, #tpu.memory_space<vmem>>, vector<256x128xf32>
    %1 = arith.truncf %0 : vector<256x128xf32> to vector<256x128xbf16>
    %c0_1 = arith.constant 0 : index
    %c0_2 = arith.constant 0 : index
    %2 = vector.load %arg2[%c0_1, %c0_2] : memref<128x128xbf16, #tpu.memory_space<vmem>>, vector<128x128xbf16>
    %cst = arith.constant dense<0.000000e+00> : vector<256x128xf32>
    %3 = tpu.matmul %1, %2, %cst {dimension_numbers = #tpu.dot_dimension_numbers<[1], [0], [0], [1], [0, 0, 1, 1], [], []>} : vector<256x128xbf16>, vector<128x128xbf16>, vector<256x128xf32> -> vector<256x128xf32>
    %c0_3 = arith.constant 0 : index
    %c0_4 = arith.constant 0 : index
    %4 = vector.load %arg3[%c0_3, %c0_4] : memref<256x1xf32, #tpu.memory_space<vmem>>, vector<256x1xf32>
    %5 = vector.broadcast %4 : vector<256x1xf32> to vector<256x128xf32>
    %6 = arith.mulf %3, %5 : vector<256x128xf32>
    %7 = arith.truncf %6 : vector<256x128xf32> to vector<256x128xbf16>
    %c0_5 = arith.constant 0 : index
    %c0_6 = arith.constant 0 : index
    %8 = vector.load %arg4[%c0_5, %c0_6] : memref<256x128xbf16, #tpu.memory_space<vmem>>, vector<256x128xbf16>
    tpu.vector_store %arg4[%c0_5, %c0_6], %7 {strides = array<i32>} : memref<256x128xbf16, #tpu.memory_space<vmem>>, vector<256x128xbf16>,
    return
  }
  func.func @transform_0(%arg0: i32) -> (i32, i32) {
    %c0_i32 = arith.constant 0 : i32
    %c0_i32_0 = arith.constant 0 : i32
    return %arg0, %c0_i32 : i32, i32
  }
  func.func @transform_1(%arg0: i32) -> (i32, i32) {
    %c0_i32 = arith.constant 0 : i32
    %c0_i32_0 = arith.constant 0 : i32
    %c0_i32_1 = arith.constant 0 : i32
    return %c0_i32, %c0_i32_0 : i32, i32
  }
  func.func @transform_2(%arg0: i32) -> (i32, i32) {
    %c0_i32 = arith.constant 0 : i32
    %c0_i32_0 = arith.constant 0 : i32
    return %arg0, %c0_i32 : i32, i32
  }
  func.func @transform_3(%arg0: i32) -> (i32, i32) {
    %c0_i32 = arith.constant 0 : i32
    %c0_i32_0 = arith.constant 0 : i32
    return %arg0, %c0_i32 : i32, i32
  }
}

module attributes {stable_mosaic.version = 11 : i64} {
  func.func @_gcn_agg_kernel(%arg0: i32, %arg1: i32, %arg2: memref<256x256xbf16, #tpu.memory_space<vmem>>, %arg3: memref<256x128xbf16, #tpu.memory_space<vmem>>, %arg4: memref<256x128xbf16, #tpu.memory_space<vmem>>, %arg5: memref<256x1xf32, #tpu.memory_space<vmem>>, %arg6: memref<1x128xf32, #tpu.memory_space<vmem>>, %arg7: memref<256x128xbf16, #tpu.memory_space<vmem>>, %arg8: memref<256x128xf32, #tpu.memory_space<vmem>>) attributes {dimension_semantics = [#tpu.dimension_semantics<parallel>, #tpu.dimension_semantics<arbitrary>], iteration_bounds = array<i64: 1, 1>, scalar_prefetch = 0 : i64, scratch_operands = 1 : i64, tpu.core_type = #tpu.core_type<tc>, window_params = [{transform_indices = @transform_0, window_bounds = array<i64: 256, 256>}, {transform_indices = @transform_1, window_bounds = array<i64: 256, 128>}, {transform_indices = @transform_2, window_bounds = array<i64: 256, 128>}, {transform_indices = @transform_3, window_bounds = array<i64: 256, 1>}, {pipeline_mode = #tpu.pipeline_mode<synchronous>, transform_indices = @transform_4, window_bounds = array<i64: 1, 128>}, {transform_indices = @transform_5, window_bounds = array<i64: 256, 128>}]} {
    %c0_i32 = arith.constant 0 : i32
    %0 = arith.cmpi eq, %arg1, %c0_i32 : i32
    %1 = arith.extui %0 : i1 to i32
    %c0_i32_0 = arith.constant 0 : i32
    %2 = arith.cmpi ne, %1, %c0_i32_0 : i32
    scf.if %2 {
      %cst_10 = arith.constant 0.000000e+00 : f32
      %12 = vector.broadcast %cst_10 : f32 to vector<256x128xf32>
      %c0_11 = arith.constant 0 : index
      %c0_12 = arith.constant 0 : index
      %13 = vector.load %arg8[%c0_11, %c0_12] : memref<256x128xf32, #tpu.memory_space<vmem>>, vector<256x128xf32>
      tpu.vector_store %arg8[%c0_11, %c0_12], %12 {strides = array<i32>} : memref<256x128xf32, #tpu.memory_space<vmem>>, vector<256x128xf32>,
    } else {
    }
    %c0 = arith.constant 0 : index
    %c0_1 = arith.constant 0 : index
    %3 = vector.load %arg8[%c0, %c0_1] : memref<256x128xf32, #tpu.memory_space<vmem>>, vector<256x128xf32>
    %c0_2 = arith.constant 0 : index
    %c0_3 = arith.constant 0 : index
    %4 = vector.load %arg2[%c0_2, %c0_3] : memref<256x256xbf16, #tpu.memory_space<vmem>>, vector<256x256xbf16>
    %c0_4 = arith.constant 0 : index
    %c0_5 = arith.constant 0 : index
    %5 = vector.load %arg3[%c0_4, %c0_5] : memref<256x128xbf16, #tpu.memory_space<vmem>>, vector<256x128xbf16>
    %cst = arith.constant dense<0.000000e+00> : vector<256x128xf32>
    %6 = tpu.matmul %4, %5, %cst {dimension_numbers = #tpu.dot_dimension_numbers<[1], [0], [0], [1], [0, 0, 1, 1], [], []>} : vector<256x256xbf16>, vector<256x128xbf16>, vector<256x128xf32> -> vector<256x128xf32>
    %7 = arith.addf %3, %6 : vector<256x128xf32>
    %c0_6 = arith.constant 0 : index
    %c0_7 = arith.constant 0 : index
    %8 = vector.load %arg8[%c0_6, %c0_7] : memref<256x128xf32, #tpu.memory_space<vmem>>, vector<256x128xf32>
    tpu.vector_store %arg8[%c0_6, %c0_7], %7 {strides = array<i32>} : memref<256x128xf32, #tpu.memory_space<vmem>>, vector<256x128xf32>,
    %c0_i32_8 = arith.constant 0 : i32
    %9 = arith.cmpi eq, %arg1, %c0_i32_8 : i32
    %10 = arith.extui %9 : i1 to i32
    %c0_i32_9 = arith.constant 0 : i32
    %11 = arith.cmpi ne, %10, %c0_i32_9 : i32
    scf.if %11 {
      %c0_10 = arith.constant 0 : index
      %c0_11 = arith.constant 0 : index
      %12 = vector.load %arg8[%c0_10, %c0_11] : memref<256x128xf32, #tpu.memory_space<vmem>>, vector<256x128xf32>
      %c0_12 = arith.constant 0 : index
      %c0_13 = arith.constant 0 : index
      %13 = vector.load %arg4[%c0_12, %c0_13] : memref<256x128xbf16, #tpu.memory_space<vmem>>, vector<256x128xbf16>
      %14 = arith.extf %13 : vector<256x128xbf16> to vector<256x128xf32>
      %15 = arith.addf %12, %14 : vector<256x128xf32>
      %c0_14 = arith.constant 0 : index
      %c0_15 = arith.constant 0 : index
      %16 = vector.load %arg5[%c0_14, %c0_15] : memref<256x1xf32, #tpu.memory_space<vmem>>, vector<256x1xf32>
      %17 = vector.broadcast %16 : vector<256x1xf32> to vector<256x128xf32>
      %18 = arith.mulf %15, %17 : vector<256x128xf32>
      %c0_16 = arith.constant 0 : index
      %c0_17 = arith.constant 0 : index
      %19 = vector.load %arg6[%c0_16, %c0_17] : memref<1x128xf32, #tpu.memory_space<vmem>>, vector<1x128xf32>
      %20 = vector.broadcast %19 : vector<1x128xf32> to vector<256x128xf32>
      %21 = arith.addf %18, %20 : vector<256x128xf32>
      %cst_18 = arith.constant 0.000000e+00 : f32
      %22 = vector.broadcast %cst_18 : f32 to vector<256x128xf32>
      %23 = arith.maximumf %21, %22 : vector<256x128xf32>
      %24 = arith.truncf %23 : vector<256x128xf32> to vector<256x128xbf16>
      %c0_19 = arith.constant 0 : index
      %c0_20 = arith.constant 0 : index
      %25 = vector.load %arg7[%c0_19, %c0_20] : memref<256x128xbf16, #tpu.memory_space<vmem>>, vector<256x128xbf16>
      tpu.vector_store %arg7[%c0_19, %c0_20], %24 {strides = array<i32>} : memref<256x128xbf16, #tpu.memory_space<vmem>>, vector<256x128xbf16>,
    } else {
    }
    return
  }
  func.func @transform_0(%arg0: i32, %arg1: i32) -> (i32, i32) {
    %c0_i32 = arith.constant 0 : i32
    return %arg0, %arg1 : i32, i32
  }
  func.func @transform_1(%arg0: i32, %arg1: i32) -> (i32, i32) {
    %c0_i32 = arith.constant 0 : i32
    %c0_i32_0 = arith.constant 0 : i32
    return %arg1, %c0_i32 : i32, i32
  }
  func.func @transform_2(%arg0: i32, %arg1: i32) -> (i32, i32) {
    %c0_i32 = arith.constant 0 : i32
    %c0_i32_0 = arith.constant 0 : i32
    return %arg0, %c0_i32 : i32, i32
  }
  func.func @transform_3(%arg0: i32, %arg1: i32) -> (i32, i32) {
    %c0_i32 = arith.constant 0 : i32
    %c0_i32_0 = arith.constant 0 : i32
    return %arg0, %c0_i32 : i32, i32
  }
  func.func @transform_4(%arg0: i32, %arg1: i32) -> (i32, i32) {
    %c0_i32 = arith.constant 0 : i32
    %c0_i32_0 = arith.constant 0 : i32
    %c0_i32_1 = arith.constant 0 : i32
    return %c0_i32, %c0_i32_0 : i32, i32
  }
  func.func @transform_5(%arg0: i32, %arg1: i32) -> (i32, i32) {
    %c0_i32 = arith.constant 0 : i32
    %c0_i32_0 = arith.constant 0 : i32
    return %arg0, %c0_i32 : i32, i32
  }
}

module attributes {stable_mosaic.version = 11 : i64} {
  func.func @_hw_prep_kernel(%arg0: i32, %arg1: memref<256x128xbf16, #tpu.memory_space<vmem>>, %arg2: memref<128x128xbf16, #tpu.memory_space<vmem>>, %arg3: memref<256x1xf32, #tpu.memory_space<vmem>>, %arg4: memref<256x128xbf16, #tpu.memory_space<vmem>>) attributes {dimension_semantics = [#tpu.dimension_semantics<parallel>], iteration_bounds = array<i64: 1>, scalar_prefetch = 0 : i64, scratch_operands = 0 : i64, tpu.core_type = #tpu.core_type<tc>, window_params = [{transform_indices = @transform_0, window_bounds = array<i64: 256, 128>}, {pipeline_mode = #tpu.pipeline_mode<synchronous>, transform_indices = @transform_1, window_bounds = array<i64: 128, 128>}, {transform_indices = @transform_2, window_bounds = array<i64: 256, 1>}, {transform_indices = @transform_3, window_bounds = array<i64: 256, 128>}]} {
    %c0 = arith.constant 0 : index
    %c0_0 = arith.constant 0 : index
    %0 = vector.load %arg1[%c0, %c0_0] : memref<256x128xbf16, #tpu.memory_space<vmem>>, vector<256x128xbf16>
    %c0_1 = arith.constant 0 : index
    %c0_2 = arith.constant 0 : index
    %1 = vector.load %arg2[%c0_1, %c0_2] : memref<128x128xbf16, #tpu.memory_space<vmem>>, vector<128x128xbf16>
    %cst = arith.constant dense<0.000000e+00> : vector<256x128xf32>
    %2 = tpu.matmul %0, %1, %cst {dimension_numbers = #tpu.dot_dimension_numbers<[1], [0], [0], [1], [0, 0, 1, 1], [], []>} : vector<256x128xbf16>, vector<128x128xbf16>, vector<256x128xf32> -> vector<256x128xf32>
    %c0_3 = arith.constant 0 : index
    %c0_4 = arith.constant 0 : index
    %3 = vector.load %arg3[%c0_3, %c0_4] : memref<256x1xf32, #tpu.memory_space<vmem>>, vector<256x1xf32>
    %4 = vector.broadcast %3 : vector<256x1xf32> to vector<256x128xf32>
    %5 = arith.mulf %2, %4 : vector<256x128xf32>
    %6 = arith.truncf %5 : vector<256x128xf32> to vector<256x128xbf16>
    %c0_5 = arith.constant 0 : index
    %c0_6 = arith.constant 0 : index
    %7 = vector.load %arg4[%c0_5, %c0_6] : memref<256x128xbf16, #tpu.memory_space<vmem>>, vector<256x128xbf16>
    tpu.vector_store %arg4[%c0_5, %c0_6], %6 {strides = array<i32>} : memref<256x128xbf16, #tpu.memory_space<vmem>>, vector<256x128xbf16>,
    return
  }
  func.func @transform_0(%arg0: i32) -> (i32, i32) {
    %c0_i32 = arith.constant 0 : i32
    %c0_i32_0 = arith.constant 0 : i32
    return %arg0, %c0_i32 : i32, i32
  }
  func.func @transform_1(%arg0: i32) -> (i32, i32) {
    %c0_i32 = arith.constant 0 : i32
    %c0_i32_0 = arith.constant 0 : i32
    %c0_i32_1 = arith.constant 0 : i32
    return %c0_i32, %c0_i32_0 : i32, i32
  }
  func.func @transform_2(%arg0: i32) -> (i32, i32) {
    %c0_i32 = arith.constant 0 : i32
    %c0_i32_0 = arith.constant 0 : i32
    return %arg0, %c0_i32 : i32, i32
  }
  func.func @transform_3(%arg0: i32) -> (i32, i32) {
    %c0_i32 = arith.constant 0 : i32
    %c0_i32_0 = arith.constant 0 : i32
    return %arg0, %c0_i32 : i32, i32
  }
}

module attributes {stable_mosaic.version = 11 : i64} {
  func.func @_dec_hw_prep_kernel(%arg0: i32, %arg1: memref<256x128xbf16, #tpu.memory_space<vmem>>, %arg2: memref<128x128xbf16, #tpu.memory_space<vmem>>, %arg3: memref<256x1xf32, #tpu.memory_space<vmem>>, %arg4: memref<128x128xbf16, #tpu.memory_space<vmem>>, %arg5: memref<256x1xf32, #tpu.memory_space<vmem>>, %arg6: memref<256x128xbf16, #tpu.memory_space<vmem>>) attributes {dimension_semantics = [#tpu.dimension_semantics<parallel>], iteration_bounds = array<i64: 1>, scalar_prefetch = 0 : i64, scratch_operands = 0 : i64, tpu.core_type = #tpu.core_type<tc>, window_params = [{transform_indices = @transform_0, window_bounds = array<i64: 256, 128>}, {pipeline_mode = #tpu.pipeline_mode<synchronous>, transform_indices = @transform_1, window_bounds = array<i64: 128, 128>}, {transform_indices = @transform_2, window_bounds = array<i64: 256, 1>}, {pipeline_mode = #tpu.pipeline_mode<synchronous>, transform_indices = @transform_3, window_bounds = array<i64: 128, 128>}, {transform_indices = @transform_4, window_bounds = array<i64: 256, 1>}, {transform_indices = @transform_5, window_bounds = array<i64: 256, 128>}]} {
    %c0 = arith.constant 0 : index
    %c0_0 = arith.constant 0 : index
    %0 = vector.load %arg1[%c0, %c0_0] : memref<256x128xbf16, #tpu.memory_space<vmem>>, vector<256x128xbf16>
    %c0_1 = arith.constant 0 : index
    %c0_2 = arith.constant 0 : index
    %1 = vector.load %arg2[%c0_1, %c0_2] : memref<128x128xbf16, #tpu.memory_space<vmem>>, vector<128x128xbf16>
    %cst = arith.constant dense<0.000000e+00> : vector<256x128xf32>
    %2 = tpu.matmul %0, %1, %cst {dimension_numbers = #tpu.dot_dimension_numbers<[1], [0], [0], [1], [0, 0, 1, 1], [], []>} : vector<256x128xbf16>, vector<128x128xbf16>, vector<256x128xf32> -> vector<256x128xf32>
    %c0_3 = arith.constant 0 : index
    %c0_4 = arith.constant 0 : index
    %3 = vector.load %arg3[%c0_3, %c0_4] : memref<256x1xf32, #tpu.memory_space<vmem>>, vector<256x1xf32>
    %4 = vector.broadcast %3 : vector<256x1xf32> to vector<256x128xf32>
    %5 = arith.mulf %2, %4 : vector<256x128xf32>
    %6 = arith.truncf %5 : vector<256x128xf32> to vector<256x128xbf16>
    %c0_5 = arith.constant 0 : index
    %c0_6 = arith.constant 0 : index
    %7 = vector.load %arg4[%c0_5, %c0_6] : memref<128x128xbf16, #tpu.memory_space<vmem>>, vector<128x128xbf16>
    %cst_7 = arith.constant dense<0.000000e+00> : vector<256x128xf32>
    %8 = tpu.matmul %6, %7, %cst_7 {dimension_numbers = #tpu.dot_dimension_numbers<[1], [0], [0], [1], [0, 0, 1, 1], [], []>} : vector<256x128xbf16>, vector<128x128xbf16>, vector<256x128xf32> -> vector<256x128xf32>
    %c0_8 = arith.constant 0 : index
    %c0_9 = arith.constant 0 : index
    %9 = vector.load %arg5[%c0_8, %c0_9] : memref<256x1xf32, #tpu.memory_space<vmem>>, vector<256x1xf32>
    %10 = vector.broadcast %9 : vector<256x1xf32> to vector<256x128xf32>
    %11 = arith.mulf %8, %10 : vector<256x128xf32>
    %12 = arith.truncf %11 : vector<256x128xf32> to vector<256x128xbf16>
    %c0_10 = arith.constant 0 : index
    %c0_11 = arith.constant 0 : index
    %13 = vector.load %arg6[%c0_10, %c0_11] : memref<256x128xbf16, #tpu.memory_space<vmem>>, vector<256x128xbf16>
    tpu.vector_store %arg6[%c0_10, %c0_11], %12 {strides = array<i32>} : memref<256x128xbf16, #tpu.memory_space<vmem>>, vector<256x128xbf16>,
    return
  }
  func.func @transform_0(%arg0: i32) -> (i32, i32) {
    %c0_i32 = arith.constant 0 : i32
    %c0_i32_0 = arith.constant 0 : i32
    return %arg0, %c0_i32 : i32, i32
  }
  func.func @transform_1(%arg0: i32) -> (i32, i32) {
    %c0_i32 = arith.constant 0 : i32
    %c0_i32_0 = arith.constant 0 : i32
    %c0_i32_1 = arith.constant 0 : i32
    return %c0_i32, %c0_i32_0 : i32, i32
  }
  func.func @transform_2(%arg0: i32) -> (i32, i32) {
    %c0_i32 = arith.constant 0 : i32
    %c0_i32_0 = arith.constant 0 : i32
    return %arg0, %c0_i32 : i32, i32
  }
  func.func @transform_3(%arg0: i32) -> (i32, i32) {
    %c0_i32 = arith.constant 0 : i32
    %c0_i32_0 = arith.constant 0 : i32
    %c0_i32_1 = arith.constant 0 : i32
    return %c0_i32, %c0_i32_0 : i32, i32
  }
  func.func @transform_4(%arg0: i32) -> (i32, i32) {
    %c0_i32 = arith.constant 0 : i32
    %c0_i32_0 = arith.constant 0 : i32
    return %arg0, %c0_i32 : i32, i32
  }
  func.func @transform_5(%arg0: i32) -> (i32, i32) {
    %c0_i32 = arith.constant 0 : i32
    %c0_i32_0 = arith.constant 0 : i32
    return %arg0, %c0_i32 : i32, i32
  }
}

module attributes {stable_mosaic.version = 11 : i64} {
  func.func @_dec_neigh_kernel(%arg0: i32, %arg1: i32, %arg2: memref<256x256xbf16, #tpu.memory_space<vmem>>, %arg3: memref<256x128xbf16, #tpu.memory_space<vmem>>, %arg4: memref<256x128xbf16, #tpu.memory_space<vmem>>, %arg5: memref<256x128xbf16, #tpu.memory_space<vmem>>, %arg6: memref<256x128xbf16, #tpu.memory_space<vmem>>, %arg7: memref<256x1xf32, #tpu.memory_space<vmem>>, %arg8: memref<1x128xf32, #tpu.memory_space<vmem>>, %arg9: memref<256x1xf32, #tpu.memory_space<vmem>>, %arg10: memref<256x1xf32, #tpu.memory_space<vmem>>, %arg11: memref<256x128xf32, #tpu.memory_space<vmem>>, %arg12: memref<128x128xf32, #tpu.memory_space<vmem>>, %arg13: memref<128x128xf32, #tpu.memory_space<vmem>>, %arg14: memref<1x128xf32, #tpu.memory_space<vmem>>, %arg15: memref<1x128xf32, #tpu.memory_space<vmem>>, %arg16: memref<256x128xf32, #tpu.memory_space<vmem>>, %arg17: memref<256x128xf32, #tpu.memory_space<vmem>>) attributes {dimension_semantics = [#tpu.dimension_semantics<arbitrary>, #tpu.dimension_semantics<arbitrary>], iteration_bounds = array<i64: 1, 1>, scalar_prefetch = 0 : i64, scratch_operands = 2 : i64, tpu.core_type = #tpu.core_type<tc>, window_params = [{transform_indices = @transform_0, window_bounds = array<i64: 256, 256>}, {transform_indices = @transform_1, window_bounds = array<i64: 256, 128>}, {transform_indices = @transform_2, window_bounds = array<i64: 256, 128>}, {transform_indices = @transform_3, window_bounds = array<i64: 256, 128>}, {transform_indices = @transform_4, window_bounds = array<i64: 256, 128>}, {transform_indices = @transform_5, window_bounds = array<i64: 256, 1>}, {pipeline_mode = #tpu.pipeline_mode<synchronous>, transform_indices = @transform_6, window_bounds = array<i64: 1, 128>}, {transform_indices = @transform_7, window_bounds = array<i64: 256, 1>}, {transform_indices = @transform_8, window_bounds = array<i64: 256, 1>}, {transform_indices = @transform_9, window_bounds = array<i64: 256, 128>}, {pipeline_mode = #tpu.pipeline_mode<synchronous>, transform_indices = @transform_10, window_bounds = array<i64: 128, 128>}, {pipeline_mode = #tpu.pipeline_mode<synchronous>, transform_indices = @transform_11, window_bounds = array<i64: 128, 128>}, {pipeline_mode = #tpu.pipeline_mode<synchronous>, transform_indices = @transform_12, window_bounds = array<i64: 1, 128>}, {pipeline_mode = #tpu.pipeline_mode<synchronous>, transform_indices = @transform_13, window_bounds = array<i64: 1, 128>}]} {
    %c0_i32 = arith.constant 0 : i32
    %0 = arith.cmpi eq, %arg0, %c0_i32 : i32
    %c0_i32_0 = arith.constant 0 : i32
    %1 = arith.cmpi eq, %arg1, %c0_i32_0 : i32
    %2 = arith.andi %0, %1 : i1
    %3 = arith.extui %2 : i1 to i32
    %c0_i32_1 = arith.constant 0 : i32
    %4 = arith.cmpi ne, %3, %c0_i32_1 : i32
    scf.if %4 {
      %cst_20 = arith.constant 0.000000e+00 : f32
      %22 = vector.broadcast %cst_20 : f32 to vector<128x128xf32>
      %c0_21 = arith.constant 0 : index
      %c0_22 = arith.constant 0 : index
      %23 = vector.load %arg12[%c0_21, %c0_22] : memref<128x128xf32, #tpu.memory_space<vmem>>, vector<128x128xf32>
      tpu.vector_store %arg12[%c0_21, %c0_22], %22 {strides = array<i32>} : memref<128x128xf32, #tpu.memory_space<vmem>>, vector<128x128xf32>,
      %cst_23 = arith.constant 0.000000e+00 : f32
      %24 = vector.broadcast %cst_23 : f32 to vector<128x128xf32>
      %c0_24 = arith.constant 0 : index
      %c0_25 = arith.constant 0 : index
      %25 = vector.load %arg13[%c0_24, %c0_25] : memref<128x128xf32, #tpu.memory_space<vmem>>, vector<128x128xf32>
      tpu.vector_store %arg13[%c0_24, %c0_25], %24 {strides = array<i32>} : memref<128x128xf32, #tpu.memory_space<vmem>>, vector<128x128xf32>,
      %cst_26 = arith.constant 0.000000e+00 : f32
      %26 = vector.broadcast %cst_26 : f32 to vector<1x128xf32>
      %c0_27 = arith.constant 0 : index
      %c0_28 = arith.constant 0 : index
      %27 = vector.load %arg14[%c0_27, %c0_28] : memref<1x128xf32, #tpu.memory_space<vmem>>, vector<1x128xf32>
      tpu.vector_store %arg14[%c0_27, %c0_28], %26 {strides = array<i32>} : memref<1x128xf32, #tpu.memory_space<vmem>>, vector<1x128xf32>,
      %cst_29 = arith.constant 0.000000e+00 : f32
      %28 = vector.broadcast %cst_29 : f32 to vector<1x128xf32>
      %c0_30 = arith.constant 0 : index
      %c0_31 = arith.constant 0 : index
      %29 = vector.load %arg15[%c0_30, %c0_31] : memref<1x128xf32, #tpu.memory_space<vmem>>, vector<1x128xf32>
      tpu.vector_store %arg15[%c0_30, %c0_31], %28 {strides = array<i32>} : memref<1x128xf32, #tpu.memory_space<vmem>>, vector<1x128xf32>,
    } else {
    }
    %c0_i32_2 = arith.constant 0 : i32
    %5 = arith.cmpi eq, %arg1, %c0_i32_2 : i32
    %6 = arith.extui %5 : i1 to i32
    %c0_i32_3 = arith.constant 0 : i32
    %7 = arith.cmpi ne, %6, %c0_i32_3 : i32
    scf.if %7 {
      %cst_20 = arith.constant 0.000000e+00 : f32
      %22 = vector.broadcast %cst_20 : f32 to vector<256x128xf32>
      %c0_21 = arith.constant 0 : index
      %c0_22 = arith.constant 0 : index
      %23 = vector.load %arg16[%c0_21, %c0_22] : memref<256x128xf32, #tpu.memory_space<vmem>>, vector<256x128xf32>
      tpu.vector_store %arg16[%c0_21, %c0_22], %22 {strides = array<i32>} : memref<256x128xf32, #tpu.memory_space<vmem>>, vector<256x128xf32>,
      %cst_23 = arith.constant 0.000000e+00 : f32
      %24 = vector.broadcast %cst_23 : f32 to vector<256x128xf32>
      %c0_24 = arith.constant 0 : index
      %c0_25 = arith.constant 0 : index
      %25 = vector.load %arg17[%c0_24, %c0_25] : memref<256x128xf32, #tpu.memory_space<vmem>>, vector<256x128xf32>
      tpu.vector_store %arg17[%c0_24, %c0_25], %24 {strides = array<i32>} : memref<256x128xf32, #tpu.memory_space<vmem>>, vector<256x128xf32>,
    } else {
    }
    %c0 = arith.constant 0 : index
    %c0_4 = arith.constant 0 : index
    %8 = vector.load %arg2[%c0, %c0_4] : memref<256x256xbf16, #tpu.memory_space<vmem>>, vector<256x256xbf16>
    %c0_5 = arith.constant 0 : index
    %c0_6 = arith.constant 0 : index
    %9 = vector.load %arg16[%c0_5, %c0_6] : memref<256x128xf32, #tpu.memory_space<vmem>>, vector<256x128xf32>
    %c0_7 = arith.constant 0 : index
    %c0_8 = arith.constant 0 : index
    %10 = vector.load %arg3[%c0_7, %c0_8] : memref<256x128xbf16, #tpu.memory_space<vmem>>, vector<256x128xbf16>
    %cst = arith.constant dense<0.000000e+00> : vector<256x128xf32>
    %11 = tpu.matmul %8, %10, %cst {dimension_numbers = #tpu.dot_dimension_numbers<[1], [0], [0], [1], [0, 0, 1, 1], [], []>} : vector<256x256xbf16>, vector<256x128xbf16>, vector<256x128xf32> -> vector<256x128xf32>
    %12 = arith.addf %9, %11 : vector<256x128xf32>
    %c0_9 = arith.constant 0 : index
    %c0_10 = arith.constant 0 : index
    %13 = vector.load %arg16[%c0_9, %c0_10] : memref<256x128xf32, #tpu.memory_space<vmem>>, vector<256x128xf32>
    tpu.vector_store %arg16[%c0_9, %c0_10], %12 {strides = array<i32>} : memref<256x128xf32, #tpu.memory_space<vmem>>, vector<256x128xf32>,
    %c0_11 = arith.constant 0 : index
    %c0_12 = arith.constant 0 : index
    %14 = vector.load %arg17[%c0_11, %c0_12] : memref<256x128xf32, #tpu.memory_space<vmem>>, vector<256x128xf32>
    %c0_13 = arith.constant 0 : index
    %c0_14 = arith.constant 0 : index
    %15 = vector.load %arg4[%c0_13, %c0_14] : memref<256x128xbf16, #tpu.memory_space<vmem>>, vector<256x128xbf16>
    %cst_15 = arith.constant dense<0.000000e+00> : vector<256x128xf32>
    %16 = tpu.matmul %8, %15, %cst_15 {dimension_numbers = #tpu.dot_dimension_numbers<[1], [0], [0], [1], [0, 0, 1, 1], [], []>} : vector<256x256xbf16>, vector<256x128xbf16>, vector<256x128xf32> -> vector<256x128xf32>
    %17 = arith.addf %14, %16 : vector<256x128xf32>
    %c0_16 = arith.constant 0 : index
    %c0_17 = arith.constant 0 : index
    %18 = vector.load %arg17[%c0_16, %c0_17] : memref<256x128xf32, #tpu.memory_space<vmem>>, vector<256x128xf32>
    tpu.vector_store %arg17[%c0_16, %c0_17], %17 {strides = array<i32>} : memref<256x128xf32, #tpu.memory_space<vmem>>, vector<256x128xf32>,
    %c0_i32_18 = arith.constant 0 : i32
    %19 = arith.cmpi eq, %arg1, %c0_i32_18 : i32
    %20 = arith.extui %19 : i1 to i32
    %c0_i32_19 = arith.constant 0 : i32
    %21 = arith.cmpi ne, %20, %c0_i32_19 : i32
    scf.if %21 {
      %c0_20 = arith.constant 0 : index
      %c0_21 = arith.constant 0 : index
      %22 = vector.load %arg16[%c0_20, %c0_21] : memref<256x128xf32, #tpu.memory_space<vmem>>, vector<256x128xf32>
      %c0_22 = arith.constant 0 : index
      %c0_23 = arith.constant 0 : index
      %23 = vector.load %arg5[%c0_22, %c0_23] : memref<256x128xbf16, #tpu.memory_space<vmem>>, vector<256x128xbf16>
      %24 = arith.extf %23 : vector<256x128xbf16> to vector<256x128xf32>
      %25 = arith.addf %22, %24 : vector<256x128xf32>
      %c0_24 = arith.constant 0 : index
      %c0_25 = arith.constant 0 : index
      %26 = vector.load %arg7[%c0_24, %c0_25] : memref<256x1xf32, #tpu.memory_space<vmem>>, vector<256x1xf32>
      %27 = vector.broadcast %26 : vector<256x1xf32> to vector<256x128xf32>
      %28 = arith.mulf %25, %27 : vector<256x128xf32>
      %c0_26 = arith.constant 0 : index
      %c0_27 = arith.constant 0 : index
      %29 = vector.load %arg8[%c0_26, %c0_27] : memref<1x128xf32, #tpu.memory_space<vmem>>, vector<1x128xf32>
      %30 = vector.broadcast %29 : vector<1x128xf32> to vector<256x128xf32>
      %31 = arith.addf %28, %30 : vector<256x128xf32>
      %c0_28 = arith.constant 0 : index
      %c0_29 = arith.constant 0 : index
      %32 = vector.load %arg11[%c0_28, %c0_29] : memref<256x128xf32, #tpu.memory_space<vmem>>, vector<256x128xf32>
      tpu.vector_store %arg11[%c0_28, %c0_29], %31 {strides = array<i32>} : memref<256x128xf32, #tpu.memory_space<vmem>>, vector<256x128xf32>,
      %c0_30 = arith.constant 0 : index
      %c0_31 = arith.constant 0 : index
      %33 = vector.load %arg10[%c0_30, %c0_31] : memref<256x1xf32, #tpu.memory_space<vmem>>, vector<256x1xf32>
      %c0_32 = arith.constant 0 : index
      %c0_33 = arith.constant 0 : index
      %34 = vector.load %arg6[%c0_32, %c0_33] : memref<256x128xbf16, #tpu.memory_space<vmem>>, vector<256x128xbf16>
      %35 = arith.extf %34 : vector<256x128xbf16> to vector<256x128xf32>
      %36 = vector.broadcast %33 : vector<256x1xf32> to vector<256x128xf32>
      %37 = arith.mulf %35, %36 : vector<256x128xf32>
      %c0_34 = arith.constant 0 : index
      %c0_35 = arith.constant 0 : index
      %38 = vector.load %arg9[%c0_34, %c0_35] : memref<256x1xf32, #tpu.memory_space<vmem>>, vector<256x1xf32>
      %cst_36 = arith.constant 0.000000e+00 : f32
      %39 = vector.broadcast %cst_36 : f32 to vector<256x1xf32>
      %40 = arith.cmpf ogt, %38, %39 : vector<256x1xf32>
      %c0_37 = arith.constant 0 : index
      %c0_38 = arith.constant 0 : index
      %41 = vector.load %arg17[%c0_37, %c0_38] : memref<256x128xf32, #tpu.memory_space<vmem>>, vector<256x128xf32>
      %cst_39 = arith.constant 0.000000e+00 : f32
      %42 = vector.broadcast %cst_39 : f32 to vector<256x1xf32>
      %43 = arith.cmpf ogt, %38, %42 : vector<256x1xf32>
      %cst_40 = arith.constant 1.000000e+00 : f32
      %44 = vector.broadcast %cst_40 : f32 to vector<256x1xf32>
      %45 = arith.select %43, %38, %44 : vector<256x1xi1>, vector<256x1xf32>
      %46 = vector.broadcast %45 : vector<256x1xf32> to vector<256x128xf32>
      %47 = arith.divf %41, %46 : vector<256x128xf32>
      %cst_41 = arith.constant 0.000000e+00 : f32
      %48 = vector.shape_cast %40 : vector<256x1xi1> to vector<256x1xi1>
      %49 = vector.broadcast %48 : vector<256x1xi1> to vector<256x128xi1>
      %50 = vector.broadcast %cst_41 : f32 to vector<256x128xf32>
      %51 = arith.select %49, %47, %50 : vector<256x128xi1>, vector<256x128xf32>
      %52 = vector.broadcast %33 : vector<256x1xf32> to vector<256x128xf32>
      %53 = arith.mulf %51, %52 : vector<256x128xf32>
      %c0_42 = arith.constant 0 : index
      %c0_43 = arith.constant 0 : index
      %54 = vector.load %arg14[%c0_42, %c0_43] : memref<1x128xf32, #tpu.memory_space<vmem>>, vector<1x128xf32>
      %cst_44 = arith.constant dense<0.000000e+00> : vector<128xf32>
      %55 = vector.multi_reduction <add>, %37, %cst_44 [0] : vector<256x128xf32> to vector<128xf32>
      %56 = vector.shape_cast %55 : vector<128xf32> to vector<1x128xf32>
      %57 = arith.addf %54, %56 : vector<1x128xf32>
      %c0_45 = arith.constant 0 : index
      %c0_46 = arith.constant 0 : index
      %58 = vector.load %arg14[%c0_45, %c0_46] : memref<1x128xf32, #tpu.memory_space<vmem>>, vector<1x128xf32>
      tpu.vector_store %arg14[%c0_45, %c0_46], %57 {strides = array<i32>} : memref<1x128xf32, #tpu.memory_space<vmem>>, vector<1x128xf32>,
      %c0_47 = arith.constant 0 : index
      %c0_48 = arith.constant 0 : index
      %59 = vector.load %arg15[%c0_47, %c0_48] : memref<1x128xf32, #tpu.memory_space<vmem>>, vector<1x128xf32>
      %cst_49 = arith.constant dense<0.000000e+00> : vector<128xf32>
      %60 = vector.multi_reduction <add>, %53, %cst_49 [0] : vector<256x128xf32> to vector<128xf32>
      %61 = vector.shape_cast %60 : vector<128xf32> to vector<1x128xf32>
      %62 = arith.addf %59, %61 : vector<1x128xf32>
      %c0_50 = arith.constant 0 : index
      %c0_51 = arith.constant 0 : index
      %63 = vector.load %arg15[%c0_50, %c0_51] : memref<1x128xf32, #tpu.memory_space<vmem>>, vector<1x128xf32>
      tpu.vector_store %arg15[%c0_50, %c0_51], %62 {strides = array<i32>} : memref<1x128xf32, #tpu.memory_space<vmem>>, vector<1x128xf32>,
      %c0_52 = arith.constant 0 : index
      %c0_53 = arith.constant 0 : index
      %64 = vector.load %arg12[%c0_52, %c0_53] : memref<128x128xf32, #tpu.memory_space<vmem>>, vector<128x128xf32>
      %cst_54 = arith.constant dense<0.000000e+00> : vector<128x128xf32>
      %65 = tpu.matmul %37, %37, %cst_54 {dimension_numbers = #tpu.dot_dimension_numbers<[0], [0], [1], [1], [0, 1, 1, 1], [], []>} : vector<256x128xf32>, vector<256x128xf32>, vector<128x128xf32> -> vector<128x128xf32>
      %66 = arith.addf %64, %65 : vector<128x128xf32>
      %c0_55 = arith.constant 0 : index
      %c0_56 = arith.constant 0 : index
      %67 = vector.load %arg12[%c0_55, %c0_56] : memref<128x128xf32, #tpu.memory_space<vmem>>, vector<128x128xf32>
      tpu.vector_store %arg12[%c0_55, %c0_56], %66 {strides = array<i32>} : memref<128x128xf32, #tpu.memory_space<vmem>>, vector<128x128xf32>,
      %c0_57 = arith.constant 0 : index
      %c0_58 = arith.constant 0 : index
      %68 = vector.load %arg13[%c0_57, %c0_58] : memref<128x128xf32, #tpu.memory_space<vmem>>, vector<128x128xf32>
      %cst_59 = arith.constant dense<0.000000e+00> : vector<128x128xf32>
      %69 = tpu.matmul %37, %53, %cst_59 {dimension_numbers = #tpu.dot_dimension_numbers<[0], [0], [1], [1], [0, 1, 1, 1], [], []>} : vector<256x128xf32>, vector<256x128xf32>, vector<128x128xf32> -> vector<128x128xf32>
      %70 = arith.addf %68, %69 : vector<128x128xf32>
      %c0_60 = arith.constant 0 : index
      %c0_61 = arith.constant 0 : index
      %71 = vector.load %arg13[%c0_60, %c0_61] : memref<128x128xf32, #tpu.memory_space<vmem>>, vector<128x128xf32>
      tpu.vector_store %arg13[%c0_60, %c0_61], %70 {strides = array<i32>} : memref<128x128xf32, #tpu.memory_space<vmem>>, vector<128x128xf32>,
    } else {
    }
    return
  }
  func.func @transform_0(%arg0: i32, %arg1: i32) -> (i32, i32) {
    %c0_i32 = arith.constant 0 : i32
    return %arg0, %arg1 : i32, i32
  }
  func.func @transform_1(%arg0: i32, %arg1: i32) -> (i32, i32) {
    %c0_i32 = arith.constant 0 : i32
    %c0_i32_0 = arith.constant 0 : i32
    return %arg1, %c0_i32 : i32, i32
  }
  func.func @transform_2(%arg0: i32, %arg1: i32) -> (i32, i32) {
    %c0_i32 = arith.constant 0 : i32
    %c0_i32_0 = arith.constant 0 : i32
    return %arg1, %c0_i32 : i32, i32
  }
  func.func @transform_3(%arg0: i32, %arg1: i32) -> (i32, i32) {
    %c0_i32 = arith.constant 0 : i32
    %c0_i32_0 = arith.constant 0 : i32
    return %arg0, %c0_i32 : i32, i32
  }
  func.func @transform_4(%arg0: i32, %arg1: i32) -> (i32, i32) {
    %c0_i32 = arith.constant 0 : i32
    %c0_i32_0 = arith.constant 0 : i32
    return %arg0, %c0_i32 : i32, i32
  }
  func.func @transform_5(%arg0: i32, %arg1: i32) -> (i32, i32) {
    %c0_i32 = arith.constant 0 : i32
    %c0_i32_0 = arith.constant 0 : i32
    return %arg0, %c0_i32 : i32, i32
  }
  func.func @transform_6(%arg0: i32, %arg1: i32) -> (i32, i32) {
    %c0_i32 = arith.constant 0 : i32
    %c0_i32_0 = arith.constant 0 : i32
    %c0_i32_1 = arith.constant 0 : i32
    return %c0_i32, %c0_i32_0 : i32, i32
  }
  func.func @transform_7(%arg0: i32, %arg1: i32) -> (i32, i32) {
    %c0_i32 = arith.constant 0 : i32
    %c0_i32_0 = arith.constant 0 : i32
    return %arg0, %c0_i32 : i32, i32
  }
  func.func @transform_8(%arg0: i32, %arg1: i32) -> (i32, i32) {
    %c0_i32 = arith.constant 0 : i32
    %c0_i32_0 = arith.constant 0 : i32
    return %arg0, %c0_i32 : i32, i32
  }
  func.func @transform_9(%arg0: i32, %arg1: i32) -> (i32, i32) {
    %c0_i32 = arith.constant 0 : i32
    %c0_i32_0 = arith.constant 0 : i32
    return %arg0, %c0_i32 : i32, i32
  }
  func.func @transform_10(%arg0: i32, %arg1: i32) -> (i32, i32) {
    %c0_i32 = arith.constant 0 : i32
    %c0_i32_0 = arith.constant 0 : i32
    %c0_i32_1 = arith.constant 0 : i32
    return %c0_i32, %c0_i32_0 : i32, i32
  }
  func.func @transform_11(%arg0: i32, %arg1: i32) -> (i32, i32) {
    %c0_i32 = arith.constant 0 : i32
    %c0_i32_0 = arith.constant 0 : i32
    %c0_i32_1 = arith.constant 0 : i32
    return %c0_i32, %c0_i32_0 : i32, i32
  }
  func.func @transform_12(%arg0: i32, %arg1: i32) -> (i32, i32) {
    %c0_i32 = arith.constant 0 : i32
    %c0_i32_0 = arith.constant 0 : i32
    %c0_i32_1 = arith.constant 0 : i32
    return %c0_i32, %c0_i32_0 : i32, i32
  }
  func.func @transform_13(%arg0: i32, %arg1: i32) -> (i32, i32) {
    %c0_i32 = arith.constant 0 : i32
    %c0_i32_0 = arith.constant 0 : i32
    %c0_i32_1 = arith.constant 0 : i32
    return %c0_i32, %c0_i32_0 : i32, i32
  }
}

module attributes {stable_mosaic.version = 11 : i64} {
  func.func @_sce_kernel(%arg0: i32, %arg1: memref<256x128xf32, #tpu.memory_space<vmem>>, %arg2: memref<256x128xf32, #tpu.memory_space<vmem>>, %arg3: memref<256x1xf32, #tpu.memory_space<vmem>>, %arg4: memref<1x1xf32, #tpu.memory_space<vmem>>) attributes {dimension_semantics = [#tpu.dimension_semantics<arbitrary>], iteration_bounds = array<i64: 1>, scalar_prefetch = 0 : i64, scratch_operands = 0 : i64, tpu.core_type = #tpu.core_type<tc>, window_params = [{transform_indices = @transform_0, window_bounds = array<i64: 256, 128>}, {transform_indices = @transform_1, window_bounds = array<i64: 256, 128>}, {transform_indices = @transform_2, window_bounds = array<i64: 256, 1>}, {pipeline_mode = #tpu.pipeline_mode<synchronous>, transform_indices = @transform_3, window_bounds = array<i64: 1, 1>}]} {
    %c0_i32 = arith.constant 0 : i32
    %0 = arith.cmpi eq, %arg0, %c0_i32 : i32
    %1 = arith.extui %0 : i1 to i32
    %c0_i32_0 = arith.constant 0 : i32
    %2 = arith.cmpi ne, %1, %c0_i32_0 : i32
    scf.if %2 {
      %cst_18 = arith.constant 0.000000e+00 : f32
      %40 = vector.broadcast %cst_18 : f32 to vector<1x1xf32>
      %c0_19 = arith.constant 0 : index
      %c0_20 = arith.constant 0 : index
      %41 = vector.load %arg4[%c0_19, %c0_20] : memref<1x1xf32, #tpu.memory_space<vmem>>, vector<1x1xf32>
      tpu.vector_store %arg4[%c0_19, %c0_20], %40 {strides = array<i32>} : memref<1x1xf32, #tpu.memory_space<vmem>>, vector<1x1xf32>,
    } else {
    }
    %c0 = arith.constant 0 : index
    %c0_1 = arith.constant 0 : index
    %3 = vector.load %arg1[%c0, %c0_1] : memref<256x128xf32, #tpu.memory_space<vmem>>, vector<256x128xf32>
    %c0_2 = arith.constant 0 : index
    %c0_3 = arith.constant 0 : index
    %4 = vector.load %arg2[%c0_2, %c0_3] : memref<256x128xf32, #tpu.memory_space<vmem>>, vector<256x128xf32>
    %5 = arith.mulf %3, %3 : vector<256x128xf32>
    %cst = arith.constant dense<0.000000e+00> : vector<256xf32>
    %6 = vector.multi_reduction <add>, %5, %cst [1] : vector<256x128xf32> to vector<256xf32>
    %7 = vector.shape_cast %6 : vector<256xf32> to vector<256x1xf32>
    %8 = math.sqrt %7 : vector<256x1xf32>
    %cst_4 = arith.constant 9.99999996E-13 : f32
    %9 = vector.broadcast %cst_4 : f32 to vector<256x1xf32>
    %10 = arith.maximumf %8, %9 : vector<256x1xf32>
    %11 = vector.broadcast %10 : vector<256x1xf32> to vector<256x128xf32>
    %12 = arith.divf %3, %11 : vector<256x128xf32>
    %13 = arith.mulf %4, %4 : vector<256x128xf32>
    %cst_5 = arith.constant dense<0.000000e+00> : vector<256xf32>
    %14 = vector.multi_reduction <add>, %13, %cst_5 [1] : vector<256x128xf32> to vector<256xf32>
    %15 = vector.shape_cast %14 : vector<256xf32> to vector<256x1xf32>
    %16 = math.sqrt %15 : vector<256x1xf32>
    %cst_6 = arith.constant 9.99999996E-13 : f32
    %17 = vector.broadcast %cst_6 : f32 to vector<256x1xf32>
    %18 = arith.maximumf %16, %17 : vector<256x1xf32>
    %19 = vector.broadcast %18 : vector<256x1xf32> to vector<256x128xf32>
    %20 = arith.divf %4, %19 : vector<256x128xf32>
    %21 = arith.mulf %12, %20 : vector<256x128xf32>
    %cst_7 = arith.constant dense<0.000000e+00> : vector<256xf32>
    %22 = vector.multi_reduction <add>, %21, %cst_7 [1] : vector<256x128xf32> to vector<256xf32>
    %23 = vector.shape_cast %22 : vector<256xf32> to vector<256x1xf32>
    %c0_8 = arith.constant 0 : index
    %c0_9 = arith.constant 0 : index
    %24 = vector.load %arg3[%c0_8, %c0_9] : memref<256x1xf32, #tpu.memory_space<vmem>>, vector<256x1xf32>
    %cst_10 = arith.constant 1.000000e+00 : f32
    %25 = vector.broadcast %cst_10 : f32 to vector<256x1xf32>
    %26 = arith.subf %25, %23 : vector<256x1xf32>
    %27 = arith.mulf %26, %26 : vector<256x1xf32>
    %28 = arith.mulf %24, %27 : vector<256x1xf32>
    %29 = vector.shape_cast %28 : vector<256x1xf32> to vector<1x256x1xf32>
    %cst_11 = arith.constant dense<0.000000e+00> : vector<1xf32>
    %30 = vector.multi_reduction <add>, %29, %cst_11 [1, 2] : vector<1x256x1xf32> to vector<1xf32>
    %31 = vector.shape_cast %30 : vector<1xf32> to vector<1x1x1xf32>
    %32 = vector.extract %31[0, 0, 0] : f32 from vector<1x1x1xf32>
    %c0_12 = arith.constant 0 : index
    %c0_13 = arith.constant 0 : index
    %33 = vector.load %arg4[%c0_12, %c0_13] : memref<1x1xf32, #tpu.memory_space<vmem>>, vector<1x1xf32>
    %34 = vector.broadcast %32 : f32 to vector<1x1xf32>
    %35 = arith.addf %33, %34 : vector<1x1xf32>
    %c0_14 = arith.constant 0 : index
    %c0_15 = arith.constant 0 : index
    %36 = vector.load %arg4[%c0_14, %c0_15] : memref<1x1xf32, #tpu.memory_space<vmem>>, vector<1x1xf32>
    tpu.vector_store %arg4[%c0_14, %c0_15], %35 {strides = array<i32>} : memref<1x1xf32, #tpu.memory_space<vmem>>, vector<1x1xf32>,
    %c0_i32_16 = arith.constant 0 : i32
    %37 = arith.cmpi eq, %arg0, %c0_i32_16 : i32
    %38 = arith.extui %37 : i1 to i32
    %c0_i32_17 = arith.constant 0 : i32
    %39 = arith.cmpi ne, %38, %c0_i32_17 : i32
    scf.if %39 {
      %c0_18 = arith.constant 0 : index
      %c0_19 = arith.constant 0 : index
      %40 = vector.load %arg4[%c0_18, %c0_19] : memref<1x1xf32, #tpu.memory_space<vmem>>, vector<1x1xf32>
      %cst_20 = arith.constant 1.900000e+01 : f32
      %41 = vector.broadcast %cst_20 : f32 to vector<1x1xf32>
      %42 = arith.divf %40, %41 : vector<1x1xf32>
      %c0_21 = arith.constant 0 : index
      %c0_22 = arith.constant 0 : index
      %43 = vector.load %arg4[%c0_21, %c0_22] : memref<1x1xf32, #tpu.memory_space<vmem>>, vector<1x1xf32>
      tpu.vector_store %arg4[%c0_21, %c0_22], %42 {strides = array<i32>} : memref<1x1xf32, #tpu.memory_space<vmem>>, vector<1x1xf32>,
    } else {
    }
    return
  }
  func.func @transform_0(%arg0: i32) -> (i32, i32) {
    %c0_i32 = arith.constant 0 : i32
    %c0_i32_0 = arith.constant 0 : i32
    return %arg0, %c0_i32 : i32, i32
  }
  func.func @transform_1(%arg0: i32) -> (i32, i32) {
    %c0_i32 = arith.constant 0 : i32
    %c0_i32_0 = arith.constant 0 : i32
    return %arg0, %c0_i32 : i32, i32
  }
  func.func @transform_2(%arg0: i32) -> (i32, i32) {
    %c0_i32 = arith.constant 0 : i32
    %c0_i32_0 = arith.constant 0 : i32
    return %arg0, %c0_i32 : i32, i32
  }
  func.func @transform_3(%arg0: i32) -> (i32, i32) {
    %c0_i32 = arith.constant 0 : i32
    %c0_i32_0 = arith.constant 0 : i32
    %c0_i32_1 = arith.constant 0 : i32
    return %c0_i32, %c0_i32_0 : i32, i32
  }
}

module attributes {stable_mosaic.version = 11 : i64} {
  func.func @_kl_kernel(%arg0: i32, %arg1: memref<256x128xf32, #tpu.memory_space<vmem>>, %arg2: memref<256x128xf32, #tpu.memory_space<vmem>>, %arg3: memref<256x128xf32, #tpu.memory_space<vmem>>, %arg4: memref<256x128xf32, #tpu.memory_space<vmem>>, %arg5: memref<256x1xf32, #tpu.memory_space<vmem>>, %arg6: memref<1x128xf32, #tpu.memory_space<vmem>>, %arg7: memref<1x1xf32, #tpu.memory_space<vmem>>) attributes {dimension_semantics = [#tpu.dimension_semantics<arbitrary>], iteration_bounds = array<i64: 3>, scalar_prefetch = 0 : i64, scratch_operands = 0 : i64, tpu.core_type = #tpu.core_type<tc>, window_params = [{transform_indices = @transform_0, window_bounds = array<i64: 256, 128>}, {transform_indices = @transform_1, window_bounds = array<i64: 256, 128>}, {transform_indices = @transform_2, window_bounds = array<i64: 256, 128>}, {transform_indices = @transform_3, window_bounds = array<i64: 256, 128>}, {transform_indices = @transform_4, window_bounds = array<i64: 256, 1>}, {pipeline_mode = #tpu.pipeline_mode<synchronous>, transform_indices = @transform_5, window_bounds = array<i64: 1, 128>}, {pipeline_mode = #tpu.pipeline_mode<synchronous>, transform_indices = @transform_6, window_bounds = array<i64: 1, 1>}]} {
    %c0_i32 = arith.constant 0 : i32
    %0 = arith.cmpi eq, %arg0, %c0_i32 : i32
    %1 = arith.extui %0 : i1 to i32
    %c0_i32_0 = arith.constant 0 : i32
    %2 = arith.cmpi ne, %1, %c0_i32_0 : i32
    scf.if %2 {
      %cst_29 = arith.constant 0.000000e+00 : f32
      %75 = vector.broadcast %cst_29 : f32 to vector<1x1xf32>
      %c0_30 = arith.constant 0 : index
      %c0_31 = arith.constant 0 : index
      %76 = vector.load %arg7[%c0_30, %c0_31] : memref<1x1xf32, #tpu.memory_space<vmem>>, vector<1x1xf32>
      tpu.vector_store %arg7[%c0_30, %c0_31], %75 {strides = array<i32>} : memref<1x1xf32, #tpu.memory_space<vmem>>, vector<1x1xf32>,
    } else {
    }
    %c0 = arith.constant 0 : index
    %c0_1 = arith.constant 0 : index
    %3 = vector.load %arg6[%c0, %c0_1] : memref<1x128xf32, #tpu.memory_space<vmem>>, vector<1x128xf32>
    %cst = arith.constant 0.000000e+00 : f32
    %4 = vector.broadcast %cst : f32 to vector<1x128xf32>
    %5 = arith.cmpf ogt, %3, %4 : vector<1x128xf32>
    %c0_2 = arith.constant 0 : index
    %c0_3 = arith.constant 0 : index
    %6 = vector.load %arg1[%c0_2, %c0_3] : memref<256x128xf32, #tpu.memory_space<vmem>>, vector<256x128xf32>
    %c0_4 = arith.constant 0 : index
    %c0_5 = arith.constant 0 : index
    %7 = vector.load %arg2[%c0_4, %c0_5] : memref<256x128xf32, #tpu.memory_space<vmem>>, vector<256x128xf32>
    %8 = arith.subf %6, %7 : vector<256x128xf32>
    %9 = math.absf %8 : vector<256x128xf32>
    %c0_6 = arith.constant 0 : index
    %c0_7 = arith.constant 0 : index
    %10 = vector.load %arg3[%c0_6, %c0_7] : memref<256x128xf32, #tpu.memory_space<vmem>>, vector<256x128xf32>
    %c0_8 = arith.constant 0 : index
    %c0_9 = arith.constant 0 : index
    %11 = vector.load %arg4[%c0_8, %c0_9] : memref<256x128xf32, #tpu.memory_space<vmem>>, vector<256x128xf32>
    %12 = arith.subf %10, %11 : vector<256x128xf32>
    %13 = math.absf %12 : vector<256x128xf32>
    %cst_10 = arith.constant 1.000000e+00 : f32
    %14 = vector.broadcast %cst_10 : f32 to vector<256x128xf32>
    %15 = arith.divf %9, %14 : vector<256x128xf32>
    %cst_11 = arith.constant -1.000000e+30 : f32
    %16 = vector.shape_cast %5 : vector<1x128xi1> to vector<1x128xi1>
    %17 = vector.broadcast %16 : vector<1x128xi1> to vector<256x128xi1>
    %18 = vector.broadcast %cst_11 : f32 to vector<256x128xf32>
    %19 = arith.select %17, %15, %18 : vector<256x128xi1>, vector<256x128xf32>
    %cst_12 = arith.constant dense<0xFF800000> : vector<256xf32>
    %20 = vector.multi_reduction <maximumf>, %19, %cst_12 [1] : vector<256x128xf32> to vector<256xf32>
    %21 = vector.shape_cast %20 : vector<256xf32> to vector<256x1xf32>
    %22 = vector.broadcast %21 : vector<256x1xf32> to vector<256x128xf32>
    %23 = arith.subf %19, %22 : vector<256x128xf32>
    %24 = math.exp %23 : vector<256x128xf32>
    %cst_13 = arith.constant 0.000000e+00 : f32
    %25 = vector.shape_cast %5 : vector<1x128xi1> to vector<1x128xi1>
    %26 = vector.broadcast %25 : vector<1x128xi1> to vector<256x128xi1>
    %27 = vector.broadcast %cst_13 : f32 to vector<256x128xf32>
    %28 = arith.select %26, %24, %27 : vector<256x128xi1>, vector<256x128xf32>
    %cst_14 = arith.constant dense<0.000000e+00> : vector<256xf32>
    %29 = vector.multi_reduction <add>, %28, %cst_14 [1] : vector<256x128xf32> to vector<256xf32>
    %30 = vector.shape_cast %29 : vector<256xf32> to vector<256x1xf32>
    %31 = math.log %30 : vector<256x1xf32>
    %32 = vector.broadcast %31 : vector<256x1xf32> to vector<256x128xf32>
    %33 = arith.subf %23, %32 : vector<256x128xf32>
    %cst_15 = arith.constant 1.000000e+00 : f32
    %34 = vector.broadcast %cst_15 : f32 to vector<256x128xf32>
    %35 = arith.divf %13, %34 : vector<256x128xf32>
    %cst_16 = arith.constant -1.000000e+30 : f32
    %36 = vector.shape_cast %5 : vector<1x128xi1> to vector<1x128xi1>
    %37 = vector.broadcast %36 : vector<1x128xi1> to vector<256x128xi1>
    %38 = vector.broadcast %cst_16 : f32 to vector<256x128xf32>
    %39 = arith.select %37, %35, %38 : vector<256x128xi1>, vector<256x128xf32>
    %cst_17 = arith.constant dense<0xFF800000> : vector<256xf32>
    %40 = vector.multi_reduction <maximumf>, %39, %cst_17 [1] : vector<256x128xf32> to vector<256xf32>
    %41 = vector.shape_cast %40 : vector<256xf32> to vector<256x1xf32>
    %42 = vector.broadcast %41 : vector<256x1xf32> to vector<256x128xf32>
    %43 = arith.subf %39, %42 : vector<256x128xf32>
    %44 = math.exp %43 : vector<256x128xf32>
    %cst_18 = arith.constant 0.000000e+00 : f32
    %45 = vector.shape_cast %5 : vector<1x128xi1> to vector<1x128xi1>
    %46 = vector.broadcast %45 : vector<1x128xi1> to vector<256x128xi1>
    %47 = vector.broadcast %cst_18 : f32 to vector<256x128xf32>
    %48 = arith.select %46, %44, %47 : vector<256x128xi1>, vector<256x128xf32>
    %cst_19 = arith.constant dense<0.000000e+00> : vector<256xf32>
    %49 = vector.multi_reduction <add>, %48, %cst_19 [1] : vector<256x128xf32> to vector<256xf32>
    %50 = vector.shape_cast %49 : vector<256xf32> to vector<256x1xf32>
    %51 = math.log %50 : vector<256x1xf32>
    %52 = vector.broadcast %51 : vector<256x1xf32> to vector<256x128xf32>
    %53 = arith.subf %43, %52 : vector<256x128xf32>
    %c0_20 = arith.constant 0 : index
    %c0_21 = arith.constant 0 : index
    %54 = vector.load %arg5[%c0_20, %c0_21] : memref<256x1xf32, #tpu.memory_space<vmem>>, vector<256x1xf32>
    %55 = math.exp %33 : vector<256x128xf32>
    %56 = arith.subf %33, %53 : vector<256x128xf32>
    %57 = arith.mulf %55, %56 : vector<256x128xf32>
    %cst_22 = arith.constant 0.000000e+00 : f32
    %58 = vector.shape_cast %5 : vector<1x128xi1> to vector<1x128xi1>
    %59 = vector.broadcast %58 : vector<1x128xi1> to vector<256x128xi1>
    %60 = vector.broadcast %cst_22 : f32 to vector<256x128xf32>
    %61 = arith.select %59, %57, %60 : vector<256x128xi1>, vector<256x128xf32>
    %62 = vector.broadcast %54 : vector<256x1xf32> to vector<256x128xf32>
    %63 = arith.mulf %62, %61 : vector<256x128xf32>
    %64 = vector.shape_cast %63 : vector<256x128xf32> to vector<1x256x128xf32>
    %cst_23 = arith.constant dense<0.000000e+00> : vector<1xf32>
    %65 = vector.multi_reduction <add>, %64, %cst_23 [1, 2] : vector<1x256x128xf32> to vector<1xf32>
    %66 = vector.shape_cast %65 : vector<1xf32> to vector<1x1x1xf32>
    %67 = vector.extract %66[0, 0, 0] : f32 from vector<1x1x1xf32>
    %c0_24 = arith.constant 0 : index
    %c0_25 = arith.constant 0 : index
    %68 = vector.load %arg7[%c0_24, %c0_25] : memref<1x1xf32, #tpu.memory_space<vmem>>, vector<1x1xf32>
    %69 = vector.broadcast %67 : f32 to vector<1x1xf32>
    %70 = arith.addf %68, %69 : vector<1x1xf32>
    %c0_26 = arith.constant 0 : index
    %c0_27 = arith.constant 0 : index
    %71 = vector.load %arg7[%c0_26, %c0_27] : memref<1x1xf32, #tpu.memory_space<vmem>>, vector<1x1xf32>
    tpu.vector_store %arg7[%c0_26, %c0_27], %70 {strides = array<i32>} : memref<1x1xf32, #tpu.memory_space<vmem>>, vector<1x1xf32>,
    %c2_i32 = arith.constant 2 : i32
    %72 = arith.cmpi eq, %arg0, %c2_i32 : i32
    %73 = arith.extui %72 : i1 to i32
    %c0_i32_28 = arith.constant 0 : i32
    %74 = arith.cmpi ne, %73, %c0_i32_28 : i32
    scf.if %74 {
      %c0_29 = arith.constant 0 : index
      %c0_30 = arith.constant 0 : index
      %75 = vector.load %arg7[%c0_29, %c0_30] : memref<1x1xf32, #tpu.memory_space<vmem>>, vector<1x1xf32>
      %cst_31 = arith.constant 6.100000e+02 : f32
      %76 = vector.broadcast %cst_31 : f32 to vector<1x1xf32>
      %77 = arith.divf %75, %76 : vector<1x1xf32>
      %c0_32 = arith.constant 0 : index
      %c0_33 = arith.constant 0 : index
      %78 = vector.load %arg7[%c0_32, %c0_33] : memref<1x1xf32, #tpu.memory_space<vmem>>, vector<1x1xf32>
      tpu.vector_store %arg7[%c0_32, %c0_33], %77 {strides = array<i32>} : memref<1x1xf32, #tpu.memory_space<vmem>>, vector<1x1xf32>,
    } else {
    }
    return
  }
  func.func @transform_0(%arg0: i32) -> (i32, i32) {
    %c0_i32 = arith.constant 0 : i32
    %c0_i32_0 = arith.constant 0 : i32
    return %arg0, %c0_i32 : i32, i32
  }
  func.func @transform_1(%arg0: i32) -> (i32, i32) {
    %c0_i32 = arith.constant 0 : i32
    %c0_i32_0 = arith.constant 0 : i32
    return %arg0, %c0_i32 : i32, i32
  }
  func.func @transform_2(%arg0: i32) -> (i32, i32) {
    %c0_i32 = arith.constant 0 : i32
    %c0_i32_0 = arith.constant 0 : i32
    return %arg0, %c0_i32 : i32, i32
  }
  func.func @transform_3(%arg0: i32) -> (i32, i32) {
    %c0_i32 = arith.constant 0 : i32
    %c0_i32_0 = arith.constant 0 : i32
    return %arg0, %c0_i32 : i32, i32
  }
  func.func @transform_4(%arg0: i32) -> (i32, i32) {
    %c0_i32 = arith.constant 0 : i32
    %c0_i32_0 = arith.constant 0 : i32
    return %arg0, %c0_i32 : i32, i32
  }
  func.func @transform_5(%arg0: i32) -> (i32, i32) {
    %c0_i32 = arith.constant 0 : i32
    %c0_i32_0 = arith.constant 0 : i32
    %c0_i32_1 = arith.constant 0 : i32
    return %c0_i32, %c0_i32_0 : i32, i32
  }
  func.func @transform_6(%arg0: i32) -> (i32, i32) {
    %c0_i32 = arith.constant 0 : i32
    %c0_i32_0 = arith.constant 0 : i32
    %c0_i32_1 = arith.constant 0 : i32
    return %c0_i32, %c0_i32_0 : i32, i32
  }
}

</mosaic_0001>

<bundles_post_ra>
// kernel: _device_forward.8
= control target key start
LH: loop header
LB: loop body
LE: loop exit
PB: predicated region body
PF: predicated region fallthrough
CT: control target
= control target key end

     0   :  { %v942_v1 = vmov 0   ;;  %s1260_s1 = inlined_call_operand.vmem [shape: bf16[128,128], index: 1, kind: input, shape index: {}]   ;;  %s1261_s2 = inlined_call_operand.vmem [shape: f32[256,1], index: 2, kind: input, shape index: {}]   ;;  %s1262_s0 = inlined_call_operand.vmem [shape: f32[256,128], index: 0, kind: input, shape index: {}]   ;;  %s1263_s3 = inlined_call_operand.vmem [shape: bf16[256,128], index: 3, kind: output, shape index: {}]  }
   0x1   :  { %v934_v0 = vld [vmem:[%s1260_s1] sm:$0xff]   ;;  %933 = vset.pattern.permute.xlu1 %v942_v1  ;;  %932 = vset.pattern.permute.xlu0 %v942_v1  ;;  %v935_v2 = vld [vmem:[%s1260_s1 + $0x8] sm:$0xff]   ;;  %v936_v3 = vld [vmem:[%s1260_s1 + $0x10] sm:$0xff]  }
   0x2   :  { %867 = vmatprep.subr.bf16.mxu0 %v934_v0  ;;  %915 = vmatprep.subr.bf16.mxu1 %v934_v0  ;;  %v290_v4 = vld [vmem:[%s1261_s2 + $0x10] sm:$0xff]  ;;  %v288_v5 = vld [vmem:[%s1261_s2] sm:$0xff]  ;;  %v937_v6 = vld [vmem:[%s1260_s1 + $0x18] sm:$0xff]  }
   0x3   :  { %868 = vmatpush3.bf16.msra.mxu0 %v934_v0  ;;  %923 = vmatpush3.bf16.msra.mxu1 %v934_v0  ;;  %v291_v7 = vld [vmem:[%s1261_s2 + $0x18] sm:$0xff]  ;;  %v289_v8 = vld [vmem:[%s1261_s2 + $0x8] sm:$0xff]  ;;  %v15_v9 = vld [vmem:[%s1262_s0] sm:$0xff] }
   0x4   :  { %869 = vmatprep.subr.bf16.mxu0 %v935_v2  ;;  %916 = vmatprep.subr.bf16.mxu1 %v935_v2  ;;  %v16_v10 = vld [vmem:[%s1262_s0 + $0x8] sm:$0xff]  ;;  %v31_v11 = vld [vmem:[%s1262_s0 + $0x80] sm:$0xff]  ;;  %v295_v19 = vld [vmem:[%s1261_s2 + $0x38] sm:$0xff] }
   0x5   :  { %332 = vperm.xlu1 %933, %v290_v4   ;;  %322 = vperm.xlu0 %932, %v288_v5   ;;  %v47_v12 = vpack.c.bf16 %v16_v10, %v15_v9  ;;  %v32_v13 = vld [vmem:[%s1262_s0 + $0x88] sm:$0xff]  ;;  %v938_v14 = vld [vmem:[%s1260_s1 + $0x20] sm:$0xff]   ;;  %v294_v20 = vld [vmem:[%s1261_s2 + $0x30] sm:$0xff] }
   0x6   :  { %v55_v15 = vpack.c.bf16 %v32_v13, %v31_v11  ;;  %v293_v16 = vld [vmem:[%s1261_s2 + $0x28] sm:$0xff]  ;;  %v292_v17 = vld [vmem:[%s1261_s2 + $0x20] sm:$0xff]  ;;  %v940_v21 = vld [vmem:[%s1260_s1 + $0x30] sm:$0xff]  }
   0x7   :  { %870 = vmatpush3.bf16.msra.mxu0 %v935_v2  ;;  %924 = vmatpush3.bf16.msra.mxu1 %v935_v2  ;;  %v939_v18 = vld [vmem:[%s1260_s1 + $0x28] sm:$0xff]   ;;  %v296_v23 = vld [vmem:[%s1261_s2 + $0x40] sm:$0xff]  ;;  %v941_v24 = vld [vmem:[%s1260_s1 + $0x38] sm:$0xff]  }
   0x8   :  { %871 = vmatprep.subr.bf16.mxu0 %v936_v3  ;;  %917 = vmatprep.subr.bf16.mxu1 %v936_v3  ;;  %v297_v22 = vld [vmem:[%s1261_s2 + $0x48] sm:$0xff]  ;;  %v17_v25 = vld [vmem:[%s1262_s0 + $0x10] sm:$0xff]  ;;  %v18_v26 = vld [vmem:[%s1262_s0 + $0x18] sm:$0xff] }
   0x9   :  { %337 = vperm.xlu1 %933, %v291_v7   ;;  %327 = vperm.xlu0 %932, %v289_v8   ;;  %v299_v27 = vld [vmem:[%s1261_s2 + $0x58] sm:$0xff]  ;;  %v298_v28 = vld [vmem:[%s1261_s2 + $0x50] sm:$0xff]  ;;  %v19_v31 = vld [vmem:[%s1262_s0 + $0x20] sm:$0xff]  ;;  %v48_v35 = vpack.c.bf16 %v18_v26, %v17_v25 }
   0xa   :  { %883 = vmatprep.mubr.bf16.mxu0 %v47_v12  ;;  %899 = vmatprep.mubr.bf16.mxu1 %v55_v15  ;;  %v33_v29 = vld [vmem:[%s1262_s0 + $0x90] sm:$0xff]  ;;  %v34_v30 = vld [vmem:[%s1262_s0 + $0x98] sm:$0xff]  ;;  %v20_v32 = vld [vmem:[%s1262_s0 + $0x28] sm:$0xff] }
   0xb   :  { %872 = vmatpush3.bf16.msra.mxu0 %v936_v3  ;;  %925 = vmatpush3.bf16.msra.mxu1 %v936_v3  ;;  %v35_v33 = vld [vmem:[%s1262_s0 + $0xa0] sm:$0xff]  ;;  %v36_v34 = vld [vmem:[%s1262_s0 + $0xa8] sm:$0xff]  ;;  %v56_v36 = vpack.c.bf16 %v34_v30, %v33_v29  ;;  %v49_v39 = vpack.c.bf16 %v20_v32, %v19_v31  ;;  %v21_v41 = vld [vmem:[%s1262_s0 + $0x30] sm:$0xff] }
   0xc   :  { %873 = vmatprep.subr.bf16.mxu0 %v937_v6  ;;  %918 = vmatprep.subr.bf16.mxu1 %v937_v6  ;;  %v301_v37 = vld [vmem:[%s1261_s2 + $0x68] sm:$0xff]  ;;  %v300_v38 = vld [vmem:[%s1261_s2 + $0x60] sm:$0xff]  ;;  %v57_v40 = vpack.c.bf16 %v36_v34, %v35_v33  ;;  %v22_v42 = vld [vmem:[%s1262_s0 + $0x38] sm:$0xff] }
   0xd   :  { %347 = vperm.xlu1 %933, %v293_v16   ;;  %342 = vperm.xlu0 %932, %v292_v17   ;;  %v303_v43 = vld [vmem:[%s1261_s2 + $0x78] sm:$0xff]  ;;  %v302_v44 = vld [vmem:[%s1261_s2 + $0x70] sm:$0xff]  ;;  %v23_v47 = vld [vmem:[%s1262_s0 + $0x40] sm:$0xff]  ;;  %v50_v51 = vpack.c.bf16 %v22_v42, %v21_v41 }
   0xe   :  { %v37_v45 = vld [vmem:[%s1262_s0 + $0xb0] sm:$0xff]  ;;  %v38_v46 = vld [vmem:[%s1262_s0 + $0xb8] sm:$0xff]  ;;  %v24_v48 = vld [vmem:[%s1262_s0 + $0x48] sm:$0xff] }
   0xf   :  { %874 = vmatpush3.bf16.msra.mxu0 %v937_v6  ;;  %926 = vmatpush3.bf16.msra.mxu1 %v937_v6  ;;  %v39_v49 = vld [vmem:[%s1262_s0 + $0xc0] sm:$0xff]  ;;  %v40_v50 = vld [vmem:[%s1262_s0 + $0xc8] sm:$0xff]  ;;  %v58_v52 = vpack.c.bf16 %v38_v46, %v37_v45  ;;  %v51_v55 = vpack.c.bf16 %v24_v48, %v23_v47  ;;  %v25_v57 = vld [vmem:[%s1262_s0 + $0x50] sm:$0xff] }
  0x10   :  { %875 = vmatprep.subr.bf16.mxu0 %v938_v14  ;;  %919 = vmatprep.subr.bf16.mxu1 %v938_v14  ;;  %v305_v53 = vld [vmem:[%s1261_s2 + $0x88] sm:$0xff]  ;;  %v304_v54 = vld [vmem:[%s1261_s2 + $0x80] sm:$0xff]  ;;  %v59_v56 = vpack.c.bf16 %v40_v50, %v39_v49  ;;  %v26_v58 = vld [vmem:[%s1262_s0 + $0x58] sm:$0xff] }
  0x11   :  { %357 = vperm.xlu1 %933, %v295_v19   ;;  %352 = vperm.xlu0 %932, %v294_v20   ;;  %v307_v59 = vld [vmem:[%s1261_s2 + $0x98] sm:$0xff]  ;;  %v306_v60 = vld [vmem:[%s1261_s2 + $0x90] sm:$0xff]  ;;  %v27_v63 = vld [vmem:[%s1262_s0 + $0x60] sm:$0xff]  ;;  %v52_v3 = vpack.c.bf16 %v26_v58, %v25_v57 }
  0x12   :  { %v41_v61 = vld [vmem:[%s1262_s0 + $0xd0] sm:$0xff]  ;;  %v42_v62 = vld [vmem:[%s1262_s0 + $0xd8] sm:$0xff]  ;;  %v28_v0 = vld [vmem:[%s1262_s0 + $0x68] sm:$0xff] }
  0x13   :  { %876 = vmatpush3.bf16.msra.mxu0 %v938_v14  ;;  %927 = vmatpush3.bf16.msra.mxu1 %v938_v14  ;;  %v43_v1 = vld [vmem:[%s1262_s0 + $0xe0] sm:$0xff]  ;;  %v44_v2 = vld [vmem:[%s1262_s0 + $0xe8] sm:$0xff]  ;;  %v60_v4 = vpack.c.bf16 %v42_v62, %v41_v61  ;;  %v53_v7 = vpack.c.bf16 %v28_v0, %v27_v63  ;;  %v29_v9 = vld [vmem:[%s1262_s0 + $0x70] sm:$0xff] }
  0x14   :  { %877 = vmatprep.subr.bf16.mxu0 %v939_v18  ;;  %920 = vmatprep.subr.bf16.mxu1 %v939_v18  ;;  %v309_v5 = vld [vmem:[%s1261_s2 + $0xa8] sm:$0xff]  ;;  %v308_v6 = vld [vmem:[%s1261_s2 + $0xa0] sm:$0xff]  ;;  %v61_v8 = vpack.c.bf16 %v44_v2, %v43_v1  ;;  %v311_v10 = vld [vmem:[%s1261_s2 + $0xb8] sm:$0xff] }
  0x15   :  { %367 = vperm.xlu1 %933, %v297_v22   ;;  %362 = vperm.xlu0 %932, %v296_v23   ;;  %v310_v11 = vld [vmem:[%s1261_s2 + $0xb0] sm:$0xff]  ;;  %v30_v12 = vld [vmem:[%s1262_s0 + $0x78] sm:$0xff]  ;;  %v313_v17 = vld [vmem:[%s1261_s2 + $0xc8] sm:$0xff] }
  0x16   :  { %v45_v13 = vld [vmem:[%s1262_s0 + $0xf0] sm:$0xff]  ;;  %v46_v14 = vld [vmem:[%s1262_s0 + $0xf8] sm:$0xff]  ;;  %v54_v15 = vpack.c.bf16 %v30_v12, %v29_v9  ;;  %v316_v22 = vld [vmem:[%s1261_s2 + $0xe0] sm:$0xff] }
  0x17   :  { %878 = vmatpush3.bf16.msra.mxu0 %v939_v18  ;;  %928 = vmatpush3.bf16.msra.mxu1 %v939_v18  ;;  %v62_v16 = vpack.c.bf16 %v46_v14, %v45_v13  ;;  %v312_v18 = vld [vmem:[%s1261_s2 + $0xc0] sm:$0xff]  ;;  %v315_v19 = vld [vmem:[%s1261_s2 + $0xd8] sm:$0xff]  ;;  %v314_v20 = vld [vmem:[%s1261_s2 + $0xd0] sm:$0xff] }
  0x18   :  { %879 = vmatprep.subr.bf16.mxu0 %v940_v21  ;;  %921 = vmatprep.subr.bf16.mxu1 %v940_v21  ;;  %v319_v23 = vld [vmem:[%s1261_s2 + $0xf8] sm:$0xff] }
  0x19   :  { %377 = vperm.xlu1 %933, %v299_v27   ;;  %372 = vperm.xlu0 %932, %v298_v28  }
  0x1b   :  { %880 = vmatpush3.bf16.msra.mxu0 %v940_v21  ;;  %929 = vmatpush3.bf16.msra.mxu1 %v940_v21  ;;  %v317_v21 = vld [vmem:[%s1261_s2 + $0xe8] sm:$0xff] }
  0x1c   :  { %881 = vmatprep.subr.bf16.mxu0 %v941_v24  ;;  %922 = vmatprep.subr.bf16.mxu1 %v941_v24 }
  0x1d   :  { %387 = vperm.xlu1 %933, %v301_v37   ;;  %382 = vperm.xlu0 %932, %v300_v38  }
  0x1f   :  { %882 = vmatpush3.bf16.msra.mxu0 %v941_v24  ;;  %930 = vmatpush3.bf16.msra.mxu1 %v941_v24  ;;  %v318_v24 = vld [vmem:[%s1261_s2 + $0xf0] sm:$0xff] }
  0x21   :  { %397 = vperm.xlu1 %933, %v303_v43   ;;  %392 = vperm.xlu0 %932, %v302_v44  }
  0x22   :  { %884 = vmatmul.mubr.bf16.vlgmr.msra.gmra.mrb[0].mxu0 %v48_v35  ;;  %900 = vmatmul.mubr.bf16.vlgmr.msra.gmra.mrb[0].mxu1 %v56_v36 }
  0x23   :  { %887 = vmatprep.mubr.bf16.mxu0 %v49_v39  ;;  %903 = vmatprep.mubr.bf16.mxu1 %v57_v40 }
  0x25   :  { %407 = vperm.xlu1 %933, %v305_v53   ;;  %402 = vperm.xlu0 %932, %v304_v54  }
  0x29   :  { %417 = vperm.xlu1 %933, %v307_v59   ;;  %412 = vperm.xlu0 %932, %v306_v60  }
  0x2a   :  { %888 = vmatmul.mubr.bf16.gmra.mrb[4].mxu0 %v50_v51  ;;  %904 = vmatmul.mubr.bf16.gmra.mrb[4].mxu1 %v58_v52 }
  0x2b   :  { %891 = vmatprep.mubr.bf16.mxu0 %v51_v55  ;;  %907 = vmatprep.mubr.bf16.mxu1 %v59_v56 }
  0x2d   :  { %427 = vperm.xlu1 %933, %v309_v5   ;;  %422 = vperm.xlu0 %932, %v308_v6  }
  0x31   :  { %437 = vperm.xlu1 %933, %v311_v10   ;;  %432 = vperm.xlu0 %932, %v310_v11  }
  0x32   :  { %892 = vmatmul.mubr.bf16.gmra.mrb[8].mxu0 %v52_v3  ;;  %908 = vmatmul.mubr.bf16.gmra.mrb[8].mxu1 %v60_v4 }
  0x33   :  { %895 = vmatprep.mubr.bf16.mxu0 %v53_v7  ;;  %911 = vmatprep.mubr.bf16.mxu1 %v61_v8 }
  0x35   :  { %447 = vperm.xlu1 %933, %v313_v17   ;;  %442 = vperm.xlu0 %932, %v312_v18  }
  0x39   :  { %457 = vperm.xlu1 %933, %v315_v19   ;;  %452 = vperm.xlu0 %932, %v314_v20  }
  0x3a   :  { %896 = vmatmul.mubr.bf16.gmra.mrb[12].mxu0 %v54_v15  ;;  %912 = vmatmul.mubr.bf16.gmra.mrb[12].mxu1 %v62_v16 }
  0x3d   :  { %467 = vperm.xlu1 %933, %v317_v21   ;;  %462 = vperm.xlu0 %932, %v316_v22  }
  0x41   :  { %477 = vperm.xlu1 %933, %v319_v23   ;;  %472 = vperm.xlu0 %932, %v318_v24  }
  0x84   :  { %v333_v25 = vpop.permute.xlu1 %332  ;;  %v323_v26 = vpop.permute.xlu0 %322 }
  0x88   :  { %v338_v27 = vpop.permute.xlu1 %337  ;;  %v328_v28 = vpop.permute.xlu0 %327 }
  0x8c   :  { %v1179_v29 = vpop.permute.xlu1 %347  ;;  %v343_v30 = vpop.permute.xlu0 %342 }
  0x90   :  { %v358_v31 = vpop.permute.xlu1 %357  ;;  %v353_v32 = vpop.permute.xlu0 %352 }
  0x94   :  { %v1181_v33 = vpop.permute.xlu1 %367  ;;  %v1183_v34 = vpop.permute.xlu0 %362 }
  0x98   :  { %v1185_v35 = vpop.permute.xlu1 %377  ;;  %v1187_v36 = vpop.permute.xlu0 %372 }
  0x9c   :  { %v1189_v37 = vpop.permute.xlu1 %387  ;;  %v1191_v38 = vpop.permute.xlu0 %382 }
  0xa0   :  { %v1193_v39 = vpop.permute.xlu1 %397  ;;  %v1195_v40 = vpop.permute.xlu0 %392 }
  0xa4   :  { %v408_v41 = vpop.permute.xlu1 %407  ;;  %v403_v42 = vpop.permute.xlu0 %402 }
  0xa8   :  { %v418_v43 = vpop.permute.xlu1 %417  ;;  %v413_v44 = vpop.permute.xlu0 %412 }
  0xac   :  { %v428_v45 = vpop.permute.xlu1 %427  ;;  %v423_v46 = vpop.permute.xlu0 %422 }
  0xb0   :  { %v438_v47 = vpop.permute.xlu1 %437  ;;  %v433_v48 = vpop.permute.xlu0 %432 }
  0xb4   :  { %v1197_v49 = vpop.permute.xlu1 %447  ;;  %v1199_v50 = vpop.permute.xlu0 %442 }
  0xb8   :  { %v458_v7 = vpop.permute.xlu1 %457  ;;  %v453_v8 = vpop.permute.xlu0 %452 }
  0xf5   :  { %v885_v51 = vpop.f32.mrb[0].mxu0  ;;  %v901_v52 = vpop.f32.mrb[0].mxu1 }
  0xf6   :  { %v161_v53 = vpop.f32.mrb[1].mxu0  ;;  %v225_v54 = vpop.f32.mrb[1].mxu1  ;;  %v482_v57 = vmul.f32 %v885_v51, %v333_v25  ;;  %v498_v58 = vmul.f32 %v901_v52, %v413_v44 }
  0xf7   :  { %v886_v55 = vpop.f32.mrb[2].mxu0  ;;  %v902_v56 = vpop.f32.mrb[2].mxu1  ;;  %v480_v63 = vmul.f32 %v323_v26, %v161_v53  ;;  %v496_v0 = vmul.f32 %v403_v42, %v225_v54 }
  0xf8   :  { %v483_v59 = vmul.f32 %v886_v55, %v338_v27  ;;  %v499_v60 = vmul.f32 %v902_v56, %v418_v43  ;;  %v164_v61 = vpop.f32.mrb[3].mxu0  ;;  %v228_v62 = vpop.f32.mrb[3].mxu1 }
  0xf9   :  { %v481_v1 = vmul.f32 %v328_v28, %v164_v61  ;;  %v497_v2 = vmul.f32 %v408_v41, %v228_v62  ;;  %v468_v41 = vpop.permute.xlu1 %467  ;;  %v463_v42 = vpop.permute.xlu0 %462 }
  0xfa   :  { %v756_v3 = vpack.c.bf16 %v483_v59, %v482_v57  ;;  %v796_v4 = vpack.c.bf16 %v499_v60, %v498_v58 }
  0xfb   :  { %v751_v5 = vpack.c.bf16 %v481_v1, %v480_v63  ;;  %v791_v6 = vpack.c.bf16 %v497_v2, %v496_v0 }
  0xfc   :  { %828 = vst [vmem:[%s1263_s3 + $0x8] sm:$0xff] %v756_v3   ;;  %836 = vst [vmem:[%s1263_s3 + $0x48] sm:$0xff] %v796_v4  }
  0xfd   :  { %752 = vst [vmem:[%s1263_s3] sm:$0xff] %v751_v5   ;;  %835 = vst [vmem:[%s1263_s3 + $0x40] sm:$0xff] %v791_v6   ;;  %v889_v9 = vpop.f32.mrb[4].mxu0  ;;  %v905_v10 = vpop.f32.mrb[4].mxu1 }
  0xfe   :  { %v177_v11 = vpop.f32.mrb[5].mxu0  ;;  %v241_v12 = vpop.f32.mrb[5].mxu1  ;;  %v486_v15 = vmul.f32 %v889_v9, %v353_v32  ;;  %v502_v16 = vmul.f32 %v905_v10, %v433_v48 }
  0xff   :  { %v890_v13 = vpop.f32.mrb[6].mxu0  ;;  %v906_v14 = vpop.f32.mrb[6].mxu1  ;;  %v484_v21 = vmul.f32 %v343_v30, %v177_v11  ;;  %v500_v22 = vmul.f32 %v423_v46, %v241_v12 }
 0x100   :  { %v487_v17 = vmul.f32 %v890_v13, %v358_v31  ;;  %v503_v18 = vmul.f32 %v906_v14, %v438_v47  ;;  %v180_v19 = vpop.f32.mrb[7].mxu0  ;;  %v244_v20 = vpop.f32.mrb[7].mxu1 }
 0x101   :  { %v485_v23 = vmul.f32 %v1179_v29, %v180_v19  ;;  %v501_v24 = vmul.f32 %v428_v45, %v244_v20  ;;  %v478_v61 = vpop.permute.xlu1 %477 }
 0x102   :  { %v766_v25 = vpack.c.bf16 %v487_v17, %v486_v15  ;;  %v806_v26 = vpack.c.bf16 %v503_v18, %v502_v16 }
 0x103   :  { %v761_v27 = vpack.c.bf16 %v485_v23, %v484_v21  ;;  %v801_v28 = vpack.c.bf16 %v501_v24, %v500_v22 }
 0x104   :  { %830 = vst [vmem:[%s1263_s3 + $0x18] sm:$0xff] %v766_v25   ;;  %838 = vst [vmem:[%s1263_s3 + $0x58] sm:$0xff] %v806_v26  }
 0x105   :  { %829 = vst [vmem:[%s1263_s3 + $0x10] sm:$0xff] %v761_v27   ;;  %837 = vst [vmem:[%s1263_s3 + $0x50] sm:$0xff] %v801_v28   ;;  %v893_v29 = vpop.f32.mrb[8].mxu0  ;;  %v909_v30 = vpop.f32.mrb[8].mxu1 }
 0x106   :  { %v193_v31 = vpop.f32.mrb[9].mxu0  ;;  %v257_v32 = vpop.f32.mrb[9].mxu1  ;;  %v490_v45 = vmul.f32 %v893_v29, %v1187_v36  ;;  %v506_v46 = vmul.f32 %v909_v30, %v453_v8 }
 0x107   :  { %v894_v43 = vpop.f32.mrb[10].mxu0  ;;  %v910_v44 = vpop.f32.mrb[10].mxu1  ;;  %v488_v53 = vmul.f32 %v1183_v34, %v193_v31  ;;  %v504_v54 = vmul.f32 %v1199_v50, %v257_v32 }
 0x108   :  { %v491_v47 = vmul.f32 %v894_v43, %v1185_v35  ;;  %v507_v48 = vmul.f32 %v910_v44, %v458_v7  ;;  %v196_v51 = vpop.f32.mrb[11].mxu0  ;;  %v260_v52 = vpop.f32.mrb[11].mxu1 }
 0x109   :  { %v489_v55 = vmul.f32 %v1181_v33, %v196_v51  ;;  %v505_v56 = vmul.f32 %v1197_v49, %v260_v52  ;;  %v473_v36 = vpop.permute.xlu0 %472 }
 0x10a   :  { %v776_v57 = vpack.c.bf16 %v491_v47, %v490_v45  ;;  %v816_v58 = vpack.c.bf16 %v507_v48, %v506_v46 }
 0x10b   :  { %v771_v59 = vpack.c.bf16 %v489_v55, %v488_v53  ;;  %v811_v60 = vpack.c.bf16 %v505_v56, %v504_v54 }
 0x10c   :  { %832 = vst [vmem:[%s1263_s3 + $0x28] sm:$0xff] %v776_v57   ;;  %840 = vst [vmem:[%s1263_s3 + $0x68] sm:$0xff] %v816_v58  }
 0x10d   :  { %831 = vst [vmem:[%s1263_s3 + $0x20] sm:$0xff] %v771_v59   ;;  %839 = vst [vmem:[%s1263_s3 + $0x60] sm:$0xff] %v811_v60   ;;  %v897_v33 = vpop.f32.mrb[12].mxu0  ;;  %v913_v34 = vpop.f32.mrb[12].mxu1 }
 0x10e   :  { %v209_v35 = vpop.f32.mrb[13].mxu0  ;;  %v273_v49 = vpop.f32.mrb[13].mxu1  ;;  %v494_v63 = vmul.f32 %v897_v33, %v1195_v40  ;;  %v510_v0 = vmul.f32 %v913_v34, %v473_v36 }
 0x10f   :  { %v898_v50 = vpop.f32.mrb[14].mxu0  ;;  %v914_v62 = vpop.f32.mrb[14].mxu1  ;;  %v492_v5 = vmul.f32 %v1191_v38, %v209_v35  ;;  %v508_v6 = vmul.f32 %v463_v42, %v273_v49 }
 0x110   :  { %v495_v1 = vmul.f32 %v898_v50, %v1193_v39  ;;  %v511_v2 = vmul.f32 %v914_v62, %v478_v61  ;;  %v212_v3 = vpop.f32.mrb[15].mxu0  ;;  %v276_v4 = vpop.f32.mrb[15].mxu1 }
 0x111   :  { %v493_v7 = vmul.f32 %v1189_v37, %v212_v3  ;;  %v509_v8 = vmul.f32 %v468_v41, %v276_v4 }
 0x112   :  { %v786_v9 = vpack.c.bf16 %v495_v1, %v494_v63  ;;  %v826_v10 = vpack.c.bf16 %v511_v2, %v510_v0 }
 0x113   :  { %v781_v11 = vpack.c.bf16 %v493_v7, %v492_v5  ;;  %v821_v12 = vpack.c.bf16 %v509_v8, %v508_v6 }
 0x114   :  { %834 = vst [vmem:[%s1263_s3 + $0x38] sm:$0xff] %v786_v9   ;;  %842 = vst [vmem:[%s1263_s3 + $0x78] sm:$0xff] %v826_v10  }
 0x115   :  { %833 = vst [vmem:[%s1263_s3 + $0x30] sm:$0xff] %v781_v11   ;;  %841 = vst [vmem:[%s1263_s3 + $0x70] sm:$0xff] %v821_v12  }

// kernel: _device_forward.10
= control target key start
LH: loop header
LB: loop body
LE: loop exit
PB: predicated region body
PF: predicated region fallthrough
CT: control target
= control target key end

     0   :  { %v1054_v1 = vmov 0   ;;  %s1324_s1 = inlined_call_operand.vmem [shape: bf16[128,128], index: 1, kind: input, shape index: {}]   ;;  %s1325_s2 = inlined_call_operand.vmem [shape: f32[256,1], index: 2, kind: input, shape index: {}]   ;;  %s1326_s0 = inlined_call_operand.vmem [shape: bf16[256,128], index: 0, kind: input, shape index: {}]   ;;  %s1327_s3 = inlined_call_operand.vmem [shape: bf16[256,128], index: 3, kind: output, shape index: {}]  }
   0x1   :  { %v1030_v0 = vld [vmem:[%s1324_s1] sm:$0xff]   ;;  %1029 = vset.pattern.permute.xlu1 %v1054_v1  ;;  %1028 = vset.pattern.permute.xlu0 %v1054_v1  ;;  %v1031_v2 = vld [vmem:[%s1324_s1 + $0x8] sm:$0xff]   ;;  %v1032_v3 = vld [vmem:[%s1324_s1 + $0x10] sm:$0xff]  }
   0x2   :  { %963 = vmatprep.subr.bf16.mxu0 %v1030_v0  ;;  %1011 = vmatprep.subr.bf16.mxu1 %v1030_v0  ;;  %v370_v4 = vld [vmem:[%s1325_s2 + $0x10] sm:$0xff]  ;;  %v368_v5 = vld [vmem:[%s1325_s2] sm:$0xff]  ;;  %v1033_v6 = vld [vmem:[%s1324_s1 + $0x18] sm:$0xff]  }
   0x3   :  { %964 = vmatpush3.bf16.msra.mxu0 %v1030_v0  ;;  %1019 = vmatpush3.bf16.msra.mxu1 %v1030_v0  ;;  %v371_v7 = vld [vmem:[%s1325_s2 + $0x18] sm:$0xff]  ;;  %v369_v8 = vld [vmem:[%s1325_s2 + $0x8] sm:$0xff]  ;;  %v1038_v9 = vld [vmem:[%s1326_s0] sm:$0xff]  }
   0x4   :  { %965 = vmatprep.subr.bf16.mxu0 %v1031_v2  ;;  %1012 = vmatprep.subr.bf16.mxu1 %v1031_v2  ;;  %v1039_v10 = vld [vmem:[%s1326_s0 + $0x40] sm:$0xff]   ;;  %v373_v12 = vld [vmem:[%s1325_s2 + $0x28] sm:$0xff]  ;;  %v375_v15 = vld [vmem:[%s1325_s2 + $0x38] sm:$0xff] }
   0x5   :  { %412 = vperm.xlu1 %1029, %v370_v4   ;;  %402 = vperm.xlu0 %1028, %v368_v5   ;;  %v1034_v11 = vld [vmem:[%s1324_s1 + $0x20] sm:$0xff]   ;;  %v1035_v14 = vld [vmem:[%s1324_s1 + $0x28] sm:$0xff]   ;;  %v374_v16 = vld [vmem:[%s1325_s2 + $0x30] sm:$0xff] }
   0x6   :  { %v372_v13 = vld [vmem:[%s1325_s2 + $0x20] sm:$0xff]  ;;  %979 = vmatprep.mubr.bf16.mxu0 %v1038_v9  ;;  %995 = vmatprep.mubr.bf16.mxu1 %v1039_v10  ;;  %v1036_v17 = vld [vmem:[%s1324_s1 + $0x30] sm:$0xff]   ;;  %v377_v18 = vld [vmem:[%s1325_s2 + $0x48] sm:$0xff] }
   0x7   :  { %966 = vmatpush3.bf16.msra.mxu0 %v1031_v2  ;;  %1020 = vmatpush3.bf16.msra.mxu1 %v1031_v2  ;;  %v376_v19 = vld [vmem:[%s1325_s2 + $0x40] sm:$0xff]  ;;  %v1037_v20 = vld [vmem:[%s1324_s1 + $0x38] sm:$0xff]   ;;  %v378_v22 = vld [vmem:[%s1325_s2 + $0x50] sm:$0xff] }
   0x8   :  { %967 = vmatprep.subr.bf16.mxu0 %v1032_v3  ;;  %1013 = vmatprep.subr.bf16.mxu1 %v1032_v3  ;;  %v379_v21 = vld [vmem:[%s1325_s2 + $0x58] sm:$0xff]  ;;  %v1040_v23 = vld [vmem:[%s1326_s0 + $0x8] sm:$0xff]   ;;  %v380_v26 = vld [vmem:[%s1325_s2 + $0x60] sm:$0xff] }
   0x9   :  { %417 = vperm.xlu1 %1029, %v371_v7   ;;  %407 = vperm.xlu0 %1028, %v369_v8   ;;  %v1041_v24 = vld [vmem:[%s1326_s0 + $0x48] sm:$0xff]   ;;  %v1042_v27 = vld [vmem:[%s1326_s0 + $0x10] sm:$0xff]   ;;  %v383_v29 = vld [vmem:[%s1325_s2 + $0x78] sm:$0xff] }
   0xa   :  { %v381_v25 = vld [vmem:[%s1325_s2 + $0x68] sm:$0xff]  ;;  %v1043_v28 = vld [vmem:[%s1326_s0 + $0x50] sm:$0xff]   ;;  %v1044_v31 = vld [vmem:[%s1326_s0 + $0x18] sm:$0xff]  }
   0xb   :  { %968 = vmatpush3.bf16.msra.mxu0 %v1032_v3  ;;  %1021 = vmatpush3.bf16.msra.mxu1 %v1032_v3  ;;  %v382_v30 = vld [vmem:[%s1325_s2 + $0x70] sm:$0xff]  ;;  %v1045_v32 = vld [vmem:[%s1326_s0 + $0x58] sm:$0xff]   ;;  %v385_v33 = vld [vmem:[%s1325_s2 + $0x88] sm:$0xff] }
   0xc   :  { %969 = vmatprep.subr.bf16.mxu0 %v1033_v6  ;;  %1014 = vmatprep.subr.bf16.mxu1 %v1033_v6  ;;  %v384_v34 = vld [vmem:[%s1325_s2 + $0x80] sm:$0xff]  ;;  %v387_v37 = vld [vmem:[%s1325_s2 + $0x98] sm:$0xff]  ;;  %v386_v38 = vld [vmem:[%s1325_s2 + $0x90] sm:$0xff] }
   0xd   :  { %427 = vperm.xlu1 %1029, %v373_v12   ;;  %422 = vperm.xlu0 %1028, %v372_v13   ;;  %v1046_v35 = vld [vmem:[%s1326_s0 + $0x20] sm:$0xff]   ;;  %v1048_v39 = vld [vmem:[%s1326_s0 + $0x28] sm:$0xff]   ;;  %v1050_v43 = vld [vmem:[%s1326_s0 + $0x30] sm:$0xff]  }
   0xe   :  { %v1047_v36 = vld [vmem:[%s1326_s0 + $0x60] sm:$0xff]   ;;  %v1049_v40 = vld [vmem:[%s1326_s0 + $0x68] sm:$0xff]   ;;  %v1051_v44 = vld [vmem:[%s1326_s0 + $0x70] sm:$0xff]  }
   0xf   :  { %970 = vmatpush3.bf16.msra.mxu0 %v1033_v6  ;;  %1022 = vmatpush3.bf16.msra.mxu1 %v1033_v6  ;;  %v389_v41 = vld [vmem:[%s1325_s2 + $0xa8] sm:$0xff]  ;;  %v388_v42 = vld [vmem:[%s1325_s2 + $0xa0] sm:$0xff]  ;;  %v391_v45 = vld [vmem:[%s1325_s2 + $0xb8] sm:$0xff] }
  0x10   :  { %971 = vmatprep.subr.bf16.mxu0 %v1034_v11  ;;  %1015 = vmatprep.subr.bf16.mxu1 %v1034_v11  ;;  %v390_v46 = vld [vmem:[%s1325_s2 + $0xb0] sm:$0xff]  ;;  %v1052_v47 = vld [vmem:[%s1326_s0 + $0x38] sm:$0xff]   ;;  %v393_v49 = vld [vmem:[%s1325_s2 + $0xc8] sm:$0xff] }
  0x11   :  { %437 = vperm.xlu1 %1029, %v375_v15   ;;  %432 = vperm.xlu0 %1028, %v374_v16   ;;  %v1053_v48 = vld [vmem:[%s1326_s0 + $0x78] sm:$0xff]   ;;  %v392_v50 = vld [vmem:[%s1325_s2 + $0xc0] sm:$0xff]  ;;  %v394_v52 = vld [vmem:[%s1325_s2 + $0xd0] sm:$0xff] }
  0x12   :  { %v395_v51 = vld [vmem:[%s1325_s2 + $0xd8] sm:$0xff]  ;;  %v397_v53 = vld [vmem:[%s1325_s2 + $0xe8] sm:$0xff]  ;;  %v396_v54 = vld [vmem:[%s1325_s2 + $0xe0] sm:$0xff] }
  0x13   :  { %972 = vmatpush3.bf16.msra.mxu0 %v1034_v11  ;;  %1023 = vmatpush3.bf16.msra.mxu1 %v1034_v11  ;;  %v399_v55 = vld [vmem:[%s1325_s2 + $0xf8] sm:$0xff]  ;;  %v398_v56 = vld [vmem:[%s1325_s2 + $0xf0] sm:$0xff] }
  0x14   :  { %973 = vmatprep.subr.bf16.mxu0 %v1035_v14  ;;  %1016 = vmatprep.subr.bf16.mxu1 %v1035_v14 }
  0x15   :  { %447 = vperm.xlu1 %1029, %v377_v18   ;;  %442 = vperm.xlu0 %1028, %v376_v19  }
  0x17   :  { %974 = vmatpush3.bf16.msra.mxu0 %v1035_v14  ;;  %1024 = vmatpush3.bf16.msra.mxu1 %v1035_v14 }
  0x18   :  { %975 = vmatprep.subr.bf16.mxu0 %v1036_v17  ;;  %1017 = vmatprep.subr.bf16.mxu1 %v1036_v17 }
  0x19   :  { %457 = vperm.xlu1 %1029, %v379_v21   ;;  %452 = vperm.xlu0 %1028, %v378_v22  }
  0x1b   :  { %976 = vmatpush3.bf16.msra.mxu0 %v1036_v17  ;;  %1025 = vmatpush3.bf16.msra.mxu1 %v1036_v17 }
  0x1c   :  { %977 = vmatprep.subr.bf16.mxu0 %v1037_v20  ;;  %1018 = vmatprep.subr.bf16.mxu1 %v1037_v20 }
  0x1d   :  { %467 = vperm.xlu1 %1029, %v381_v25   ;;  %462 = vperm.xlu0 %1028, %v380_v26  }
  0x1f   :  { %978 = vmatpush3.bf16.msra.mxu0 %v1037_v20  ;;  %1026 = vmatpush3.bf16.msra.mxu1 %v1037_v20 }
  0x21   :  { %477 = vperm.xlu1 %1029, %v383_v29   ;;  %472 = vperm.xlu0 %1028, %v382_v30  }
  0x22   :  { %980 = vmatmul.mubr.bf16.vlgmr.msra.gmra.mrb[0].mxu0 %v1040_v23  ;;  %996 = vmatmul.mubr.bf16.vlgmr.msra.gmra.mrb[0].mxu1 %v1041_v24 }
  0x23   :  { %983 = vmatprep.mubr.bf16.mxu0 %v1042_v27  ;;  %999 = vmatprep.mubr.bf16.mxu1 %v1043_v28 }
  0x25   :  { %487 = vperm.xlu1 %1029, %v385_v33   ;;  %482 = vperm.xlu0 %1028, %v384_v34  }
  0x29   :  { %497 = vperm.xlu1 %1029, %v387_v37   ;;  %492 = vperm.xlu0 %1028, %v386_v38  }
  0x2a   :  { %984 = vmatmul.mubr.bf16.gmra.mrb[4].mxu0 %v1044_v31  ;;  %1000 = vmatmul.mubr.bf16.gmra.mrb[4].mxu1 %v1045_v32 }
  0x2b   :  { %987 = vmatprep.mubr.bf16.mxu0 %v1046_v35  ;;  %1003 = vmatprep.mubr.bf16.mxu1 %v1047_v36 }
  0x2d   :  { %507 = vperm.xlu1 %1029, %v389_v41   ;;  %502 = vperm.xlu0 %1028, %v388_v42  }
  0x31   :  { %517 = vperm.xlu1 %1029, %v391_v45   ;;  %512 = vperm.xlu0 %1028, %v390_v46  }
  0x32   :  { %988 = vmatmul.mubr.bf16.gmra.mrb[8].mxu0 %v1048_v39  ;;  %1004 = vmatmul.mubr.bf16.gmra.mrb[8].mxu1 %v1049_v40 }
  0x33   :  { %991 = vmatprep.mubr.bf16.mxu0 %v1050_v43  ;;  %1007 = vmatprep.mubr.bf16.mxu1 %v1051_v44 }
  0x35   :  { %527 = vperm.xlu1 %1029, %v393_v49   ;;  %522 = vperm.xlu0 %1028, %v392_v50  }
  0x39   :  { %537 = vperm.xlu1 %1029, %v395_v51   ;;  %532 = vperm.xlu0 %1028, %v394_v52  }
  0x3a   :  { %992 = vmatmul.mubr.bf16.gmra.mrb[12].mxu0 %v1052_v47  ;;  %1008 = vmatmul.mubr.bf16.gmra.mrb[12].mxu1 %v1053_v48 }
  0x3d   :  { %547 = vperm.xlu1 %1029, %v397_v53   ;;  %542 = vperm.xlu0 %1028, %v396_v54  }
  0x41   :  { %557 = vperm.xlu1 %1029, %v399_v55   ;;  %552 = vperm.xlu0 %1028, %v398_v56  }
  0x84   :  { %v413_v57 = vpop.permute.xlu1 %412  ;;  %v403_v58 = vpop.permute.xlu0 %402 }
  0x88   :  { %v418_v59 = vpop.permute.xlu1 %417  ;;  %v408_v60 = vpop.permute.xlu0 %407 }
  0x8c   :  { %v1243_v61 = vpop.permute.xlu1 %427  ;;  %v423_v62 = vpop.permute.xlu0 %422 }
  0x90   :  { %v438_v63 = vpop.permute.xlu1 %437  ;;  %v433_v0 = vpop.permute.xlu0 %432 }
  0x94   :  { %v1245_v1 = vpop.permute.xlu1 %447  ;;  %v1247_v2 = vpop.permute.xlu0 %442 }
  0x98   :  { %v1249_v3 = vpop.permute.xlu1 %457  ;;  %v1251_v4 = vpop.permute.xlu0 %452 }
  0x9c   :  { %v1253_v5 = vpop.permute.xlu1 %467  ;;  %v1255_v6 = vpop.permute.xlu0 %462 }
  0xa0   :  { %v1257_v7 = vpop.permute.xlu1 %477  ;;  %v1259_v8 = vpop.permute.xlu0 %472 }
  0xa4   :  { %v488_v9 = vpop.permute.xlu1 %487  ;;  %v483_v10 = vpop.permute.xlu0 %482 }
  0xa8   :  { %v498_v11 = vpop.permute.xlu1 %497  ;;  %v493_v12 = vpop.permute.xlu0 %492 }
  0xac   :  { %v508_v13 = vpop.permute.xlu1 %507  ;;  %v503_v14 = vpop.permute.xlu0 %502 }
  0xb0   :  { %v518_v15 = vpop.permute.xlu1 %517  ;;  %v513_v16 = vpop.permute.xlu0 %512 }
  0xb4   :  { %v1261_v17 = vpop.permute.xlu1 %527  ;;  %v1263_v18 = vpop.permute.xlu0 %522 }
  0xb8   :  { %v538_v39 = vpop.permute.xlu1 %537  ;;  %v533_v40 = vpop.permute.xlu0 %532 }
  0xf5   :  { %v981_v19 = vpop.f32.mrb[0].mxu0  ;;  %v997_v20 = vpop.f32.mrb[0].mxu1 }
  0xf6   :  { %v241_v21 = vpop.f32.mrb[1].mxu0  ;;  %v305_v22 = vpop.f32.mrb[1].mxu1  ;;  %v562_v25 = vmul.f32 %v981_v19, %v413_v57  ;;  %v578_v26 = vmul.f32 %v997_v20, %v493_v12 }
  0xf7   :  { %v982_v23 = vpop.f32.mrb[2].mxu0  ;;  %v998_v24 = vpop.f32.mrb[2].mxu1  ;;  %v560_v31 = vmul.f32 %v403_v58, %v241_v21  ;;  %v576_v32 = vmul.f32 %v483_v10, %v305_v22 }
  0xf8   :  { %v563_v27 = vmul.f32 %v982_v23, %v418_v59  ;;  %v579_v28 = vmul.f32 %v998_v24, %v498_v11  ;;  %v244_v29 = vpop.f32.mrb[3].mxu0  ;;  %v308_v30 = vpop.f32.mrb[3].mxu1 }
  0xf9   :  { %v561_v33 = vmul.f32 %v408_v60, %v244_v29  ;;  %v577_v34 = vmul.f32 %v488_v9, %v308_v30  ;;  %v548_v9 = vpop.permute.xlu1 %547  ;;  %v543_v10 = vpop.permute.xlu0 %542 }
  0xfa   :  { %v852_v35 = vpack.c.bf16 %v563_v27, %v562_v25  ;;  %v892_v36 = vpack.c.bf16 %v579_v28, %v578_v26 }
  0xfb   :  { %v847_v37 = vpack.c.bf16 %v561_v33, %v560_v31  ;;  %v887_v38 = vpack.c.bf16 %v577_v34, %v576_v32 }
  0xfc   :  { %924 = vst [vmem:[%s1327_s3 + $0x8] sm:$0xff] %v852_v35   ;;  %932 = vst [vmem:[%s1327_s3 + $0x48] sm:$0xff] %v892_v36  }
  0xfd   :  { %848 = vst [vmem:[%s1327_s3] sm:$0xff] %v847_v37   ;;  %931 = vst [vmem:[%s1327_s3 + $0x40] sm:$0xff] %v887_v38   ;;  %v985_v41 = vpop.f32.mrb[4].mxu0  ;;  %v1001_v42 = vpop.f32.mrb[4].mxu1 }
  0xfe   :  { %v257_v43 = vpop.f32.mrb[5].mxu0  ;;  %v321_v44 = vpop.f32.mrb[5].mxu1  ;;  %v566_v47 = vmul.f32 %v985_v41, %v433_v0  ;;  %v582_v48 = vmul.f32 %v1001_v42, %v513_v16 }
  0xff   :  { %v986_v45 = vpop.f32.mrb[6].mxu0  ;;  %v1002_v46 = vpop.f32.mrb[6].mxu1  ;;  %v564_v53 = vmul.f32 %v423_v62, %v257_v43  ;;  %v580_v54 = vmul.f32 %v503_v14, %v321_v44 }
 0x100   :  { %v567_v49 = vmul.f32 %v986_v45, %v438_v63  ;;  %v583_v50 = vmul.f32 %v1002_v46, %v518_v15  ;;  %v260_v51 = vpop.f32.mrb[7].mxu0  ;;  %v324_v52 = vpop.f32.mrb[7].mxu1 }
 0x101   :  { %v565_v55 = vmul.f32 %v1243_v61, %v260_v51  ;;  %v581_v56 = vmul.f32 %v508_v13, %v324_v52  ;;  %v558_v29 = vpop.permute.xlu1 %557 }
 0x102   :  { %v862_v57 = vpack.c.bf16 %v567_v49, %v566_v47  ;;  %v902_v58 = vpack.c.bf16 %v583_v50, %v582_v48 }
 0x103   :  { %v857_v59 = vpack.c.bf16 %v565_v55, %v564_v53  ;;  %v897_v60 = vpack.c.bf16 %v581_v56, %v580_v54 }
 0x104   :  { %926 = vst [vmem:[%s1327_s3 + $0x18] sm:$0xff] %v862_v57   ;;  %934 = vst [vmem:[%s1327_s3 + $0x58] sm:$0xff] %v902_v58  }
 0x105   :  { %925 = vst [vmem:[%s1327_s3 + $0x10] sm:$0xff] %v857_v59   ;;  %933 = vst [vmem:[%s1327_s3 + $0x50] sm:$0xff] %v897_v60   ;;  %v989_v61 = vpop.f32.mrb[8].mxu0  ;;  %v1005_v62 = vpop.f32.mrb[8].mxu1 }
 0x106   :  { %v273_v63 = vpop.f32.mrb[9].mxu0  ;;  %v337_v0 = vpop.f32.mrb[9].mxu1  ;;  %v570_v13 = vmul.f32 %v989_v61, %v1251_v4  ;;  %v586_v14 = vmul.f32 %v1005_v62, %v533_v40 }
 0x107   :  { %v990_v11 = vpop.f32.mrb[10].mxu0  ;;  %v1006_v12 = vpop.f32.mrb[10].mxu1  ;;  %v568_v21 = vmul.f32 %v1247_v2, %v273_v63  ;;  %v584_v22 = vmul.f32 %v1263_v18, %v337_v0 }
 0x108   :  { %v571_v15 = vmul.f32 %v990_v11, %v1249_v3  ;;  %v587_v16 = vmul.f32 %v1006_v12, %v538_v39  ;;  %v276_v19 = vpop.f32.mrb[11].mxu0  ;;  %v340_v20 = vpop.f32.mrb[11].mxu1 }
 0x109   :  { %v569_v23 = vmul.f32 %v1245_v1, %v276_v19  ;;  %v585_v24 = vmul.f32 %v1261_v17, %v340_v20  ;;  %v553_v4 = vpop.permute.xlu0 %552 }
 0x10a   :  { %v872_v25 = vpack.c.bf16 %v571_v15, %v570_v13  ;;  %v912_v26 = vpack.c.bf16 %v587_v16, %v586_v14 }
 0x10b   :  { %v867_v27 = vpack.c.bf16 %v569_v23, %v568_v21  ;;  %v907_v28 = vpack.c.bf16 %v585_v24, %v584_v22 }
 0x10c   :  { %928 = vst [vmem:[%s1327_s3 + $0x28] sm:$0xff] %v872_v25   ;;  %936 = vst [vmem:[%s1327_s3 + $0x68] sm:$0xff] %v912_v26  }
 0x10d   :  { %927 = vst [vmem:[%s1327_s3 + $0x20] sm:$0xff] %v867_v27   ;;  %935 = vst [vmem:[%s1327_s3 + $0x60] sm:$0xff] %v907_v28   ;;  %v993_v1 = vpop.f32.mrb[12].mxu0  ;;  %v1009_v2 = vpop.f32.mrb[12].mxu1 }
 0x10e   :  { %v289_v3 = vpop.f32.mrb[13].mxu0  ;;  %v353_v17 = vpop.f32.mrb[13].mxu1  ;;  %v574_v31 = vmul.f32 %v993_v1, %v1259_v8  ;;  %v590_v32 = vmul.f32 %v1009_v2, %v553_v4 }
 0x10f   :  { %v994_v18 = vpop.f32.mrb[14].mxu0  ;;  %v1010_v30 = vpop.f32.mrb[14].mxu1  ;;  %v572_v37 = vmul.f32 %v1255_v6, %v289_v3  ;;  %v588_v38 = vmul.f32 %v543_v10, %v353_v17 }
 0x110   :  { %v575_v33 = vmul.f32 %v994_v18, %v1257_v7  ;;  %v591_v34 = vmul.f32 %v1010_v30, %v558_v29  ;;  %v292_v35 = vpop.f32.mrb[15].mxu0  ;;  %v356_v36 = vpop.f32.mrb[15].mxu1 }
 0x111   :  { %v573_v39 = vmul.f32 %v1253_v5, %v292_v35  ;;  %v589_v40 = vmul.f32 %v548_v9, %v356_v36 }
 0x112   :  { %v882_v41 = vpack.c.bf16 %v575_v33, %v574_v31  ;;  %v922_v42 = vpack.c.bf16 %v591_v34, %v590_v32 }
 0x113   :  { %v877_v43 = vpack.c.bf16 %v573_v39, %v572_v37  ;;  %v917_v44 = vpack.c.bf16 %v589_v40, %v588_v38 }
 0x114   :  { %930 = vst [vmem:[%s1327_s3 + $0x38] sm:$0xff] %v882_v41   ;;  %938 = vst [vmem:[%s1327_s3 + $0x78] sm:$0xff] %v922_v42  }
 0x115   :  { %929 = vst [vmem:[%s1327_s3 + $0x30] sm:$0xff] %v877_v43   ;;  %937 = vst [vmem:[%s1327_s3 + $0x70] sm:$0xff] %v917_v44  }

// kernel: _device_forward.9
= control target key start
LH: loop header
LB: loop body
LE: loop exit
PB: predicated region body
PF: predicated region fallthrough
CT: control target
= control target key end

     0   :  { %v1706_v1 = vmov 0   ;;  %s2152_s1 = inlined_call_operand.vmem [shape: bf16[256,128], index: 1, kind: input, shape index: {}, may-alias: {1,2}]   ;;  %s2153_s0 = inlined_call_operand.vmem [shape: bf16[256,256], index: 0, kind: input, shape index: {}]   ;;  %s2154_s3 = inlined_call_operand.vmem [shape: f32[256,1], index: 3, kind: input, shape index: {}]   ;;  %s2155_s2 = inlined_call_operand.vmem [shape: bf16[256,128], index: 2, kind: input, shape index: {}, may-alias: {1,2}]   ;;  %s2156_s4 = inlined_call_operand.vmem [shape: f32[1,128], index: 4, kind: input, shape index: {}]   ;;  %s2157_s5 = inlined_call_operand.vmem [shape: bf16[256,128], index: 5, kind: output, shape index: {}]  }
   0x1   :  { %v1642_v0 = vld [vmem:[%s2152_s1 + $0x40] sm:$0xff]   ;;  %1641 = vset.pattern.permute.xlu1 %v1706_v1  ;;  %1640 = vset.pattern.permute.xlu0 %v1706_v1  ;;  %v1644_v3 = vld [vmem:[%s2152_s1 + $0x48] sm:$0xff]   ;;  %v1646_v5 = vld [vmem:[%s2152_s1 + $0x50] sm:$0xff]  }
   0x2   :  { %v1643_v2 = vld [vmem:[%s2152_s1] sm:$0xff]   ;;  %1511 = vmatprep.subr.bf16.mxu0 %v1642_v0  ;;  %1623 = vmatprep.subr.bf16.mxu1 %v1642_v0  ;;  %v1645_v4 = vld [vmem:[%s2152_s1 + $0x8] sm:$0xff]   ;;  %v1647_v6 = vld [vmem:[%s2152_s1 + $0x10] sm:$0xff]  }
   0x3   :  { %1512 = vmatpush3.bf16.msra.mxu0 %v1643_v2  ;;  %1631 = vmatpush3.bf16.msra.mxu1 %v1643_v2  ;;  %v1648_v7 = vld [vmem:[%s2152_s1 + $0x58] sm:$0xff]   ;;  %v1650_v9 = vld [vmem:[%s2152_s1 + $0x60] sm:$0xff]   ;;  %v1652_v11 = vld [vmem:[%s2152_s1 + $0x68] sm:$0xff]  }
   0x4   :  { %1513 = vmatprep.subr.bf16.mxu0 %v1644_v3  ;;  %1624 = vmatprep.subr.bf16.mxu1 %v1644_v3  ;;  %v1649_v8 = vld [vmem:[%s2152_s1 + $0x18] sm:$0xff]   ;;  %v1651_v10 = vld [vmem:[%s2152_s1 + $0x20] sm:$0xff]   ;;  %v1653_v14 = vld [vmem:[%s2152_s1 + $0x28] sm:$0xff]  }
   0x5   :  { %v1660_v12 = vld [vmem:[%s2153_s0 + $0x4] ss:$8 sps:$4 sm:$0xff]   ;;  %v1654_v15 = vld [vmem:[%s2152_s1 + $0x70] sm:$0xff]   ;;  %v1656_v17 = vld [vmem:[%s2152_s1 + $0x78] sm:$0xff]  }
   0x6   :  { %v1663_v13 = vld [vmem:[%s2153_s0 + $0x84] ss:$8 sps:$4 sm:$0xff]   ;;  %441 = vmatprep.mubr.bf16.mxu0 %v1660_v12  ;;  %v1655_v16 = vld [vmem:[%s2152_s1 + $0x30] sm:$0xff]   ;;  %v1657_v19 = vld [vmem:[%s2152_s1 + $0x38] sm:$0xff]  }
   0x7   :  { %1514 = vmatpush3.bf16.msra.mxu0 %v1645_v4  ;;  %1632 = vmatpush3.bf16.msra.mxu1 %v1645_v4  ;;  %v767_v18 = vld [vmem:[%s2154_s3 + $0x10] sm:$0xff]  ;;  %v765_v20 = vld [vmem:[%s2154_s3] sm:$0xff]  ;;  %v768_v23 = vld [vmem:[%s2154_s3 + $0x18] sm:$0xff] }
   0x8   :  { %1515 = vmatprep.subr.bf16.mxu0 %v1646_v5  ;;  %1625 = vmatprep.subr.bf16.mxu1 %v1646_v5  ;;  %v1658_v21 = vld [vmem:[%s2153_s0] ss:$8 sps:$4 sm:$0xff]   ;;  %v1664_v25 = vld [vmem:[%s2153_s0 + $0x14] ss:$8 sps:$4 sm:$0xff]   ;;  %v1668_v29 = vld [vmem:[%s2153_s0 + $0x10] ss:$8 sps:$4 sm:$0xff]  }
   0x9   :  { %505 = vmatprep.mubr.bf16.mxu1 %v1663_v13  ;;  %809 = vperm.xlu1 %1641, %v767_v18   ;;  %v1661_v22 = vld [vmem:[%s2153_s0 + $0x80] ss:$8 sps:$4 sm:$0xff]   ;;  %v1666_v26 = vld [vmem:[%s2153_s0 + $0x94] ss:$8 sps:$4 sm:$0xff]   ;;  %v1669_v30 = vld [vmem:[%s2153_s0 + $0x90] ss:$8 sps:$4 sm:$0xff]  }
   0xa   :  { %799 = vperm.xlu0 %1640, %v765_v20   ;;  %v766_v24 = vld [vmem:[%s2154_s3 + $0x8] sm:$0xff]  ;;  %v769_v28 = vld [vmem:[%s2154_s3 + $0x20] sm:$0xff]  ;;  %v772_v31 = vld [vmem:[%s2154_s3 + $0x38] sm:$0xff] }
   0xb   :  { %1516 = vmatpush3.bf16.msra.mxu0 %v1647_v6  ;;  %1633 = vmatpush3.bf16.msra.mxu1 %v1647_v6  ;;  %v770_v27 = vld [vmem:[%s2154_s3 + $0x28] sm:$0xff]  ;;  %v771_v32 = vld [vmem:[%s2154_s3 + $0x30] sm:$0xff]  ;;  %v773_v36 = vld [vmem:[%s2154_s3 + $0x40] sm:$0xff] }
   0xc   :  { %1517 = vmatprep.subr.bf16.mxu0 %v1648_v7  ;;  %1626 = vmatprep.subr.bf16.mxu1 %v1648_v7  ;;  %v1670_v33 = vld [vmem:[%s2153_s0 + $0x24] ss:$8 sps:$4 sm:$0xff]   ;;  %v1674_v37 = vld [vmem:[%s2153_s0 + $0x20] ss:$8 sps:$4 sm:$0xff]   ;;  %v776_v39 = vld [vmem:[%s2154_s3 + $0x58] sm:$0xff] }
   0xd   :  { %814 = vperm.xlu1 %1641, %v768_v23   ;;  %v1672_v34 = vld [vmem:[%s2153_s0 + $0xa4] ss:$8 sps:$4 sm:$0xff]   ;;  %v1675_v38 = vld [vmem:[%s2153_s0 + $0xa0] ss:$8 sps:$4 sm:$0xff]   ;;  %v775_v40 = vld [vmem:[%s2154_s3 + $0x50] sm:$0xff] }
   0xe   :  { %804 = vperm.xlu0 %1640, %v766_v24   ;;  %v774_v35 = vld [vmem:[%s2154_s3 + $0x48] sm:$0xff]  ;;  %v1676_v41 = vld [vmem:[%s2153_s0 + $0x34] ss:$8 sps:$4 sm:$0xff]   ;;  %v777_v44 = vld [vmem:[%s2154_s3 + $0x60] sm:$0xff] }
   0xf   :  { %1518 = vmatpush3.bf16.msra.mxu0 %v1649_v8  ;;  %1634 = vmatpush3.bf16.msra.mxu1 %v1649_v8  ;;  %v1678_v42 = vld [vmem:[%s2153_s0 + $0xb4] ss:$8 sps:$4 sm:$0xff]   ;;  %v778_v43 = vld [vmem:[%s2154_s3 + $0x68] sm:$0xff]  ;;  %v1680_v45 = vld [vmem:[%s2153_s0 + $0x30] ss:$8 sps:$4 sm:$0xff]  }
  0x10   :  { %1519 = vmatprep.subr.bf16.mxu0 %v1650_v9  ;;  %1627 = vmatprep.subr.bf16.mxu1 %v1650_v9  ;;  %v1681_v46 = vld [vmem:[%s2153_s0 + $0xb0] ss:$8 sps:$4 sm:$0xff]   ;;  %v1682_v49 = vld [vmem:[%s2153_s0 + $0x44] ss:$8 sps:$4 sm:$0xff]   ;;  %v1686_v53 = vld [vmem:[%s2153_s0 + $0x40] ss:$8 sps:$4 sm:$0xff]  }
  0x11   :  { %824 = vperm.xlu1 %1641, %v770_v27   ;;  %v780_v47 = vld [vmem:[%s2154_s3 + $0x78] sm:$0xff]  ;;  %v779_v48 = vld [vmem:[%s2154_s3 + $0x70] sm:$0xff]  ;;  %v1684_v50 = vld [vmem:[%s2153_s0 + $0xc4] ss:$8 sps:$4 sm:$0xff]  }
  0x12   :  { %819 = vperm.xlu0 %1640, %v769_v28   ;;  %v782_v51 = vld [vmem:[%s2154_s3 + $0x88] sm:$0xff]  ;;  %v781_v52 = vld [vmem:[%s2154_s3 + $0x80] sm:$0xff]  ;;  %v784_v55 = vld [vmem:[%s2154_s3 + $0x98] sm:$0xff] }
  0x13   :  { %1520 = vmatpush3.bf16.msra.mxu0 %v1651_v10  ;;  %1635 = vmatpush3.bf16.msra.mxu1 %v1651_v10  ;;  %v1687_v54 = vld [vmem:[%s2153_s0 + $0xc0] ss:$8 sps:$4 sm:$0xff]   ;;  %v783_v56 = vld [vmem:[%s2154_s3 + $0x90] sm:$0xff]  ;;  %v788_v63 = vld [vmem:[%s2154_s3 + $0xb8] sm:$0xff] }
  0x14   :  { %1521 = vmatprep.subr.bf16.mxu0 %v1652_v11  ;;  %1628 = vmatprep.subr.bf16.mxu1 %v1652_v11  ;;  %v1688_v57 = vld [vmem:[%s2153_s0 + $0x54] ss:$8 sps:$4 sm:$0xff]   ;;  %v786_v59 = vld [vmem:[%s2154_s3 + $0xa8] sm:$0xff]  ;;  %v785_v60 = vld [vmem:[%s2154_s3 + $0xa0] sm:$0xff] }
  0x15   :  { %834 = vperm.xlu1 %1641, %v772_v31   ;;  %v1690_v58 = vld [vmem:[%s2153_s0 + $0xd4] ss:$8 sps:$4 sm:$0xff]   ;;  %v1692_v61 = vld [vmem:[%s2153_s0 + $0x50] ss:$8 sps:$4 sm:$0xff]   ;;  %v1694_v1 = vld [vmem:[%s2153_s0 + $0x64] ss:$8 sps:$4 sm:$0xff]  }
  0x16   :  { %829 = vperm.xlu0 %1640, %v771_v32   ;;  %v1693_v62 = vld [vmem:[%s2153_s0 + $0xd0] ss:$8 sps:$4 sm:$0xff]   ;;  %v1696_v2 = vld [vmem:[%s2153_s0 + $0xe4] ss:$8 sps:$4 sm:$0xff]   ;;  %v1698_v5 = vld [vmem:[%s2153_s0 + $0x60] ss:$8 sps:$4 sm:$0xff]  }
  0x17   :  { %1522 = vmatpush3.bf16.msra.mxu0 %v1653_v14  ;;  %1636 = vmatpush3.bf16.msra.mxu1 %v1653_v14  ;;  %v787_v0 = vld [vmem:[%s2154_s3 + $0xb0] sm:$0xff]  ;;  %v790_v3 = vld [vmem:[%s2154_s3 + $0xc8] sm:$0xff]  ;;  %v789_v4 = vld [vmem:[%s2154_s3 + $0xc0] sm:$0xff] }
  0x18   :  { %1523 = vmatprep.subr.bf16.mxu0 %v1654_v15  ;;  %1629 = vmatprep.subr.bf16.mxu1 %v1654_v15  ;;  %v1699_v6 = vld [vmem:[%s2153_s0 + $0xe0] ss:$8 sps:$4 sm:$0xff]   ;;  %v792_v7 = vld [vmem:[%s2154_s3 + $0xd8] sm:$0xff]  ;;  %v791_v8 = vld [vmem:[%s2154_s3 + $0xd0] sm:$0xff] }
  0x19   :  { %844 = vperm.xlu1 %1641, %v774_v35   ;;  %v1700_v9 = vld [vmem:[%s2153_s0 + $0x74] ss:$8 sps:$4 sm:$0xff]   ;;  %v794_v11 = vld [vmem:[%s2154_s3 + $0xe8] sm:$0xff]  ;;  %v793_v12 = vld [vmem:[%s2154_s3 + $0xe0] sm:$0xff] }
  0x1a   :  { %839 = vperm.xlu0 %1640, %v773_v36   ;;  %v1702_v10 = vld [vmem:[%s2153_s0 + $0xf4] ss:$8 sps:$4 sm:$0xff]   ;;  %v1704_v13 = vld [vmem:[%s2153_s0 + $0x70] ss:$8 sps:$4 sm:$0xff]   ;;  %v1338_v31 = vld [vmem:[%s2155_s2] sm:$0xff]  }
  0x1b   :  { %1524 = vmatpush3.bf16.msra.mxu0 %v1655_v16  ;;  %1637 = vmatpush3.bf16.msra.mxu1 %v1655_v16  ;;  %v1705_v14 = vld [vmem:[%s2153_s0 + $0xf0] ss:$8 sps:$4 sm:$0xff]   ;;  %v1488_v32 = vld [vmem:[%s2155_s2 + $0x40] sm:$0xff]  }
  0x1c   :  { %1525 = vmatprep.subr.bf16.mxu0 %v1656_v17  ;;  %1630 = vmatprep.subr.bf16.mxu1 %v1656_v17  ;;  %v796_v15 = vld [vmem:[%s2154_s3 + $0xf8] sm:$0xff]  ;;  %v795_v16 = vld [vmem:[%s2154_s3 + $0xf0] sm:$0xff] }
  0x1d   :  { %854 = vperm.xlu1 %1641, %v776_v39  }
  0x1e   :  { %849 = vperm.xlu0 %1640, %v775_v40  }
  0x1f   :  { %1526 = vmatpush3.bf16.msra.mxu0 %v1657_v19  ;;  %1638 = vmatpush3.bf16.msra.mxu1 %v1657_v19 }
  0x21   :  { %864 = vperm.xlu1 %1641, %v778_v43  }
  0x22   :  { %442 = vmatmul.mubr.bf16.vlgmr.msra.gmra.mrb[0].mxu0 %v1658_v21  ;;  %506 = vmatmul.mubr.bf16.vlgmr.msra.gmra.mrb[0].mxu1 %v1661_v22 }
  0x23   :  { %449 = vmatprep.mubr.bf16.mxu0 %v1664_v25  ;;  %513 = vmatprep.mubr.bf16.mxu1 %v1666_v26 }
  0x24   :  { %859 = vperm.xlu0 %1640, %v777_v44  }
  0x25   :  { %874 = vperm.xlu1 %1641, %v780_v47  }
  0x28   :  { %869 = vperm.xlu0 %1640, %v779_v48  }
  0x29   :  { %884 = vperm.xlu1 %1641, %v782_v51  }
  0x2a   :  { %450 = vmatmul.mubr.bf16.gmra.mrb[4].mxu0 %v1668_v29  ;;  %514 = vmatmul.mubr.bf16.gmra.mrb[4].mxu1 %v1669_v30 }
  0x2b   :  { %457 = vmatprep.mubr.bf16.mxu0 %v1670_v33  ;;  %521 = vmatprep.mubr.bf16.mxu1 %v1672_v34 }
  0x2c   :  { %879 = vperm.xlu0 %1640, %v781_v52  }
  0x2d   :  { %894 = vperm.xlu1 %1641, %v784_v55  }
  0x30   :  { %889 = vperm.xlu0 %1640, %v783_v56  }
  0x31   :  { %904 = vperm.xlu1 %1641, %v786_v59   ;;  %v1481_v59 = vld [vmem:[%s2155_s2 + $0x8] sm:$0xff]  }
  0x32   :  { %458 = vmatmul.mubr.bf16.gmra.mrb[8].mxu0 %v1674_v37  ;;  %522 = vmatmul.mubr.bf16.gmra.mrb[8].mxu1 %v1675_v38  ;;  %v1339_v37 = vunpack.c.l.bf16 %v1338_v31  ;;  %v1371_v38 = vunpack.c.l.bf16 %v1488_v32 }
  0x33   :  { %465 = vmatprep.mubr.bf16.mxu0 %v1676_v41  ;;  %529 = vmatprep.mubr.bf16.mxu1 %v1678_v42 }
  0x34   :  { %899 = vperm.xlu0 %1640, %v785_v60   ;;  %v1489_v60 = vld [vmem:[%s2155_s2 + $0x48] sm:$0xff]  }
  0x35   :  { %914 = vperm.xlu1 %1641, %v788_v63  }
  0x38   :  { %909 = vperm.xlu0 %1640, %v787_v0  }
  0x39   :  { %924 = vperm.xlu1 %1641, %v790_v3  }
  0x3a   :  { %466 = vmatmul.mubr.bf16.gmra.mrb[12].mxu0 %v1680_v45  ;;  %530 = vmatmul.mubr.bf16.gmra.mrb[12].mxu1 %v1681_v46  ;;  %v1340_v45 = vunpack.c.h.bf16 %v1338_v31  ;;  %v1372_v46 = vunpack.c.h.bf16 %v1488_v32 }
  0x3b   :  { %473 = vmatprep.mubr.bf16.mxu0 %v1682_v49  ;;  %537 = vmatprep.mubr.bf16.mxu1 %v1684_v50 }
  0x3c   :  { %919 = vperm.xlu0 %1640, %v789_v4  }
  0x3d   :  { %934 = vperm.xlu1 %1641, %v792_v7   ;;  %v1375_v7 = vunpack.c.l.bf16 %v1489_v60 }
  0x40   :  { %929 = vperm.xlu0 %1640, %v791_v8  }
  0x41   :  { %944 = vperm.xlu1 %1641, %v794_v11  }
  0x42   :  { %474 = vmatmul.mubr.bf16.gmra.mrb[16].mxu0 %v1686_v53  ;;  %538 = vmatmul.mubr.bf16.gmra.mrb[16].mxu1 %v1687_v54  ;;  %v2014_v54 = vld [vmem:[%s2156_s4] ss:$0 sm:$0xff] }
  0x43   :  { %481 = vmatprep.mubr.bf16.mxu0 %v1688_v57  ;;  %545 = vmatprep.mubr.bf16.mxu1 %v1690_v58 }
  0x44   :  { %939 = vperm.xlu0 %1640, %v793_v12   ;;  %v1344_v12 = vunpack.c.h.bf16 %v1481_v59 }
  0x45   :  { %954 = vperm.xlu1 %1641, %v796_v15  }
  0x48   :  { %949 = vperm.xlu0 %1640, %v795_v16  }
  0x4a   :  { %482 = vmatmul.mubr.bf16.gmra.mrb[20].mxu0 %v1692_v61  ;;  %546 = vmatmul.mubr.bf16.gmra.mrb[20].mxu1 %v1693_v62 }
  0x4b   :  { %489 = vmatprep.mubr.bf16.mxu0 %v1694_v1  ;;  %553 = vmatprep.mubr.bf16.mxu1 %v1696_v2 }
  0x52   :  { %490 = vmatmul.mubr.bf16.gmra.mrb[24].mxu0 %v1698_v5  ;;  %554 = vmatmul.mubr.bf16.gmra.mrb[24].mxu1 %v1699_v6  ;;  %v1343_v5 = vunpack.c.l.bf16 %v1481_v59 }
  0x53   :  { %497 = vmatprep.mubr.bf16.mxu0 %v1700_v9  ;;  %561 = vmatprep.mubr.bf16.mxu1 %v1702_v10 }
  0x5a   :  { %498 = vmatmul.mubr.bf16.gmra.mrb[28].mxu0 %v1704_v13  ;;  %562 = vmatmul.mubr.bf16.gmra.mrb[28].mxu1 %v1705_v14  ;;  %v1376_v13 = vunpack.c.h.bf16 %v1489_v60 }
  0x88   :  { %v1977_v17 = vpop.permute.xlu1 %809 }
  0x89   :  { %v800_v18 = vpop.permute.xlu0 %799 }
  0x8c   :  { %v1979_v19 = vpop.permute.xlu1 %814 }
  0x8d   :  { %v805_v20 = vpop.permute.xlu0 %804 }
  0x90   :  { %v1981_v21 = vpop.permute.xlu1 %824 }
  0x91   :  { %v1983_v22 = vpop.permute.xlu0 %819 }
  0x94   :  { %v1985_v23 = vpop.permute.xlu1 %834 }
  0x95   :  { %v1987_v24 = vpop.permute.xlu0 %829 }
  0x98   :  { %v1989_v25 = vpop.permute.xlu1 %844 }
  0x99   :  { %v1991_v26 = vpop.permute.xlu0 %839 }
  0x9c   :  { %v1993_v27 = vpop.permute.xlu1 %854 }
  0x9d   :  { %v1995_v28 = vpop.permute.xlu0 %849 }
  0xa0   :  { %v1997_v29 = vpop.permute.xlu1 %864 }
  0xa3   :  { %v1999_v30 = vpop.permute.xlu0 %859 }
  0xa4   :  { %v2007_v33 = vpop.permute.xlu1 %874 }
  0xa7   :  { %v2009_v34 = vpop.permute.xlu0 %869 }
  0xa8   :  { %v885_v61 = vpop.permute.xlu1 %884 }
  0xab   :  { %v880_v53 = vpop.permute.xlu0 %879 }
  0xf5   :  { %v1527_v35 = vpop.f32.mrb[0].mxu0  ;;  %v1575_v36 = vpop.f32.mrb[0].mxu1 }
  0xf6   :  { %v1528_v39 = vpop.f32.mrb[1].mxu0  ;;  %v1576_v40 = vpop.f32.mrb[1].mxu1 }
  0xf7   :  { %v1529_v41 = vadd.f32 %v1528_v39, %v1527_v35  ;;  %v1577_v42 = vadd.f32 %v1576_v40, %v1575_v36  ;;  %v1530_v43 = vpop.f32.mrb[2].mxu0  ;;  %v1578_v44 = vpop.f32.mrb[2].mxu1  ;;  %v1482_v40 = vld [vmem:[%s2155_s2 + $0x10] sm:$0xff]  }
  0xf8   :  { %v1531_v47 = vpop.f32.mrb[3].mxu0  ;;  %v1579_v48 = vpop.f32.mrb[3].mxu1 }
  0xf9   :  { %v733_v49 = vadd.f32 %v1529_v41, %v1339_v37  ;;  %v749_v50 = vadd.f32 %v1577_v42, %v1371_v38  ;;  %v1532_v51 = vadd.f32 %v1531_v47, %v1530_v43  ;;  %v1580_v52 = vadd.f32 %v1579_v48, %v1578_v44  ;;  %v1490_v41 = vld [vmem:[%s2155_s2 + $0x50] sm:$0xff]   ;;  %v890_v42 = vpop.permute.xlu0 %889  ;;  %v895_v47 = vpop.permute.xlu1 %894 }
  0xfb   :  { %v957_v55 = vmul.f32 %v800_v18, %v733_v49  ;;  %v973_v56 = vmul.f32 %v880_v53, %v749_v50  ;;  %v734_v57 = vadd.f32 %v1532_v51, %v1340_v45  ;;  %v750_v58 = vadd.f32 %v1580_v52, %v1372_v46 }
  0xfd   :  { %v996_v62 = vadd.f32 %v2014_v54, %v957_v55  ;;  %v1012_v63 = vadd.f32 %v2014_v54, %v973_v56  ;;  %v958_v0 = vmul.f32 %v805_v20, %v734_v57  ;;  %v974_v1 = vmul.f32 %v885_v61, %v750_v58  ;;  %v1533_v2 = vpop.f32.mrb[4].mxu0  ;;  %v1581_v3 = vpop.f32.mrb[4].mxu1 }
  0xfe   :  { %v1534_v4 = vpop.f32.mrb[5].mxu0  ;;  %v1582_v6 = vpop.f32.mrb[5].mxu1  ;;  %v1347_v55 = vunpack.c.l.bf16 %v1482_v40  ;;  %v1379_v56 = vunpack.c.l.bf16 %v1490_v41 }
  0xff   :  { %v997_v8 = vadd.f32 %v2014_v54, %v958_v0  ;;  %v1013_v9 = vadd.f32 %v2014_v54, %v974_v1  ;;  %v1536_v10 = vpop.f32.mrb[6].mxu0  ;;  %v1584_v11 = vpop.f32.mrb[6].mxu1  ;;  %v1028_v14 = vmax.f32 %v996_v62, 0.0  ;;  %v1044_v15 = vmax.f32 %v1012_v63, 0.0 }
 0x100   :  { %v1535_v16 = vadd.f32 %v1534_v4, %v1533_v2  ;;  %v1583_v18 = vadd.f32 %v1582_v6, %v1581_v3  ;;  %v1537_v20 = vpop.f32.mrb[7].mxu0  ;;  %v1585_v31 = vpop.f32.mrb[7].mxu1  ;;  %v1348_v4 = vunpack.c.h.bf16 %v1482_v40  ;;  %v1380_v6 = vunpack.c.h.bf16 %v1490_v41 }
 0x101   :  { %v1029_v32 = vmax.f32 %v997_v8, 0.0  ;;  %v1045_v35 = vmax.f32 %v1013_v9, 0.0  ;;  %v1538_v36 = vadd.f32 %v1537_v20, %v1536_v10  ;;  %v1586_v37 = vadd.f32 %v1585_v31, %v1584_v11  ;;  %v900_v11 = vpop.permute.xlu0 %899 }
 0x102   :  { %v735_v38 = vadd.f32 %v1535_v16, %v1343_v5  ;;  %v751_v39 = vadd.f32 %v1583_v18, %v1375_v7 }
 0x103   :  { %v1404_v43 = vpack.c.bf16 %v1029_v32, %v1028_v14  ;;  %v1444_v44 = vpack.c.bf16 %v1045_v35, %v1044_v15  ;;  %v736_v45 = vadd.f32 %v1538_v36, %v1344_v12  ;;  %v752_v46 = vadd.f32 %v1586_v37, %v1376_v13  ;;  %v1483_v14 = vld [vmem:[%s2155_s2 + $0x18] sm:$0xff]   ;;  %v905_v32 = vpop.permute.xlu1 %904 }
 0x104   :  { %v959_v48 = vmul.f32 %v1977_v17, %v735_v38  ;;  %v975_v49 = vmul.f32 %v890_v42, %v751_v39  ;;  %v1491_v15 = vld [vmem:[%s2155_s2 + $0x58] sm:$0xff]   ;;  %v1351_v39 = vunpack.c.l.bf16 %v1483_v14 }
 0x105   :  { %1405 = vst [vmem:[%s2157_s5] sm:$0xff] %v1404_v43   ;;  %1503 = vst [vmem:[%s2157_s5 + $0x40] sm:$0xff] %v1444_v44   ;;  %v960_v50 = vmul.f32 %v1979_v19, %v736_v45  ;;  %v976_v51 = vmul.f32 %v895_v47, %v752_v46  ;;  %v1539_v52 = vpop.f32.mrb[8].mxu0  ;;  %v1587_v53 = vpop.f32.mrb[8].mxu1  ;;  %v1383_v40 = vunpack.c.l.bf16 %v1491_v15 }
 0x106   :  { %v998_v57 = vadd.f32 %v2014_v54, %v959_v48  ;;  %v1014_v17 = vadd.f32 %v2014_v54, %v975_v49  ;;  %v1540_v58 = vpop.f32.mrb[9].mxu0  ;;  %v1588_v59 = vpop.f32.mrb[9].mxu1 }
 0x107   :  { %v999_v60 = vadd.f32 %v2014_v54, %v960_v50  ;;  %v1015_v61 = vadd.f32 %v2014_v54, %v976_v51  ;;  %v1541_v62 = vadd.f32 %v1540_v58, %v1539_v52  ;;  %v1589_v63 = vadd.f32 %v1588_v59, %v1587_v53  ;;  %v1542_v0 = vpop.f32.mrb[10].mxu0  ;;  %v1590_v1 = vpop.f32.mrb[10].mxu1 }
 0x108   :  { %v1030_v19 = vmax.f32 %v998_v57, 0.0  ;;  %v1046_v2 = vmax.f32 %v1014_v17, 0.0  ;;  %v1543_v3 = vpop.f32.mrb[11].mxu0  ;;  %v1591_v5 = vpop.f32.mrb[11].mxu1  ;;  %v1352_v50 = vunpack.c.h.bf16 %v1483_v14  ;;  %v1384_v51 = vunpack.c.h.bf16 %v1491_v15 }
 0x109   :  { %v1031_v7 = vmax.f32 %v999_v60, 0.0  ;;  %v1047_v8 = vmax.f32 %v1015_v61, 0.0  ;;  %v737_v9 = vadd.f32 %v1541_v62, %v1347_v55  ;;  %v753_v10 = vadd.f32 %v1589_v63, %v1379_v56 }
 0x10a   :  { %v1544_v12 = vadd.f32 %v1543_v3, %v1542_v0  ;;  %v1592_v13 = vadd.f32 %v1591_v5, %v1590_v1  ;;  %v1484_v3 = vld [vmem:[%s2155_s2 + $0x20] sm:$0xff]   ;;  %v915_v5 = vpop.permute.xlu1 %914 }
 0x10b   :  { %v1409_v16 = vpack.c.bf16 %v1031_v7, %v1030_v19  ;;  %v1449_v18 = vpack.c.bf16 %v1047_v8, %v1046_v2  ;;  %v961_v20 = vmul.f32 %v1983_v22, %v737_v9  ;;  %v977_v31 = vmul.f32 %v900_v11, %v753_v10 }
 0x10c   :  { %v738_v35 = vadd.f32 %v1544_v12, %v1348_v4  ;;  %v754_v36 = vadd.f32 %v1592_v13, %v1380_v6  ;;  %v1492_v4 = vld [vmem:[%s2155_s2 + $0x60] sm:$0xff]   ;;  %v1355_v14 = vunpack.c.l.bf16 %v1484_v3 }
 0x10d   :  { %1496 = vst [vmem:[%s2157_s5 + $0x8] sm:$0xff] %v1409_v16   ;;  %1504 = vst [vmem:[%s2157_s5 + $0x48] sm:$0xff] %v1449_v18   ;;  %v1545_v37 = vpop.f32.mrb[12].mxu0  ;;  %v1593_v38 = vpop.f32.mrb[12].mxu1  ;;  %v1000_v41 = vadd.f32 %v2014_v54, %v961_v20  ;;  %v1016_v22 = vadd.f32 %v2014_v54, %v977_v31  ;;  %v1387_v16 = vunpack.c.l.bf16 %v1492_v4 }
 0x10e   :  { %v962_v42 = vmul.f32 %v1981_v21, %v738_v35  ;;  %v978_v43 = vmul.f32 %v905_v32, %v754_v36  ;;  %v1546_v44 = vpop.f32.mrb[13].mxu0  ;;  %v1594_v45 = vpop.f32.mrb[13].mxu1  ;;  %v1356_v32 = vunpack.c.h.bf16 %v1484_v3  ;;  %v1388_v35 = vunpack.c.h.bf16 %v1492_v4 }
 0x10f   :  { %v1547_v46 = vadd.f32 %v1546_v44, %v1545_v37  ;;  %v1595_v47 = vadd.f32 %v1594_v45, %v1593_v38  ;;  %v1548_v48 = vpop.f32.mrb[14].mxu0  ;;  %v1596_v49 = vpop.f32.mrb[14].mxu1  ;;  %v1032_v60 = vmax.f32 %v1000_v41, 0.0  ;;  %v1048_v61 = vmax.f32 %v1016_v22, 0.0 }
 0x110   :  { %v1001_v52 = vadd.f32 %v2014_v54, %v962_v42  ;;  %v1017_v53 = vadd.f32 %v2014_v54, %v978_v43  ;;  %v1549_v55 = vpop.f32.mrb[15].mxu0  ;;  %v1597_v56 = vpop.f32.mrb[15].mxu1 }
 0x111   :  { %v739_v57 = vadd.f32 %v1547_v46, %v1351_v39  ;;  %v755_v17 = vadd.f32 %v1595_v47, %v1383_v40  ;;  %v1550_v58 = vadd.f32 %v1549_v55, %v1548_v48  ;;  %v1598_v59 = vadd.f32 %v1597_v56, %v1596_v49  ;;  %v910_v21 = vpop.permute.xlu0 %909  ;;  %v1485_v47 = vld [vmem:[%s2155_s2 + $0x28] sm:$0xff]   ;;  %v925_v55 = vpop.permute.xlu1 %924 }
 0x112   :  { %v1033_v62 = vmax.f32 %v1001_v52, 0.0  ;;  %v1049_v63 = vmax.f32 %v1017_v53, 0.0  ;;  %v1493_v48 = vld [vmem:[%s2155_s2 + $0x68] sm:$0xff]  }
 0x113   :  { %v963_v0 = vmul.f32 %v1987_v24, %v739_v57  ;;  %v979_v1 = vmul.f32 %v910_v21, %v755_v17  ;;  %v740_v19 = vadd.f32 %v1550_v58, %v1352_v50  ;;  %v756_v2 = vadd.f32 %v1598_v59, %v1384_v51 }
 0x114   :  { %v1414_v6 = vpack.c.bf16 %v1033_v62, %v1032_v60  ;;  %v1454_v7 = vpack.c.bf16 %v1049_v63, %v1048_v61  ;;  %v1359_v60 = vunpack.c.l.bf16 %v1485_v47  ;;  %v1391_v61 = vunpack.c.l.bf16 %v1493_v48 }
 0x115   :  { %v1002_v8 = vadd.f32 %v2014_v54, %v963_v0  ;;  %v1018_v9 = vadd.f32 %v2014_v54, %v979_v1  ;;  %v964_v24 = vmul.f32 %v1985_v23, %v740_v19  ;;  %v980_v10 = vmul.f32 %v915_v5, %v756_v2  ;;  %v1551_v11 = vpop.f32.mrb[16].mxu0  ;;  %v1599_v12 = vpop.f32.mrb[16].mxu1 }
 0x116   :  { %1497 = vst [vmem:[%s2157_s5 + $0x10] sm:$0xff] %v1414_v6   ;;  %1505 = vst [vmem:[%s2157_s5 + $0x50] sm:$0xff] %v1454_v7   ;;  %v1552_v13 = vpop.f32.mrb[17].mxu0  ;;  %v1600_v15 = vpop.f32.mrb[17].mxu1 }
 0x117   :  { %v1003_v18 = vadd.f32 %v2014_v54, %v964_v24  ;;  %v1019_v20 = vadd.f32 %v2014_v54, %v980_v10  ;;  %v1554_v23 = vpop.f32.mrb[18].mxu0  ;;  %v1602_v31 = vpop.f32.mrb[18].mxu1  ;;  %v1034_v36 = vmax.f32 %v1002_v8, 0.0  ;;  %v1050_v37 = vmax.f32 %v1018_v9, 0.0 }
 0x118   :  { %v1553_v38 = vadd.f32 %v1552_v13, %v1551_v11  ;;  %v1601_v39 = vadd.f32 %v1600_v15, %v1599_v12  ;;  %v1555_v40 = vpop.f32.mrb[19].mxu0  ;;  %v1603_v41 = vpop.f32.mrb[19].mxu1  ;;  %v1360_v8 = vunpack.c.h.bf16 %v1485_v47  ;;  %v1392_v24 = vunpack.c.h.bf16 %v1493_v48 }
 0x119   :  { %v1035_v22 = vmax.f32 %v1003_v18, 0.0  ;;  %v1051_v42 = vmax.f32 %v1019_v20, 0.0  ;;  %v1556_v43 = vadd.f32 %v1555_v40, %v1554_v23  ;;  %v1604_v44 = vadd.f32 %v1603_v41, %v1602_v31  ;;  %v920_v49 = vpop.permute.xlu0 %919  ;;  %v1486_v18 = vld [vmem:[%s2155_s2 + $0x30] sm:$0xff]  }
 0x11a   :  { %v741_v45 = vadd.f32 %v1553_v38, %v1355_v14  ;;  %v757_v46 = vadd.f32 %v1601_v39, %v1387_v16  ;;  %v1494_v20 = vld [vmem:[%s2155_s2 + $0x70] sm:$0xff]   ;;  %v1363_v41 = vunpack.c.l.bf16 %v1486_v18 }
 0x11b   :  { %v1419_v50 = vpack.c.bf16 %v1035_v22, %v1034_v36  ;;  %v1459_v51 = vpack.c.bf16 %v1051_v42, %v1050_v37  ;;  %v742_v52 = vadd.f32 %v1556_v43, %v1356_v32  ;;  %v758_v53 = vadd.f32 %v1604_v44, %v1388_v35  ;;  %v935_v36 = vpop.permute.xlu1 %934 }
 0x11c   :  { %v965_v56 = vmul.f32 %v1991_v26, %v741_v45  ;;  %v981_v57 = vmul.f32 %v920_v49, %v757_v46  ;;  %v1395_v22 = vunpack.c.l.bf16 %v1494_v20 }
 0x11d   :  { %1498 = vst [vmem:[%s2157_s5 + $0x18] sm:$0xff] %v1419_v50   ;;  %1506 = vst [vmem:[%s2157_s5 + $0x58] sm:$0xff] %v1459_v51   ;;  %v966_v17 = vmul.f32 %v1989_v25, %v742_v52  ;;  %v982_v58 = vmul.f32 %v925_v55, %v758_v53  ;;  %v1557_v59 = vpop.f32.mrb[20].mxu0  ;;  %v1605_v21 = vpop.f32.mrb[20].mxu1  ;;  %v1364_v51 = vunpack.c.h.bf16 %v1486_v18  ;;  %v1396_v52 = vunpack.c.h.bf16 %v1494_v20 }
 0x11e   :  { %v1004_v62 = vadd.f32 %v2014_v54, %v965_v56  ;;  %v1020_v26 = vadd.f32 %v2014_v54, %v981_v57  ;;  %v1558_v63 = vpop.f32.mrb[21].mxu0  ;;  %v1606_v0 = vpop.f32.mrb[21].mxu1 }
 0x11f   :  { %v1005_v1 = vadd.f32 %v2014_v54, %v966_v17  ;;  %v1021_v19 = vadd.f32 %v2014_v54, %v982_v58  ;;  %v1559_v2 = vadd.f32 %v1558_v63, %v1557_v59  ;;  %v1607_v3 = vadd.f32 %v1606_v0, %v1605_v21  ;;  %v1560_v4 = vpop.f32.mrb[22].mxu0  ;;  %v1608_v5 = vpop.f32.mrb[22].mxu1 }
 0x120   :  { %v1036_v25 = vmax.f32 %v1004_v62, 0.0  ;;  %v1052_v6 = vmax.f32 %v1020_v26, 0.0  ;;  %v1561_v7 = vpop.f32.mrb[23].mxu0  ;;  %v1609_v9 = vpop.f32.mrb[23].mxu1 }
 0x121   :  { %v1037_v10 = vmax.f32 %v1005_v1, 0.0  ;;  %v1053_v11 = vmax.f32 %v1021_v19, 0.0  ;;  %v743_v12 = vadd.f32 %v1559_v2, %v1359_v60  ;;  %v759_v13 = vadd.f32 %v1607_v3, %v1391_v61  ;;  %v930_v14 = vpop.permute.xlu0 %929  ;;  %v1487_v2 = vld [vmem:[%s2155_s2 + $0x38] sm:$0xff]  }
 0x122   :  { %v1562_v15 = vadd.f32 %v1561_v7, %v1560_v4  ;;  %v1610_v16 = vadd.f32 %v1609_v9, %v1608_v5  ;;  %v1495_v3 = vld [vmem:[%s2155_s2 + $0x78] sm:$0xff]   ;;  %v945_v4 = vpop.permute.xlu1 %944  ;;  %v1368_v18 = vunpack.c.h.bf16 %v1487_v2 }
 0x123   :  { %v1424_v23 = vpack.c.bf16 %v1037_v10, %v1036_v25  ;;  %v1464_v31 = vpack.c.bf16 %v1053_v11, %v1052_v6  ;;  %v967_v32 = vmul.f32 %v1995_v28, %v743_v12  ;;  %v983_v35 = vmul.f32 %v930_v14, %v759_v13 }
 0x124   :  { %v744_v37 = vadd.f32 %v1562_v15, %v1360_v8  ;;  %v760_v38 = vadd.f32 %v1610_v16, %v1392_v24  ;;  %v1367_v11 = vunpack.c.l.bf16 %v1487_v2  ;;  %v1399_v13 = vunpack.c.l.bf16 %v1495_v3 }
 0x125   :  { %1499 = vst [vmem:[%s2157_s5 + $0x20] sm:$0xff] %v1424_v23   ;;  %1507 = vst [vmem:[%s2157_s5 + $0x60] sm:$0xff] %v1464_v31   ;;  %v1563_v39 = vpop.f32.mrb[24].mxu0  ;;  %v1611_v40 = vpop.f32.mrb[24].mxu1  ;;  %v1006_v42 = vadd.f32 %v2014_v54, %v967_v32  ;;  %v1022_v28 = vadd.f32 %v2014_v54, %v983_v35  ;;  %v1400_v20 = vunpack.c.h.bf16 %v1495_v3 }
 0x126   :  { %v968_v43 = vmul.f32 %v1993_v27, %v744_v37  ;;  %v984_v44 = vmul.f32 %v935_v36, %v760_v38  ;;  %v1564_v45 = vpop.f32.mrb[25].mxu0  ;;  %v1612_v46 = vpop.f32.mrb[25].mxu1 }
 0x127   :  { %v1565_v47 = vadd.f32 %v1564_v45, %v1563_v39  ;;  %v1613_v48 = vadd.f32 %v1612_v46, %v1611_v40  ;;  %v1566_v49 = vpop.f32.mrb[26].mxu0  ;;  %v1614_v50 = vpop.f32.mrb[26].mxu1  ;;  %v1038_v60 = vmax.f32 %v1006_v42, 0.0  ;;  %v1054_v61 = vmax.f32 %v1022_v28, 0.0 }
 0x128   :  { %v1007_v53 = vadd.f32 %v2014_v54, %v968_v43  ;;  %v1023_v55 = vadd.f32 %v2014_v54, %v984_v44  ;;  %v1567_v56 = vpop.f32.mrb[27].mxu0  ;;  %v1615_v57 = vpop.f32.mrb[27].mxu1 }
 0x129   :  { %v745_v17 = vadd.f32 %v1565_v47, %v1363_v41  ;;  %v761_v58 = vadd.f32 %v1613_v48, %v1395_v22  ;;  %v1568_v59 = vadd.f32 %v1567_v56, %v1566_v49  ;;  %v1616_v21 = vadd.f32 %v1615_v57, %v1614_v50  ;;  %v940_v27 = vpop.permute.xlu0 %939  ;;  %v955_v47 = vpop.permute.xlu1 %954 }
 0x12a   :  { %v1039_v62 = vmax.f32 %v1007_v53, 0.0  ;;  %v1055_v26 = vmax.f32 %v1023_v55, 0.0 }
 0x12b   :  { %v969_v63 = vmul.f32 %v1999_v30, %v745_v17  ;;  %v985_v0 = vmul.f32 %v940_v27, %v761_v58  ;;  %v746_v1 = vadd.f32 %v1568_v59, %v1364_v51  ;;  %v762_v19 = vadd.f32 %v1616_v21, %v1396_v52 }
 0x12c   :  { %v1429_v5 = vpack.c.bf16 %v1039_v62, %v1038_v60  ;;  %v1469_v25 = vpack.c.bf16 %v1055_v26, %v1054_v61 }
 0x12d   :  { %v1008_v6 = vadd.f32 %v2014_v54, %v969_v63  ;;  %v1024_v7 = vadd.f32 %v2014_v54, %v985_v0  ;;  %v970_v30 = vmul.f32 %v1997_v29, %v746_v1  ;;  %v986_v8 = vmul.f32 %v945_v4, %v762_v19  ;;  %v1569_v9 = vpop.f32.mrb[28].mxu0  ;;  %v1617_v24 = vpop.f32.mrb[28].mxu1 }
 0x12e   :  { %1500 = vst [vmem:[%s2157_s5 + $0x28] sm:$0xff] %v1429_v5   ;;  %1508 = vst [vmem:[%s2157_s5 + $0x68] sm:$0xff] %v1469_v25   ;;  %v1570_v10 = vpop.f32.mrb[29].mxu0  ;;  %v1618_v12 = vpop.f32.mrb[29].mxu1 }
 0x12f   :  { %v1009_v14 = vadd.f32 %v2014_v54, %v970_v30  ;;  %v1025_v15 = vadd.f32 %v2014_v54, %v986_v8  ;;  %v1572_v29 = vpop.f32.mrb[30].mxu0  ;;  %v1620_v16 = vpop.f32.mrb[30].mxu1  ;;  %v1040_v23 = vmax.f32 %v1008_v6, 0.0  ;;  %v1056_v31 = vmax.f32 %v1024_v7, 0.0 }
 0x130   :  { %v1571_v32 = vadd.f32 %v1570_v10, %v1569_v9  ;;  %v1619_v35 = vadd.f32 %v1618_v12, %v1617_v24  ;;  %v1573_v36 = vpop.f32.mrb[31].mxu0  ;;  %v1621_v37 = vpop.f32.mrb[31].mxu1 }
 0x131   :  { %v1041_v38 = vmax.f32 %v1009_v14, 0.0  ;;  %v1057_v39 = vmax.f32 %v1025_v15, 0.0  ;;  %v1574_v40 = vadd.f32 %v1573_v36, %v1572_v29  ;;  %v1622_v41 = vadd.f32 %v1621_v37, %v1620_v16  ;;  %v950_v28 = vpop.permute.xlu0 %949 }
 0x132   :  { %v747_v22 = vadd.f32 %v1571_v32, %v1367_v11  ;;  %v763_v42 = vadd.f32 %v1619_v35, %v1399_v13 }
 0x133   :  { %v1434_v43 = vpack.c.bf16 %v1041_v38, %v1040_v23  ;;  %v1474_v44 = vpack.c.bf16 %v1057_v39, %v1056_v31  ;;  %v748_v45 = vadd.f32 %v1574_v40, %v1368_v18  ;;  %v764_v46 = vadd.f32 %v1622_v41, %v1400_v20 }
 0x134   :  { %v971_v48 = vmul.f32 %v2009_v34, %v747_v22  ;;  %v987_v49 = vmul.f32 %v950_v28, %v763_v42 }
 0x135   :  { %1501 = vst [vmem:[%s2157_s5 + $0x30] sm:$0xff] %v1434_v43   ;;  %1509 = vst [vmem:[%s2157_s5 + $0x70] sm:$0xff] %v1474_v44   ;;  %v972_v50 = vmul.f32 %v2007_v33, %v748_v45  ;;  %v988_v51 = vmul.f32 %v955_v47, %v764_v46 }
 0x136   :  { %v1010_v52 = vadd.f32 %v2014_v54, %v971_v48  ;;  %v1026_v53 = vadd.f32 %v2014_v54, %v987_v49 }
 0x137   :  { %v1011_v55 = vadd.f32 %v2014_v54, %v972_v50  ;;  %v1027_v34 = vadd.f32 %v2014_v54, %v988_v51 }
 0x138   :  { %v1042_v56 = vmax.f32 %v1010_v52, 0.0  ;;  %v1058_v57 = vmax.f32 %v1026_v53, 0.0 }
 0x139   :  { %v1043_v17 = vmax.f32 %v1011_v55, 0.0  ;;  %v1059_v58 = vmax.f32 %v1027_v34, 0.0 }
 0x13b   :  { %v1439_v59 = vpack.c.bf16 %v1043_v17, %v1042_v56  ;;  %v1479_v21 = vpack.c.bf16 %v1059_v58, %v1058_v57 }
 0x13d   :  { %1502 = vst [vmem:[%s2157_s5 + $0x38] sm:$0xff] %v1439_v59   ;;  %1510 = vst [vmem:[%s2157_s5 + $0x78] sm:$0xff] %v1479_v21  }

// kernel: _device_forward.12
= control target key start
LH: loop header
LB: loop body
LE: loop exit
PB: predicated region body
PF: predicated region fallthrough
CT: control target
= control target key end

     0   :  { %v1597_v0 = vmov 0   ;;  %s1964_s2 = inlined_call_operand.vmem [shape: f32[256,1], index: 2, kind: input, shape index: {}]   ;;  %s1965_s1 = inlined_call_operand.vmem [shape: bf16[128,128], index: 1, kind: input, shape index: {}]   ;;  %s1966_s0 = inlined_call_operand.vmem [shape: bf16[256,128], index: 0, kind: input, shape index: {}]   ;;  %s1967_s4 = inlined_call_operand.vmem [shape: f32[256,1], index: 4, kind: input, shape index: {}]   ;;  %s1968_s3 = inlined_call_operand.vmem [shape: bf16[128,128], index: 3, kind: input, shape index: {}]   ;;  %s1969_s5 = inlined_call_operand.vmem [shape: bf16[256,128], index: 5, kind: output, shape index: {}]  }
   0x1   :  { %1564 = vset.pattern.permute.xlu1 %v1597_v0  ;;  %1563 = vset.pattern.permute.xlu0 %v1597_v0  ;;  %v376_v1 = vld [vmem:[%s1964_s2 + $0x10] sm:$0xff]  ;;  %v374_v2 = vld [vmem:[%s1964_s2] sm:$0xff]  ;;  %v377_v4 = vld [vmem:[%s1964_s2 + $0x18] sm:$0xff] }
   0x2   :  { %418 = vperm.xlu1 %1564, %v376_v1   ;;  %408 = vperm.xlu0 %1563, %v374_v2   ;;  %v1565_v3 = vld [vmem:[%s1965_s1] sm:$0xff]   ;;  %v375_v5 = vld [vmem:[%s1964_s2 + $0x8] sm:$0xff]  ;;  %v1567_v9 = vld [vmem:[%s1965_s1 + $0x10] sm:$0xff]  }
   0x3   :  { %1466 = vmatprep.subr.bf16.mxu0 %v1565_v3  ;;  %v1566_v6 = vld [vmem:[%s1965_s1 + $0x8] sm:$0xff]   ;;  %v378_v8 = vld [vmem:[%s1964_s2 + $0x20] sm:$0xff]  ;;  %v381_v10 = vld [vmem:[%s1964_s2 + $0x38] sm:$0xff] }
   0x4   :  { %1467 = vmatpush3.bf16.msra.mxu0 %v1565_v3  ;;  %v379_v7 = vld [vmem:[%s1964_s2 + $0x28] sm:$0xff]  ;;  %v380_v11 = vld [vmem:[%s1964_s2 + $0x30] sm:$0xff]  ;;  %v1568_v12 = vld [vmem:[%s1965_s1 + $0x18] sm:$0xff]  }
   0x5   :  { %1468 = vmatprep.subr.bf16.mxu0 %v1566_v6  ;;  %v383_v13 = vld [vmem:[%s1964_s2 + $0x48] sm:$0xff]  ;;  %v382_v14 = vld [vmem:[%s1964_s2 + $0x40] sm:$0xff]  ;;  %v385_v17 = vld [vmem:[%s1964_s2 + $0x58] sm:$0xff] }
   0x6   :  { %423 = vperm.xlu1 %1564, %v377_v4   ;;  %413 = vperm.xlu0 %1563, %v375_v5   ;;  %v1569_v15 = vld [vmem:[%s1965_s1 + $0x20] sm:$0xff]   ;;  %v384_v18 = vld [vmem:[%s1964_s2 + $0x50] sm:$0xff]  ;;  %v1570_v19 = vld [vmem:[%s1965_s1 + $0x28] sm:$0xff]  }
   0x7   :  { %v1573_v16 = vld [vmem:[%s1966_s0] sm:$0xff]   ;;  %v387_v20 = vld [vmem:[%s1964_s2 + $0x68] sm:$0xff]  ;;  %v1571_v22 = vld [vmem:[%s1965_s1 + $0x30] sm:$0xff]  }
   0x8   :  { %1469 = vmatpush3.bf16.msra.mxu0 %v1566_v6  ;;  %1482 = vmatprep.mubr.bf16.mxu0 %v1573_v16  ;;  %v386_v21 = vld [vmem:[%s1964_s2 + $0x60] sm:$0xff]  ;;  %v389_v23 = vld [vmem:[%s1964_s2 + $0x78] sm:$0xff]  ;;  %v388_v24 = vld [vmem:[%s1964_s2 + $0x70] sm:$0xff] }
   0x9   :  { %1470 = vmatprep.subr.bf16.mxu0 %v1567_v9  ;;  %v1572_v25 = vld [vmem:[%s1965_s1 + $0x38] sm:$0xff]   ;;  %v391_v26 = vld [vmem:[%s1964_s2 + $0x88] sm:$0xff]  ;;  %v390_v27 = vld [vmem:[%s1964_s2 + $0x80] sm:$0xff] }
   0xa   :  { %433 = vperm.xlu1 %1564, %v379_v7   ;;  %428 = vperm.xlu0 %1563, %v378_v8   ;;  %v1574_v28 = vld [vmem:[%s1966_s0 + $0x8] sm:$0xff]   ;;  %v1575_v29 = vld [vmem:[%s1966_s0 + $0x10] sm:$0xff]   ;;  %v393_v30 = vld [vmem:[%s1964_s2 + $0x98] sm:$0xff] }
   0xb   :  { %v392_v31 = vld [vmem:[%s1964_s2 + $0x90] sm:$0xff]  ;;  %v395_v32 = vld [vmem:[%s1964_s2 + $0xa8] sm:$0xff]  ;;  %v394_v33 = vld [vmem:[%s1964_s2 + $0xa0] sm:$0xff] }
   0xc   :  { %1471 = vmatpush3.bf16.msra.mxu0 %v1567_v9  ;;  %v1576_v34 = vld [vmem:[%s1966_s0 + $0x18] sm:$0xff]   ;;  %v1577_v35 = vld [vmem:[%s1966_s0 + $0x20] sm:$0xff]   ;;  %v396_v37 = vld [vmem:[%s1964_s2 + $0xb0] sm:$0xff] }
   0xd   :  { %1472 = vmatprep.subr.bf16.mxu0 %v1568_v12  ;;  %v397_v36 = vld [vmem:[%s1964_s2 + $0xb8] sm:$0xff]  ;;  %v399_v38 = vld [vmem:[%s1964_s2 + $0xc8] sm:$0xff]  ;;  %v398_v39 = vld [vmem:[%s1964_s2 + $0xc0] sm:$0xff] }
   0xe   :  { %443 = vperm.xlu1 %1564, %v381_v10   ;;  %438 = vperm.xlu0 %1563, %v380_v11   ;;  %v1578_v40 = vld [vmem:[%s1966_s0 + $0x28] sm:$0xff]   ;;  %v1579_v41 = vld [vmem:[%s1966_s0 + $0x30] sm:$0xff]   ;;  %v401_v42 = vld [vmem:[%s1964_s2 + $0xd8] sm:$0xff] }
   0xf   :  { %v400_v43 = vld [vmem:[%s1964_s2 + $0xd0] sm:$0xff]  ;;  %v403_v44 = vld [vmem:[%s1964_s2 + $0xe8] sm:$0xff]  ;;  %v402_v45 = vld [vmem:[%s1964_s2 + $0xe0] sm:$0xff] }
  0x10   :  { %1473 = vmatpush3.bf16.msra.mxu0 %v1568_v12  ;;  %v1580_v46 = vld [vmem:[%s1966_s0 + $0x38] sm:$0xff]   ;;  %v1581_v47 = vld [vmem:[%s1966_s0 + $0x40] sm:$0xff]   ;;  %v404_v49 = vld [vmem:[%s1964_s2 + $0xf0] sm:$0xff] }
  0x11   :  { %1474 = vmatprep.subr.bf16.mxu0 %v1569_v15  ;;  %v405_v48 = vld [vmem:[%s1964_s2 + $0xf8] sm:$0xff]  ;;  %v840_v50 = vld [vmem:[%s1967_s4 + $0x8] sm:$0xff]  ;;  %v839_v51 = vld [vmem:[%s1967_s4] sm:$0xff] }
  0x12   :  { %453 = vperm.xlu1 %1564, %v383_v13   ;;  %448 = vperm.xlu0 %1563, %v382_v14   ;;  %v1582_v52 = vld [vmem:[%s1966_s0 + $0x48] sm:$0xff]   ;;  %v1583_v53 = vld [vmem:[%s1966_s0 + $0x50] sm:$0xff]   ;;  %v842_v54 = vld [vmem:[%s1967_s4 + $0x18] sm:$0xff] }
  0x13   :  { %v841_v55 = vld [vmem:[%s1967_s4 + $0x10] sm:$0xff]  ;;  %v844_v56 = vld [vmem:[%s1967_s4 + $0x28] sm:$0xff]  ;;  %v843_v57 = vld [vmem:[%s1967_s4 + $0x20] sm:$0xff] }
  0x14   :  { %1475 = vmatpush3.bf16.msra.mxu0 %v1569_v15  ;;  %v1584_v58 = vld [vmem:[%s1966_s0 + $0x58] sm:$0xff]   ;;  %v1585_v59 = vld [vmem:[%s1966_s0 + $0x60] sm:$0xff]   ;;  %v845_v61 = vld [vmem:[%s1967_s4 + $0x30] sm:$0xff] }
  0x15   :  { %1476 = vmatprep.subr.bf16.mxu0 %v1570_v19  ;;  %v846_v60 = vld [vmem:[%s1967_s4 + $0x38] sm:$0xff]  ;;  %v848_v62 = vld [vmem:[%s1967_s4 + $0x48] sm:$0xff]  ;;  %v847_v63 = vld [vmem:[%s1967_s4 + $0x40] sm:$0xff] }
  0x16   :  { %463 = vperm.xlu1 %1564, %v385_v17   ;;  %458 = vperm.xlu0 %1563, %v384_v18   ;;  %v1586_v0 = vld [vmem:[%s1966_s0 + $0x68] sm:$0xff]   ;;  %v1587_v1 = vld [vmem:[%s1966_s0 + $0x70] sm:$0xff]   ;;  %v850_v2 = vld [vmem:[%s1967_s4 + $0x58] sm:$0xff] }
  0x17   :  { %v849_v3 = vld [vmem:[%s1967_s4 + $0x50] sm:$0xff]  ;;  %v852_v4 = vld [vmem:[%s1967_s4 + $0x68] sm:$0xff]  ;;  %v851_v5 = vld [vmem:[%s1967_s4 + $0x60] sm:$0xff] }
  0x18   :  { %1477 = vmatpush3.bf16.msra.mxu0 %v1570_v19  ;;  %v1588_v6 = vld [vmem:[%s1966_s0 + $0x78] sm:$0xff]   ;;  %v853_v8 = vld [vmem:[%s1967_s4 + $0x70] sm:$0xff]  ;;  %v856_v9 = vld [vmem:[%s1967_s4 + $0x88] sm:$0xff] }
  0x19   :  { %1478 = vmatprep.subr.bf16.mxu0 %v1571_v22  ;;  %v854_v7 = vld [vmem:[%s1967_s4 + $0x78] sm:$0xff]  ;;  %v855_v10 = vld [vmem:[%s1967_s4 + $0x80] sm:$0xff]  ;;  %v857_v13 = vld [vmem:[%s1967_s4 + $0x90] sm:$0xff] }
  0x1a   :  { %473 = vperm.xlu1 %1564, %v387_v20   ;;  %468 = vperm.xlu0 %1563, %v386_v21   ;;  %v1589_v11 = vld [vmem:[%s1968_s3] sm:$0xff]   ;;  %v858_v12 = vld [vmem:[%s1967_s4 + $0x98] sm:$0xff]  ;;  %v1590_v14 = vld [vmem:[%s1968_s3 + $0x8] sm:$0xff]  }
  0x1b   :  { %1514 = vmatprep.subr.bf16.mxu1 %v1589_v11  ;;  %v1591_v15 = vld [vmem:[%s1968_s3 + $0x10] sm:$0xff]   ;;  %v860_v16 = vld [vmem:[%s1967_s4 + $0xa8] sm:$0xff]  ;;  %v859_v17 = vld [vmem:[%s1967_s4 + $0xa0] sm:$0xff] }
  0x1c   :  { %1479 = vmatpush3.bf16.msra.mxu0 %v1571_v22  ;;  %1515 = vmatpush3.bf16.msra.mxu1 %v1589_v11  ;;  %v1592_v18 = vld [vmem:[%s1968_s3 + $0x18] sm:$0xff]   ;;  %v861_v20 = vld [vmem:[%s1967_s4 + $0xb0] sm:$0xff]  ;;  %v1593_v21 = vld [vmem:[%s1968_s3 + $0x20] sm:$0xff]  }
  0x1d   :  { %1480 = vmatprep.subr.bf16.mxu0 %v1572_v25  ;;  %1516 = vmatprep.subr.bf16.mxu1 %v1590_v14  ;;  %v862_v19 = vld [vmem:[%s1967_s4 + $0xb8] sm:$0xff]  ;;  %v864_v22 = vld [vmem:[%s1967_s4 + $0xc8] sm:$0xff] }
  0x1e   :  { %483 = vperm.xlu1 %1564, %v389_v23   ;;  %478 = vperm.xlu0 %1563, %v388_v24   ;;  %v863_v23 = vld [vmem:[%s1967_s4 + $0xc0] sm:$0xff]  ;;  %v1594_v24 = vld [vmem:[%s1968_s3 + $0x28] sm:$0xff]  }
  0x20   :  { %1481 = vmatpush3.bf16.msra.mxu0 %v1572_v25  ;;  %1517 = vmatpush3.bf16.msra.mxu1 %v1590_v14  ;;  %v866_v25 = vld [vmem:[%s1967_s4 + $0xd8] sm:$0xff] }
  0x21   :  { %1518 = vmatprep.subr.bf16.mxu1 %v1591_v15 }
  0x22   :  { %493 = vperm.xlu1 %1564, %v391_v26   ;;  %488 = vperm.xlu0 %1563, %v390_v27   ;;  %v865_v26 = vld [vmem:[%s1967_s4 + $0xd0] sm:$0xff] }
  0x23   :  { %1483 = vmatmul.mubr.bf16.vlgmr.msra.gmra.mrb[0].mxu0 %v1574_v28  ;;  %v1595_v27 = vld [vmem:[%s1968_s3 + $0x30] sm:$0xff]   ;;  %v868_v28 = vld [vmem:[%s1967_s4 + $0xe8] sm:$0xff] }
  0x24   :  { %1486 = vmatprep.mubr.bf16.mxu0 %v1575_v29  ;;  %1519 = vmatpush3.bf16.msra.mxu1 %v1591_v15  ;;  %v867_v29 = vld [vmem:[%s1967_s4 + $0xe0] sm:$0xff] }
  0x25   :  { %1520 = vmatprep.subr.bf16.mxu1 %v1592_v18 }
  0x26   :  { %503 = vperm.xlu1 %1564, %v393_v30   ;;  %498 = vperm.xlu0 %1563, %v392_v31   ;;  %v870_v30 = vld [vmem:[%s1967_s4 + $0xf8] sm:$0xff]  ;;  %v869_v31 = vld [vmem:[%s1967_s4 + $0xf0] sm:$0xff] }
  0x28   :  { %1521 = vmatpush3.bf16.msra.mxu1 %v1592_v18 }
  0x29   :  { %1522 = vmatprep.subr.bf16.mxu1 %v1593_v21 }
  0x2a   :  { %513 = vperm.xlu1 %1564, %v395_v32   ;;  %508 = vperm.xlu0 %1563, %v394_v33   ;;  %v1596_v32 = vld [vmem:[%s1968_s3 + $0x38] sm:$0xff]  }
  0x2b   :  { %1487 = vmatmul.mubr.bf16.gmra.mrb[4].mxu0 %v1576_v34 }
  0x2c   :  { %1490 = vmatprep.mubr.bf16.mxu0 %v1577_v35  ;;  %1523 = vmatpush3.bf16.msra.mxu1 %v1593_v21 }
  0x2d   :  { %1524 = vmatprep.subr.bf16.mxu1 %v1594_v24 }
  0x2e   :  { %523 = vperm.xlu1 %1564, %v397_v36   ;;  %518 = vperm.xlu0 %1563, %v396_v37  }
  0x30   :  { %1525 = vmatpush3.bf16.msra.mxu1 %v1594_v24 }
  0x31   :  { %1526 = vmatprep.subr.bf16.mxu1 %v1595_v27 }
  0x32   :  { %533 = vperm.xlu1 %1564, %v399_v38   ;;  %528 = vperm.xlu0 %1563, %v398_v39  }
  0x33   :  { %1491 = vmatmul.mubr.bf16.gmra.mrb[8].mxu0 %v1578_v40 }
  0x34   :  { %1494 = vmatprep.mubr.bf16.mxu0 %v1579_v41  ;;  %1527 = vmatpush3.bf16.msra.mxu1 %v1595_v27 }
  0x35   :  { %1528 = vmatprep.subr.bf16.mxu1 %v1596_v32 }
  0x36   :  { %543 = vperm.xlu1 %1564, %v401_v42   ;;  %538 = vperm.xlu0 %1563, %v400_v43  }
  0x38   :  { %1529 = vmatpush3.bf16.msra.mxu1 %v1596_v32 }
  0x3a   :  { %553 = vperm.xlu1 %1564, %v403_v44   ;;  %548 = vperm.xlu0 %1563, %v402_v45  }
  0x3b   :  { %1495 = vmatmul.mubr.bf16.gmra.mrb[12].mxu0 %v1580_v46 }
  0x3c   :  { %1498 = vmatprep.mubr.bf16.mxu0 %v1581_v47 }
  0x3e   :  { %563 = vperm.xlu1 %1564, %v405_v48   ;;  %558 = vperm.xlu0 %1563, %v404_v49  }
  0x42   :  { %878 = vperm.xlu1 %1564, %v840_v50   ;;  %873 = vperm.xlu0 %1563, %v839_v51  }
  0x43   :  { %1499 = vmatmul.mubr.bf16.gmra.mrb[16].mxu0 %v1582_v52 }
  0x44   :  { %1502 = vmatprep.mubr.bf16.mxu0 %v1583_v53 }
  0x46   :  { %888 = vperm.xlu1 %1564, %v842_v54   ;;  %883 = vperm.xlu0 %1563, %v841_v55  }
  0x4a   :  { %898 = vperm.xlu1 %1564, %v844_v56   ;;  %893 = vperm.xlu0 %1563, %v843_v57  }
  0x4b   :  { %1503 = vmatmul.mubr.bf16.gmra.mrb[20].mxu0 %v1584_v58 }
  0x4c   :  { %1506 = vmatprep.mubr.bf16.mxu0 %v1585_v59 }
  0x4e   :  { %908 = vperm.xlu1 %1564, %v846_v60   ;;  %903 = vperm.xlu0 %1563, %v845_v61  }
  0x52   :  { %918 = vperm.xlu1 %1564, %v848_v62   ;;  %913 = vperm.xlu0 %1563, %v847_v63  }
  0x53   :  { %1507 = vmatmul.mubr.bf16.gmra.mrb[24].mxu0 %v1586_v0 }
  0x54   :  { %1510 = vmatprep.mubr.bf16.mxu0 %v1587_v1 }
  0x56   :  { %928 = vperm.xlu1 %1564, %v850_v2   ;;  %923 = vperm.xlu0 %1563, %v849_v3  }
  0x5a   :  { %938 = vperm.xlu1 %1564, %v852_v4   ;;  %933 = vperm.xlu0 %1563, %v851_v5  }
  0x5b   :  { %1511 = vmatmul.mubr.bf16.gmra.mrb[28].mxu0 %v1588_v6 }
  0x5e   :  { %948 = vperm.xlu1 %1564, %v854_v7   ;;  %943 = vperm.xlu0 %1563, %v853_v8  }
  0x62   :  { %958 = vperm.xlu1 %1564, %v856_v9   ;;  %953 = vperm.xlu0 %1563, %v855_v10  }
  0x66   :  { %968 = vperm.xlu1 %1564, %v858_v12   ;;  %963 = vperm.xlu0 %1563, %v857_v13  }
  0x6a   :  { %978 = vperm.xlu1 %1564, %v860_v16   ;;  %973 = vperm.xlu0 %1563, %v859_v17  }
  0x6e   :  { %988 = vperm.xlu1 %1564, %v862_v19   ;;  %983 = vperm.xlu0 %1563, %v861_v20  }
  0x72   :  { %998 = vperm.xlu1 %1564, %v864_v22   ;;  %993 = vperm.xlu0 %1563, %v863_v23  }
  0x76   :  { %1008 = vperm.xlu1 %1564, %v866_v25   ;;  %1003 = vperm.xlu0 %1563, %v865_v26  }
  0x7a   :  { %1018 = vperm.xlu1 %1564, %v868_v28   ;;  %1013 = vperm.xlu0 %1563, %v867_v29  }
  0x7e   :  { %1028 = vperm.xlu1 %1564, %v870_v30   ;;  %1023 = vperm.xlu0 %1563, %v869_v31  }
  0x81   :  { %v419_v33 = vpop.permute.xlu1 %418  ;;  %v409_v34 = vpop.permute.xlu0 %408 }
  0x85   :  { %v424_v35 = vpop.permute.xlu1 %423  ;;  %v414_v36 = vpop.permute.xlu0 %413 }
  0x89   :  { %v434_v37 = vpop.permute.xlu1 %433  ;;  %v429_v38 = vpop.permute.xlu0 %428 }
  0x8d   :  { %v444_v39 = vpop.permute.xlu1 %443  ;;  %v439_v40 = vpop.permute.xlu0 %438 }
  0x91   :  { %v454_v41 = vpop.permute.xlu1 %453  ;;  %v449_v42 = vpop.permute.xlu0 %448 }
  0x95   :  { %v464_v43 = vpop.permute.xlu1 %463  ;;  %v459_v44 = vpop.permute.xlu0 %458 }
  0x99   :  { %v474_v47 = vpop.permute.xlu1 %473  ;;  %v469_v49 = vpop.permute.xlu0 %468 }
  0x9d   :  { %v484_v58 = vpop.permute.xlu1 %483  ;;  %v479_v60 = vpop.permute.xlu0 %478 }
  0xa1   :  { %v494_v5 = vpop.permute.xlu1 %493  ;;  %v489_v6 = vpop.permute.xlu0 %488 }
  0xa5   :  { %v504_v15 = vpop.permute.xlu1 %503  ;;  %v499_v17 = vpop.permute.xlu0 %498 }
  0xa9   :  { %v514_v22 = vpop.permute.xlu1 %513  ;;  %v509_v26 = vpop.permute.xlu0 %508 }
  0xad   :  { %v524_v32 = vpop.permute.xlu1 %523 }
  0xf6   :  { %v1484_v45 = vpop.f32.mrb[0].mxu0 }
  0xf7   :  { %v247_v46 = vpop.f32.mrb[1].mxu0  ;;  %v568_v50 = vmul.f32 %v1484_v45, %v419_v33 }
  0xf8   :  { %v1485_v48 = vpop.f32.mrb[2].mxu0  ;;  %v566_v53 = vmul.f32 %v409_v34, %v247_v46  ;;  %v519_v34 = vpop.permute.xlu0 %518 }
  0xf9   :  { %v569_v51 = vmul.f32 %v1485_v48, %v424_v35  ;;  %v250_v52 = vpop.f32.mrb[3].mxu0 }
  0xfa   :  { %v567_v54 = vmul.f32 %v414_v36, %v250_v52 }
  0xfb   :  { %v599_v55 = vpack.c.bf16 %v569_v51, %v568_v50 }
  0xfc   :  { %v598_v56 = vpack.c.bf16 %v567_v54, %v566_v53 }
  0xfe   :  { %v1488_v57 = vpop.f32.mrb[4].mxu0  ;;  %1530 = vmatprep.mubr.bf16.mxu1 %v598_v56 }
  0xff   :  { %v263_v59 = vpop.f32.mrb[5].mxu0  ;;  %1531 = vmatmul.mubr.bf16.vlgmr.msra.gmra.mrb[0].mxu1 %v599_v55  ;;  %v572_v62 = vmul.f32 %v1488_v57, %v439_v40 }
 0x100   :  { %v1489_v61 = vpop.f32.mrb[6].mxu0  ;;  %v570_v1 = vmul.f32 %v429_v38, %v263_v59 }
 0x101   :  { %v573_v63 = vmul.f32 %v1489_v61, %v444_v39  ;;  %v266_v0 = vpop.f32.mrb[7].mxu0 }
 0x102   :  { %v571_v2 = vmul.f32 %v434_v37, %v266_v0 }
 0x103   :  { %v601_v3 = vpack.c.bf16 %v573_v63, %v572_v62 }
 0x104   :  { %v600_v4 = vpack.c.bf16 %v571_v2, %v570_v1 }
 0x106   :  { %v1492_v7 = vpop.f32.mrb[8].mxu0  ;;  %1534 = vmatprep.mubr.bf16.mxu1 %v600_v4 }
 0x107   :  { %v279_v8 = vpop.f32.mrb[9].mxu0  ;;  %1535 = vmatmul.mubr.bf16.gmra.mrb[4].mxu1 %v601_v3  ;;  %v576_v10 = vmul.f32 %v1492_v7, %v459_v44  ;;  %v529_v44 = vpop.permute.xlu0 %528 }
 0x108   :  { %v1493_v9 = vpop.f32.mrb[10].mxu0  ;;  %v574_v13 = vmul.f32 %v449_v42, %v279_v8 }
 0x109   :  { %v577_v11 = vmul.f32 %v1493_v9, %v464_v43  ;;  %v282_v12 = vpop.f32.mrb[11].mxu0  ;;  %v534_v43 = vpop.permute.xlu1 %533 }
 0x10a   :  { %v575_v14 = vmul.f32 %v454_v41, %v282_v12 }
 0x10b   :  { %v603_v16 = vpack.c.bf16 %v577_v11, %v576_v10  ;;  %v539_v55 = vpop.permute.xlu0 %538 }
 0x10c   :  { %v602_v18 = vpack.c.bf16 %v575_v14, %v574_v13 }
 0x10d   :  { %v544_v53 = vpop.permute.xlu1 %543 }
 0x10e   :  { %v1496_v19 = vpop.f32.mrb[12].mxu0  ;;  %1538 = vmatprep.mubr.bf16.mxu1 %v602_v18 }
 0x10f   :  { %v295_v20 = vpop.f32.mrb[13].mxu0  ;;  %1539 = vmatmul.mubr.bf16.gmra.mrb[8].mxu1 %v603_v16  ;;  %v580_v23 = vmul.f32 %v1496_v19, %v479_v60  ;;  %v549_v0 = vpop.permute.xlu0 %548 }
 0x110   :  { %v1497_v21 = vpop.f32.mrb[14].mxu0  ;;  %v578_v27 = vmul.f32 %v469_v49, %v295_v20 }
 0x111   :  { %v581_v24 = vmul.f32 %v1497_v21, %v484_v58  ;;  %v298_v25 = vpop.f32.mrb[15].mxu0  ;;  %v554_v60 = vpop.permute.xlu1 %553 }
 0x112   :  { %v579_v28 = vmul.f32 %v474_v47, %v298_v25 }
 0x113   :  { %v605_v29 = vpack.c.bf16 %v581_v24, %v580_v23  ;;  %v559_v8 = vpop.permute.xlu0 %558 }
 0x114   :  { %v604_v30 = vpack.c.bf16 %v579_v28, %v578_v27 }
 0x116   :  { %v1500_v31 = vpop.f32.mrb[16].mxu0  ;;  %1542 = vmatprep.mubr.bf16.mxu1 %v604_v30 }
 0x117   :  { %v311_v33 = vpop.f32.mrb[17].mxu0  ;;  %1543 = vmatmul.mubr.bf16.gmra.mrb[12].mxu1 %v605_v29  ;;  %v584_v36 = vmul.f32 %v1500_v31, %v499_v17  ;;  %v874_v18 = vpop.permute.xlu0 %873 }
 0x118   :  { %v1501_v35 = vpop.f32.mrb[18].mxu0  ;;  %v582_v39 = vmul.f32 %v489_v6, %v311_v33  ;;  %v564_v6 = vpop.permute.xlu1 %563 }
 0x119   :  { %v585_v37 = vmul.f32 %v1501_v35, %v504_v15  ;;  %v314_v38 = vpop.f32.mrb[19].mxu0 }
 0x11a   :  { %v583_v40 = vmul.f32 %v494_v5, %v314_v38 }
 0x11b   :  { %v607_v41 = vpack.c.bf16 %v585_v37, %v584_v36  ;;  %v884_v20 = vpop.permute.xlu0 %883 }
 0x11c   :  { %v606_v42 = vpack.c.bf16 %v583_v40, %v582_v39  ;;  %v879_v17 = vpop.permute.xlu1 %878 }
 0x11e   :  { %v1504_v45 = vpop.f32.mrb[20].mxu0  ;;  %1546 = vmatprep.mubr.bf16.mxu1 %v606_v42 }
 0x11f   :  { %v327_v46 = vpop.f32.mrb[21].mxu0  ;;  %1547 = vmatmul.mubr.bf16.gmra.mrb[16].mxu1 %v607_v41  ;;  %v588_v48 = vmul.f32 %v1504_v45, %v519_v34 }
 0x120   :  { %v1505_v47 = vpop.f32.mrb[22].mxu0  ;;  %v586_v51 = vmul.f32 %v509_v26, %v327_v46  ;;  %v889_v19 = vpop.permute.xlu1 %888 }
 0x121   :  { %v589_v49 = vmul.f32 %v1505_v47, %v524_v32  ;;  %v330_v50 = vpop.f32.mrb[23].mxu0 }
 0x122   :  { %v587_v52 = vmul.f32 %v514_v22, %v330_v50  ;;  %v894_v22 = vpop.permute.xlu0 %893 }
 0x123   :  { %v609_v54 = vpack.c.bf16 %v589_v49, %v588_v48 }
 0x124   :  { %v608_v56 = vpack.c.bf16 %v587_v52, %v586_v51  ;;  %v899_v21 = vpop.permute.xlu1 %898 }
 0x126   :  { %v1508_v57 = vpop.f32.mrb[24].mxu0  ;;  %1550 = vmatprep.mubr.bf16.mxu1 %v608_v56  ;;  %v904_v24 = vpop.permute.xlu0 %903 }
 0x127   :  { %v343_v58 = vpop.f32.mrb[25].mxu0  ;;  %1551 = vmatmul.mubr.bf16.gmra.mrb[20].mxu1 %v609_v54  ;;  %v592_v61 = vmul.f32 %v1508_v57, %v539_v55 }
 0x128   :  { %v1509_v59 = vpop.f32.mrb[26].mxu0  ;;  %v590_v1 = vmul.f32 %v529_v44, %v343_v58  ;;  %v909_v23 = vpop.permute.xlu1 %908 }
 0x129   :  { %v593_v62 = vmul.f32 %v1509_v59, %v544_v53  ;;  %v346_v63 = vpop.f32.mrb[27].mxu0 }
 0x12a   :  { %v591_v2 = vmul.f32 %v534_v43, %v346_v63  ;;  %v914_v26 = vpop.permute.xlu0 %913 }
 0x12b   :  { %v611_v3 = vpack.c.bf16 %v593_v62, %v592_v61 }
 0x12c   :  { %v610_v4 = vpack.c.bf16 %v591_v2, %v590_v1  ;;  %v919_v25 = vpop.permute.xlu1 %918 }
 0x12e   :  { %v1512_v5 = vpop.f32.mrb[28].mxu0  ;;  %1554 = vmatprep.mubr.bf16.mxu1 %v610_v4  ;;  %v924_v28 = vpop.permute.xlu0 %923 }
 0x12f   :  { %v359_v7 = vpop.f32.mrb[29].mxu0  ;;  %1555 = vmatmul.mubr.bf16.gmra.mrb[24].mxu1 %v611_v3  ;;  %v596_v10 = vmul.f32 %v1512_v5, %v559_v8 }
 0x130   :  { %v1513_v9 = vpop.f32.mrb[30].mxu0  ;;  %v594_v13 = vmul.f32 %v549_v0, %v359_v7  ;;  %v929_v27 = vpop.permute.xlu1 %928 }
 0x131   :  { %v597_v11 = vmul.f32 %v1513_v9, %v564_v6  ;;  %v362_v12 = vpop.f32.mrb[31].mxu0 }
 0x132   :  { %v595_v14 = vmul.f32 %v554_v60, %v362_v12  ;;  %v934_v36 = vpop.permute.xlu0 %933 }
 0x133   :  { %v613_v15 = vpack.c.bf16 %v597_v11, %v596_v10 }
 0x134   :  { %v612_v16 = vpack.c.bf16 %v595_v14, %v594_v13  ;;  %v939_v32 = vpop.permute.xlu1 %938 }
 0x136   :  { %1558 = vmatprep.mubr.bf16.mxu1 %v612_v16  ;;  %v944_v44 = vpop.permute.xlu0 %943 }
 0x137   :  { %1559 = vmatmul.mubr.bf16.gmra.mrb[28].mxu1 %v613_v15 }
 0x138   :  { %v949_v42 = vpop.permute.xlu1 %948 }
 0x13a   :  { %v954_v54 = vpop.permute.xlu0 %953 }
 0x13c   :  { %v959_v53 = vpop.permute.xlu1 %958 }
 0x13e   :  { %v964_v1 = vpop.permute.xlu0 %963 }
 0x140   :  { %v969_v63 = vpop.permute.xlu1 %968 }
 0x142   :  { %v974_v10 = vpop.permute.xlu0 %973 }
 0x144   :  { %v979_v6 = vpop.permute.xlu1 %978 }
 0x148   :  { %v989_v16 = vpop.permute.xlu1 %988 }
 0x1d2   :  { %v1532_v29 = vpop.f32.mrb[0].mxu1 }
 0x1d3   :  { %v712_v30 = vpop.f32.mrb[1].mxu1  ;;  %v1033_v33 = vmul.f32 %v1532_v29, %v884_v20 }
 0x1d4   :  { %v1533_v31 = vpop.f32.mrb[2].mxu1  ;;  %v1031_v37 = vmul.f32 %v874_v18, %v712_v30  ;;  %v984_v18 = vpop.permute.xlu0 %983 }
 0x1d5   :  { %v1034_v34 = vmul.f32 %v1533_v31, %v889_v19  ;;  %v715_v35 = vpop.f32.mrb[3].mxu1 }
 0x1d6   :  { %v1032_v38 = vmul.f32 %v879_v17, %v715_v35 }
 0x1d7   :  { %v1331_v39 = vpack.c.bf16 %v1034_v34, %v1033_v33 }
 0x1d8   :  { %v1326_v40 = vpack.c.bf16 %v1032_v38, %v1031_v37 }
 0x1d9   :  { %1403 = vst [vmem:[%s1969_s5 + $0x8] sm:$0xff] %v1331_v39  }
 0x1da   :  { %1327 = vst [vmem:[%s1969_s5] sm:$0xff] %v1326_v40   ;;  %v1536_v41 = vpop.f32.mrb[4].mxu1 }
 0x1db   :  { %v728_v43 = vpop.f32.mrb[5].mxu1  ;;  %v1037_v46 = vmul.f32 %v1536_v41, %v904_v24 }
 0x1dc   :  { %v1537_v45 = vpop.f32.mrb[6].mxu1  ;;  %v1035_v49 = vmul.f32 %v894_v22, %v728_v43 }
 0x1dd   :  { %v1038_v47 = vmul.f32 %v1537_v45, %v909_v23  ;;  %v731_v48 = vpop.f32.mrb[7].mxu1 }
 0x1de   :  { %v1036_v50 = vmul.f32 %v899_v21, %v731_v48 }
 0x1df   :  { %v1341_v51 = vpack.c.bf16 %v1038_v47, %v1037_v46 }
 0x1e0   :  { %v1336_v52 = vpack.c.bf16 %v1036_v50, %v1035_v49 }
 0x1e1   :  { %1405 = vst [vmem:[%s1969_s5 + $0x18] sm:$0xff] %v1341_v51  }
 0x1e2   :  { %1404 = vst [vmem:[%s1969_s5 + $0x10] sm:$0xff] %v1336_v52   ;;  %v1540_v55 = vpop.f32.mrb[8].mxu1 }
 0x1e3   :  { %v744_v56 = vpop.f32.mrb[9].mxu1  ;;  %v1041_v58 = vmul.f32 %v1540_v55, %v924_v28  ;;  %v994_v28 = vpop.permute.xlu0 %993 }
 0x1e4   :  { %v1541_v57 = vpop.f32.mrb[10].mxu1  ;;  %v1039_v61 = vmul.f32 %v914_v26, %v744_v56 }
 0x1e5   :  { %v1042_v59 = vmul.f32 %v1541_v57, %v929_v27  ;;  %v747_v60 = vpop.f32.mrb[11].mxu1  ;;  %v999_v27 = vpop.permute.xlu1 %998 }
 0x1e6   :  { %v1040_v62 = vmul.f32 %v919_v25, %v747_v60 }
 0x1e7   :  { %v1351_v0 = vpack.c.bf16 %v1042_v59, %v1041_v58  ;;  %v1004_v39 = vpop.permute.xlu0 %1003 }
 0x1e8   :  { %v1346_v2 = vpack.c.bf16 %v1040_v62, %v1039_v61 }
 0x1e9   :  { %1407 = vst [vmem:[%s1969_s5 + $0x28] sm:$0xff] %v1351_v0   ;;  %v1009_v37 = vpop.permute.xlu1 %1008 }
 0x1ea   :  { %1406 = vst [vmem:[%s1969_s5 + $0x20] sm:$0xff] %v1346_v2   ;;  %v1544_v3 = vpop.f32.mrb[12].mxu1 }
 0x1eb   :  { %v760_v4 = vpop.f32.mrb[13].mxu1  ;;  %v1045_v7 = vmul.f32 %v1544_v3, %v944_v44  ;;  %v1014_v48 = vpop.permute.xlu0 %1013 }
 0x1ec   :  { %v1545_v5 = vpop.f32.mrb[14].mxu1  ;;  %v1043_v11 = vmul.f32 %v934_v36, %v760_v4 }
 0x1ed   :  { %v1046_v8 = vmul.f32 %v1545_v5, %v949_v42  ;;  %v763_v9 = vpop.f32.mrb[15].mxu1  ;;  %v1019_v44 = vpop.permute.xlu1 %1018 }
 0x1ee   :  { %v1044_v12 = vmul.f32 %v939_v32, %v763_v9 }
 0x1ef   :  { %v1361_v13 = vpack.c.bf16 %v1046_v8, %v1045_v7  ;;  %v1024_v56 = vpop.permute.xlu0 %1023 }
 0x1f0   :  { %v1356_v14 = vpack.c.bf16 %v1044_v12, %v1043_v11 }
 0x1f1   :  { %1409 = vst [vmem:[%s1969_s5 + $0x38] sm:$0xff] %v1361_v13  }
 0x1f2   :  { %1408 = vst [vmem:[%s1969_s5 + $0x30] sm:$0xff] %v1356_v14   ;;  %v1548_v15 = vpop.f32.mrb[16].mxu1 }
 0x1f3   :  { %v776_v17 = vpop.f32.mrb[17].mxu1  ;;  %v1049_v20 = vmul.f32 %v1548_v15, %v964_v1 }
 0x1f4   :  { %v1549_v19 = vpop.f32.mrb[18].mxu1  ;;  %v1047_v23 = vmul.f32 %v954_v54, %v776_v17  ;;  %v1029_v54 = vpop.permute.xlu1 %1028 }
 0x1f5   :  { %v1050_v21 = vmul.f32 %v1549_v19, %v969_v63  ;;  %v779_v22 = vpop.f32.mrb[19].mxu1 }
 0x1f6   :  { %v1048_v24 = vmul.f32 %v959_v53, %v779_v22 }
 0x1f7   :  { %v1371_v25 = vpack.c.bf16 %v1050_v21, %v1049_v20 }
 0x1f8   :  { %v1366_v26 = vpack.c.bf16 %v1048_v24, %v1047_v23 }
 0x1f9   :  { %1411 = vst [vmem:[%s1969_s5 + $0x48] sm:$0xff] %v1371_v25  }
 0x1fa   :  { %1410 = vst [vmem:[%s1969_s5 + $0x40] sm:$0xff] %v1366_v26   ;;  %v1552_v29 = vpop.f32.mrb[20].mxu1 }
 0x1fb   :  { %v792_v30 = vpop.f32.mrb[21].mxu1  ;;  %v1053_v32 = vmul.f32 %v1552_v29, %v984_v18 }
 0x1fc   :  { %v1553_v31 = vpop.f32.mrb[22].mxu1  ;;  %v1051_v35 = vmul.f32 %v974_v10, %v792_v30 }
 0x1fd   :  { %v1054_v33 = vmul.f32 %v1553_v31, %v989_v16  ;;  %v795_v34 = vpop.f32.mrb[23].mxu1 }
 0x1fe   :  { %v1052_v36 = vmul.f32 %v979_v6, %v795_v34 }
 0x1ff   :  { %v1381_v38 = vpack.c.bf16 %v1054_v33, %v1053_v32 }
 0x200   :  { %v1376_v40 = vpack.c.bf16 %v1052_v36, %v1051_v35 }
 0x201   :  { %1413 = vst [vmem:[%s1969_s5 + $0x58] sm:$0xff] %v1381_v38  }
 0x202   :  { %1412 = vst [vmem:[%s1969_s5 + $0x50] sm:$0xff] %v1376_v40   ;;  %v1556_v41 = vpop.f32.mrb[24].mxu1 }
 0x203   :  { %v808_v42 = vpop.f32.mrb[25].mxu1  ;;  %v1057_v45 = vmul.f32 %v1556_v41, %v1004_v39 }
 0x204   :  { %v1557_v43 = vpop.f32.mrb[26].mxu1  ;;  %v1055_v49 = vmul.f32 %v994_v28, %v808_v42 }
 0x205   :  { %v1058_v46 = vmul.f32 %v1557_v43, %v1009_v37  ;;  %v811_v47 = vpop.f32.mrb[27].mxu1 }
 0x206   :  { %v1056_v50 = vmul.f32 %v999_v27, %v811_v47 }
 0x207   :  { %v1391_v51 = vpack.c.bf16 %v1058_v46, %v1057_v45 }
 0x208   :  { %v1386_v52 = vpack.c.bf16 %v1056_v50, %v1055_v49 }
 0x209   :  { %1415 = vst [vmem:[%s1969_s5 + $0x68] sm:$0xff] %v1391_v51  }
 0x20a   :  { %1414 = vst [vmem:[%s1969_s5 + $0x60] sm:$0xff] %v1386_v52   ;;  %v1560_v53 = vpop.f32.mrb[28].mxu1 }
 0x20b   :  { %v824_v55 = vpop.f32.mrb[29].mxu1  ;;  %v1061_v58 = vmul.f32 %v1560_v53, %v1024_v56 }
 0x20c   :  { %v1561_v57 = vpop.f32.mrb[30].mxu1  ;;  %v1059_v61 = vmul.f32 %v1014_v48, %v824_v55 }
 0x20d   :  { %v1062_v59 = vmul.f32 %v1561_v57, %v1029_v54  ;;  %v827_v60 = vpop.f32.mrb[31].mxu1 }
 0x20e   :  { %v1060_v62 = vmul.f32 %v1019_v44, %v827_v60 }
 0x20f   :  { %v1401_v63 = vpack.c.bf16 %v1062_v59, %v1061_v58 }
 0x210   :  { %v1396_v0 = vpack.c.bf16 %v1060_v62, %v1059_v61 }
 0x211   :  { %1417 = vst [vmem:[%s1969_s5 + $0x78] sm:$0xff] %v1401_v63  }
 0x212   :  { %1416 = vst [vmem:[%s1969_s5 + $0x70] sm:$0xff] %v1396_v0  }

// kernel: _device_forward.14
= control target key start
LH: loop header
LB: loop body
LE: loop exit
PB: predicated region body
PF: predicated region fallthrough
CT: control target
= control target key end

     0   :  { %s3170_s0 = inlined_call_operand.vmem [shape: f32[256,128], index: 0, kind: input, shape index: {}]   ;;  %s3171_s1 = inlined_call_operand.vmem [shape: f32[256,128], index: 1, kind: input, shape index: {}]   ;;  %s3172_s2 = inlined_call_operand.vmem [shape: f32[256,1], index: 2, kind: input, shape index: {}]   ;;  %s3173_s3 = inlined_call_operand.hbm [shape: f32[1,1], index: 3, kind: output, shape index: {}]  }
   0x1   :  { %v1599_v0 = vld [vmem:[%s3171_s1] sm:$0xff]  ;;  %v1609_v2 = vld [vmem:[%s3171_s1 + $0x8] sm:$0xff]  ;;  %v1627_v8 = vld [vmem:[%s3171_s1 + $0x10] sm:$0xff] }
   0x2   :  { %v1604_v1 = vld [vmem:[%s3170_s0] sm:$0xff]  ;;  %v501_v3 = vmul.f32 %v1599_v0, %v1599_v0  ;;  %v1618_v5 = vld [vmem:[%s3170_s0 + $0x8] sm:$0xff]  ;;  %v502_v6 = vmul.f32 %v1609_v2, %v1609_v2  ;;  %v1632_v9 = vld [vmem:[%s3170_s0 + $0x10] sm:$0xff]  ;;  %v503_v10 = vmul.f32 %v1627_v8, %v1627_v8 }
   0x3   :  { %v85_v4 = vmul.f32 %v1604_v1, %v1604_v1  ;;  %v86_v7 = vmul.f32 %v1618_v5, %v1618_v5  ;;  %v87_v11 = vmul.f32 %v1632_v9, %v1632_v9  ;;  %v1641_v12 = vld [vmem:[%s3171_s1 + $0x18] sm:$0xff]  ;;  %v1655_v16 = vld [vmem:[%s3171_s1 + $0x20] sm:$0xff]  ;;  %v1669_v20 = vld [vmem:[%s3171_s1 + $0x28] sm:$0xff] }
   0x4   :  { %533 = vadd.xlane.f32.xlu1 %v501_v3  ;;  %v1646_v13 = vld [vmem:[%s3170_s0 + $0x18] sm:$0xff]  ;;  %v504_v14 = vmul.f32 %v1641_v12, %v1641_v12  ;;  %v1660_v17 = vld [vmem:[%s3170_s0 + $0x20] sm:$0xff]  ;;  %v505_v18 = vmul.f32 %v1655_v16, %v1655_v16  ;;  %v1674_v21 = vld [vmem:[%s3170_s0 + $0x28] sm:$0xff]  ;;  %v506_v22 = vmul.f32 %v1669_v20, %v1669_v20 }
   0x5   :  { %117 = vadd.xlane.f32.xlu0 %v85_v4  ;;  %v88_v15 = vmul.f32 %v1646_v13, %v1646_v13  ;;  %v89_v19 = vmul.f32 %v1660_v17, %v1660_v17  ;;  %v90_v23 = vmul.f32 %v1674_v21, %v1674_v21  ;;  %v1683_v24 = vld [vmem:[%s3171_s1 + $0x30] sm:$0xff] }
   0x6   :  { %v1688_v25 = vld [vmem:[%s3170_s0 + $0x30] sm:$0xff] }
   0x8   :  { %535 = vadd.xlane.f32.xlu1 %v502_v6 }
   0x9   :  { %119 = vadd.xlane.f32.xlu0 %v86_v7 }
   0xc   :  { %537 = vadd.xlane.f32.xlu1 %v503_v10 }
   0xd   :  { %121 = vadd.xlane.f32.xlu0 %v87_v11 }
  0x10   :  { %539 = vadd.xlane.f32.xlu1 %v504_v14 }
  0x11   :  { %123 = vadd.xlane.f32.xlu0 %v88_v15 }
  0x14   :  { %541 = vadd.xlane.f32.xlu1 %v505_v18 }
  0x15   :  { %125 = vadd.xlane.f32.xlu0 %v89_v19 }
  0x16   :  { %8 = vsyncpa [#allocation3], 0  ;;  %v507_v26 = vmul.f32 %v1683_v24, %v1683_v24  ;;  %v91_v27 = vmul.f32 %v1688_v25, %v1688_v25  ;;  %v60_v28 = vld [vmem:[%s3171_s1 + $0x38] sm:$0xff]  ;;  %v61_v32 = vld [vmem:[%s3171_s1 + $0x40] sm:$0xff]  ;;  %s1575_s28 = smov [#allocation2]  }
  0x17   :  { %v28_v29 = vld [vmem:[%s3170_s0 + $0x38] sm:$0xff]  ;;  %v508_v30 = vmul.f32 %v60_v28, %v60_v28  ;;  %v29_v33 = vld [vmem:[%s3170_s0 + $0x40] sm:$0xff]  ;;  %v509_v34 = vmul.f32 %v61_v32, %v61_v32  ;;  %v62_v36 = vld [vmem:[%s3171_s1 + $0x48] sm:$0xff]  ;;  %s1232_s29 = sshll.u32 %s1575_s28, 4  ;;  %s1233_s29 = int_to_ptr.vmem [resolvable:$true] %s1232_s29 }
  0x18   :  { %543 = vadd.xlane.f32.xlu1 %v506_v22  ;;  %v92_v31 = vmul.f32 %v28_v29, %v28_v29  ;;  %v93_v35 = vmul.f32 %v29_v33, %v29_v33  ;;  %v30_v37 = vld [vmem:[%s3170_s0 + $0x48] sm:$0xff]  ;;  %v510_v38 = vmul.f32 %v62_v36, %v62_v36  ;;  %v63_v40 = vld [vmem:[%s3171_s1 + $0x50] sm:$0xff]  ;;  %v64_v44 = vld [vmem:[%s3171_s1 + $0x58] sm:$0xff]  ;;  %s1550_s30 = scalar_lea.vmem %s1233_s29, 16  ;;  %s1554_s4 = scalar_lea.vmem %s1233_s29, 32 }
  0x19   :  { %127 = vadd.xlane.f32.xlu0 %v90_v23  ;;  %v94_v39 = vmul.f32 %v30_v37, %v30_v37  ;;  %v31_v41 = vld [vmem:[%s3170_s0 + $0x50] sm:$0xff]  ;;  %v511_v42 = vmul.f32 %v63_v40, %v63_v40  ;;  %v32_v45 = vld [vmem:[%s3170_s0 + $0x58] sm:$0xff]  ;;  %v512_v46 = vmul.f32 %v64_v44, %v64_v44  ;;  %v65_v48 = vld [vmem:[%s3171_s1 + $0x60] sm:$0xff]  ;;  %p1551_p0 = scmp.ne.s32.totalorder %s1233_s29, %s1550_s30  ;;  %p1555_p1 = scmp.lt.s32.totalorder %s1233_s29, %s1233_s29 }
  0x1a   :  { %v95_v43 = vmul.f32 %v31_v41, %v31_v41  ;;  %v96_v47 = vmul.f32 %v32_v45, %v32_v45  ;;  %v33_v49 = vld [vmem:[%s3170_s0 + $0x60] sm:$0xff]  ;;  %v513_v50 = vmul.f32 %v65_v48, %v65_v48  ;;  %v66_v52 = vld [vmem:[%s3171_s1 + $0x68] sm:$0xff]  ;;  %v67_v56 = vld [vmem:[%s3171_s1 + $0x70] sm:$0xff]  ;;  %p1556_p2 = scmp.lt.s32.totalorder %s1554_s4, %s1550_s30 }
  0x1b   :  { %v97_v51 = vmul.f32 %v33_v49, %v33_v49  ;;  %v34_v53 = vld [vmem:[%s3170_s0 + $0x68] sm:$0xff]  ;;  %v514_v54 = vmul.f32 %v66_v52, %v66_v52  ;;  %v35_v57 = vld [vmem:[%s3170_s0 + $0x70] sm:$0xff]  ;;  %v515_v58 = vmul.f32 %v67_v56, %v67_v56  ;;  %v68_v60 = vld [vmem:[%s3171_s1 + $0x78] sm:$0xff] }
  0x1c   :  { %545 = vadd.xlane.f32.xlu1 %v507_v26  ;;  %v98_v55 = vmul.f32 %v34_v53, %v34_v53  ;;  %v99_v59 = vmul.f32 %v35_v57, %v35_v57  ;;  %v36_v61 = vld [vmem:[%s3170_s0 + $0x78] sm:$0xff]  ;;  %v516_v62 = vmul.f32 %v68_v60, %v68_v60  ;;  %v69_v3 = vld [vmem:[%s3171_s1 + $0x80] sm:$0xff]  ;;  %v70_v10 = vld [vmem:[%s3171_s1 + $0x88] sm:$0xff]  ;;  %p1557_p3 = por %p1556_p2, %p1555_p1 }
  0x1d   :  { %129 = vadd.xlane.f32.xlu0 %v91_v27  ;;  %v100_v63 = vmul.f32 %v36_v61, %v36_v61  ;;  %v37_v4 = vld [vmem:[%s3170_s0 + $0x80] sm:$0xff]  ;;  %v517_v6 = vmul.f32 %v69_v3, %v69_v3  ;;  %v38_v11 = vld [vmem:[%s3170_s0 + $0x88] sm:$0xff]  ;;  %v518_v14 = vmul.f32 %v70_v10, %v70_v10  ;;  %v71_v18 = vld [vmem:[%s3171_s1 + $0x90] sm:$0xff] }
  0x1e   :  { %v101_v7 = vmul.f32 %v37_v4, %v37_v4  ;;  %v102_v15 = vmul.f32 %v38_v11, %v38_v11  ;;  %v39_v19 = vld [vmem:[%s3170_s0 + $0x90] sm:$0xff]  ;;  %v519_v22 = vmul.f32 %v71_v18, %v71_v18  ;;  %v72_v26 = vld [vmem:[%s3171_s1 + $0x98] sm:$0xff]  ;;  %p1558_p4 = pnand %p1557_p3, %p1551_p0 }
  0x1f   :  { %v103_v23 = vmul.f32 %v39_v19, %v39_v19  ;;  %v40_v27 = vld [vmem:[%s3170_s0 + $0x98] sm:$0xff]  ;;  %v520_v28 = vmul.f32 %v72_v26, %v72_v26 }
  0x20   :  { %547 = vadd.xlane.f32.xlu1 %v508_v30  ;;  %v104_v29 = vmul.f32 %v40_v27, %v40_v27  ;;  %v73_v30 = vld [vmem:[%s3171_s1 + $0xa0] sm:$0xff] }
  0x21   :  { %131 = vadd.xlane.f32.xlu0 %v92_v31  ;;  %v41_v31 = vld [vmem:[%s3170_s0 + $0xa0] sm:$0xff]  ;;  %v521_v32 = vmul.f32 %v73_v30, %v73_v30 }
  0x22   :  { %v105_v33 = vmul.f32 %v41_v31, %v41_v31 }
  0x24   :  { %549 = vadd.xlane.f32.xlu1 %v509_v34  ;;  %v74_v34 = vld [vmem:[%s3171_s1 + $0xa8] sm:$0xff] }
  0x25   :  { %133 = vadd.xlane.f32.xlu0 %v93_v35  ;;  %v42_v35 = vld [vmem:[%s3170_s0 + $0xa8] sm:$0xff]  ;;  %v522_v36 = vmul.f32 %v74_v34, %v74_v34 }
  0x26   :  { %v106_v37 = vmul.f32 %v42_v35, %v42_v35 }
  0x28   :  { %551 = vadd.xlane.f32.xlu1 %v510_v38  ;;  %v75_v38 = vld [vmem:[%s3171_s1 + $0xb0] sm:$0xff] }
  0x29   :  { %135 = vadd.xlane.f32.xlu0 %v94_v39  ;;  %v43_v39 = vld [vmem:[%s3170_s0 + $0xb0] sm:$0xff]  ;;  %v523_v40 = vmul.f32 %v75_v38, %v75_v38 }
  0x2a   :  { %v107_v41 = vmul.f32 %v43_v39, %v43_v39 }
  0x2c   :  { %553 = vadd.xlane.f32.xlu1 %v511_v42  ;;  %v76_v42 = vld [vmem:[%s3171_s1 + $0xb8] sm:$0xff] }
  0x2d   :  { %137 = vadd.xlane.f32.xlu0 %v95_v43  ;;  %v44_v43 = vld [vmem:[%s3170_s0 + $0xb8] sm:$0xff]  ;;  %v524_v44 = vmul.f32 %v76_v42, %v76_v42 }
  0x2e   :  { %v108_v45 = vmul.f32 %v44_v43, %v44_v43 }
  0x30   :  { %555 = vadd.xlane.f32.xlu1 %v512_v46  ;;  %v77_v46 = vld [vmem:[%s3171_s1 + $0xc0] sm:$0xff] }
  0x31   :  { %139 = vadd.xlane.f32.xlu0 %v96_v47  ;;  %v45_v47 = vld [vmem:[%s3170_s0 + $0xc0] sm:$0xff]  ;;  %v525_v48 = vmul.f32 %v77_v46, %v77_v46 }
  0x32   :  { %v109_v49 = vmul.f32 %v45_v47, %v45_v47 }
  0x34   :  { %557 = vadd.xlane.f32.xlu1 %v513_v50  ;;  %v78_v50 = vld [vmem:[%s3171_s1 + $0xc8] sm:$0xff] }
  0x35   :  { %141 = vadd.xlane.f32.xlu0 %v97_v51  ;;  %v46_v51 = vld [vmem:[%s3170_s0 + $0xc8] sm:$0xff]  ;;  %v526_v52 = vmul.f32 %v78_v50, %v78_v50 }
  0x36   :  { %v110_v53 = vmul.f32 %v46_v51, %v46_v51 }
  0x38   :  { %559 = vadd.xlane.f32.xlu1 %v514_v54  ;;  %v79_v54 = vld [vmem:[%s3171_s1 + $0xd0] sm:$0xff] }
  0x39   :  { %143 = vadd.xlane.f32.xlu0 %v98_v55  ;;  %v47_v55 = vld [vmem:[%s3170_s0 + $0xd0] sm:$0xff]  ;;  %v527_v56 = vmul.f32 %v79_v54, %v79_v54 }
  0x3a   :  { %v111_v57 = vmul.f32 %v47_v55, %v47_v55 }
  0x3c   :  { %561 = vadd.xlane.f32.xlu1 %v515_v58  ;;  %v80_v58 = vld [vmem:[%s3171_s1 + $0xd8] sm:$0xff] }
  0x3d   :  { %145 = vadd.xlane.f32.xlu0 %v99_v59  ;;  %v48_v59 = vld [vmem:[%s3170_s0 + $0xd8] sm:$0xff]  ;;  %v528_v60 = vmul.f32 %v80_v58, %v80_v58 }
  0x3e   :  { %v112_v61 = vmul.f32 %v48_v59, %v48_v59 }
  0x40   :  { %563 = vadd.xlane.f32.xlu1 %v516_v62  ;;  %v81_v62 = vld [vmem:[%s3171_s1 + $0xe0] sm:$0xff] }
  0x41   :  { %147 = vadd.xlane.f32.xlu0 %v100_v63  ;;  %v49_v63 = vld [vmem:[%s3170_s0 + $0xe0] sm:$0xff]  ;;  %v529_v3 = vmul.f32 %v81_v62, %v81_v62 }
  0x42   :  { %v113_v4 = vmul.f32 %v49_v63, %v49_v63 }
  0x44   :  { %565 = vadd.xlane.f32.xlu1 %v517_v6  ;;  %v82_v6 = vld [vmem:[%s3171_s1 + $0xe8] sm:$0xff] }
  0x45   :  { %149 = vadd.xlane.f32.xlu0 %v101_v7  ;;  %v50_v7 = vld [vmem:[%s3170_s0 + $0xe8] sm:$0xff]  ;;  %v530_v10 = vmul.f32 %v82_v6, %v82_v6 }
  0x46   :  { %v114_v11 = vmul.f32 %v50_v7, %v50_v7 }
  0x48   :  { %567 = vadd.xlane.f32.xlu1 %v518_v14  ;;  %v83_v14 = vld [vmem:[%s3171_s1 + $0xf0] sm:$0xff] }
  0x49   :  { %151 = vadd.xlane.f32.xlu0 %v102_v15  ;;  %v51_v15 = vld [vmem:[%s3170_s0 + $0xf0] sm:$0xff]  ;;  %v531_v18 = vmul.f32 %v83_v14, %v83_v14 }
  0x4a   :  { %v115_v19 = vmul.f32 %v51_v15, %v51_v15 }
  0x4c   :  { %569 = vadd.xlane.f32.xlu1 %v519_v22  ;;  %v84_v22 = vld [vmem:[%s3171_s1 + $0xf8] sm:$0xff] }
  0x4d   :  { %153 = vadd.xlane.f32.xlu0 %v103_v23  ;;  %v52_v23 = vld [vmem:[%s3170_s0 + $0xf8] sm:$0xff]  ;;  %v532_v26 = vmul.f32 %v84_v22, %v84_v22 }
  0x4e   :  { %v116_v27 = vmul.f32 %v52_v23, %v52_v23 }
  0x50   :  { %571 = vadd.xlane.f32.xlu1 %v520_v28 }
  0x51   :  { %155 = vadd.xlane.f32.xlu0 %v104_v29 }
  0x54   :  { %573 = vadd.xlane.f32.xlu1 %v521_v32 }
  0x55   :  { %157 = vadd.xlane.f32.xlu0 %v105_v33 }
  0x58   :  { %575 = vadd.xlane.f32.xlu1 %v522_v36 }
  0x59   :  { %159 = vadd.xlane.f32.xlu0 %v106_v37 }
  0x5c   :  { %577 = vadd.xlane.f32.xlu1 %v523_v40 }
  0x5d   :  { %161 = vadd.xlane.f32.xlu0 %v107_v41 }
  0x60   :  { %579 = vadd.xlane.f32.xlu1 %v524_v44 }
  0x61   :  { %163 = vadd.xlane.f32.xlu0 %v108_v45 }
  0x64   :  { %581 = vadd.xlane.f32.xlu1 %v525_v48 }
  0x65   :  { %165 = vadd.xlane.f32.xlu0 %v109_v49 }
  0x68   :  { %583 = vadd.xlane.f32.xlu1 %v526_v52 }
  0x69   :  { %167 = vadd.xlane.f32.xlu0 %v110_v53 }
  0x6c   :  { %585 = vadd.xlane.f32.xlu1 %v527_v56 }
  0x6d   :  { %169 = vadd.xlane.f32.xlu0 %v111_v57 }
  0x70   :  { %587 = vadd.xlane.f32.xlu1 %v528_v60 }
  0x71   :  { %171 = vadd.xlane.f32.xlu0 %v112_v61 }
  0x74   :  { %589 = vadd.xlane.f32.xlu1 %v529_v3 }
  0x75   :  { %173 = vadd.xlane.f32.xlu0 %v113_v4 }
  0x78   :  { %591 = vadd.xlane.f32.xlu1 %v530_v10 }
  0x79   :  { %175 = vadd.xlane.f32.xlu0 %v114_v11 }
  0x7c   :  { %593 = vadd.xlane.f32.xlu1 %v531_v18 }
  0x7d   :  { %177 = vadd.xlane.f32.xlu0 %v115_v19 }
  0x80   :  { %595 = vadd.xlane.f32.xlu1 %v532_v26 }
  0x81   :  { %179 = vadd.xlane.f32.xlu0 %v116_v27 }
  0x91   :  { %v1844_v28 = vpop.xlane.xlu1 %533 }
  0x92   :  { %v118_v29 = vpop.xlane.xlu0 %117  ;;  %vm599_vm0 = vcmp.eq.f32.partialorder %v1844_v28, inf  ;;  %vm601_vm1 = vcmp.eq.f32.partialorder %v1844_v28, 0.0  ;;  %v602_v44 = vand.u32 2147483648, %v1844_v28 }
  0x93   :  { %1244 = vrsqrt.f32 %v118_v29  ;;  %vm183_vm2 = vcmp.eq.f32.partialorder %v118_v29, inf  ;;  %vm185_vm3 = vcmp.eq.f32.partialorder %v118_v29, 0.0  ;;  %v186_v46 = vand.u32 2147483648, %v118_v29 }
  0x94   :  { %1246 = vrsqrt.f32 %v1844_v28 }
  0x95   :  { %v1846_v30 = vpop.xlane.xlu1 %535 }
  0x96   :  { %v1848_v31 = vpop.xlane.xlu0 %119  ;;  %1248 = vrsqrt.f32 %v1846_v30  ;;  %vm606_vm4 = vcmp.eq.f32.partialorder %v1846_v30, inf  ;;  %vm608_vm5 = vcmp.eq.f32.partialorder %v1846_v30, 0.0  ;;  %v609_v50 = vand.u32 2147483648, %v1846_v30 }
  0x97   :  { %1250 = vrsqrt.f32 %v1848_v31  ;;  %vm190_vm6 = vcmp.eq.f32.partialorder %v1848_v31, inf  ;;  %vm192_vm7 = vcmp.eq.f32.partialorder %v1848_v31, 0.0  ;;  %v193_v55 = vand.u32 2147483648, %v1848_v31 }
  0x99   :  { %v1850_v32 = vpop.xlane.xlu1 %537 }
  0x9a   :  { %v1852_v33 = vpop.xlane.xlu0 %121  ;;  %1252 = vrsqrt.f32 %v1850_v32  ;;  %vm613_vm8 = vcmp.eq.f32.partialorder %v1850_v32, inf  ;;  %vm615_vm9 = vcmp.eq.f32.partialorder %v1850_v32, 0.0  ;;  %v616_v56 = vand.u32 2147483648, %v1850_v32 }
  0x9b   :  { %1254 = vrsqrt.f32 %v1852_v33  ;;  %vm197_vm10 = vcmp.eq.f32.partialorder %v1852_v33, inf  ;;  %vm199_vm11 = vcmp.eq.f32.partialorder %v1852_v33, 0.0  ;;  %v200_v6 = vand.u32 2147483648, %v1852_v33 }
  0x9d   :  { %v1855_v34 = vpop.xlane.xlu1 %539  ;;  %v1245_v38 = vpop.eup %1244 }
  0x9e   :  { %v1857_v35 = vpop.xlane.xlu0 %123  ;;  %1256 = vrsqrt.f32 %v1855_v34  ;;  %v1247_v41 = vpop.eup %1246  ;;  %v182_v42 = vmul.f32 %v1245_v38, %v118_v29  ;;  %vm620_vm12 = vcmp.eq.f32.partialorder %v1855_v34, inf  ;;  %vm622_vm13 = vcmp.eq.f32.partialorder %v1855_v34, 0.0 }
  0x9f   :  { %1258 = vrsqrt.f32 %v1857_v35  ;;  %v598_v45 = vmul.f32 %v1247_v41, %v1844_v28  ;;  %v623_v11 = vand.u32 2147483648, %v1855_v34  ;;  %vm204_vm14 = vcmp.eq.f32.partialorder %v1857_v35, inf }
  0xa0   :  { %v1249_v43 = vpop.eup %1248  ;;  %v184_v52 = vsel %vm183_vm2, %v118_v29, %v182_v42  ;;  %vm206_vm15 = vcmp.eq.f32.partialorder %v1857_v35, 0.0  ;;  %v207_v18 = vand.u32 2147483648, %v1857_v35 }
  0xa1   :  { %v1862_v36 = vpop.xlane.xlu1 %541  ;;  %v1251_v49 = vpop.eup %1250  ;;  %v605_v53 = vmul.f32 %v1249_v43, %v1846_v30  ;;  %v600_v57 = vsel %vm599_vm0, %v1844_v28, %v598_v45  ;;  %v187_v61 = vsel %vm185_vm3, %v186_v46, %v184_v52 }
  0xa2   :  { %v1864_v37 = vpop.xlane.xlu0 %125  ;;  %1260 = vrsqrt.f32 %v1862_v36  ;;  %v189_v58 = vmul.f32 %v1251_v49, %v1848_v31  ;;  %v603_v10 = vsel %vm601_vm1, %v602_v44, %v600_v57  ;;  %v405_v14 = vmax.f32 %v187_v61, 1e-12 }
  0xa3   :  { %1262 = vrsqrt.f32 %v1864_v37  ;;  %v607_v3 = vsel %vm606_vm4, %v1846_v30, %v605_v53  ;;  %v821_v29 = vmax.f32 %v603_v10, 1e-12  ;;  %vm627_vm0 = vcmp.eq.f32.partialorder %v1862_v36, inf }
  0xa4   :  { %v1253_v51 = vpop.eup %1252  ;;  %v191_v15 = vsel %vm190_vm6, %v1848_v31, %v189_v58  ;;  %v610_v23 = vsel %vm608_vm5, %v609_v50, %v607_v3  ;;  %vm629_vm1 = vcmp.eq.f32.partialorder %v1862_v36, 0.0  ;;  %v630_v43 = vand.u32 2147483648, %v1862_v36 }
  0xa5   :  { %v1868_v39 = vpop.xlane.xlu1 %543  ;;  %v1255_v54 = vpop.eup %1254  ;;  %v612_v62 = vmul.f32 %v1253_v51, %v1850_v32  ;;  %v194_v42 = vsel %vm192_vm7, %v193_v55, %v191_v15  ;;  %vm211_vm2 = vcmp.eq.f32.partialorder %v1864_v37, inf  ;;  %v822_v44 = vmax.f32 %v610_v23, 1e-12 }
  0xa6   :  { %v1870_v40 = vpop.xlane.xlu0 %127  ;;  %1264 = vrsqrt.f32 %v1868_v39  ;;  %v196_v4 = vmul.f32 %v1255_v54, %v1852_v33  ;;  %vm213_vm3 = vcmp.eq.f32.partialorder %v1864_v37, 0.0  ;;  %v214_v46 = vand.u32 2147483648, %v1864_v37 }
  0xa7   :  { %1266 = vrsqrt.f32 %v1870_v40  ;;  %v614_v26 = vsel %vm613_vm8, %v1850_v32, %v612_v62  ;;  %v406_v53 = vmax.f32 %v194_v42, 1e-12  ;;  %vm634_vm4 = vcmp.eq.f32.partialorder %v1868_v39, inf }
  0xa8   :  { %v1257_v63 = vpop.eup %1256  ;;  %v198_v38 = vsel %vm197_vm10, %v1852_v33, %v196_v4  ;;  %v1948_v45 = vsel %vm615_vm9, %v616_v56, %v614_v26  ;;  %v637_v57 = vand.u32 2147483648, %v1868_v39  ;;  %vm218_vm5 = vcmp.eq.f32.partialorder %v1870_v40, inf }
  0xa9   :  { %v1878_v47 = vpop.xlane.xlu1 %545  ;;  %v1259_v7 = vpop.eup %1258  ;;  %v619_v27 = vmul.f32 %v1257_v63, %v1855_v34  ;;  %v201_v50 = vsel %vm199_vm11, %v200_v6, %v198_v38  ;;  %v823_v33 = vmax.f32 %v1948_v45, 1e-12  ;;  %vm636_vm6 = vcmp.eq.f32.partialorder %v1868_v39, 0.0 }
  0xaa   :  { %v1880_v48 = vpop.xlane.xlu0 %129  ;;  %1268 = vrsqrt.f32 %v1878_v47  ;;  %v203_v41 = vmul.f32 %v1259_v7, %v1857_v35  ;;  %v407_v58 = vmax.f32 %v201_v50, 1e-12  ;;  %vm220_vm7 = vcmp.eq.f32.partialorder %v1870_v40, 0.0 }
  0xab   :  { %1270 = vrsqrt.f32 %v1880_v48  ;;  %v621_v51 = vsel %vm620_vm12, %v1855_v34, %v619_v27  ;;  %v221_v62 = vand.u32 2147483648, %v1870_v40  ;;  %vm641_vm8 = vcmp.eq.f32.partialorder %v1878_v47, inf }
  0xac   :  { %v1261_v28 = vpop.eup %1260  ;;  %v205_v54 = vsel %vm204_vm14, %v1857_v35, %v203_v41  ;;  %v1973_v61 = vsel %vm622_vm13, %v623_v11, %v621_v51  ;;  %v644_v15 = vand.u32 2147483648, %v1878_v47  ;;  %vm225_vm9 = vcmp.eq.f32.partialorder %v1880_v48, inf }
  0xad   :  { %v1899_v59 = vpop.xlane.xlu1 %547  ;;  %v1263_v30 = vpop.eup %1262  ;;  %v626_v32 = vmul.f32 %v1261_v28, %v1862_v36  ;;  %v208_v4 = vsel %vm206_vm15, %v207_v18, %v205_v54  ;;  %vm643_vm10 = vcmp.eq.f32.partialorder %v1878_v47, 0.0  ;;  %vm227_vm11 = vcmp.eq.f32.partialorder %v1880_v48, 0.0 }
  0xae   :  { %v1901_v60 = vpop.xlane.xlu0 %131  ;;  %1272 = vrsqrt.f32 %v1899_v59  ;;  %v210_v55 = vmul.f32 %v1263_v30, %v1864_v37  ;;  %v408_v18 = vmax.f32 %v208_v4, 1e-12  ;;  %v228_v26 = vand.u32 2147483648, %v1880_v48 }
  0xaf   :  { %1274 = vrsqrt.f32 %v1901_v60  ;;  %v628_v34 = vsel %vm627_vm0, %v1862_v36, %v626_v32  ;;  %vm648_vm12 = vcmp.eq.f32.partialorder %v1899_v59, inf  ;;  %v651_v45 = vand.u32 2147483648, %v1899_v59 }
  0xb0   :  { %1276 = vrcp.f32 %v405_v14  ;;  %v1265_v52 = vpop.eup %1264  ;;  %v212_v10 = vsel %vm211_vm2, %v1864_v37, %v210_v55  ;;  %v824_v14 = vmax.f32 %v1973_v61, 1e-12  ;;  %v2000_v23 = vsel %vm629_vm1, %v630_v43, %v628_v34 }
  0xb1   :  { %v1924_v19 = vpop.xlane.xlu1 %549  ;;  %1278 = vrcp.f32 %v821_v29  ;;  %v1267_v56 = vpop.eup %1266  ;;  %v633_v6 = vmul.f32 %v1265_v52, %v1868_v39  ;;  %v2012_v38 = vsel %vm213_vm3, %v214_v46, %v212_v10  ;;  %vm232_vm13 = vcmp.eq.f32.partialorder %v1901_v60, inf }
  0xb2   :  { %v1926_v22 = vpop.xlane.xlu0 %133  ;;  %1280 = vrsqrt.f32 %v1924_v19  ;;  %v217_v11 = vmul.f32 %v1267_v56, %v1870_v40  ;;  %v409_v50 = vmax.f32 %v2012_v38, 1e-12  ;;  %vm650_vm14 = vcmp.eq.f32.partialorder %v1899_v59, 0.0 }
  0xb3   :  { %1282 = vrsqrt.f32 %v1926_v22  ;;  %v635_v36 = vsel %vm634_vm4, %v1868_v39, %v633_v6  ;;  %v235_v51 = vand.u32 2147483648, %v1901_v60  ;;  %v658_v32 = vand.u32 2147483648, %v1924_v19 }
  0xb4   :  { %v1269_v7 = vpop.eup %1268  ;;  %1284 = vrcp.f32 %v406_v53  ;;  %v219_v30 = vsel %vm218_vm5, %v1870_v40, %v217_v11  ;;  %v2038_v55 = vsel %vm636_vm6, %v637_v57, %v635_v36  ;;  %vm234_vm15 = vcmp.eq.f32.partialorder %v1901_v60, 0.0 }
  0xb5   :  { %v1953_v31 = vpop.xlane.xlu1 %551  ;;  %v1271_v35 = vpop.eup %1270  ;;  %1286 = vrcp.f32 %v822_v44  ;;  %v640_v42 = vmul.f32 %v1269_v7, %v1878_v47  ;;  %v825_v44 = vmax.f32 %v2000_v23, 1e-12  ;;  %v2042_v56 = vsel %vm220_vm7, %v221_v62, %v219_v30 }
  0xb6   :  { %v1955_v49 = vpop.xlane.xlu0 %135  ;;  %1288 = vrsqrt.f32 %v1953_v31  ;;  %v224_v43 = vmul.f32 %v1271_v35, %v1880_v48  ;;  %vm655_vm0 = vcmp.eq.f32.partialorder %v1924_v19, inf  ;;  %vm239_vm1 = vcmp.eq.f32.partialorder %v1926_v22, inf }
  0xb7   :  { %1290 = vrsqrt.f32 %v1955_v49  ;;  %v826_v4 = vmax.f32 %v2038_v55, 1e-12  ;;  %v410_v34 = vmax.f32 %v2042_v56, 1e-12  ;;  %v242_v6 = vand.u32 2147483648, %v1926_v22 }
  0xb8   :  { %v1273_v29 = vpop.eup %1272  ;;  %1292 = vrcp.f32 %v407_v58  ;;  %v226_v39 = vsel %vm225_vm9, %v1880_v48, %v224_v43  ;;  %vm657_vm2 = vcmp.eq.f32.partialorder %v1924_v19, 0.0  ;;  %vm241_vm3 = vcmp.eq.f32.partialorder %v1926_v22, 0.0 }
  0xb9   :  { %v1979_v63 = vpop.xlane.xlu1 %553  ;;  %v1275_v41 = vpop.eup %1274  ;;  %1294 = vrcp.f32 %v823_v33  ;;  %v647_v57 = vmul.f32 %v1273_v29, %v1899_v59  ;;  %vm662_vm4 = vcmp.eq.f32.partialorder %v1953_v31, inf  ;;  %vm664_vm5 = vcmp.eq.f32.partialorder %v1953_v31, 0.0 }
  0xba   :  { %v1981_v3 = vpop.xlane.xlu0 %137  ;;  %v1277_v37 = vpop.eup %1276  ;;  %1296 = vrsqrt.f32 %v1979_v63  ;;  %vm246_vm6 = vcmp.eq.f32.partialorder %v1955_v49, inf  ;;  %vm248_vm7 = vcmp.eq.f32.partialorder %v1955_v49, 0.0  ;;  %vm671_vm9 = vcmp.eq.f32.partialorder %v1979_v63, 0.0 }
  0xbb   :  { %v1279_v46 = vpop.eup %1278  ;;  %v438_v52 = vmul.f32 %v1277_v37, %v1604_v1  ;;  %v642_v1 = vsel %vm641_vm8, %v1878_v47, %v640_v42  ;;  %1298 = vrsqrt.f32 %v1981_v3  ;;  %v649_v47 = vsel %vm648_vm12, %v1899_v59, %v647_v57 }
  0xbc   :  { %v854_v33 = vmul.f32 %v1279_v46, %v1599_v0  ;;  %v1281_v58 = vpop.eup %1280  ;;  %v231_v0 = vmul.f32 %v1275_v41, %v1901_v60  ;;  %1300 = vrcp.f32 %v408_v18  ;;  %v2067_v35 = vsel %vm643_vm10, %v644_v15, %v642_v1 }
  0xbd   :  { %v2006_v27 = vpop.xlane.xlu1 %555  ;;  %v1283_v40 = vpop.eup %1282  ;;  %1302 = vrcp.f32 %v824_v14  ;;  %v2071_v18 = vsel %vm227_vm11, %v228_v26, %v226_v39  ;;  %v665_v15 = vand.u32 2147483648, %v1953_v31  ;;  %v654_v36 = vmul.f32 %v1281_v58, %v1924_v19 }
  0xbe   :  { %v2008_v28 = vpop.xlane.xlu0 %139  ;;  %v917_v61 = vmul.f32 %v854_v33, %v438_v52  ;;  %v1285_v62 = vpop.eup %1284  ;;  %1304 = vrsqrt.f32 %v2006_v27  ;;  %v233_v38 = vsel %vm232_vm13, %v1901_v60, %v231_v0  ;;  %v411_v30 = vmax.f32 %v2071_v18, 1e-12 }
  0xbf   :  { %v1287_v11 = vpop.eup %1286  ;;  %v440_v14 = vmul.f32 %v1285_v62, %v1618_v5  ;;  %v238_v5 = vmul.f32 %v1283_v40, %v1926_v22  ;;  %1306 = vrsqrt.f32 %v2008_v28  ;;  %v2102_v52 = vsel %vm650_vm14, %v651_v45, %v649_v47 }
  0xc0   :  { %949 = vadd.xlane.f32.xlu0 %v917_v61  ;;  %v1289_v29 = vpop.eup %1288  ;;  %v856_v48 = vmul.f32 %v1287_v11, %v1609_v2  ;;  %v827_v2 = vmax.f32 %v2067_v35, 1e-12  ;;  %v2108_v1 = vsel %vm234_vm15, %v235_v51, %v233_v38  ;;  %v249_v39 = vand.u32 2147483648, %v1955_v49 }
  0xc1   :  { %v2032_v53 = vpop.xlane.xlu1 %557  ;;  %v1291_v26 = vpop.eup %1290  ;;  %v661_v33 = vmul.f32 %v1289_v29, %v1953_v31  ;;  %v240_v60 = vsel %vm239_vm1, %v1926_v22, %v238_v5  ;;  %vm669_vm8 = vcmp.eq.f32.partialorder %v1979_v63, inf  ;;  %v672_v45 = vand.u32 2147483648, %v1979_v63 }
  0xc2   :  { %v2034_v54 = vpop.xlane.xlu0 %141  ;;  %v1293_v41 = vpop.eup %1292  ;;  %v918_v42 = vmul.f32 %v856_v48, %v440_v14  ;;  %1308 = vrsqrt.f32 %v2032_v53  ;;  %v828_v51 = vmax.f32 %v2102_v52, 1e-12  ;;  %v412_v61 = vmax.f32 %v2108_v1, 1e-12 }
  0xc3   :  { %v1295_v46 = vpop.eup %1294  ;;  %v442_v58 = vmul.f32 %v1293_v41, %v1632_v9  ;;  %1310 = vrcp.f32 %v409_v50  ;;  %v656_v9 = vsel %vm655_vm0, %v1924_v19, %v654_v36  ;;  %v663_v62 = vsel %vm662_vm4, %v1953_v31, %v661_v33 }
  0xc4   :  { %951 = vadd.xlane.f32.xlu1 %v918_v42  ;;  %v858_v57 = vmul.f32 %v1295_v46, %v1627_v8  ;;  %1312 = vrcp.f32 %v825_v44  ;;  %v1297_v59 = vpop.eup %1296  ;;  %v245_v8 = vmul.f32 %v1291_v26, %v1955_v49  ;;  %vm253_vm10 = vcmp.eq.f32.partialorder %v1981_v3, inf }
  0xc5   :  { %v2061_v7 = vpop.xlane.xlu1 %559  ;;  %v1299_v50 = vpop.eup %1298  ;;  %1314 = vrsqrt.f32 %v2034_v54  ;;  %v256_v11 = vand.u32 2147483648, %v1981_v3  ;;  %v2141_v29 = vsel %vm657_vm2, %v658_v32, %v656_v9  ;;  %v2147_v47 = vsel %vm241_vm3, %v242_v6, %v240_v60 }
  0xc6   :  { %v2063_v10 = vpop.xlane.xlu0 %143  ;;  %v919_v23 = vmul.f32 %v858_v57, %v442_v58  ;;  %v1301_v0 = vpop.eup %1300  ;;  %vm255_vm11 = vcmp.eq.f32.partialorder %v1981_v3, 0.0  ;;  %1316 = vrsqrt.f32 %v2061_v7  ;;  %v668_v26 = vmul.f32 %v1297_v59, %v1979_v63 }
  0xc7   :  { %v1303_v14 = vpop.eup %1302  ;;  %v444_v48 = vmul.f32 %v1301_v0, %v1646_v13  ;;  %vm676_vm12 = vcmp.eq.f32.partialorder %v2006_v27, inf  ;;  %1318 = vrcp.f32 %v410_v34  ;;  %v2159_v22 = vsel %vm664_vm5, %v665_v15, %v663_v62 }
  0xc8   :  { %953 = vadd.xlane.f32.xlu0 %v919_v23  ;;  %v860_v19 = vmul.f32 %v1303_v14, %v1641_v12  ;;  %v1305_v32 = vpop.eup %1304  ;;  %v247_v13 = vsel %vm246_vm6, %v1955_v49, %v245_v8  ;;  %v252_v6 = vmul.f32 %v1299_v50, %v1981_v3  ;;  %1320 = vrcp.f32 %v826_v4 }
  0xc9   :  { %v2094_v43 = vpop.xlane.xlu1 %561  ;;  %v1307_v56 = vpop.eup %1306  ;;  %v829_v34 = vmax.f32 %v2141_v29, 1e-12  ;;  %v413_v31 = vmax.f32 %v2147_v47, 1e-12  ;;  %1322 = vrsqrt.f32 %v2063_v10  ;;  %vm678_vm13 = vcmp.eq.f32.partialorder %v2006_v27, 0.0 }
  0xca   :  { %v2096_v37 = vpop.xlane.xlu0 %145  ;;  %v920_v15 = vmul.f32 %v860_v19, %v444_v48  ;;  %v679_v5 = vand.u32 2147483648, %v2006_v27  ;;  %vm260_vm14 = vcmp.eq.f32.partialorder %v2008_v28, inf  ;;  %v263_v55 = vand.u32 2147483648, %v2008_v28 }
  0xcb   :  { %vm683_vm15 = vcmp.eq.f32.partialorder %v2032_v53, inf  ;;  %v830_v41 = vmax.f32 %v2159_v22, 1e-12  ;;  %v2182_v42 = vsel %vm248_vm7, %v249_v39, %v247_v13  ;;  %v670_v46 = vsel %vm669_vm8, %v1979_v63, %v668_v26  ;;  %v1501_v22 = vld [vmem:[%s3171_s1 + $0x38] sm:$0xff] }
  0xcc   :  { %v1309_v36 = vpop.eup %1308  ;;  %vm262_vm0 = vcmp.eq.f32.partialorder %v2008_v28, 0.0  ;;  %955 = vadd.xlane.f32.xlu1 %v920_v15  ;;  %1324 = vrsqrt.f32 %v2094_v43  ;;  %v254_v58 = vsel %vm253_vm10, %v1981_v3, %v252_v6  ;;  %v675_v57 = vmul.f32 %v1305_v32, %v2006_v27 }
  0xcd   :  { %v2126_v44 = vpop.xlane.xlu1 %563  ;;  %v1311_v4 = vpop.eup %1310  ;;  %1326 = vrcp.f32 %v411_v30  ;;  %v259_v9 = vmul.f32 %v1307_v56, %v2008_v28  ;;  %vm685_vm1 = vcmp.eq.f32.partialorder %v2032_v53, 0.0  ;;  %v686_v60 = vand.u32 2147483648, %v2032_v53 }
  0xce   :  { %v2128_v40 = vpop.xlane.xlu0 %147  ;;  %v1313_v33 = vpop.eup %1312  ;;  %v446_v49 = vmul.f32 %v1311_v4, %v1660_v17  ;;  %1328 = vrcp.f32 %v827_v2  ;;  %v414_v17 = vmax.f32 %v2182_v42, 1e-12  ;;  %v2211_v18 = vsel %vm671_vm9, %v672_v45, %v670_v46 }
  0xcf   :  { %v862_v50 = vmul.f32 %v1313_v33, %v1655_v16  ;;  %v1315_v8 = vpop.eup %1314  ;;  %vm267_vm2 = vcmp.eq.f32.partialorder %v2034_v54, inf  ;;  %1330 = vrsqrt.f32 %v2096_v37  ;;  %v2217_v30 = vsel %vm255_vm11, %v256_v11, %v254_v58 }
  0xd0   :  { %v682_v16 = vmul.f32 %v1309_v36, %v2032_v53  ;;  %vm269_vm3 = vcmp.eq.f32.partialorder %v2034_v54, 0.0  ;;  %1332 = vrsqrt.f32 %v2126_v44  ;;  %v1317_v2 = vpop.eup %1316  ;;  %v677_v63 = vsel %vm676_vm12, %v2006_v27, %v675_v57 }
  0xd1   :  { %v2167_v38 = vpop.xlane.xlu1 %565  ;;  %v921_v35 = vmul.f32 %v862_v50, %v446_v49  ;;  %v270_v45 = vand.u32 2147483648, %v2034_v54  ;;  %vm690_vm4 = vcmp.eq.f32.partialorder %v2061_v7, inf  ;;  %1334 = vrsqrt.f32 %v2128_v40  ;;  %v1319_v23 = vpop.eup %1318 }
  0xd2   :  { %v2169_v12 = vpop.xlane.xlu0 %149  ;;  %v831_v0 = vmax.f32 %v2211_v18, 1e-12  ;;  %v261_v62 = vsel %vm260_vm14, %v2008_v28, %v259_v9  ;;  %v266_v11 = vmul.f32 %v1315_v8, %v2034_v54  ;;  %1336 = vrcp.f32 %v412_v61  ;;  %v1321_v14 = vpop.eup %1320 }
  0xd3   :  { %957 = vadd.xlane.f32.xlu0 %v921_v35  ;;  %v415_v48 = vmax.f32 %v2217_v30, 1e-12  ;;  %v693_v26 = vand.u32 2147483648, %v2061_v7  ;;  %v448_v19 = vmul.f32 %v1319_v23, %v1674_v21  ;;  %1338 = vrcp.f32 %v828_v51  ;;  %v1323_v13 = vpop.eup %1322 }
  0xd4   :  { %v2246_v6 = vsel %vm678_vm13, %v679_v5, %v677_v63  ;;  %v684_v1 = vsel %vm683_vm15, %v2032_v53, %v682_v16  ;;  %vm274_vm5 = vcmp.eq.f32.partialorder %v2063_v10, inf  ;;  %v864_v61 = vmul.f32 %v1321_v14, %v1669_v20  ;;  %v1500_v63 = vld [vmem:[%s3170_s0 + $0x38] sm:$0xff] }
  0xd5   :  { %v2196_v39 = vpop.xlane.xlu1 %567  ;;  %v2255_v21 = vsel %vm262_vm0, %v263_v55, %v261_v62  ;;  %vm692_vm6 = vcmp.eq.f32.partialorder %v2061_v7, 0.0  ;;  %vm276_vm7 = vcmp.eq.f32.partialorder %v2063_v10, 0.0  ;;  %v277_v27 = vand.u32 2147483648, %v2063_v10 }
  0xd6   :  { %v2198_v59 = vpop.xlane.xlu0 %151  ;;  %1340 = vrsqrt.f32 %v2167_v38  ;;  %v1325_v52 = vpop.eup %1324  ;;  %v268_v51 = vsel %vm267_vm2, %v2034_v54, %v266_v11  ;;  %v689_v56 = vmul.f32 %v1317_v2, %v2061_v7  ;;  %v922_v20 = vmul.f32 %v864_v61, %v448_v19 }
  0xd7   :  { %1342 = vrsqrt.f32 %v2169_v12  ;;  %v1327_v28 = vpop.eup %1326  ;;  %v832_v15 = vmax.f32 %v2246_v6, 1e-12  ;;  %v2269_v36 = vsel %vm685_vm1, %v686_v60, %v684_v1  ;;  %v273_v5 = vmul.f32 %v1323_v13, %v2063_v10 }
  0xd8   :  { %1344 = vrcp.f32 %v413_v31  ;;  %v1329_v4 = vpop.eup %1328  ;;  %v416_v46 = vmax.f32 %v2255_v21, 1e-12  ;;  %959 = vadd.xlane.f32.xlu1 %v922_v20  ;;  %vm697_vm8 = vcmp.eq.f32.partialorder %v2094_v43, inf  ;;  %v450_v33 = vmul.f32 %v1327_v28, %v1688_v25  ;;  %v1502_v28 = vld [vmem:[%s3170_s0 + $0x40] sm:$0xff] }
  0xd9   :  { %v2228_v3 = vpop.xlane.xlu1 %569  ;;  %1346 = vrcp.f32 %v829_v34  ;;  %v1331_v53 = vpop.eup %1330  ;;  %v2283_v58 = vsel %vm269_vm3, %v270_v45, %v268_v51  ;;  %vm699_vm9 = vcmp.eq.f32.partialorder %v2094_v43, 0.0  ;;  %v700_v47 = vand.u32 2147483648, %v2094_v43 }
  0xda   :  { %v2242_v32 = vpop.xlane.xlu0 %153  ;;  %vm281_vm10 = vcmp.eq.f32.partialorder %v2096_v37, inf  ;;  %v866_v31 = vmul.f32 %v1329_v4, %v1683_v24  ;;  %v1333_v49 = vpop.eup %1332  ;;  %v833_v25 = vmax.f32 %v2269_v36, 1e-12  ;;  %v691_v29 = vsel %vm690_vm4, %v2061_v7, %v689_v56 }
  0xdb   :  { %vm283_vm11 = vcmp.eq.f32.partialorder %v2096_v37, 0.0  ;;  %v284_v54 = vand.u32 2147483648, %v2096_v37  ;;  %1348 = vrsqrt.f32 %v2196_v39  ;;  %v1335_v34 = vpop.eup %1334  ;;  %v275_v24 = vsel %vm274_vm5, %v2063_v10, %v273_v5 }
  0xdc   :  { %v696_v9 = vmul.f32 %v1325_v52, %v2094_v43  ;;  %v923_v60 = vmul.f32 %v866_v31, %v450_v33  ;;  %1350 = vrsqrt.f32 %v2198_v59  ;;  %v1337_v50 = vpop.eup %1336  ;;  %v417_v8 = vmax.f32 %v2283_v58, 1e-12 }
  0xdd   :  { %v2274_v55 = vpop.xlane.xlu1 %571  ;;  %v280_v16 = vmul.f32 %v1331_v53, %v2096_v37  ;;  %vm704_vm12 = vcmp.eq.f32.partialorder %v2126_v44, inf  ;;  %1352 = vrcp.f32 %v414_v17  ;;  %v1339_v35 = vpop.eup %1338  ;;  %vm706_vm13 = vcmp.eq.f32.partialorder %v2126_v44, 0.0 }
  0xde   :  { %v2289_v57 = vpop.xlane.xlu0 %155  ;;  %961 = vadd.xlane.f32.xlu0 %v923_v60  ;;  %v707_v2 = vand.u32 2147483648, %v2126_v44  ;;  %vm288_vm14 = vcmp.eq.f32.partialorder %v2128_v40, inf  ;;  %v452_v45 = vmul.f32 %v1500_v63, %v1337_v50  ;;  %1354 = vrcp.f32 %v830_v41  ;;  %v1505_v63 = vld [vmem:[%s3171_s1 + $0x48] sm:$0xff] }
  0xdf   :  { %v2322_v42 = vsel %vm692_vm6, %v693_v26, %v691_v29  ;;  %v2326_v17 = vsel %vm276_vm7, %v277_v27, %v275_v24  ;;  %vm290_vm15 = vcmp.eq.f32.partialorder %v2128_v40, 0.0  ;;  %v291_v62 = vand.u32 2147483648, %v2128_v40 }
  0xe0   :  { %v868_v41 = vmul.f32 %v1501_v22, %v1339_v35  ;;  %v1341_v11 = vpop.eup %1340  ;;  %v698_v7 = vsel %vm697_vm8, %v2094_v43, %v696_v9  ;;  %v703_v14 = vmul.f32 %v1333_v49, %v2126_v44  ;;  %vm711_vm0 = vcmp.eq.f32.partialorder %v2167_v38, inf }
  0xe1   :  { %v2316_v23 = vpop.xlane.xlu1 %573  ;;  %1356 = vrsqrt.f32 %v2228_v3  ;;  %v1343_v26 = vpop.eup %1342  ;;  %v282_v19 = vsel %vm281_vm10, %v2096_v37, %v280_v16  ;;  %v287_v13 = vmul.f32 %v1335_v34, %v2128_v40  ;;  %v834_v27 = vmax.f32 %v2322_v42, 1e-12 }
  0xe2   :  { %v2339_v10 = vpop.xlane.xlu0 %157  ;;  %v924_v1 = vmul.f32 %v868_v41, %v452_v45  ;;  %1358 = vrsqrt.f32 %v2242_v32  ;;  %v1345_v61 = vpop.eup %1344  ;;  %v418_v52 = vmax.f32 %v2326_v17, 1e-12  ;;  %v714_v51 = vand.u32 2147483648, %v2167_v38 }
  0xe3   :  { %1360 = vrcp.f32 %v415_v48  ;;  %v1347_v56 = vpop.eup %1346  ;;  %v2353_v20 = vsel %vm699_vm9, %v700_v47, %v698_v7  ;;  %vm713_vm1 = vcmp.eq.f32.partialorder %v2167_v38, 0.0  ;;  %vm295_vm2 = vcmp.eq.f32.partialorder %v2169_v12, inf  ;;  %v1503_v48 = vld [vmem:[%s3171_s1 + $0x40] sm:$0xff] }
  0xe4   :  { %963 = vadd.xlane.f32.xlu1 %v924_v1  ;;  %v454_v5 = vmul.f32 %v1502_v28, %v1345_v61  ;;  %1362 = vrcp.f32 %v831_v0  ;;  %v2364_v30 = vsel %vm283_vm11, %v284_v54, %v282_v19  ;;  %v705_v43 = vsel %vm704_vm12, %v2126_v44, %v703_v14  ;;  %v1504_v44 = vld [vmem:[%s3170_s0 + $0x48] sm:$0xff]  ;;  %v1507_v28 = vld [vmem:[%s3171_s1 + $0x50] sm:$0xff] }
  0xe5   :  { %vm297_vm3 = vcmp.eq.f32.partialorder %v2169_v12, 0.0  ;;  %v870_v4 = vmul.f32 %v1503_v48, %v1347_v56  ;;  %v2373_v33 = vpop.xlane.xlu1 %575  ;;  %v1349_v53 = vpop.eup %1348  ;;  %v289_v37 = vsel %vm288_vm14, %v2128_v40, %v287_v13  ;;  %v710_v18 = vmul.f32 %v1341_v11, %v2167_v38 }
  0xe6   :  { %v294_v0 = vmul.f32 %v1343_v26, %v2169_v12  ;;  %1364 = vrsqrt.f32 %v2274_v55  ;;  %v1351_v47 = vpop.eup %1350  ;;  %v835_v31 = vmax.f32 %v2353_v20, 1e-12  ;;  %v298_v49 = vand.u32 2147483648, %v2169_v12  ;;  %v2384_v54 = vpop.xlane.xlu0 %159 }
  0xe7   :  { %v925_v29 = vmul.f32 %v870_v4, %v454_v5  ;;  %vm718_vm4 = vcmp.eq.f32.partialorder %v2196_v39, inf  ;;  %v1353_v34 = vpop.eup %1352  ;;  %v419_v24 = vmax.f32 %v2364_v30, 1e-12  ;;  %v2389_v9 = vsel %vm706_vm13, %v707_v2, %v705_v43 }
  0xe8   :  { %v721_v60 = vand.u32 2147483648, %v2196_v39  ;;  %1366 = vrsqrt.f32 %v2289_v57  ;;  %v1355_v50 = vpop.eup %1354  ;;  %v2395_v16 = vsel %vm290_vm15, %v291_v62, %v289_v37  ;;  %vm720_vm5 = vcmp.eq.f32.partialorder %v2196_v39, 0.0 }
  0xe9   :  { %965 = vadd.xlane.f32.xlu0 %v925_v29  ;;  %vm302_vm6 = vcmp.eq.f32.partialorder %v2198_v59, inf  ;;  %v456_v35 = vmul.f32 %v1504_v44, %v1353_v34  ;;  %1368 = vrcp.f32 %v416_v46  ;;  %v712_v2 = vsel %vm711_vm0, %v2167_v38, %v710_v18  ;;  %v2420_v41 = vpop.xlane.xlu1 %577  ;;  %v1506_v38 = vld [vmem:[%s3170_s0 + $0x50] sm:$0xff] }
  0xea   :  { %v296_v40 = vsel %vm295_vm2, %v2169_v12, %v294_v0  ;;  %vm304_vm7 = vcmp.eq.f32.partialorder %v2198_v59, 0.0  ;;  %v872_v45 = vmul.f32 %v1505_v63, %v1355_v50  ;;  %1370 = vrcp.f32 %v832_v15  ;;  %v2435_v13 = vpop.xlane.xlu0 %161 }
  0xeb   :  { %v1357_v21 = vpop.eup %1356  ;;  %v836_v46 = vmax.f32 %v2389_v9, 1e-12  ;;  %v717_v62 = vmul.f32 %v1349_v53, %v2196_v39  ;;  %v305_v22 = vand.u32 2147483648, %v2198_v59  ;;  %vm725_vm8 = vcmp.eq.f32.partialorder %v2228_v3, inf }
  0xec   :  { %v1359_v11 = vpop.eup %1358  ;;  %v420_v7 = vmax.f32 %v2395_v16, 1e-12  ;;  %v301_v14 = vmul.f32 %v1351_v47, %v2198_v59  ;;  %v926_v26 = vmul.f32 %v872_v45, %v456_v35  ;;  %1372 = vrsqrt.f32 %v2316_v23  ;;  %v1509_v35 = vld [vmem:[%s3171_s1 + $0x58] sm:$0xff] }
  0xed   :  { %v1361_v6 = vpop.eup %1360  ;;  %v2427_v15 = vsel %vm713_vm1, %v714_v51, %v712_v2  ;;  %v2431_v19 = vsel %vm297_vm3, %v298_v49, %v296_v40  ;;  %vm727_vm9 = vcmp.eq.f32.partialorder %v2228_v3, 0.0  ;;  %1374 = vrsqrt.f32 %v2339_v10  ;;  %v2463_v36 = vpop.xlane.xlu1 %579 }
  0xee   :  { %v1363_v1 = vpop.eup %1362  ;;  %967 = vadd.xlane.f32.xlu1 %v926_v26  ;;  %v728_v61 = vand.u32 2147483648, %v2228_v3  ;;  %vm309_vm10 = vcmp.eq.f32.partialorder %v2242_v32, inf  ;;  %v458_v51 = vmul.f32 %v1506_v38, %v1361_v6  ;;  %1376 = vrcp.f32 %v417_v8  ;;  %v2482_v34 = vpop.xlane.xlu0 %163 }
  0xef   :  { %v719_v12 = vsel %vm718_vm4, %v2196_v39, %v717_v62  ;;  %v724_v56 = vmul.f32 %v1357_v21, %v2228_v3  ;;  %vm311_vm11 = vcmp.eq.f32.partialorder %v2242_v32, 0.0  ;;  %v874_v5 = vmul.f32 %v1507_v28, %v1363_v1 }
  0xf0   :  { %1378 = vrcp.f32 %v833_v25  ;;  %v1365_v43 = vpop.eup %1364  ;;  %v837_v58 = vmax.f32 %v2427_v15, 1e-12  ;;  %v421_v8 = vmax.f32 %v2431_v19, 1e-12  ;;  %v303_v48 = vsel %vm302_vm6, %v2198_v59, %v301_v14  ;;  %v1508_v59 = vld [vmem:[%s3170_s0 + $0x58] sm:$0xff] }
  0xf1   :  { %v312_v4 = vand.u32 2147483648, %v2242_v32  ;;  %v308_v53 = vmul.f32 %v1359_v11, %v2242_v32  ;;  %v927_v37 = vmul.f32 %v874_v5, %v458_v51  ;;  %vm732_vm12 = vcmp.eq.f32.partialorder %v2274_v55, inf }
  0xf2   :  { %1380 = vrsqrt.f32 %v2373_v33  ;;  %v1367_v25 = vpop.eup %1366  ;;  %v2467_v18 = vsel %vm720_vm5, %v721_v60, %v719_v12  ;;  %vm734_vm13 = vcmp.eq.f32.partialorder %v2274_v55, 0.0  ;;  %v735_v0 = vand.u32 2147483648, %v2274_v55  ;;  %v2530_v38 = vpop.xlane.xlu0 %165  ;;  %v1511_v12 = vld [vmem:[%s3171_s1 + $0x60] sm:$0xff] }
  0xf3   :  { %1382 = vrsqrt.f32 %v2384_v54  ;;  %v1369_v47 = vpop.eup %1368  ;;  %v2474_v49 = vsel %vm304_vm7, %v305_v22, %v303_v48  ;;  %v726_v29 = vsel %vm725_vm8, %v2228_v3, %v724_v56  ;;  %969 = vadd.xlane.f32.xlu0 %v927_v37  ;;  %v731_v39 = vmul.f32 %v1365_v43, %v2274_v55  ;;  %v2511_v22 = vpop.xlane.xlu1 %581 }
  0xf4   :  { %1384 = vrcp.f32 %v418_v52  ;;  %v1371_v60 = vpop.eup %1370  ;;  %vm316_vm14 = vcmp.eq.f32.partialorder %v2289_v57, inf  ;;  %vm318_vm15 = vcmp.eq.f32.partialorder %v2289_v57, 0.0  ;;  %v460_v50 = vmul.f32 %v1508_v59, %v1369_v47 }
  0xf5   :  { %1386 = vrcp.f32 %v834_v27  ;;  %v838_v44 = vmax.f32 %v2467_v18, 1e-12  ;;  %v310_v17 = vsel %vm309_vm10, %v2242_v32, %v308_v53  ;;  %v319_v52 = vand.u32 2147483648, %v2289_v57  ;;  %v1510_v32 = vld [vmem:[%s3170_s0 + $0x60] sm:$0xff] }
  0xf6   :  { %v876_v2 = vmul.f32 %v1509_v35, %v1371_v60  ;;  %v1373_v40 = vpop.eup %1372  ;;  %v422_v63 = vmax.f32 %v2474_v49, 1e-12  ;;  %v2502_v42 = vsel %vm727_vm9, %v728_v61, %v726_v29  ;;  %v315_v27 = vmul.f32 %v1367_v25, %v2289_v57 }
  0xf7   :  { %1388 = vrsqrt.f32 %v2420_v41  ;;  %v1375_v45 = vpop.eup %1374  ;;  %v733_v21 = vsel %vm732_vm12, %v2274_v55, %v731_v39  ;;  %vm739_vm0 = vcmp.eq.f32.partialorder %v2316_v23, inf  ;;  %v2515_v3 = vsel %vm311_vm11, %v312_v4, %v310_v17  ;;  %v2558_v25 = vpop.xlane.xlu1 %583 }
  0xf8   :  { %v928_v62 = vmul.f32 %v876_v2, %v460_v50  ;;  %1390 = vrsqrt.f32 %v2435_v13  ;;  %v1377_v11 = vpop.eup %1376  ;;  %vm741_vm1 = vcmp.eq.f32.partialorder %v2316_v23, 0.0  ;;  %v742_v14 = vand.u32 2147483648, %v2316_v23  ;;  %v1513_v50 = vld [vmem:[%s3171_s1 + $0x68] sm:$0xff] }
  0xf9   :  { %vm323_vm2 = vcmp.eq.f32.partialorder %v2339_v10, inf  ;;  %1392 = vrcp.f32 %v419_v24  ;;  %v839_v6 = vmax.f32 %v2502_v42, 1e-12  ;;  %vm325_vm3 = vcmp.eq.f32.partialorder %v2339_v10, 0.0 }
  0xfa   :  { %v1379_v26 = vpop.eup %1378  ;;  %971 = vadd.xlane.f32.xlu1 %v928_v62  ;;  %v326_v1 = vand.u32 2147483648, %v2339_v10  ;;  %v462_v61 = vmul.f32 %v1510_v32, %v1377_v11  ;;  %1394 = vrcp.f32 %v835_v31  ;;  %v2534_v30 = vsel %vm734_vm13, %v735_v0, %v733_v21 }
  0xfb   :  { %v317_v24 = vsel %vm316_vm14, %v2289_v57, %v315_v27  ;;  %v738_v51 = vmul.f32 %v1373_v40, %v2316_v23  ;;  %v878_v56 = vmul.f32 %v1511_v12, %v1379_v26  ;;  %v423_v20 = vmax.f32 %v2515_v3, 1e-12  ;;  %v1512_v57 = vld [vmem:[%s3170_s0 + $0x68] sm:$0xff]  ;;  %v2609_v26 = vpop.xlane.xlu1 %585 }
  0xfc   :  { %v1381_v28 = vpop.eup %1380  ;;  %v322_v31 = vmul.f32 %v1375_v45, %v2339_v10  ;;  %vm746_vm4 = vcmp.eq.f32.partialorder %v2373_v33, inf  ;;  %1396 = vrsqrt.f32 %v2463_v36  ;;  %v749_v43 = vand.u32 2147483648, %v2373_v33 }
  0xfd   :  { %v1383_v55 = vpop.eup %1382  ;;  %v929_v5 = vmul.f32 %v878_v56, %v462_v61  ;;  %vm330_vm5 = vcmp.eq.f32.partialorder %v2384_v54, inf  ;;  %1398 = vrsqrt.f32 %v2482_v34  ;;  %v840_v4 = vmax.f32 %v2534_v30, 1e-12  ;;  %v1515_v61 = vld [vmem:[%s3171_s1 + $0x70] sm:$0xff] }
  0xfe   :  { %v1385_v48 = vpop.eup %1384  ;;  %v2553_v53 = vsel %vm318_vm15, %v319_v52, %v317_v24  ;;  %vm748_vm6 = vcmp.eq.f32.partialorder %v2373_v33, 0.0  ;;  %vm332_vm7 = vcmp.eq.f32.partialorder %v2384_v54, 0.0  ;;  %v333_v37 = vand.u32 2147483648, %v2384_v54  ;;  %v2578_v52 = vpop.xlane.xlu0 %167 }
  0xff   :  { %v1387_v0 = vpop.eup %1386  ;;  %v740_v47 = vsel %vm739_vm0, %v2316_v23, %v738_v51  ;;  %973 = vadd.xlane.f32.xlu0 %v929_v5  ;;  %v745_v29 = vmul.f32 %v1381_v28, %v2373_v33  ;;  %v464_v39 = vmul.f32 %v1512_v57, %v1385_v48  ;;  %1400 = vrcp.f32 %v420_v7  ;;  %v2655_v57 = vpop.xlane.xlu1 %587 }
 0x100   :  { %v324_v60 = vsel %vm323_vm2, %v2339_v10, %v322_v31  ;;  %v329_v59 = vmul.f32 %v1383_v55, %v2384_v54  ;;  %v880_v17 = vmul.f32 %v1513_v50, %v1387_v0  ;;  %1402 = vrcp.f32 %v836_v46  ;;  %v1514_v10 = vld [vmem:[%s3170_s0 + $0x70] sm:$0xff] }
 0x101   :  { %v1389_v35 = vpop.eup %1388  ;;  %v424_v16 = vmax.f32 %v2553_v53, 1e-12  ;;  %vm753_vm8 = vcmp.eq.f32.partialorder %v2420_v41, inf  ;;  %v756_v7 = vand.u32 2147483648, %v2420_v41  ;;  %1404 = vrsqrt.f32 %v2511_v22 }
 0x102   :  { %v1391_v2 = vpop.eup %1390  ;;  %v2586_v40 = vsel %vm741_vm1, %v742_v14, %v740_v47  ;;  %v930_v27 = vmul.f32 %v880_v17, %v464_v39  ;;  %vm755_vm9 = vcmp.eq.f32.partialorder %v2420_v41, 0.0  ;;  %vm337_vm10 = vcmp.eq.f32.partialorder %v2435_v13, inf  ;;  %v1516_v47 = vld [vmem:[%s3170_s0 + $0x78] sm:$0xff] }
 0x103   :  { %1406 = vrsqrt.f32 %v2530_v38  ;;  %v1393_v9 = vpop.eup %1392  ;;  %v2593_v46 = vsel %vm325_vm3, %v326_v1, %v324_v60  ;;  %v747_v45 = vsel %vm746_vm4, %v2373_v33, %v745_v29  ;;  %vm339_vm11 = vcmp.eq.f32.partialorder %v2435_v13, 0.0 }
 0x104   :  { %v340_v23 = vand.u32 2147483648, %v2435_v13  ;;  %v1395_v21 = vpop.eup %1394  ;;  %v331_v62 = vsel %vm330_vm5, %v2384_v54, %v329_v59  ;;  %975 = vadd.xlane.f32.xlu1 %v930_v27  ;;  %v752_v11 = vmul.f32 %v1389_v35, %v2420_v41  ;;  %v466_v14 = vmul.f32 %v1514_v10, %v1393_v9 }
 0x105   :  { %1408 = vrcp.f32 %v421_v8  ;;  %v841_v1 = vmax.f32 %v2586_v40, 1e-12  ;;  %v336_v32 = vmul.f32 %v1391_v2, %v2435_v13  ;;  %v882_v24 = vmul.f32 %v1515_v61, %v1395_v21  ;;  %v2622_v8 = vpop.xlane.xlu0 %169  ;;  %v1518_v21 = vld [vmem:[%s3170_s0 + $0x80] sm:$0xff] }
 0x106   :  { %1410 = vrcp.f32 %v837_v58  ;;  %v1397_v51 = vpop.eup %1396  ;;  %v425_v12 = vmax.f32 %v2593_v46, 1e-12  ;;  %vm760_vm12 = vcmp.eq.f32.partialorder %v2463_v36, inf  ;;  %v763_v19 = vand.u32 2147483648, %v2463_v36 }
 0x107   :  { %1412 = vrsqrt.f32 %v2558_v25  ;;  %v1399_v56 = vpop.eup %1398  ;;  %v2626_v28 = vsel %vm748_vm6, %v749_v43, %v747_v45  ;;  %v2630_v15 = vsel %vm332_vm7, %v333_v37, %v331_v62  ;;  %v931_v58 = vmul.f32 %v882_v24, %v466_v14 }
 0x108   :  { %vm762_vm13 = vcmp.eq.f32.partialorder %v2463_v36, 0.0  ;;  %vm344_vm14 = vcmp.eq.f32.partialorder %v2482_v34, inf  ;;  %v754_v31 = vsel %vm753_vm8, %v2420_v41, %v752_v11  ;;  %vm346_vm15 = vcmp.eq.f32.partialorder %v2482_v34, 0.0 }
 0x109   :  { %v347_v55 = vand.u32 2147483648, %v2482_v34  ;;  %1414 = vrsqrt.f32 %v2578_v52  ;;  %v1401_v33 = vpop.eup %1400  ;;  %v338_v54 = vsel %vm337_vm10, %v2435_v13, %v336_v32  ;;  %977 = vadd.xlane.f32.xlu0 %v931_v58  ;;  %v759_v5 = vmul.f32 %v1397_v51, %v2463_v36  ;;  %v2707_v32 = vpop.xlane.xlu1 %589 }
 0x10a   :  { %v343_v43 = vmul.f32 %v1399_v56, %v2482_v34  ;;  %vm767_vm0 = vcmp.eq.f32.partialorder %v2511_v22, inf  ;;  %1416 = vrcp.f32 %v422_v63  ;;  %v1403_v48 = vpop.eup %1402  ;;  %v842_v37 = vmax.f32 %v2626_v28, 1e-12  ;;  %v1517_v63 = vld [vmem:[%s3171_s1 + $0x78] sm:$0xff] }
 0x10b   :  { %v426_v0 = vmax.f32 %v2630_v15, 1e-12  ;;  %v468_v29 = vmul.f32 %v1516_v47, %v1401_v33  ;;  %1418 = vrcp.f32 %v838_v44  ;;  %v1405_v39 = vpop.eup %1404  ;;  %v2659_v49 = vsel %vm755_vm9, %v756_v7, %v754_v31  ;;  %v2674_v44 = vpop.xlane.xlu0 %171 }
 0x10c   :  { %v884_v60 = vmul.f32 %v1517_v63, %v1403_v48  ;;  %v770_v59 = vand.u32 2147483648, %v2511_v22  ;;  %1420 = vrsqrt.f32 %v2609_v26  ;;  %v2668_v18 = vsel %vm339_vm11, %v340_v23, %v338_v54  ;;  %v1520_v54 = vld [vmem:[%s3170_s0 + $0x88] sm:$0xff] }
 0x10d   :  { %v1407_v50 = vpop.eup %1406  ;;  %vm769_vm1 = vcmp.eq.f32.partialorder %v2511_v22, 0.0  ;;  %vm351_vm2 = vcmp.eq.f32.partialorder %v2530_v38, inf  ;;  %vm353_vm3 = vcmp.eq.f32.partialorder %v2530_v38, 0.0  ;;  %v354_v41 = vand.u32 2147483648, %v2530_v38 }
 0x10e   :  { %v761_v17 = vsel %vm760_vm12, %v2463_v36, %v759_v5  ;;  %v345_v13 = vsel %vm344_vm14, %v2482_v34, %v343_v43  ;;  %v932_v35 = vmul.f32 %v884_v60, %v468_v29  ;;  %1422 = vrsqrt.f32 %v2622_v8 }
 0x10f   :  { %v1409_v7 = vpop.eup %1408  ;;  %v843_v2 = vmax.f32 %v2659_v49, 1e-12  ;;  %v766_v27 = vmul.f32 %v1405_v39, %v2511_v22  ;;  %v350_v9 = vmul.f32 %v1407_v50, %v2530_v38  ;;  %1424 = vrcp.f32 %v423_v20  ;;  %v1519_v20 = vld [vmem:[%s3171_s1 + $0x80] sm:$0xff]  ;;  %v2721_v51 = vpop.xlane.xlu0 %173  ;;  %v1521_v39 = vld [vmem:[%s3171_s1 + $0x88] sm:$0xff] }
 0x110   :  { %v1411_v45 = vpop.eup %1410  ;;  %v427_v23 = vmax.f32 %v2668_v18, 1e-12  ;;  %979 = vadd.xlane.f32.xlu1 %v932_v35  ;;  %v470_v62 = vmul.f32 %v1518_v21, %v1409_v7  ;;  %vm774_vm4 = vcmp.eq.f32.partialorder %v2558_v25, inf  ;;  %1426 = vrcp.f32 %v839_v6  ;;  %v1522_v7 = vld [vmem:[%s3170_s0 + $0x90] sm:$0xff] }
 0x111   :  { %v1413_v11 = vpop.eup %1412  ;;  %v2697_v10 = vsel %vm762_vm13, %v763_v19, %v761_v17  ;;  %v2701_v3 = vsel %vm346_vm15, %v347_v55, %v345_v13  ;;  %v886_v14 = vmul.f32 %v1519_v20, %v1411_v45  ;;  %1428 = vrsqrt.f32 %v2655_v57 }
 0x112   :  { %vm776_vm5 = vcmp.eq.f32.partialorder %v2558_v25, 0.0  ;;  %v777_v42 = vand.u32 2147483648, %v2558_v25  ;;  %vm358_vm6 = vcmp.eq.f32.partialorder %v2578_v52, inf  ;;  %v361_v36 = vand.u32 2147483648, %v2578_v52 }
 0x113   :  { %v1415_v34 = vpop.eup %1414  ;;  %v768_v6 = vsel %vm767_vm0, %v2511_v22, %v766_v27  ;;  %v352_v61 = vsel %vm351_vm2, %v2530_v38, %v350_v9  ;;  %v933_v24 = vmul.f32 %v886_v14, %v470_v62  ;;  %vm360_vm7 = vcmp.eq.f32.partialorder %v2578_v52, 0.0  ;;  %v2752_v38 = vpop.xlane.xlu1 %591  ;;  %v1523_v62 = vld [vmem:[%s3171_s1 + $0x90] sm:$0xff] }
 0x114   :  { %1430 = vrsqrt.f32 %v2674_v44  ;;  %v1417_v19 = vpop.eup %1416  ;;  %v844_v56 = vmax.f32 %v2697_v10, 1e-12  ;;  %v428_v58 = vmax.f32 %v2701_v3, 1e-12  ;;  %v773_v31 = vmul.f32 %v1413_v11, %v2558_v25  ;;  %v2765_v13 = vpop.xlane.xlu0 %175 }
 0x115   :  { %vm781_vm8 = vcmp.eq.f32.partialorder %v2609_v26, inf  ;;  %v1419_v55 = vpop.eup %1418  ;;  %981 = vadd.xlane.f32.xlu0 %v933_v24  ;;  %v357_v33 = vmul.f32 %v1415_v34, %v2578_v52  ;;  %v472_v5 = vmul.f32 %v1520_v54, %v1417_v19  ;;  %v784_v43 = vand.u32 2147483648, %v2609_v26 }
 0x116   :  { %1432 = vrcp.f32 %v424_v16  ;;  %v1421_v48 = vpop.eup %1420  ;;  %v2736_v47 = vsel %vm769_vm1, %v770_v59, %v768_v6  ;;  %v2740_v29 = vsel %vm353_vm3, %v354_v41, %v352_v61  ;;  %v888_v63 = vmul.f32 %v1521_v39, %v1419_v55 }
 0x117   :  { %vm783_vm9 = vcmp.eq.f32.partialorder %v2609_v26, 0.0  ;;  %1434 = vrcp.f32 %v840_v4  ;;  %vm365_vm10 = vcmp.eq.f32.partialorder %v2622_v8, inf  ;;  %vm367_vm11 = vcmp.eq.f32.partialorder %v2622_v8, 0.0 }
 0x118   :  { %v368_v22 = vand.u32 2147483648, %v2622_v8  ;;  %1436 = vrsqrt.f32 %v2707_v32  ;;  %v1423_v53 = vpop.eup %1422  ;;  %v775_v16 = vsel %vm774_vm4, %v2558_v25, %v773_v31  ;;  %v934_v60 = vmul.f32 %v888_v63, %v472_v5  ;;  %v2814_v19 = vpop.xlane.xlu0 %177 }
 0x119   :  { %v780_v59 = vmul.f32 %v1421_v48, %v2609_v26  ;;  %1438 = vrsqrt.f32 %v2721_v51  ;;  %v1425_v30 = vpop.eup %1424  ;;  %v845_v4 = vmax.f32 %v2736_v47, 1e-12  ;;  %v429_v50 = vmax.f32 %v2740_v29, 1e-12 }
 0x11a   :  { %v359_v41 = vsel %vm358_vm6, %v2578_v52, %v357_v33  ;;  %v364_v17 = vmul.f32 %v1423_v53, %v2622_v8  ;;  %v1427_v35 = vpop.eup %1426  ;;  %983 = vadd.xlane.f32.xlu1 %v934_v60  ;;  %v474_v27 = vmul.f32 %v1522_v7, %v1425_v30  ;;  %vm788_vm12 = vcmp.eq.f32.partialorder %v2655_v57, inf  ;;  %v1527_v7 = vld [vmem:[%s3171_s1 + $0xa0] sm:$0xff] }
 0x11b   :  { %v791_v9 = vand.u32 2147483648, %v2655_v57  ;;  %1440 = vrcp.f32 %v425_v12  ;;  %v1429_v45 = vpop.eup %1428  ;;  %v2776_v21 = vsel %vm776_vm5, %v777_v42, %v775_v16  ;;  %v890_v11 = vmul.f32 %v1523_v62, %v1427_v35 }
 0x11c   :  { %vm790_vm13 = vcmp.eq.f32.partialorder %v2655_v57, 0.0  ;;  %vm372_vm14 = vcmp.eq.f32.partialorder %v2674_v44, inf  ;;  %1442 = vrcp.f32 %v841_v1  ;;  %v2787_v46 = vsel %vm360_vm7, %v361_v36, %v359_v41  ;;  %v2799_v1 = vpop.xlane.xlu1 %593  ;;  %v2868_v18 = vpop.xlane.xlu0 %179 }
 0x11d   :  { %v782_v25 = vsel %vm781_vm8, %v2609_v26, %v780_v59  ;;  %vm374_vm15 = vcmp.eq.f32.partialorder %v2674_v44, 0.0  ;;  %1444 = vrsqrt.f32 %v2752_v38  ;;  %v366_v20 = vsel %vm365_vm10, %v2622_v8, %v364_v17  ;;  %v1524_v26 = vld [vmem:[%s3170_s0 + $0x98] sm:$0xff] }
 0x11e   :  { %v1431_v12 = vpop.eup %1430  ;;  %v935_v14 = vmul.f32 %v890_v11, %v474_v27  ;;  %v787_v40 = vmul.f32 %v1429_v45, %v2655_v57  ;;  %v375_v52 = vand.u32 2147483648, %v2674_v44  ;;  %v846_v42 = vmax.f32 %v2776_v21, 1e-12 }
 0x11f   :  { %v371_v36 = vmul.f32 %v1431_v12, %v2674_v44  ;;  %vm795_vm0 = vcmp.eq.f32.partialorder %v2707_v32, inf  ;;  %1446 = vrsqrt.f32 %v2765_v13  ;;  %v430_v6 = vmax.f32 %v2787_v46, 1e-12 }
 0x120   :  { %v1433_v34 = vpop.eup %1432  ;;  %v2808_v61 = vsel %vm783_vm9, %v784_v43, %v782_v25  ;;  %985 = vadd.xlane.f32.xlu0 %v935_v14  ;;  %vm797_vm1 = vcmp.eq.f32.partialorder %v2707_v32, 0.0  ;;  %v798_v24 = vand.u32 2147483648, %v2707_v32  ;;  %1448 = vrcp.f32 %v426_v0  ;;  %v1525_v0 = vld [vmem:[%s3171_s1 + $0x98] sm:$0xff]  ;;  %v2843_v53 = vpop.xlane.xlu1 %595 }
 0x121   :  { %v1435_v31 = vpop.eup %1434  ;;  %v2818_v55 = vsel %vm367_vm11, %v368_v22, %v366_v20  ;;  %v476_v33 = vmul.f32 %v1524_v26, %v1433_v34  ;;  %vm379_vm2 = vcmp.eq.f32.partialorder %v2721_v51, inf  ;;  %1450 = vrcp.f32 %v842_v37  ;;  %v1529_v26 = vld [vmem:[%s3171_s1 + $0xa8] sm:$0xff] }
 0x122   :  { %v1437_v54 = vpop.eup %1436  ;;  %v789_v15 = vsel %vm788_vm12, %v2655_v57, %v787_v40  ;;  %v373_v8 = vsel %vm372_vm14, %v2674_v44, %v371_v36  ;;  %v892_v5 = vmul.f32 %v1525_v0, %v1435_v31  ;;  %1452 = vrsqrt.f32 %v2799_v1  ;;  %v1526_v44 = vld [vmem:[%s3170_s0 + $0xa0] sm:$0xff] }
 0x123   :  { %v1439_v43 = vpop.eup %1438  ;;  %v847_v28 = vmax.f32 %v2808_v61, 1e-12  ;;  %v794_v37 = vmul.f32 %v1437_v54, %v2707_v32  ;;  %vm381_vm3 = vcmp.eq.f32.partialorder %v2721_v51, 0.0  ;;  %v382_v48 = vand.u32 2147483648, %v2721_v51 }
 0x124   :  { %v431_v39 = vmax.f32 %v2818_v55, 1e-12  ;;  %v936_v63 = vmul.f32 %v892_v5, %v476_v33  ;;  %v378_v22 = vmul.f32 %v1439_v43, %v2721_v51  ;;  %1454 = vrsqrt.f32 %v2814_v19 }
 0x125   :  { %v1441_v16 = vpop.eup %1440  ;;  %v2847_v60 = vsel %vm790_vm13, %v791_v9, %v789_v15  ;;  %v2851_v59 = vsel %vm374_vm15, %v375_v52, %v373_v8  ;;  %vm802_vm4 = vcmp.eq.f32.partialorder %v2752_v38, inf  ;;  %v805_v30 = vand.u32 2147483648, %v2752_v38 }
 0x126   :  { %1456 = vrcp.f32 %v427_v23  ;;  %v1443_v41 = vpop.eup %1442  ;;  %987 = vadd.xlane.f32.xlu1 %v936_v63  ;;  %v796_v17 = vsel %vm795_vm0, %v2707_v32, %v794_v37  ;;  %v380_v57 = vsel %vm379_vm2, %v2721_v51, %v378_v22  ;;  %v478_v35 = vmul.f32 %v1526_v44, %v1441_v16  ;;  %v1528_v51 = vld [vmem:[%s3170_s0 + $0xa8] sm:$0xff]  ;;  %v1533_v44 = vld [vmem:[%s3171_s1 + $0xb8] sm:$0xff] }
 0x127   :  { %1458 = vrcp.f32 %v843_v2  ;;  %v1445_v23 = vpop.eup %1444  ;;  %v894_v27 = vmul.f32 %v1527_v7, %v1443_v41  ;;  %vm386_vm5 = vcmp.eq.f32.partialorder %v2765_v13, inf  ;;  %vm388_vm6 = vcmp.eq.f32.partialorder %v2765_v13, 0.0 }
 0x128   :  { %1460 = vrsqrt.f32 %v2843_v53  ;;  %v848_v9 = vmax.f32 %v2847_v60, 1e-12  ;;  %v432_v45 = vmax.f32 %v2851_v59, 1e-12  ;;  %vm804_vm7 = vcmp.eq.f32.partialorder %v2752_v38, 0.0  ;;  %v1532_v60 = vld [vmem:[%s3170_s0 + $0xb8] sm:$0xff] }
 0x129   :  { %v389_v49 = vand.u32 2147483648, %v2765_v13  ;;  %vm809_vm8 = vcmp.eq.f32.partialorder %v2799_v1, inf  ;;  %v1447_v2 = vpop.eup %1446  ;;  %v2883_v62 = vsel %vm797_vm1, %v798_v24, %v796_v17  ;;  %v2887_v11 = vsel %vm381_vm3, %v382_v48, %v380_v57 }
 0x12a   :  { %v937_v25 = vmul.f32 %v894_v27, %v478_v35  ;;  %1462 = vrsqrt.f32 %v2868_v18  ;;  %v1449_v12 = vpop.eup %1448  ;;  %v801_v20 = vmul.f32 %v1445_v23, %v2752_v38  ;;  %v385_v14 = vmul.f32 %v1447_v2, %v2765_v13 }
 0x12b   :  { %vm811_vm9 = vcmp.eq.f32.partialorder %v2799_v1, 0.0  ;;  %v812_v40 = vand.u32 2147483648, %v2799_v1  ;;  %vm393_vm10 = vcmp.eq.f32.partialorder %v2814_v19, inf  ;;  %v1451_v32 = vpop.eup %1450  ;;  %v480_v52 = vmul.f32 %v1528_v51, %v1449_v12 }
 0x12c   :  { %989 = vadd.xlane.f32.xlu0 %v937_v25  ;;  %vm395_vm11 = vcmp.eq.f32.partialorder %v2814_v19, 0.0  ;;  %v396_v36 = vand.u32 2147483648, %v2814_v19  ;;  %1464 = vrcp.f32 %v428_v58  ;;  %v1453_v34 = vpop.eup %1452  ;;  %v849_v24 = vmax.f32 %v2883_v62, 1e-12  ;;  %v1536_v25 = vld [vmem:[%s3170_s0 + $0xc8] sm:$0xff] }
 0x12d   :  { %v433_v31 = vmax.f32 %v2887_v11, 1e-12  ;;  %v896_v33 = vmul.f32 %v1529_v26, %v1451_v32  ;;  %1466 = vrcp.f32 %v844_v56  ;;  %v387_v54 = vsel %vm386_vm5, %v2765_v13, %v385_v14 }
 0x12e   :  { %v808_v3 = vmul.f32 %v1453_v34, %v2799_v1  ;;  %vm816_vm12 = vcmp.eq.f32.partialorder %v2843_v53, inf  ;;  %1468 = vrcp.f32 %v429_v50  ;;  %v1455_v58 = vpop.eup %1454  ;;  %v803_v15 = vsel %vm802_vm4, %v2752_v38, %v801_v20 }
 0x12f   :  { %v938_v8 = vmul.f32 %v896_v33, %v480_v52  ;;  %vm818_vm13 = vcmp.eq.f32.partialorder %v2843_v53, 0.0  ;;  %1470 = vrcp.f32 %v845_v4  ;;  %v392_v56 = vmul.f32 %v1455_v58, %v2814_v19  ;;  %v1530_v4 = vld [vmem:[%s3170_s0 + $0xb0] sm:$0xff] }
 0x130   :  { %v1457_v10 = vpop.eup %1456  ;;  %v819_v0 = vand.u32 2147483648, %v2843_v53  ;;  %vm400_vm14 = vcmp.eq.f32.partialorder %v2868_v18, inf  ;;  %1472 = vrcp.f32 %v430_v6  ;;  %v390_v50 = vsel %vm388_vm6, %v389_v49, %v387_v54  ;;  %v1531_v6 = vld [vmem:[%s3171_s1 + $0xb0] sm:$0xff]  ;;  %v1540_v54 = vld [vmem:[%s3170_s0 + $0xd8] sm:$0xff] }
 0x131   :  { %v1459_v29 = vpop.eup %1458  ;;  %991 = vadd.xlane.f32.xlu1 %v938_v8  ;;  %v810_v47 = vsel %vm809_vm8, %v2799_v1, %v808_v3  ;;  %v482_v5 = vmul.f32 %v1530_v4, %v1457_v10  ;;  %1474 = vrcp.f32 %v846_v42  ;;  %v806_v13 = vsel %vm804_vm7, %v805_v30, %v803_v15  ;;  %v1538_v52 = vld [vmem:[%s3170_s0 + $0xd0] sm:$0xff]  ;;  %v1541_v8 = vld [vmem:[%s3171_s1 + $0xd8] sm:$0xff]  ;;  %v1543_v4 = vld [vmem:[%s3171_s1 + $0xe0] sm:$0xff] }
 0x132   :  { %v1461_v43 = vpop.eup %1460  ;;  %v394_v46 = vsel %vm393_vm10, %v2814_v19, %v392_v56  ;;  %v898_v37 = vmul.f32 %v1531_v6, %v1459_v29  ;;  %1476 = vrcp.f32 %v431_v39  ;;  %vm402_vm15 = vcmp.eq.f32.partialorder %v2868_v18, 0.0 }
 0x133   :  { %v397_v21 = vsel %vm395_vm11, %v396_v36, %v394_v46  ;;  %v815_v42 = vmul.f32 %v1461_v43, %v2843_v53  ;;  %1478 = vrcp.f32 %v847_v28  ;;  %v434_v48 = vmax.f32 %v390_v50, 1e-12 }
 0x134   :  { %v1463_v38 = vpop.eup %1462  ;;  %v813_v63 = vsel %vm811_vm9, %v812_v40, %v810_v47  ;;  %v939_v22 = vmul.f32 %v898_v37, %v482_v5  ;;  %1480 = vrcp.f32 %v432_v45  ;;  %v850_v55 = vmax.f32 %v806_v13, 1e-12  ;;  %v1537_v40 = vld [vmem:[%s3171_s1 + $0xc8] sm:$0xff] }
 0x135   :  { %v817_v19 = vsel %vm816_vm12, %v2843_v53, %v815_v42  ;;  %v399_v39 = vmul.f32 %v1463_v38, %v2868_v18  ;;  %1482 = vrcp.f32 %v848_v9  ;;  %v435_v28 = vmax.f32 %v397_v21, 1e-12  ;;  %v1534_v9 = vld [vmem:[%s3170_s0 + $0xc0] sm:$0xff]  ;;  %v1544_v13 = vld [vmem:[%s3170_s0 + $0xe8] sm:$0xff] }
 0x136   :  { %v1465_v61 = vpop.eup %1464  ;;  %993 = vadd.xlane.f32.xlu0 %v939_v22  ;;  %v820_v1 = vsel %vm818_vm13, %v819_v0, %v817_v19  ;;  %v403_v16 = vand.u32 2147483648, %v2868_v18  ;;  %1484 = vrcp.f32 %v433_v31  ;;  %v851_v30 = vmax.f32 %v813_v63, 1e-12  ;;  %v1539_v31 = vld [vmem:[%s3171_s1 + $0xd0] sm:$0xff]  ;;  %v1542_v0 = vld [vmem:[%s3170_s0 + $0xe0] sm:$0xff]  ;;  %v1545_v21 = vld [vmem:[%s3171_s1 + $0xe8] sm:$0xff] }
 0x137   :  { %v1467_v59 = vpop.eup %1466  ;;  %v401_v41 = vsel %vm400_vm14, %v2868_v18, %v399_v39  ;;  %v484_v17 = vmul.f32 %v1532_v60, %v1465_v61  ;;  %1486 = vrcp.f32 %v849_v24  ;;  %v852_v7 = vmax.f32 %v820_v1, 1e-12  ;;  %v1535_v18 = vld [vmem:[%s3171_s1 + $0xc0] sm:$0xff]  ;;  %v1547_v19 = vld [vmem:[%s3171_s1 + $0xf0] sm:$0xff] }
 0x138   :  { %v1469_v57 = vpop.eup %1468  ;;  %v404_v53 = vsel %vm402_vm15, %v403_v16, %v401_v41  ;;  %v900_v35 = vmul.f32 %v1533_v44, %v1467_v59  ;;  %1488 = vrcp.f32 %v434_v48  ;;  %v1546_v48 = vld [vmem:[%s3170_s0 + $0xf0] sm:$0xff]  ;;  %v1549_v59 = vld [vmem:[%s3171_s1 + $0xf8] sm:$0xff]  ;;  %vm1141_vm0 = vcmask 7168  }
 0x139   :  { %v1471_v23 = vpop.eup %1470  ;;  %v436_v27 = vmax.f32 %v404_v53, 1e-12  ;;  %v486_v45 = vmul.f32 %v1534_v9, %v1469_v57  ;;  %1490 = vrcp.f32 %v850_v55  ;;  %vm19_vm1 = vcmask 0  }
 0x13a   :  { %v1473_v49 = vpop.eup %1472  ;;  %v940_v2 = vmul.f32 %v900_v35, %v484_v17  ;;  %v902_v62 = vmul.f32 %v1535_v18, %v1471_v23  ;;  %1492 = vrcp.f32 %v435_v28  ;;  %v1548_v28 = vld [vmem:[%s3170_s0 + $0xf8] sm:$0xff]  ;;  %v1013_v18 = vld [vmem:[%s3172_s2] sm:$0xff] }
 0x13b   :  { %v1475_v11 = vpop.eup %1474  ;;  %v488_v12 = vmul.f32 %v1536_v25, %v1473_v49  ;;  %1494 = vrcp.f32 %v851_v30  ;;  %v1014_v49 = vld [vmem:[%s3172_s2 + $0x8] sm:$0xff]  ;;  %v1015_v25 = vld [vmem:[%s3172_s2 + $0x10] sm:$0xff] }
 0x13c   :  { %v1477_v20 = vpop.eup %1476  ;;  %995 = vadd.xlane.f32.xlu1 %v940_v2  ;;  %v941_v14 = vmul.f32 %v902_v62, %v486_v45  ;;  %v904_v32 = vmul.f32 %v1537_v40, %v1475_v11  ;;  %1496 = vrcp.f32 %v436_v27 }
 0x13d   :  { %v1479_v51 = vpop.eup %1478  ;;  %v490_v36 = vmul.f32 %v1538_v52, %v1477_v20  ;;  %1498 = vrcp.f32 %v852_v7 }
 0x13e   :  { %v1481_v34 = vpop.eup %1480  ;;  %997 = vadd.xlane.f32.xlu0 %v941_v14  ;;  %v942_v24 = vmul.f32 %v904_v32, %v488_v12  ;;  %v906_v26 = vmul.f32 %v1539_v31, %v1479_v51  ;;  %v1016_v51 = vld [vmem:[%s3172_s2 + $0x18] sm:$0xff]  ;;  %v1017_v31 = vld [vmem:[%s3172_s2 + $0x20] sm:$0xff] }
 0x13f   :  { %v1483_v33 = vpop.eup %1482  ;;  %v492_v3 = vmul.f32 %v1540_v54, %v1481_v34 }
 0x140   :  { %v1485_v58 = vpop.eup %1484  ;;  %999 = vadd.xlane.f32.xlu1 %v942_v24  ;;  %v943_v15 = vmul.f32 %v906_v26, %v490_v36  ;;  %v908_v10 = vmul.f32 %v1541_v8, %v1483_v33  ;;  %v1018_v8 = vld [vmem:[%s3172_s2 + $0x28] sm:$0xff] }
 0x141   :  { %v1487_v56 = vpop.eup %1486  ;;  %v494_v29 = vmul.f32 %v1542_v0, %v1485_v58 }
 0x142   :  { %v1489_v50 = vpop.eup %1488  ;;  %1001 = vadd.xlane.f32.xlu0 %v943_v15  ;;  %v944_v47 = vmul.f32 %v908_v10, %v492_v3  ;;  %v910_v5 = vmul.f32 %v1543_v4, %v1487_v56  ;;  %v1019_v4 = vld [vmem:[%s3172_s2 + $0x30] sm:$0xff] }
 0x143   :  { %v1491_v43 = vpop.eup %1490  ;;  %v496_v46 = vmul.f32 %v1544_v13, %v1489_v50 }
 0x144   :  { %v1493_v6 = vpop.eup %1492  ;;  %1003 = vadd.xlane.f32.xlu1 %v944_v47  ;;  %v945_v37 = vmul.f32 %v910_v5, %v494_v29  ;;  %v912_v42 = vmul.f32 %v1545_v21, %v1491_v43  ;;  %v1020_v21 = vld [vmem:[%s3172_s2 + $0x38] sm:$0xff] }
 0x145   :  { %v1495_v38 = vpop.eup %1494  ;;  %v498_v63 = vmul.f32 %v1546_v48, %v1493_v6 }
 0x146   :  { %v1497_v22 = vpop.eup %1496  ;;  %1005 = vadd.xlane.f32.xlu0 %v945_v37  ;;  %v946_v55 = vmul.f32 %v912_v42, %v496_v46  ;;  %v914_v39 = vmul.f32 %v1547_v19, %v1495_v38  ;;  %v1021_v19 = vld [vmem:[%s3172_s2 + $0x40] sm:$0xff] }
 0x147   :  { %v1499_v61 = vpop.eup %1498  ;;  %v500_v1 = vmul.f32 %v1548_v28, %v1497_v22 }
 0x148   :  { %1007 = vadd.xlane.f32.xlu1 %v946_v55  ;;  %v947_v16 = vmul.f32 %v914_v39, %v498_v63  ;;  %v916_v30 = vmul.f32 %v1549_v59, %v1499_v61 }
 0x14a   :  { %1009 = vadd.xlane.f32.xlu0 %v947_v16  ;;  %v948_v41 = vmul.f32 %v916_v30, %v500_v1  ;;  %v1022_v30 = vld [vmem:[%s3172_s2 + $0x48] sm:$0xff] }
 0x14c   :  { %1011 = vadd.xlane.f32.xlu1 %v948_v41 }
 0x14d   :  { %v950_v60 = vpop.xlane.xlu0 %949 }
 0x14e   :  { %v1045_v44 = vsub.f32 1.0, %v950_v60 }
 0x150   :  { %v1077_v45 = vmul.f32 %v1045_v44, %v1045_v44 }
 0x151   :  { %v952_v17 = vpop.xlane.xlu1 %951 }
 0x152   :  { %v1046_v53 = vsub.f32 1.0, %v952_v17  ;;  %v1109_v32 = vmul.f32 %v1077_v45, %v1013_v18 }
 0x154   :  { %v1078_v27 = vmul.f32 %v1046_v53, %v1046_v53  ;;  %v1142_v15 = vsel %vm1141_vm0, %v1109_v32, 0.0 }
 0x155   :  { %v954_v57 = vpop.xlane.xlu0 %953 }
 0x156   :  { %v1047_v23 = vsub.f32 1.0, %v954_v57  ;;  %v1110_v20 = vmul.f32 %v1078_v27, %v1014_v49 }
 0x158   :  { %v1079_v62 = vmul.f32 %v1047_v23, %v1047_v23  ;;  %v1143_v33 = vsel %vm1141_vm0, %v1110_v20, 0.0 }
 0x159   :  { %v956_v35 = vpop.xlane.xlu1 %955  ;;  %v1144_v47 = vadd.f32 %v1143_v33, %v1142_v15  ;;  %v1027_v15 = vld [vmem:[%s3172_s2 + $0x70] sm:$0xff] }
 0x15a   :  { %v1048_v9 = vsub.f32 1.0, %v956_v35  ;;  %v1111_v36 = vmul.f32 %v1079_v62, %v1015_v25  ;;  %v1023_v35 = vld [vmem:[%s3172_s2 + $0x50] sm:$0xff] }
 0x15c   :  { %v1080_v14 = vmul.f32 %v1048_v9, %v1048_v9  ;;  %v1145_v56 = vsel %vm1141_vm0, %v1111_v36, 0.0 }
 0x15d   :  { %v1146_v37 = vadd.f32 %v1145_v56, %v1144_v47  ;;  %v1028_v47 = vld [vmem:[%s3172_s2 + $0x78] sm:$0xff] }
 0x15e   :  { %v1112_v54 = vmul.f32 %v1080_v14, %v1016_v51  ;;  %v1025_v14 = vld [vmem:[%s3172_s2 + $0x60] sm:$0xff] }
 0x160   :  { %v958_v7 = vpop.xlane.xlu0 %957  ;;  %v1147_v43 = vsel %vm1141_vm0, %v1112_v54, 0.0 }
 0x161   :  { %v1049_v11 = vsub.f32 1.0, %v958_v7  ;;  %v1148_v55 = vadd.f32 %v1147_v43, %v1146_v37  ;;  %v1029_v37 = vld [vmem:[%s3172_s2 + $0x80] sm:$0xff] }
 0x163   :  { %v1081_v34 = vmul.f32 %v1049_v11, %v1049_v11 }
 0x165   :  { %v960_v2 = vpop.xlane.xlu1 %959  ;;  %v1113_v0 = vmul.f32 %v1081_v34, %v1017_v31 }
 0x166   :  { %v1050_v40 = vsub.f32 1.0, %v960_v2  ;;  %v1024_v2 = vld [vmem:[%s3172_s2 + $0x58] sm:$0xff] }
 0x167   :  { %v1149_v38 = vsel %vm1141_vm0, %v1113_v0, 0.0 }
 0x168   :  { %v1082_v3 = vmul.f32 %v1050_v40, %v1050_v40  ;;  %v1150_v59 = vadd.f32 %v1149_v38, %v1148_v55  ;;  %v1030_v55 = vld [vmem:[%s3172_s2 + $0x88] sm:$0xff] }
 0x16a   :  { %v1114_v13 = vmul.f32 %v1082_v3, %v1018_v8 }
 0x16b   :  { %v962_v12 = vpop.xlane.xlu0 %961 }
 0x16c   :  { %v1051_v24 = vsub.f32 1.0, %v962_v12  ;;  %v1151_v61 = vsel %vm1141_vm0, %v1114_v13, 0.0 }
 0x16d   :  { %v1152_v44 = vadd.f32 %v1151_v61, %v1150_v59 }
 0x16e   :  { %v1083_v29 = vmul.f32 %v1051_v24, %v1051_v24  ;;  %v1026_v24 = vld [vmem:[%s3172_s2 + $0x68] sm:$0xff] }
 0x170   :  { %v1115_v48 = vmul.f32 %v1083_v29, %v1019_v4 }
 0x171   :  { %v964_v52 = vpop.xlane.xlu1 %963 }
 0x172   :  { %v1052_v58 = vsub.f32 1.0, %v964_v52  ;;  %v1153_v60 = vsel %vm1141_vm0, %v1115_v48, 0.0 }
 0x173   :  { %v1154_v49 = vadd.f32 %v1153_v60, %v1152_v44 }
 0x174   :  { %v1084_v46 = vmul.f32 %v1052_v58, %v1052_v58 }
 0x176   :  { %v966_v26 = vpop.xlane.xlu0 %965  ;;  %v1116_v28 = vmul.f32 %v1084_v46, %v1020_v21 }
 0x177   :  { %v1053_v50 = vsub.f32 1.0, %v966_v26 }
 0x178   :  { %v1155_v7 = vsel %vm1141_vm0, %v1116_v28, 0.0 }
 0x179   :  { %v1085_v63 = vmul.f32 %v1053_v50, %v1053_v50  ;;  %v1156_v20 = vadd.f32 %v1155_v7, %v1154_v49 }
 0x17b   :  { %v968_v10 = vpop.xlane.xlu1 %967  ;;  %v1117_v17 = vmul.f32 %v1085_v63, %v1021_v19 }
 0x17c   :  { %v1054_v6 = vsub.f32 1.0, %v968_v10 }
 0x17d   :  { %v1157_v62 = vsel %vm1141_vm0, %v1117_v17, 0.0 }
 0x17e   :  { %v1086_v1 = vmul.f32 %v1054_v6, %v1054_v6  ;;  %v1158_v34 = vadd.f32 %v1157_v62, %v1156_v20 }
 0x180   :  { %v970_v5 = vpop.xlane.xlu0 %969  ;;  %v1118_v27 = vmul.f32 %v1086_v1, %v1022_v30 }
 0x181   :  { %v1055_v22 = vsub.f32 1.0, %v970_v5 }
 0x182   :  { %v1159_v32 = vsel %vm1141_vm0, %v1118_v27, 0.0  ;;  %v1033_v27 = vld [vmem:[%s3172_s2 + $0xa0] sm:$0xff] }
 0x183   :  { %v1087_v57 = vmul.f32 %v1055_v22, %v1055_v22  ;;  %v1160_v58 = vadd.f32 %v1159_v32, %v1158_v34 }
 0x185   :  { %v1119_v11 = vmul.f32 %v1087_v57, %v1023_v35  ;;  %v1032_v57 = vld [vmem:[%s3172_s2 + $0x98] sm:$0xff] }
 0x187   :  { %v972_v42 = vpop.xlane.xlu1 %971  ;;  %v1161_v26 = vsel %vm1141_vm0, %v1119_v11, 0.0 }
 0x188   :  { %v1056_v16 = vsub.f32 1.0, %v972_v42  ;;  %v1162_v50 = vadd.f32 %v1161_v26, %v1160_v58 }
 0x18a   :  { %v1088_v9 = vmul.f32 %v1056_v16, %v1056_v16  ;;  %v1031_v16 = vld [vmem:[%s3172_s2 + $0x90] sm:$0xff] }
 0x18c   :  { %v974_v39 = vpop.xlane.xlu0 %973  ;;  %v1120_v51 = vmul.f32 %v1088_v9, %v1024_v2 }
 0x18d   :  { %v1057_v53 = vsub.f32 1.0, %v974_v39 }
 0x18e   :  { %v1163_v10 = vsel %vm1141_vm0, %v1120_v51, 0.0 }
 0x18f   :  { %v1089_v25 = vmul.f32 %v1057_v53, %v1057_v53  ;;  %v1164_v6 = vadd.f32 %v1163_v10, %v1162_v50 }
 0x191   :  { %v976_v41 = vpop.xlane.xlu1 %975  ;;  %v1121_v33 = vmul.f32 %v1089_v25, %v1025_v14  ;;  %v1035_v14 = vld [vmem:[%s3172_s2 + $0xb0] sm:$0xff] }
 0x192   :  { %v1058_v45 = vsub.f32 1.0, %v976_v41 }
 0x193   :  { %v1165_v5 = vsel %vm1141_vm0, %v1121_v33, 0.0 }
 0x194   :  { %v1090_v52 = vmul.f32 %v1058_v45, %v1058_v45  ;;  %v1166_v22 = vadd.f32 %v1165_v5, %v1164_v6 }
 0x196   :  { %v978_v23 = vpop.xlane.xlu0 %977  ;;  %v1122_v56 = vmul.f32 %v1090_v52, %v1026_v24 }
 0x197   :  { %v1059_v12 = vsub.f32 1.0, %v978_v23 }
 0x198   :  { %v1167_v42 = vsel %vm1141_vm0, %v1122_v56, 0.0 }
 0x199   :  { %v1091_v54 = vmul.f32 %v1059_v12, %v1059_v12  ;;  %v1168_v1 = vadd.f32 %v1167_v42, %v1166_v22 }
 0x19b   :  { %v1123_v43 = vmul.f32 %v1091_v54, %v1027_v15 }
 0x19d   :  { %v980_v18 = vpop.xlane.xlu1 %979  ;;  %v1169_v19 = vsel %vm1141_vm0, %v1123_v43, 0.0  ;;  %v1038_v43 = vld [vmem:[%s3172_s2 + $0xc8] sm:$0xff] }
 0x19e   :  { %v1060_v36 = vsub.f32 1.0, %v980_v18  ;;  %v1170_v17 = vadd.f32 %v1169_v19, %v1168_v1  ;;  %v1034_v18 = vld [vmem:[%s3172_s2 + $0xa8] sm:$0xff] }
 0x1a0   :  { %v1092_v0 = vmul.f32 %v1060_v36, %v1060_v36 }
 0x1a2   :  { %v982_v40 = vpop.xlane.xlu0 %981  ;;  %v1124_v38 = vmul.f32 %v1092_v0, %v1028_v47  ;;  %v1037_v0 = vld [vmem:[%s3172_s2 + $0xc0] sm:$0xff] }
 0x1a3   :  { %v1061_v3 = vsub.f32 1.0, %v982_v40 }
 0x1a4   :  { %v1171_v59 = vsel %vm1141_vm0, %v1124_v38, 0.0  ;;  %v1039_v38 = vld [vmem:[%s3172_s2 + $0xd0] sm:$0xff] }
 0x1a5   :  { %v1093_v13 = vmul.f32 %v1061_v3, %v1061_v3  ;;  %v1172_v7 = vadd.f32 %v1171_v59, %v1170_v17  ;;  %v1036_v3 = vld [vmem:[%s3172_s2 + $0xb8] sm:$0xff] }
 0x1a7   :  { %v984_v31 = vpop.xlane.xlu1 %983  ;;  %v1125_v39 = vmul.f32 %v1093_v13, %v1029_v37 }
 0x1a8   :  { %v1062_v29 = vsub.f32 1.0, %v984_v31 }
 0x1a9   :  { %v1173_v44 = vsel %vm1141_vm0, %v1125_v39, 0.0 }
 0x1aa   :  { %v1094_v48 = vmul.f32 %v1062_v29, %v1062_v29  ;;  %v1174_v2 = vadd.f32 %v1173_v44, %v1172_v7  ;;  %v1042_v7 = vld [vmem:[%s3172_s2 + $0xe8] sm:$0xff] }
 0x1ac   :  { %v1126_v30 = vmul.f32 %v1094_v48, %v1030_v55 }
 0x1ad   :  { %v986_v8 = vpop.xlane.xlu0 %985 }
 0x1ae   :  { %v1063_v46 = vsub.f32 1.0, %v986_v8  ;;  %v1175_v9 = vsel %vm1141_vm0, %v1126_v30, 0.0 }
 0x1af   :  { %v1176_v20 = vadd.f32 %v1175_v9, %v1174_v2 }
 0x1b0   :  { %v1095_v61 = vmul.f32 %v1063_v46, %v1063_v46 }
 0x1b2   :  { %v1127_v35 = vmul.f32 %v1095_v61, %v1031_v16  ;;  %v1040_v61 = vld [vmem:[%s3172_s2 + $0xd8] sm:$0xff] }
 0x1b3   :  { %v988_v4 = vpop.xlane.xlu1 %987 }
 0x1b4   :  { %v1064_v63 = vsub.f32 1.0, %v988_v4  ;;  %v1177_v11 = vsel %vm1141_vm0, %v1127_v35, 0.0 }
 0x1b5   :  { %v1178_v52 = vadd.f32 %v1177_v11, %v1176_v20 }
 0x1b6   :  { %v1096_v41 = vmul.f32 %v1064_v63, %v1064_v63 }
 0x1b8   :  { %v1128_v45 = vmul.f32 %v1096_v41, %v1032_v57 }
 0x1b9   :  { %v990_v21 = vpop.xlane.xlu0 %989 }
 0x1ba   :  { %v1065_v28 = vsub.f32 1.0, %v990_v21  ;;  %v1179_v40 = vsel %vm1141_vm0, %v1128_v45, 0.0 }
 0x1bb   :  { %v1180_v24 = vadd.f32 %v1179_v40, %v1178_v52 }
 0x1bc   :  { %v1097_v23 = vmul.f32 %v1065_v28, %v1065_v28 }
 0x1be   :  { %v992_v60 = vpop.xlane.xlu1 %991  ;;  %v1129_v25 = vmul.f32 %v1097_v23, %v1033_v27 }
 0x1bf   :  { %v1066_v53 = vsub.f32 1.0, %v992_v60  ;;  %v1041_v60 = vld [vmem:[%s3172_s2 + $0xe0] sm:$0xff] }
 0x1c0   :  { %v1181_v36 = vsel %vm1141_vm0, %v1129_v25, 0.0 }
 0x1c1   :  { %v1098_v49 = vmul.f32 %v1066_v53, %v1066_v53  ;;  %v1182_v54 = vadd.f32 %v1181_v36, %v1180_v24 }
 0x1c3   :  { %v994_v62 = vpop.xlane.xlu0 %993  ;;  %v1130_v32 = vmul.f32 %v1098_v49, %v1034_v18 }
 0x1c4   :  { %v1067_v12 = vsub.f32 1.0, %v994_v62  ;;  %v1043_v62 = vld [vmem:[%s3172_s2 + $0xf0] sm:$0xff] }
 0x1c5   :  { %v1183_v26 = vsel %vm1141_vm0, %v1130_v32, 0.0  ;;  %v1044_v32 = vld [vmem:[%s3172_s2 + $0xf8] sm:$0xff] }
 0x1c6   :  { %v1099_v51 = vmul.f32 %v1067_v12, %v1067_v12  ;;  %v1184_v56 = vadd.f32 %v1183_v26, %v1182_v54 }
 0x1c8   :  { %v1131_v34 = vmul.f32 %v1099_v51, %v1035_v14 }
 0x1c9   :  { %v996_v31 = vpop.xlane.xlu1 %995 }
 0x1ca   :  { %v1068_v33 = vsub.f32 1.0, %v996_v31  ;;  %v1185_v15 = vsel %vm1141_vm0, %v1131_v34, 0.0 }
 0x1cb   :  { %v998_v58 = vpop.xlane.xlu0 %997  ;;  %v1186_v5 = vadd.f32 %v1185_v15, %v1184_v56 }
 0x1cc   :  { %v1100_v8 = vmul.f32 %v1068_v33, %v1068_v33  ;;  %v1069_v10 = vsub.f32 1.0, %v998_v58 }
 0x1cd   :  { %v1000_v29 = vpop.xlane.xlu1 %999 }
 0x1ce   :  { %v1132_v50 = vmul.f32 %v1100_v8, %v1036_v3  ;;  %v1101_v47 = vmul.f32 %v1069_v10, %v1069_v10  ;;  %v1070_v4 = vsub.f32 1.0, %v1000_v29  ;;  %v1574_v3 = vmov 0.0  }
 0x1cf   :  { %v1002_v13 = vpop.xlane.xlu0 %1001  ;;  %20 = vst.msk [vmem:[#allocation2] sm:$0x1] %vm19_vm1, %v1574_v3 }
 0x1d0   :  { %v1187_v46 = vsel %vm1141_vm0, %v1132_v50, 0.0  ;;  %v1133_v6 = vmul.f32 %v1101_v47, %v1037_v0  ;;  %v1102_v37 = vmul.f32 %v1070_v4, %v1070_v4  ;;  %v1071_v21 = vsub.f32 1.0, %v1002_v13 }
 0x1d1   :  { %v1188_v42 = vadd.f32 %v1187_v46, %v1186_v5  ;;  %v1004_v48 = vpop.xlane.xlu1 %1003 }
 0x1d2   :  { %v1189_v63 = vsel %vm1141_vm0, %v1133_v6, 0.0  ;;  %v1134_v22 = vmul.f32 %v1102_v37, %v1038_v43  ;;  %v1103_v55 = vmul.f32 %v1071_v21, %v1071_v21  ;;  %v1072_v19 = vsub.f32 1.0, %v1004_v48 }
 0x1d3   :  { %v1190_v39 = vadd.f32 %v1189_v63, %v1188_v42  ;;  %v1006_v28 = vpop.xlane.xlu0 %1005 }
 0x1d4   :  { %v1191_v1 = vsel %vm1141_vm0, %v1134_v22, 0.0  ;;  %v1135_v16 = vmul.f32 %v1103_v55, %v1039_v38  ;;  %v1104_v59 = vmul.f32 %v1072_v19, %v1072_v19  ;;  %v1073_v30 = vsub.f32 1.0, %v1006_v28 }
 0x1d5   :  { %v1192_v41 = vadd.f32 %v1191_v1, %v1190_v39  ;;  %v1008_v17 = vpop.xlane.xlu1 %1007 }
 0x1d6   :  { %v1193_v57 = vsel %vm1141_vm0, %v1135_v16, 0.0  ;;  %v1136_v53 = vmul.f32 %v1104_v59, %v1040_v61  ;;  %v1105_v44 = vmul.f32 %v1073_v30, %v1073_v30  ;;  %v1074_v35 = vsub.f32 1.0, %v1008_v17  ;;  %v1214_v50 = vld [vmem:[#allocation2] sm:$0x1] }
 0x1d7   :  { %v1194_v23 = vadd.f32 %v1193_v57, %v1192_v41  ;;  %v1010_v27 = vpop.xlane.xlu0 %1009 }
 0x1d8   :  { %v1195_v9 = vsel %vm1141_vm0, %v1136_v53, 0.0  ;;  %v1137_v45 = vmul.f32 %v1105_v44, %v1041_v60  ;;  %v1106_v49 = vmul.f32 %v1074_v35, %v1074_v35  ;;  %v1075_v2 = vsub.f32 1.0, %v1010_v27 }
 0x1d9   :  { %v1196_v18 = vadd.f32 %v1195_v9, %v1194_v23  ;;  %v1012_v11 = vpop.xlane.xlu1 %1011 }
 0x1da   :  { %v1197_v25 = vsel %vm1141_vm0, %v1137_v45, 0.0  ;;  %v1138_v12 = vmul.f32 %v1106_v49, %v1042_v7  ;;  %v1107_v20 = vmul.f32 %v1075_v2, %v1075_v2  ;;  %v1076_v14 = vsub.f32 1.0, %v1012_v11 }
 0x1db   :  { %v1198_v40 = vadd.f32 %v1197_v25, %v1196_v18 }
 0x1dc   :  { %v1199_v51 = vsel %vm1141_vm0, %v1138_v12, 0.0  ;;  %v1139_v52 = vmul.f32 %v1107_v20, %v1043_v62  ;;  %v1108_v36 = vmul.f32 %v1076_v14, %v1076_v14 }
 0x1dd   :  { %v1200_v34 = vadd.f32 %v1199_v51, %v1198_v40 }
 0x1de   :  { %v1140_v24 = vmul.f32 %v1108_v36, %v1044_v32  ;;  %v1201_v31 = vsel %vm1141_vm0, %v1139_v52, 0.0 }
 0x1df   :  { %v1202_v26 = vadd.f32 %v1201_v31, %v1200_v34 }
 0x1e0   :  { %v1203_v33 = vsel %vm1141_vm0, %v1140_v24, 0.0 }
 0x1e1   :  { %v1204_v54 = vadd.f32 %v1203_v33, %v1202_v26 }
 0x1e3   :  { %1205 = vadd.xlane.f32.xlu0 %v1204_v54 }
 0x270   :  { %v1206_v58 = vpop.xlane.xlu0 %1205 }
 0x271   :  { %v1207_v15 = vrot.slane %v1206_v58, 4 }
 0x273   :  { %v1208_v8 = vadd.f32 %v1207_v15, %v1206_v58 }
 0x275   :  { %v1209_v10 = vrot.slane %v1208_v8, 2 }
 0x277   :  { %v1210_v56 = vadd.f32 %v1209_v10, %v1208_v8 }
 0x279   :  { %v1211_v0 = vrot.slane %v1210_v56, 1 }
 0x27b   :  { %v1212_v29 = vadd.f32 %v1211_v0, %v1210_v56 }
 0x27d   :  { %1240 = vpush %v1212_v29 }
 0x2ae   :  { %s1241_s2 = spop %1240 }
 0x2af   :  { %v1215_v47 = vstv %s1241_s2 }
 0x2b0   :  { %v1216_v4 = vadd.f32 %v1215_v47, %v1214_v50 }
 0x2b2   :  { %1218 = vst.msk [vmem:[#allocation2] sm:$0x1] %vm19_vm1, %v1216_v4 }
 0x2b9   :  { %v1222_v5 = vld [vmem:[#allocation2] sm:$0x1] }
 0x2ba   :  { %v1224_v43 = vmul.f32 0.05263158, %v1222_v5 }
 0x2bc   :  { %1225 = vst.msk [vmem:[#allocation2] sm:$0x1] %vm19_vm1, %v1224_v43 }
 0x2bd   :  { %1561 = shalt.err (!%p1558_p4)
}
 0x2be   :  { %s1562_s7 = scalar_lea.hbm %s3173_s3, 16 }
 0x2bf   :  { %p1563_p5 = scmp.ne.s32.totalorder %s3173_s3, %s1562_s7  ;;  %p1566_p6 = scmp.lt.u32.totalorder %s1562_s7, %s3173_s3 }
 0x2c1   :  { %p1568_p7 = pnand %p1566_p6, %p1563_p5 }
 0x2c3   :  { %1571 = shalt.err (!%p1568_p7)
}
 0x2c4   :  { %1235 = dma.vmem_to_hbm [thread:$0]  %s1233_s29, 16, %s3173_s3, [#allocation3]  }
 0x2c5   :  { %1572 = dma.done.wait [#allocation3], 16  }
 0x2c6   :  { %1573 = vsyncadd [#allocation3], 4294967280 }
 0x2c7   :  { %1239 = vsyncpa [#allocation3], 1 }

// kernel: _device_forward.13
= control target key start
LH: loop header
LB: loop body
LE: loop exit
PB: predicated region body
PF: predicated region fallthrough
CT: control target
= control target key end

     0   :  { %v5797_v0 = vmov 0   ;;  %s5782_s5 = inlined_call_operand.vmem [shape: f32[256,1], index: 5, kind: input, shape index: {}]   ;;  %s5783_s1 = inlined_call_operand.vmem [shape: bf16[256,128], index: 1, kind: input, shape index: {}, may-alias: {1,3}]   ;;  %s5784_s2 = inlined_call_operand.vmem [shape: bf16[256,128], index: 2, kind: input, shape index: {}, may-alias: {2,4}]   ;;  %s5785_s0 = inlined_call_operand.vmem [shape: bf16[256,256], index: 0, kind: input, shape index: {}]   ;;  %s5786_s8 = inlined_call_operand.vmem [shape: f32[256,1], index: 8, kind: input, shape index: {}]   ;;  %s5787_s7 = inlined_call_operand.vmem [shape: f32[256,1], index: 7, kind: input, shape index: {}]   ;;  %s5788_s12 = inlined_call_operand.vmem [shape: f32[1,128], index: 12, kind: output, shape index: {3}]   ;;  %s5789_s4 = inlined_call_operand.vmem [shape: bf16[256,128], index: 4, kind: input, shape index: {}, may-alias: {2,4}]   ;;  %s5790_s3 = inlined_call_operand.vmem [shape: bf16[256,128], index: 3, kind: input, shape index: {}, may-alias: {1,3}]   ;;  %s5791_s6 = inlined_call_operand.vmem [shape: f32[1,128], index: 6, kind: input, shape index: {}]   ;;  %s5792_s9 = inlined_call_operand.vmem [shape: f32[256,128], index: 9, kind: output, shape index: {0}]   ;;  %s5793_s13 = inlined_call_operand.vmem [shape: f32[1,128], index: 13, kind: output, shape index: {4}]   ;;  %s5794_s10 = inlined_call_operand.vmem [shape: f32[128,128], index: 10, kind: output, shape index: {1}]   ;;  %s5795_s11 = inlined_call_operand.vmem [shape: f32[128,128], index: 11, kind: output, shape index: {2}]  }
   0x1   :  { %3621 = vset.pattern.permute.xlu1 %v5797_v0  ;;  %3620 = vset.pattern.permute.xlu0 %v5797_v0  ;;  %v1240_v1 = vld [vmem:[%s5782_s5 + $0x10] sm:$0xff]  ;;  %v1238_v2 = vld [vmem:[%s5782_s5] sm:$0xff]  ;;  %v1241_v7 = vld [vmem:[%s5782_s5 + $0x18] sm:$0xff] }
   0x2   :  { %1282 = vperm.xlu1 %3621, %v1240_v1   ;;  %1272 = vperm.xlu0 %3620, %v1238_v2   ;;  %v3734_v3 = vld [vmem:[%s5783_s1 + $0x40] sm:$0xff]   ;;  %v1239_v8 = vld [vmem:[%s5782_s5 + $0x8] sm:$0xff]  ;;  %v3742_v15 = vld [vmem:[%s5783_s1 + $0x50] sm:$0xff]  }
   0x3   :  { %v3735_v4 = vld [vmem:[%s5784_s2 + $0x40] sm:$0xff]   ;;  %3170 = vmatprep.subr.bf16.mxu0 %v3734_v3  ;;  %v3738_v9 = vld [vmem:[%s5783_s1 + $0x48] sm:$0xff]   ;;  %v3743_v16 = vld [vmem:[%s5784_s2 + $0x50] sm:$0xff]  }
   0x4   :  { %v3736_v5 = vld [vmem:[%s5783_s1] sm:$0xff]   ;;  %3282 = vmatprep.subr.bf16.mxu1 %v3735_v4  ;;  %v3739_v10 = vld [vmem:[%s5784_s2 + $0x48] sm:$0xff]   ;;  %v3744_v17 = vld [vmem:[%s5783_s1 + $0x10] sm:$0xff]  }
   0x5   :  { %v3737_v6 = vld [vmem:[%s5784_s2] sm:$0xff]   ;;  %3171 = vmatpush3.bf16.msra.mxu0 %v3736_v5  ;;  %v3740_v11 = vld [vmem:[%s5783_s1 + $0x8] sm:$0xff]   ;;  %v3745_v18 = vld [vmem:[%s5784_s2 + $0x10] sm:$0xff]  }
   0x6   :  { %1287 = vperm.xlu1 %3621, %v1241_v7   ;;  %3283 = vmatpush3.bf16.msra.mxu1 %v3737_v6  ;;  %v3741_v12 = vld [vmem:[%s5784_s2 + $0x8] sm:$0xff]   ;;  %v1242_v14 = vld [vmem:[%s5782_s5 + $0x20] sm:$0xff]  ;;  %v1245_v19 = vld [vmem:[%s5782_s5 + $0x38] sm:$0xff] }
   0x7   :  { %1277 = vperm.xlu0 %3620, %v1239_v8   ;;  %3172 = vmatprep.subr.bf16.mxu0 %v3738_v9  ;;  %v1243_v13 = vld [vmem:[%s5782_s5 + $0x28] sm:$0xff]  ;;  %v1244_v20 = vld [vmem:[%s5782_s5 + $0x30] sm:$0xff]  ;;  %v3746_v21 = vld [vmem:[%s5783_s1 + $0x58] sm:$0xff]  }
   0x8   :  { %3284 = vmatprep.subr.bf16.mxu1 %v3739_v10  ;;  %v3747_v22 = vld [vmem:[%s5784_s2 + $0x58] sm:$0xff]   ;;  %v1247_v25 = vld [vmem:[%s5782_s5 + $0x48] sm:$0xff]  ;;  %v1246_v26 = vld [vmem:[%s5782_s5 + $0x40] sm:$0xff] }
   0x9   :  { %3173 = vmatpush3.bf16.msra.mxu0 %v3740_v11  ;;  %v3748_v23 = vld [vmem:[%s5783_s1 + $0x18] sm:$0xff]   ;;  %v3750_v27 = vld [vmem:[%s5783_s1 + $0x60] sm:$0xff]   ;;  %v1248_v32 = vld [vmem:[%s5782_s5 + $0x50] sm:$0xff] }
   0xa   :  { %1297 = vperm.xlu1 %3621, %v1243_v13   ;;  %3285 = vmatpush3.bf16.msra.mxu1 %v3741_v12  ;;  %v3749_v24 = vld [vmem:[%s5784_s2 + $0x18] sm:$0xff]   ;;  %v3751_v28 = vld [vmem:[%s5784_s2 + $0x60] sm:$0xff]   ;;  %v3754_v33 = vld [vmem:[%s5783_s1 + $0x68] sm:$0xff]  }
   0xb   :  { %1292 = vperm.xlu0 %3620, %v1242_v14   ;;  %3174 = vmatprep.subr.bf16.mxu0 %v3742_v15  ;;  %v3752_v29 = vld [vmem:[%s5783_s1 + $0x20] sm:$0xff]   ;;  %v1249_v31 = vld [vmem:[%s5782_s5 + $0x58] sm:$0xff]  ;;  %v3755_v34 = vld [vmem:[%s5784_s2 + $0x68] sm:$0xff]  }
   0xc   :  { %3286 = vmatprep.subr.bf16.mxu1 %v3743_v16  ;;  %v3753_v30 = vld [vmem:[%s5784_s2 + $0x20] sm:$0xff]   ;;  %v3756_v35 = vld [vmem:[%s5783_s1 + $0x28] sm:$0xff]   ;;  %v3758_v39 = vld [vmem:[%s5783_s1 + $0x70] sm:$0xff]  }
   0xd   :  { %3175 = vmatpush3.bf16.msra.mxu0 %v3744_v17  ;;  %v3757_v36 = vld [vmem:[%s5784_s2 + $0x28] sm:$0xff]   ;;  %v1250_v38 = vld [vmem:[%s5782_s5 + $0x60] sm:$0xff]  ;;  %v3759_v40 = vld [vmem:[%s5784_s2 + $0x70] sm:$0xff]  }
   0xe   :  { %3287 = vmatpush3.bf16.msra.mxu1 %v3745_v18  ;;  %1307 = vperm.xlu1 %3621, %v1245_v19   ;;  %v1251_v37 = vld [vmem:[%s5782_s5 + $0x68] sm:$0xff]  ;;  %v3760_v41 = vld [vmem:[%s5783_s1 + $0x30] sm:$0xff]   ;;  %v1253_v43 = vld [vmem:[%s5782_s5 + $0x78] sm:$0xff] }
   0xf   :  { %1302 = vperm.xlu0 %3620, %v1244_v20   ;;  %3176 = vmatprep.subr.bf16.mxu0 %v3746_v21  ;;  %v3761_v42 = vld [vmem:[%s5784_s2 + $0x30] sm:$0xff]   ;;  %v3762_v45 = vld [vmem:[%s5783_s1 + $0x78] sm:$0xff]   ;;  %v1255_v49 = vld [vmem:[%s5782_s5 + $0x88] sm:$0xff] }
  0x10   :  { %3288 = vmatprep.subr.bf16.mxu1 %v3747_v22  ;;  %v1252_v44 = vld [vmem:[%s5782_s5 + $0x70] sm:$0xff]  ;;  %v3763_v46 = vld [vmem:[%s5784_s2 + $0x78] sm:$0xff]   ;;  %v1254_v50 = vld [vmem:[%s5782_s5 + $0x80] sm:$0xff] }
  0x11   :  { %3177 = vmatpush3.bf16.msra.mxu0 %v3748_v23  ;;  %v3764_v47 = vld [vmem:[%s5783_s1 + $0x38] sm:$0xff]   ;;  %v3766_v51 = vld [vmem:[%s5785_s0] ss:$8 sps:$4 sm:$0xff]   ;;  %v3768_v52 = vld [vmem:[%s5785_s0 + $0x4] ss:$8 sps:$4 sm:$0xff]  }
  0x12   :  { %1317 = vperm.xlu1 %3621, %v1247_v25   ;;  %3289 = vmatpush3.bf16.msra.mxu1 %v3749_v24  ;;  %v3765_v48 = vld [vmem:[%s5784_s2 + $0x38] sm:$0xff]   ;;  %v1256_v54 = vld [vmem:[%s5782_s5 + $0x90] sm:$0xff]  ;;  %v1259_v56 = vld [vmem:[%s5782_s5 + $0xa8] sm:$0xff] }
  0x13   :  { %1312 = vperm.xlu0 %3620, %v1246_v26   ;;  %3178 = vmatprep.subr.bf16.mxu0 %v3750_v27  ;;  %v1257_v53 = vld [vmem:[%s5782_s5 + $0x98] sm:$0xff]  ;;  %v1258_v57 = vld [vmem:[%s5782_s5 + $0xa0] sm:$0xff]  ;;  %v1260_v60 = vld [vmem:[%s5782_s5 + $0xb0] sm:$0xff] }
  0x14   :  { %3290 = vmatprep.subr.bf16.mxu1 %v3751_v28  ;;  %529 = vmatprep.mubr.bf16.mxu0 %v3768_v52  ;;  %v3769_v55 = vld [vmem:[%s5785_s0 + $0x14] ss:$8 sps:$4 sm:$0xff]   ;;  %v3771_v58 = vld [vmem:[%s5785_s0 + $0x10] ss:$8 sps:$4 sm:$0xff]   ;;  %v3772_v61 = vld [vmem:[%s5785_s0 + $0x24] ss:$8 sps:$4 sm:$0xff]  }
  0x15   :  { %3179 = vmatpush3.bf16.msra.mxu0 %v3752_v29  ;;  %914 = vmatprep.mubr.bf16.mxu1 %v3768_v52  ;;  %v1261_v59 = vld [vmem:[%s5782_s5 + $0xb8] sm:$0xff]  ;;  %v1263_v62 = vld [vmem:[%s5782_s5 + $0xc8] sm:$0xff]  ;;  %v1262_v63 = vld [vmem:[%s5782_s5 + $0xc0] sm:$0xff] }
  0x16   :  { %1327 = vperm.xlu1 %3621, %v1249_v31   ;;  %3291 = vmatpush3.bf16.msra.mxu1 %v3753_v30  ;;  %v3774_v1 = vld [vmem:[%s5785_s0 + $0x20] ss:$8 sps:$4 sm:$0xff]   ;;  %v1265_v2 = vld [vmem:[%s5782_s5 + $0xd8] sm:$0xff]  ;;  %v1264_v3 = vld [vmem:[%s5782_s5 + $0xd0] sm:$0xff] }
  0x17   :  { %1322 = vperm.xlu0 %3620, %v1248_v32   ;;  %3180 = vmatprep.subr.bf16.mxu0 %v3754_v33  ;;  %v3775_v4 = vld [vmem:[%s5785_s0 + $0x34] ss:$8 sps:$4 sm:$0xff]   ;;  %v1267_v5 = vld [vmem:[%s5782_s5 + $0xe8] sm:$0xff]  ;;  %v1266_v6 = vld [vmem:[%s5782_s5 + $0xe0] sm:$0xff] }
  0x18   :  { %3292 = vmatprep.subr.bf16.mxu1 %v3755_v34  ;;  %v3777_v7 = vld [vmem:[%s5785_s0 + $0x30] ss:$8 sps:$4 sm:$0xff]   ;;  %v3778_v10 = vld [vmem:[%s5785_s0 + $0x44] ss:$8 sps:$4 sm:$0xff]   ;;  %v3780_v13 = vld [vmem:[%s5785_s0 + $0x40] ss:$8 sps:$4 sm:$0xff]  }
  0x19   :  { %3181 = vmatpush3.bf16.msra.mxu0 %v3756_v35  ;;  %v1269_v8 = vld [vmem:[%s5782_s5 + $0xf8] sm:$0xff]  ;;  %v1268_v9 = vld [vmem:[%s5782_s5 + $0xf0] sm:$0xff]  ;;  %v1534_v11 = vld [vmem:[%s5786_s8 + $0x8] sm:$0xff] }
  0x1a   :  { %3293 = vmatpush3.bf16.msra.mxu1 %v3757_v36  ;;  %1337 = vperm.xlu1 %3621, %v1251_v37   ;;  %v1533_v12 = vld [vmem:[%s5786_s8] sm:$0xff]  ;;  %v1536_v14 = vld [vmem:[%s5786_s8 + $0x18] sm:$0xff]  ;;  %v1535_v15 = vld [vmem:[%s5786_s8 + $0x10] sm:$0xff] }
  0x1b   :  { %1332 = vperm.xlu0 %3620, %v1250_v38   ;;  %3182 = vmatprep.subr.bf16.mxu0 %v3758_v39  ;;  %v3781_v16 = vld [vmem:[%s5785_s0 + $0x54] ss:$8 sps:$4 sm:$0xff]   ;;  %v1538_v17 = vld [vmem:[%s5786_s8 + $0x28] sm:$0xff]  ;;  %v1537_v18 = vld [vmem:[%s5786_s8 + $0x20] sm:$0xff] }
  0x1c   :  { %3294 = vmatprep.subr.bf16.mxu1 %v3759_v40  ;;  %v3783_v19 = vld [vmem:[%s5785_s0 + $0x50] ss:$8 sps:$4 sm:$0xff]   ;;  %v3784_v22 = vld [vmem:[%s5785_s0 + $0x64] ss:$8 sps:$4 sm:$0xff]   ;;  %v3786_v25 = vld [vmem:[%s5785_s0 + $0x60] ss:$8 sps:$4 sm:$0xff]  }
  0x1d   :  { %3183 = vmatpush3.bf16.msra.mxu0 %v3760_v41  ;;  %v1540_v20 = vld [vmem:[%s5786_s8 + $0x38] sm:$0xff]  ;;  %v1539_v21 = vld [vmem:[%s5786_s8 + $0x30] sm:$0xff]  ;;  %v1542_v23 = vld [vmem:[%s5786_s8 + $0x48] sm:$0xff] }
  0x1e   :  { %1347 = vperm.xlu1 %3621, %v1253_v43   ;;  %3295 = vmatpush3.bf16.msra.mxu1 %v3761_v42  ;;  %v1541_v24 = vld [vmem:[%s5786_s8 + $0x40] sm:$0xff]  ;;  %v1544_v26 = vld [vmem:[%s5786_s8 + $0x58] sm:$0xff]  ;;  %v1543_v27 = vld [vmem:[%s5786_s8 + $0x50] sm:$0xff] }
  0x1f   :  { %1342 = vperm.xlu0 %3620, %v1252_v44   ;;  %3184 = vmatprep.subr.bf16.mxu0 %v3762_v45  ;;  %v3787_v28 = vld [vmem:[%s5785_s0 + $0x74] ss:$8 sps:$4 sm:$0xff]   ;;  %v1549_v29 = vld [vmem:[%s5786_s8 + $0x80] sm:$0xff]  ;;  %v3789_v31 = vld [vmem:[%s5785_s0 + $0x70] ss:$8 sps:$4 sm:$0xff]  }
  0x20   :  { %3296 = vmatprep.subr.bf16.mxu1 %v3763_v46  ;;  %v1545_v30 = vld [vmem:[%s5786_s8 + $0x60] sm:$0xff]  ;;  %v1551_v32 = vld [vmem:[%s5786_s8 + $0x90] sm:$0xff]  ;;  %v1550_v33 = vld [vmem:[%s5786_s8 + $0x88] sm:$0xff] }
  0x21   :  { %3185 = vmatpush3.bf16.msra.mxu0 %v3764_v47  ;;  %v3790_v34 = vld [vmem:[%s5785_s0 + $0x84] ss:$8 sps:$4 sm:$0xff]   ;;  %v1552_v36 = vld [vmem:[%s5786_s8 + $0x98] sm:$0xff]  ;;  %v3792_v37 = vld [vmem:[%s5785_s0 + $0x80] ss:$8 sps:$4 sm:$0xff]  }
  0x22   :  { %1357 = vperm.xlu1 %3621, %v1255_v49   ;;  %3297 = vmatpush3.bf16.msra.mxu1 %v3765_v48  ;;  %v1553_v35 = vld [vmem:[%s5786_s8 + $0xa0] sm:$0xff]  ;;  %v1555_v38 = vld [vmem:[%s5786_s8 + $0xb0] sm:$0xff]  ;;  %v1554_v39 = vld [vmem:[%s5786_s8 + $0xa8] sm:$0xff] }
  0x23   :  { %1352 = vperm.xlu0 %3620, %v1254_v50   ;;  %v3793_v40 = vld [vmem:[%s5785_s0 + $0x94] ss:$8 sps:$4 sm:$0xff]   ;;  %v4265_v41 = vld [vmem:[%s5787_s7 + $0x80] sm:$0xff]  ;;  %v3795_v44 = vld [vmem:[%s5785_s0 + $0x90] ss:$8 sps:$4 sm:$0xff]  }
  0x24   :  { %530 = vmatmul.mubr.bf16.vlgmr.msra.gmra.mrb[0].mxu0 %v3766_v51  ;;  %v1557_v42 = vld [vmem:[%s5786_s8 + $0xc0] sm:$0xff]  ;;  %v1556_v43 = vld [vmem:[%s5786_s8 + $0xb8] sm:$0xff]  ;;  %vm1869_vm0 = vcmp.gt.f32.partialorder %v4265_v41, 0.0  ;;  %v4285_v46 = vld [vmem:[%s5787_s7 + $0x88] sm:$0xff] }
  0x25   :  { %915 = vmatmul.mubr.bf16.vlgmr.msra.gmra.mrb[0].mxu1 %v3766_v51  ;;  %537 = vmatprep.mubr.bf16.mxu0 %v3769_v55  ;;  %v4280_v45 = vld [vmem:[%s5787_s7] sm:$0xff]  ;;  %v1933_v47 = vsel %vm1869_vm0, %v4265_v41, 1.0  ;;  %v1558_v48 = vld [vmem:[%s5786_s8 + $0xc8] sm:$0xff]  ;;  %vm1870_vm2 = vcmp.gt.f32.partialorder %v4285_v46, 0.0  ;;  %v4499_v41 = vld [vmem:[%s5787_s7 + $0x30] sm:$0xff] }
  0x26   :  { %1367 = vperm.xlu1 %3621, %v1257_v53   ;;  %922 = vmatprep.mubr.bf16.mxu1 %v3769_v55  ;;  %v3796_v49 = vld [vmem:[%s5785_s0 + $0xa4] ss:$8 sps:$4 sm:$0xff]   ;;  %vm1853_vm1 = vcmp.gt.f32.partialorder %v4280_v45, 0.0  ;;  %v1934_v52 = vsel %vm1870_vm2, %v4285_v46, 1.0  ;;  %v3798_v53 = vld [vmem:[%s5785_s0 + $0xa0] ss:$8 sps:$4 sm:$0xff]  }
  0x27   :  { %1362 = vperm.xlu0 %3620, %v1256_v54   ;;  %v4301_v50 = vld [vmem:[%s5787_s7 + $0x8] sm:$0xff]  ;;  %v1917_v51 = vsel %vm1853_vm1, %v4280_v45, 1.0  ;;  %v4316_v54 = vld [vmem:[%s5787_s7 + $0x90] sm:$0xff]  ;;  %vm1859_vm15 = vcmp.gt.f32.partialorder %v4499_v41, 0.0 }
  0x28   :  { %vm1854_vm3 = vcmp.gt.f32.partialorder %v4301_v50, 0.0  ;;  %v1559_v55 = vld [vmem:[%s5786_s8 + $0xd0] sm:$0xff]  ;;  %vm1871_vm4 = vcmp.gt.f32.partialorder %v4316_v54, 0.0 }
  0x2a   :  { %1377 = vperm.xlu1 %3621, %v1259_v56   ;;  %v1918_v56 = vsel %vm1854_vm3, %v4301_v50, 1.0 }
  0x2b   :  { %1372 = vperm.xlu0 %3620, %v1258_v57   ;;  %v3799_v57 = vld [vmem:[%s5785_s0 + $0xb4] ss:$8 sps:$4 sm:$0xff]  }
  0x2c   :  { %538 = vmatmul.mubr.bf16.gmra.mrb[4].mxu0 %v3771_v58 }
  0x2d   :  { %923 = vmatmul.mubr.bf16.gmra.mrb[4].mxu1 %v3771_v58  ;;  %545 = vmatprep.mubr.bf16.mxu0 %v3772_v61  ;;  %v4331_v58 = vld [vmem:[%s5787_s7 + $0x10] sm:$0xff] }
  0x2e   :  { %1387 = vperm.xlu1 %3621, %v1261_v59   ;;  %930 = vmatprep.mubr.bf16.mxu1 %v3772_v61  ;;  %v4336_v59 = vld [vmem:[%s5787_s7 + $0x98] sm:$0xff]  ;;  %vm1855_vm5 = vcmp.gt.f32.partialorder %v4331_v58, 0.0 }
  0x2f   :  { %1382 = vperm.xlu0 %3620, %v1260_v60   ;;  %v1935_v60 = vsel %vm1871_vm4, %v4316_v54, 1.0  ;;  %v1560_v61 = vld [vmem:[%s5786_s8 + $0xd8] sm:$0xff]  ;;  %vm1872_vm6 = vcmp.gt.f32.partialorder %v4336_v59, 0.0 }
  0x32   :  { %1397 = vperm.xlu1 %3621, %v1263_v62   ;;  %v3801_v62 = vld [vmem:[%s5785_s0 + $0xb0] ss:$8 sps:$4 sm:$0xff]  }
  0x33   :  { %1392 = vperm.xlu0 %3620, %v1262_v63   ;;  %v4352_v63 = vld [vmem:[%s5787_s7 + $0x18] sm:$0xff] }
  0x34   :  { %546 = vmatmul.mubr.bf16.gmra.mrb[8].mxu0 %v3774_v1  ;;  %vm1856_vm7 = vcmp.gt.f32.partialorder %v4352_v63, 0.0 }
  0x35   :  { %931 = vmatmul.mubr.bf16.gmra.mrb[8].mxu1 %v3774_v1  ;;  %553 = vmatprep.mubr.bf16.mxu0 %v3775_v4  ;;  %v1919_v1 = vsel %vm1855_vm5, %v4331_v58, 1.0 }
  0x36   :  { %1407 = vperm.xlu1 %3621, %v1265_v2   ;;  %938 = vmatprep.mubr.bf16.mxu1 %v3775_v4  ;;  %v1936_v2 = vsel %vm1872_vm6, %v4336_v59, 1.0 }
  0x37   :  { %1402 = vperm.xlu0 %3620, %v1264_v3  }
  0x3a   :  { %1417 = vperm.xlu1 %3621, %v1267_v5   ;;  %v3802_v5 = vld [vmem:[%s5785_s0 + $0xc4] ss:$8 sps:$4 sm:$0xff]  }
  0x3b   :  { %1412 = vperm.xlu0 %3620, %v1266_v6   ;;  %v4371_v6 = vld [vmem:[%s5787_s7 + $0xa0] sm:$0xff] }
  0x3c   :  { %554 = vmatmul.mubr.bf16.gmra.mrb[12].mxu0 %v3777_v7  ;;  %vm1873_vm8 = vcmp.gt.f32.partialorder %v4371_v6, 0.0 }
  0x3d   :  { %939 = vmatmul.mubr.bf16.gmra.mrb[12].mxu1 %v3777_v7  ;;  %561 = vmatprep.mubr.bf16.mxu0 %v3778_v10  ;;  %v1561_v7 = vld [vmem:[%s5786_s8 + $0xe0] sm:$0xff] }
  0x3e   :  { %1427 = vperm.xlu1 %3621, %v1269_v8   ;;  %946 = vmatprep.mubr.bf16.mxu1 %v3778_v10  ;;  %v1920_v8 = vsel %vm1856_vm7, %v4352_v63, 1.0 }
  0x3f   :  { %1422 = vperm.xlu0 %3620, %v1268_v9  }
  0x42   :  { %1636 = vperm.xlu1 %3621, %v1534_v11   ;;  %v3804_v11 = vld [vmem:[%s5785_s0 + $0xc0] ss:$8 sps:$4 sm:$0xff]  }
  0x43   :  { %1631 = vperm.xlu0 %3620, %v1533_v12   ;;  %v4390_v12 = vld [vmem:[%s5787_s7 + $0xa8] sm:$0xff] }
  0x44   :  { %562 = vmatmul.mubr.bf16.gmra.mrb[16].mxu0 %v3780_v13  ;;  %vm1874_vm9 = vcmp.gt.f32.partialorder %v4390_v12, 0.0 }
  0x45   :  { %947 = vmatmul.mubr.bf16.gmra.mrb[16].mxu1 %v3780_v13  ;;  %569 = vmatprep.mubr.bf16.mxu0 %v3781_v16  ;;  %v1937_v13 = vsel %vm1873_vm8, %v4371_v6, 1.0 }
  0x46   :  { %1646 = vperm.xlu1 %3621, %v1536_v14   ;;  %954 = vmatprep.mubr.bf16.mxu1 %v3781_v16  ;;  %v1562_v14 = vld [vmem:[%s5786_s8 + $0xe8] sm:$0xff] }
  0x47   :  { %1641 = vperm.xlu0 %3620, %v1535_v15   ;;  %v3805_v15 = vld [vmem:[%s5785_s0 + $0xd4] ss:$8 sps:$4 sm:$0xff]  }
  0x4a   :  { %1656 = vperm.xlu1 %3621, %v1538_v17  }
  0x4b   :  { %1651 = vperm.xlu0 %3620, %v1537_v18   ;;  %v4409_v18 = vld [vmem:[%s5787_s7 + $0x28] sm:$0xff] }
  0x4c   :  { %570 = vmatmul.mubr.bf16.gmra.mrb[20].mxu0 %v3783_v19  ;;  %vm1858_vm10 = vcmp.gt.f32.partialorder %v4409_v18, 0.0 }
  0x4d   :  { %955 = vmatmul.mubr.bf16.gmra.mrb[20].mxu1 %v3783_v19  ;;  %577 = vmatprep.mubr.bf16.mxu0 %v3784_v22  ;;  %v4414_v19 = vld [vmem:[%s5787_s7 + $0x20] sm:$0xff] }
  0x4e   :  { %1666 = vperm.xlu1 %3621, %v1540_v20   ;;  %962 = vmatprep.mubr.bf16.mxu1 %v3784_v22  ;;  %v1546_v20 = vld [vmem:[%s5786_s8 + $0x68] sm:$0xff]  ;;  %vm1857_vm11 = vcmp.gt.f32.partialorder %v4414_v19, 0.0  ;;  %v3807_v22 = vld [vmem:[%s5785_s0 + $0xd0] ss:$8 sps:$4 sm:$0xff]  }
  0x4f   :  { %1661 = vperm.xlu0 %3620, %v1539_v21   ;;  %v1938_v21 = vsel %vm1874_vm9, %v4390_v12, 1.0 }
  0x52   :  { %1676 = vperm.xlu1 %3621, %v1542_v23  }
  0x53   :  { %1671 = vperm.xlu0 %3620, %v1541_v24  }
  0x54   :  { %578 = vmatmul.mubr.bf16.gmra.mrb[24].mxu0 %v3786_v25 }
  0x55   :  { %963 = vmatmul.mubr.bf16.gmra.mrb[24].mxu1 %v3786_v25  ;;  %585 = vmatprep.mubr.bf16.mxu0 %v3787_v28  ;;  %v1922_v25 = vsel %vm1858_vm10, %v4409_v18, 1.0 }
  0x56   :  { %1686 = vperm.xlu1 %3621, %v1544_v26   ;;  %970 = vmatprep.mubr.bf16.mxu1 %v3787_v28  ;;  %v1921_v26 = vsel %vm1857_vm11, %v4414_v19, 1.0 }
  0x57   :  { %1681 = vperm.xlu0 %3620, %v1543_v27   ;;  %v3808_v27 = vld [vmem:[%s5785_s0 + $0xe4] ss:$8 sps:$4 sm:$0xff]  }
  0x5a   :  { %1711 = vperm.xlu1 %3621, %v1549_v29   ;;  %v4445_v29 = vld [vmem:[%s5787_s7 + $0xb0] sm:$0xff] }
  0x5b   :  { %1691 = vperm.xlu0 %3620, %v1545_v30   ;;  %vm1875_vm12 = vcmp.gt.f32.partialorder %v4445_v29, 0.0 }
  0x5c   :  { %586 = vmatmul.mubr.bf16.gmra.mrb[28].mxu0 %v3789_v31 }
  0x5d   :  { %971 = vmatmul.mubr.bf16.gmra.mrb[28].mxu1 %v3789_v31  ;;  %593 = vmatprep.mubr.bf16.mxu0 %v3790_v34  ;;  %v1547_v31 = vld [vmem:[%s5786_s8 + $0x70] sm:$0xff] }
  0x5e   :  { %1721 = vperm.xlu1 %3621, %v1551_v32   ;;  %978 = vmatprep.mubr.bf16.mxu1 %v3790_v34  ;;  %v1563_v32 = vld [vmem:[%s5786_s8 + $0xf0] sm:$0xff]  ;;  %v4462_v34 = vld [vmem:[%s5787_s7 + $0xb8] sm:$0xff] }
  0x5f   :  { %1716 = vperm.xlu0 %3620, %v1550_v33   ;;  %v3810_v33 = vld [vmem:[%s5785_s0 + $0xe0] ss:$8 sps:$4 sm:$0xff]   ;;  %vm1876_vm13 = vcmp.gt.f32.partialorder %v4462_v34, 0.0 }
  0x62   :  { %1731 = vperm.xlu1 %3621, %v1553_v35  }
  0x63   :  { %1726 = vperm.xlu0 %3620, %v1552_v36  }
  0x64   :  { %594 = vmatmul.mubr.bf16.gmra.mrb[32].mxu0 %v3792_v37 }
  0x65   :  { %979 = vmatmul.mubr.bf16.gmra.mrb[32].mxu1 %v3792_v37  ;;  %601 = vmatprep.mubr.bf16.mxu0 %v3793_v40  ;;  %v1939_v37 = vsel %vm1875_vm12, %v4445_v29, 1.0 }
  0x66   :  { %1741 = vperm.xlu1 %3621, %v1555_v38   ;;  %986 = vmatprep.mubr.bf16.mxu1 %v3793_v40  ;;  %v1564_v38 = vld [vmem:[%s5786_s8 + $0xf8] sm:$0xff] }
  0x67   :  { %1736 = vperm.xlu0 %3620, %v1554_v39   ;;  %v3811_v39 = vld [vmem:[%s5785_s0 + $0xf4] ss:$8 sps:$4 sm:$0xff]  }
  0x6a   :  { %1751 = vperm.xlu1 %3621, %v1557_v42   ;;  %v2189_v42 = vsel %vm1869_vm0, 1, %v5797_v0 }
  0x6b   :  { %1746 = vperm.xlu0 %3620, %v1556_v43   ;;  %v1940_v43 = vsel %vm1876_vm13, %v4462_v34, 1.0 }
  0x6c   :  { %602 = vmatmul.mubr.bf16.gmra.mrb[36].mxu0 %v3795_v44 }
  0x6d   :  { %987 = vmatmul.mubr.bf16.gmra.mrb[36].mxu1 %v3795_v44  ;;  %609 = vmatprep.mubr.bf16.mxu0 %v3796_v49 }
  0x6e   :  { %2031 = vperm.xlu1 %3621, %v1933_v47   ;;  %994 = vmatprep.mubr.bf16.mxu1 %v3796_v49  ;;  %v3813_v47 = vld [vmem:[%s5785_s0 + $0xf0] ss:$8 sps:$4 sm:$0xff]  }
  0x6f   :  { %1756 = vperm.xlu0 %3620, %v1558_v48   ;;  %v4494_v48 = vld [vmem:[%s5787_s7 + $0x38] sm:$0xff] }
  0x70   :  { %vm1860_vm14 = vcmp.gt.f32.partialorder %v4494_v48, 0.0 }
  0x72   :  { %1951 = vperm.xlu1 %3621, %v1917_v51   ;;  %v1548_v51 = vld [vmem:[%s5786_s8 + $0x78] sm:$0xff] }
  0x73   :  { %2036 = vperm.xlu0 %3620, %v1934_v52   ;;  %v2190_v52 = vsel %vm1870_vm2, 1, %v5797_v0 }
  0x74   :  { %610 = vmatmul.mubr.bf16.gmra.mrb[40].mxu0 %v3798_v53 }
  0x75   :  { %995 = vmatmul.mubr.bf16.gmra.mrb[40].mxu1 %v3798_v53  ;;  %617 = vmatprep.mubr.bf16.mxu0 %v3799_v57 }
  0x76   :  { %1761 = vperm.xlu1 %3621, %v1559_v55   ;;  %1002 = vmatprep.mubr.bf16.mxu1 %v3799_v57  ;;  %v1924_v55 = vsel %vm1860_vm14, %v4494_v48, 1.0  ;;  %v3162_v48 = vld [vmem:[%s5789_s4 + $0x40] sm:$0xff]  }
  0x77   :  { %1956 = vperm.xlu0 %3620, %v1918_v56   ;;  %v1923_v56 = vsel %vm1859_vm15, %v4499_v41, 1.0 }
  0x7a   :  { %2041 = vperm.xlu1 %3621, %v1935_v60   ;;  %v4526_v60 = vld [vmem:[%s5787_s7 + $0xc8] sm:$0xff] }
  0x7b   :  { %1766 = vperm.xlu0 %3620, %v1560_v61   ;;  %v4531_v61 = vld [vmem:[%s5787_s7 + $0xc0] sm:$0xff]  ;;  %vm1878_vm0 = vcmp.gt.f32.partialorder %v4526_v60, 0.0 }
  0x7c   :  { %618 = vmatmul.mubr.bf16.gmra.mrb[44].mxu0 %v3801_v62  ;;  %vm1877_vm2 = vcmp.gt.f32.partialorder %v4531_v61, 0.0  ;;  %v1942_v45 = vsel %vm1878_vm0, %v4526_v60, 1.0 }
  0x7d   :  { %1003 = vmatmul.mubr.bf16.gmra.mrb[44].mxu1 %v3801_v62  ;;  %625 = vmatprep.mubr.bf16.mxu0 %v3802_v5  ;;  %v2174_v62 = vsel %vm1854_vm3, 1, %v5797_v0  ;;  %v1941_v50 = vsel %vm1877_vm2, %v4531_v61, 1.0 }
  0x7e   :  { %1961 = vperm.xlu1 %3621, %v1919_v1   ;;  %1010 = vmatprep.mubr.bf16.mxu1 %v3802_v5  ;;  %v2173_v1 = vsel %vm1853_vm1, 1, %v5797_v0 }
  0x7f   :  { %2046 = vperm.xlu0 %3620, %v1936_v2  }
  0x81   :  { %v4360_v3 = vpop.permute.xlu1 %1282  ;;  %v4362_v4 = vpop.permute.xlu0 %1272 }
  0x82   :  { %1771 = vperm.xlu1 %3621, %v1561_v7   ;;  %v5796_v7 = vmov 0.0  }
  0x83   :  { %1966 = vperm.xlu0 %3620, %v1920_v8   ;;  %76 = vst [vmem:[%s5788_s12] sm:$0x1] %v5796_v7 }
  0x84   :  { %626 = vmatmul.mubr.bf16.gmra.mrb[48].mxu0 %v3804_v11 }
  0x85   :  { %v4379_v9 = vpop.permute.xlu1 %1287  ;;  %1011 = vmatmul.mubr.bf16.gmra.mrb[48].mxu1 %v3804_v11  ;;  %633 = vmatprep.mubr.bf16.mxu0 %v3805_v15 }
  0x86   :  { %v4381_v10 = vpop.permute.xlu0 %1277  ;;  %2051 = vperm.xlu1 %3621, %v1937_v13   ;;  %1018 = vmatprep.mubr.bf16.mxu1 %v3805_v15  ;;  %v4562_v13 = vld [vmem:[%s5787_s7 + $0x48] sm:$0xff]  ;;  %v2192_v15 = vsel %vm1872_vm6, 1, %v5797_v0 }
  0x87   :  { %1776 = vperm.xlu0 %3620, %v1562_v14   ;;  %v4567_v14 = vld [vmem:[%s5787_s7 + $0x40] sm:$0xff]  ;;  %vm1862_vm1 = vcmp.gt.f32.partialorder %v4562_v13, 0.0 }
  0x88   :  { %vm1861_vm3 = vcmp.gt.f32.partialorder %v4567_v14, 0.0 }
  0x89   :  { %v4401_v16 = vpop.permute.xlu1 %1297  ;;  %v1925_v59 = vsel %vm1861_vm3, %v4567_v14, 1.0 }
  0x8a   :  { %v4404_v17 = vpop.permute.xlu0 %1292  ;;  %1696 = vperm.xlu1 %3621, %v1546_v20   ;;  %v2191_v20 = vsel %vm1871_vm4, 1, %v5797_v0 }
  0x8b   :  { %2056 = vperm.xlu0 %3620, %v1938_v21  }
  0x8c   :  { %634 = vmatmul.mubr.bf16.gmra.mrb[52].mxu0 %v3807_v22 }
  0x8d   :  { %v4427_v23 = vpop.permute.xlu1 %1307  ;;  %1019 = vmatmul.mubr.bf16.gmra.mrb[52].mxu1 %v3807_v22  ;;  %641 = vmatprep.mubr.bf16.mxu0 %v3808_v27 }
  0x8e   :  { %v4429_v24 = vpop.permute.xlu0 %1302  ;;  %1976 = vperm.xlu1 %3621, %v1922_v25   ;;  %1026 = vmatprep.mubr.bf16.mxu1 %v3808_v27  ;;  %v1926_v25 = vsel %vm1862_vm1, %v4562_v13, 1.0  ;;  %v4594_v27 = vld [vmem:[%s5787_s7 + $0xd8] sm:$0xff]  ;;  %v3158_v13 = vld [vmem:[%s5789_s4 + $0x20] sm:$0xff]  }
  0x8f   :  { %1971 = vperm.xlu0 %3620, %v1921_v26   ;;  %vm1880_vm4 = vcmp.gt.f32.partialorder %v4594_v27, 0.0 }
  0x91   :  { %v4440_v28 = vpop.permute.xlu1 %1317 }
  0x92   :  { %v4447_v30 = vpop.permute.xlu0 %1312  ;;  %1701 = vperm.xlu1 %3621, %v1547_v31   ;;  %v4599_v31 = vld [vmem:[%s5787_s7 + $0xd0] sm:$0xff] }
  0x93   :  { %1781 = vperm.xlu0 %3620, %v1563_v32   ;;  %v2176_v32 = vsel %vm1856_vm7, 1, %v5797_v0  ;;  %vm1879_vm6 = vcmp.gt.f32.partialorder %v4599_v31, 0.0 }
  0x94   :  { %642 = vmatmul.mubr.bf16.gmra.mrb[56].mxu0 %v3810_v33  ;;  %v1943_v63 = vsel %vm1879_vm6, %v4599_v31, 1.0 }
  0x95   :  { %v4464_v35 = vpop.permute.xlu1 %1327  ;;  %1027 = vmatmul.mubr.bf16.gmra.mrb[56].mxu1 %v3810_v33  ;;  %649 = vmatprep.mubr.bf16.mxu0 %v3811_v39  ;;  %v2175_v33 = vsel %vm1855_vm5, 1, %v5797_v0 }
  0x96   :  { %v4466_v36 = vpop.permute.xlu0 %1322  ;;  %2061 = vperm.xlu1 %3621, %v1939_v37   ;;  %1034 = vmatprep.mubr.bf16.mxu1 %v3811_v39  ;;  %v1944_v39 = vsel %vm1880_vm4, %v4594_v27, 1.0 }
  0x97   :  { %1786 = vperm.xlu0 %3620, %v1564_v38  }
  0x99   :  { %v4478_v40 = vpop.permute.xlu1 %1337 }
  0x9a   :  { %5839 = vst [vmem:[#allocation4_spill] sm:$0xff] %v4478_v40  ;;  %v4486_v44 = vpop.permute.xlu0 %1332  ;;  %2254 = vperm.xlu1 %3621, %v2189_v42  }
  0x9b   :  { %5840 = vst [vmem:[#allocation5_spill] sm:$0xff] %v4486_v44  ;;  %2066 = vperm.xlu0 %3620, %v1940_v43   ;;  %v4626_v43 = vld [vmem:[%s5787_s7 + $0x58] sm:$0xff] }
  0x9c   :  { %650 = vmatmul.mubr.bf16.gmra.mrb[60].mxu0 %v3813_v47  ;;  %vm1864_vm5 = vcmp.gt.f32.partialorder %v4626_v43, 0.0 }
  0x9d   :  { %v4501_v49 = vpop.permute.xlu1 %1347  ;;  %1035 = vmatmul.mubr.bf16.gmra.mrb[60].mxu1 %v3813_v47  ;;  %v4631_v47 = vld [vmem:[%s5787_s7 + $0x50] sm:$0xff] }
  0x9e   :  { %5841 = vst [vmem:[#allocation6_spill] sm:$0xff] %v4501_v49  ;;  %v4509_v53 = vpop.permute.xlu0 %1342  ;;  %1706 = vperm.xlu1 %3621, %v1548_v51   ;;  %v2194_v51 = vsel %vm1874_vm9, 1, %v5797_v0  ;;  %vm1863_vm7 = vcmp.gt.f32.partialorder %v4631_v47, 0.0 }
  0x9f   :  { %5842 = vst [vmem:[#allocation7_spill] sm:$0xff] %v4509_v53  ;;  %2257 = vperm.xlu0 %3620, %v2190_v52   ;;  %v2193_v52 = vsel %vm1873_vm8, 1, %v5797_v0  ;;  %v1927_v12 = vsel %vm1863_vm7, %v4631_v47, 1.0 }
  0xa1   :  { %v4519_v46 = vpop.permute.xlu1 %1357 }
  0xa2   :  { %5843 = vst [vmem:[#allocation8_spill] sm:$0xff] %v4519_v46  ;;  %v4521_v57 = vpop.permute.xlu0 %1352  ;;  %1986 = vperm.xlu1 %3621, %v1924_v55  }
  0xa3   :  { %5844 = vst [vmem:[#allocation9_spill] sm:$0xff] %v4521_v57  ;;  %1981 = vperm.xlu0 %3620, %v1923_v56  }
  0xa5   :  { %v4541_v2 = vpop.permute.xlu1 %1367 }
  0xa6   :  { %5845 = vst [vmem:[#allocation10_spill] sm:$0xff] %v4541_v2  ;;  %v4543_v5 = vpop.permute.xlu0 %1362  ;;  %2209 = vperm.xlu1 %3621, %v2174_v62   ;;  %v1928_v62 = vsel %vm1864_vm5, %v4626_v43, 1.0 }
  0xa7   :  { %5846 = vst [vmem:[#allocation11_spill] sm:$0xff] %v4543_v5  ;;  %2206 = vperm.xlu0 %3620, %v2173_v1  }
  0xa9   :  { %v4555_v8 = vpop.permute.xlu1 %1377 }
  0xaa   :  { %5847 = vst [vmem:[#allocation12_spill] sm:$0xff] %v4555_v8  ;;  %v4557_v11 = vpop.permute.xlu0 %1372  ;;  %2076 = vperm.xlu1 %3621, %v1942_v45   ;;  %v4658_v45 = vld [vmem:[%s5787_s7 + $0xe8] sm:$0xff] }
  0xab   :  { %5848 = vst [vmem:[#allocation13_spill] sm:$0xff] %v4557_v11  ;;  %2071 = vperm.xlu0 %3620, %v1941_v50   ;;  %v4663_v50 = vld [vmem:[%s5787_s7 + $0xe0] sm:$0xff]  ;;  %vm1882_vm8 = vcmp.gt.f32.partialorder %v4658_v45, 0.0 }
  0xac   :  { %vm1881_vm9 = vcmp.gt.f32.partialorder %v4663_v50, 0.0 }
  0xad   :  { %v4577_v21 = vpop.permute.xlu1 %1387  ;;  %v1945_v18 = vsel %vm1881_vm9, %v4663_v50, 1.0 }
  0xae   :  { %5849 = vst [vmem:[#allocation14_spill] sm:$0xff] %v4577_v21  ;;  %v4579_v22 = vpop.permute.xlu0 %1382  ;;  %2263 = vperm.xlu1 %3621, %v2192_v15   ;;  %v2178_v15 = vsel %vm1858_vm10, 1, %v5797_v0  ;;  %v5872_v21 = vmov 0  }
  0xaf   :  { %5850 = vst [vmem:[#allocation15_spill] sm:$0xff] %v4579_v22  ;;  %2260 = vperm.xlu0 %3620, %v2191_v20   ;;  %v2177_v20 = vsel %vm1857_vm11, 1, %v5797_v0  ;;  %v2198_v22 = vsel %vm1878_vm0, 1, %v5872_v21 }
  0xb1   :  { %v4587_v54 = vpop.permute.xlu1 %1397 }
  0xb2   :  { %5851 = vst [vmem:[#allocation16_spill] sm:$0xff] %v4587_v54  ;;  %v4589_v26 = vpop.permute.xlu0 %1392  ;;  %1996 = vperm.xlu1 %3621, %v1926_v25   ;;  %v3163_v54 = vld [vmem:[%s5789_s4 + $0x48] sm:$0xff]  }
  0xb3   :  { %5852 = vst [vmem:[#allocation17_spill] sm:$0xff] %v4589_v26  ;;  %1991 = vperm.xlu0 %3620, %v1925_v59   ;;  %v3111_v26 = vunpack.c.h.bf16 %v3162_v48  ;;  %v3114_v60 = vunpack.c.l.bf16 %v3163_v54  ;;  %v3115_v46 = vunpack.c.h.bf16 %v3163_v54  ;;  %v3157_v54 = vld [vmem:[%s5789_s4 + $0x18] sm:$0xff]  }
  0xb5   :  { %v4609_v37 = vpop.permute.xlu1 %1407 }
  0xb6   :  { %5853 = vst [vmem:[#allocation18_spill] sm:$0xff] %v4609_v37  ;;  %v4611_v38 = vpop.permute.xlu0 %1402  ;;  %2215 = vperm.xlu1 %3621, %v2176_v32   ;;  %v1946_v32 = vsel %vm1882_vm8, %v4658_v45, 1.0  ;;  %v3155_v37 = vld [vmem:[%s5789_s4 + $0x8] sm:$0xff]  }
  0xb7   :  { %5854 = vst [vmem:[#allocation19_spill] sm:$0xff] %v4611_v38  ;;  %2212 = vperm.xlu0 %3620, %v2175_v33   ;;  %v3110_v38 = vunpack.c.l.bf16 %v3162_v48  ;;  %v3082_v8 = vunpack.c.l.bf16 %v3155_v37  ;;  %v3156_v48 = vld [vmem:[%s5789_s4 + $0x10] sm:$0xff]  }
  0xb9   :  { %v4619_v58 = vpop.permute.xlu1 %1417 }
  0xba   :  { %5855 = vst [vmem:[#allocation20_spill] sm:$0xff] %v4619_v58  ;;  %v4621_v42 = vpop.permute.xlu0 %1412  ;;  %2086 = vperm.xlu1 %3621, %v1944_v39   ;;  %v4690_v39 = vld [vmem:[%s5787_s7 + $0x68] sm:$0xff] }
  0xbb   :  { %5856 = vst [vmem:[#allocation21_spill] sm:$0xff] %v4621_v42  ;;  %2081 = vperm.xlu0 %3620, %v1943_v63   ;;  %v4695_v63 = vld [vmem:[%s5787_s7 + $0x60] sm:$0xff]  ;;  %vm1866_vm10 = vcmp.gt.f32.partialorder %v4690_v39, 0.0 }
  0xbc   :  { %vm1865_vm11 = vcmp.gt.f32.partialorder %v4695_v63, 0.0 }
  0xbd   :  { %v4641_v55 = vpop.permute.xlu1 %1427  ;;  %v1929_v34 = vsel %vm1865_vm11, %v4695_v63, 1.0 }
  0xbe   :  { %5857 = vst [vmem:[#allocation22_spill] sm:$0xff] %v4641_v55  ;;  %v4643_v56 = vpop.permute.xlu0 %1422  ;;  %2269 = vperm.xlu1 %3621, %v2194_v51   ;;  %v2196_v51 = vsel %vm1876_vm13, 1, %v5797_v0 }
  0xbf   :  { %5858 = vst [vmem:[#allocation23_spill] sm:$0xff] %v4643_v56  ;;  %2266 = vperm.xlu0 %3620, %v2193_v52   ;;  %v2195_v52 = vsel %vm1875_vm12, 1, %v5797_v0 }
  0xc1   :  { %v4651_v6 = vpop.permute.xlu1 %1636 }
  0xc2   :  { %v4653_v1 = vpop.permute.xlu0 %1631  ;;  %2006 = vperm.xlu1 %3621, %v1928_v62  }
  0xc3   :  { %5859 = vst [vmem:[#allocation24_spill] sm:$0xff] %v4653_v1  ;;  %2001 = vperm.xlu0 %3620, %v1927_v12  }
  0xc5   :  { %v4673_v25 = vpop.permute.xlu1 %1646 }
  0xc6   :  { %5860 = vst [vmem:[#allocation25_spill] sm:$0xff] %v4673_v25  ;;  %v4675_v59 = vpop.permute.xlu0 %1641  ;;  %2221 = vperm.xlu1 %3621, %v2178_v15   ;;  %v1930_v15 = vsel %vm1866_vm10, %v4690_v39, 1.0 }
  0xc7   :  { %5861 = vst [vmem:[#allocation26_spill] sm:$0xff] %v4675_v59  ;;  %2218 = vperm.xlu0 %3620, %v2177_v20  }
  0xc9   :  { %v4683_v19 = vpop.permute.xlu1 %1656 }
  0xca   :  { %5862 = vst [vmem:[#allocation27_spill] sm:$0xff] %v4683_v19  ;;  %v4685_v33 = vpop.permute.xlu0 %1651  ;;  %2096 = vperm.xlu1 %3621, %v1946_v32   ;;  %v4722_v32 = vld [vmem:[%s5787_s7 + $0xf8] sm:$0xff] }
  0xcb   :  { %5863 = vst [vmem:[#allocation28_spill] sm:$0xff] %v4685_v33  ;;  %2091 = vperm.xlu0 %3620, %v1945_v18   ;;  %v4727_v18 = vld [vmem:[%s5787_s7 + $0xf0] sm:$0xff]  ;;  %vm1884_vm12 = vcmp.gt.f32.partialorder %v4722_v32, 0.0 }
  0xcc   :  { %vm1883_vm13 = vcmp.gt.f32.partialorder %v4727_v18, 0.0  ;;  %v1948_v41 = vsel %vm1884_vm12, %v4722_v32, 1.0 }
  0xcd   :  { %v4705_v62 = vpop.permute.xlu1 %1666 }
  0xce   :  { %5864 = vst [vmem:[#allocation29_spill] sm:$0xff] %v4705_v62  ;;  %v4707_v12 = vpop.permute.xlu0 %1661  ;;  %2275 = vperm.xlu1 %3621, %v2196_v51   ;;  %v2180_v51 = vsel %vm1860_vm14, 1, %v5797_v0 }
  0xcf   :  { %5865 = vst [vmem:[#allocation30_spill] sm:$0xff] %v4707_v12  ;;  %2272 = vperm.xlu0 %3620, %v2195_v52   ;;  %v2179_v52 = vsel %vm1859_vm15, 1, %v5797_v0 }
  0xd1   :  { %v4715_v29 = vpop.permute.xlu1 %1676 }
  0xd2   :  { %5866 = vst [vmem:[#allocation31_spill] sm:$0xff] %v4715_v29  ;;  %v4717_v20 = vpop.permute.xlu0 %1671  ;;  %2016 = vperm.xlu1 %3621, %v1930_v15   ;;  %v3077_v15 = vld [vmem:[%s5789_s4] sm:$0xff]  }
  0xd3   :  { %5867 = vst [vmem:[#allocation32_spill] sm:$0xff] %v4717_v20  ;;  %2011 = vperm.xlu0 %3620, %v1929_v34   ;;  %v1947_v34 = vsel %vm1883_vm13, %v4727_v18, 1.0  ;;  %v3079_v0 = vunpack.c.h.bf16 %v3077_v15  ;;  %v3078_v42 = vunpack.c.l.bf16 %v3077_v15  ;;  %v2197_v15 = vsel %vm1877_vm2, 1, %v5872_v21 }
  0xd5   :  { %v4737_v7 = vpop.permute.xlu1 %1686  ;;  %v4792_v61 = vmul.f32 %v3078_v42, %v4653_v1 }
  0xd6   :  { %5868 = vst [vmem:[#allocation33_spill] sm:$0xff] %v4737_v7  ;;  %v4739_v55 = vpop.permute.xlu0 %1681  ;;  %2227 = vperm.xlu1 %3621, %v2180_v51   ;;  %v4760_v51 = vld [vmem:[%s5787_s7 + $0x78] sm:$0xff] }
  0xd7   :  { %5869 = vst [vmem:[#allocation34_spill] sm:$0xff] %v4739_v55  ;;  %2224 = vperm.xlu0 %3620, %v2179_v52   ;;  %v4765_v52 = vld [vmem:[%s5787_s7 + $0x70] sm:$0xff]  ;;  %vm1868_vm14 = vcmp.gt.f32.partialorder %v4760_v51, 0.0 }
  0xd8   :  { %vm1867_vm15 = vcmp.gt.f32.partialorder %v4765_v52, 0.0  ;;  %v1932_v57 = vsel %vm1868_vm14, %v4760_v51, 1.0 }
  0xd9   :  { %v4753_v56 = vpop.permute.xlu1 %1711  ;;  %v1931_v42 = vsel %vm1867_vm15, %v4765_v52, 1.0 }
  0xda   :  { %5870 = vst [vmem:[#allocation35_spill] sm:$0xff] %v4753_v56  ;;  %v4755_v58 = vpop.permute.xlu0 %1691  ;;  %2106 = vperm.xlu1 %3621, %v1948_v41   ;;  %v4782_v41 = vmul.f32 %v3079_v0, %v4651_v6  ;;  %v4795_v5 = vmul.f32 %v3110_v38, %v4753_v56  ;;  %v3087_v38 = vunpack.c.h.bf16 %v3156_v48 }
  0xdb   :  { %5871 = vst [vmem:[#allocation36_spill] sm:$0xff] %v4755_v58  ;;  %2101 = vperm.xlu0 %3620, %v1947_v34   ;;  %v3083_v34 = vunpack.c.h.bf16 %v3155_v37  ;;  %v3164_v37 = vld [vmem:[%s5789_s4 + $0x50] sm:$0xff]  }
  0xdc   :  { %v3118_v49 = vunpack.c.l.bf16 %v3164_v37  ;;  %v3556_v40 = vpack.c.bf16 %v4782_v41, %v4792_v61 }
  0xdd   :  { %v4787_v11 = vpop.permute.xlu1 %1721 }
  0xde   :  { %5873 = vst [vmem:[#allocation37_spill] sm:$0xff] %v4787_v11  ;;  %v4789_v2 = vpop.permute.xlu0 %1716  ;;  %2281 = vperm.xlu1 %3621, %v2198_v22   ;;  %v4812_v22 = vmul.f32 %v3083_v34, %v4673_v25  ;;  %v4827_v44 = vmul.f32 %v3114_v60, %v4787_v11  ;;  %v2181_v60 = vsel %vm1861_vm3, 1, %v5872_v21  ;;  %v3091_v11 = vunpack.c.h.bf16 %v3157_v54 }
  0xdf   :  { %5874 = vst [vmem:[#allocation38_spill] sm:$0xff] %v4789_v2  ;;  %v4798_v0 = vmul.f32 %v3111_v26, %v4789_v2  ;;  %2278 = vperm.xlu0 %3620, %v2197_v15   ;;  %v4815_v15 = vmul.f32 %v3082_v8, %v4675_v59  ;;  %v3086_v2 = vunpack.c.l.bf16 %v3156_v48  ;;  %v3165_v8 = vld [vmem:[%s5789_s4 + $0x58] sm:$0xff]   ;;  %v3119_v48 = vunpack.c.h.bf16 %v3164_v37 }
  0xe0   :  { %v2182_v59 = vsel %vm1862_vm1, 1, %v5872_v21  ;;  %v3090_v37 = vunpack.c.l.bf16 %v3157_v54  ;;  %v3122_v14 = vunpack.c.l.bf16 %v3165_v8  ;;  %v3123_v54 = vunpack.c.h.bf16 %v3165_v8 }
  0xe1   :  { %v3554_v26 = vpack.c.bf16 %v4798_v0, %v4795_v5  ;;  %v4820_v56 = vpop.permute.xlu1 %1731  ;;  %v3094_v8 = vunpack.c.l.bf16 %v3158_v13 }
  0xe2   :  { %5875 = vst [vmem:[#allocation39_spill] sm:$0xff] %v4820_v56  ;;  %v4822_v53 = vpop.permute.xlu0 %1726  ;;  %2026 = vperm.xlu1 %3621, %v1932_v57   ;;  %v3560_v57 = vpack.c.bf16 %v4812_v22, %v4815_v15  ;;  %v4859_v25 = vmul.f32 %v3118_v49, %v4820_v56  ;;  %v2199_v49 = vsel %vm1879_vm6, 1, %v5872_v21 }
  0xe3   :  { %5876 = vst [vmem:[#allocation40_spill] sm:$0xff] %v4822_v53  ;;  %v4830_v34 = vmul.f32 %v3115_v46, %v4822_v53  ;;  %2021 = vperm.xlu0 %3620, %v1931_v42   ;;  %3555 = vmatprep.subr.bf16.mxu0 %v3554_v26  ;;  %v4846_v42 = vmul.f32 %v3087_v38, %v4683_v19  ;;  %v3166_v38 = vld [vmem:[%s5789_s4 + $0x60] sm:$0xff]   ;;  %v2200_v19 = vsel %vm1880_vm4, 1, %v5872_v21 }
  0xe4   :  { %3557 = vmatpush3.bf16.msra.mxu0 %v3556_v40  ;;  %v4856_v40 = vmul.f32 %v3086_v2, %v4685_v33  ;;  %v3095_v2 = vunpack.c.h.bf16 %v3158_v13  ;;  %v3126_v27 = vunpack.c.l.bf16 %v3166_v38  ;;  %v2183_v13 = vsel %vm1863_vm7, 1, %v5872_v21 }
  0xe5   :  { %v3558_v46 = vpack.c.bf16 %v4830_v34, %v4827_v44  ;;  %v4851_v26 = vpop.permute.xlu1 %1741  ;;  %v4911_v43 = vmul.f32 %v3094_v8, %v4717_v20  ;;  %v2201_v8 = vsel %vm1881_vm9, 1, %v5872_v21 }
  0xe6   :  { %5877 = vst [vmem:[#allocation41_spill] sm:$0xff] %v4851_v26  ;;  %v4853_v53 = vpop.permute.xlu0 %1736  ;;  %2233 = vperm.xlu1 %3621, %v2182_v59   ;;  %v3564_v31 = vpack.c.bf16 %v4846_v42, %v4856_v40 }
  0xe7   :  { %5878 = vst [vmem:[#allocation42_spill] sm:$0xff] %v4853_v53  ;;  %v4862_v1 = vmul.f32 %v3119_v48, %v4853_v53  ;;  %2230 = vperm.xlu0 %3620, %v2181_v60   ;;  %3559 = vmatprep.subr.bf16.mxu0 %v3558_v46  ;;  %v4876_v48 = vmul.f32 %v3091_v11, %v4705_v62  ;;  %v3127_v11 = vunpack.c.h.bf16 %v3166_v38 }
  0xe8   :  { %3561 = vmatpush3.bf16.msra.mxu0 %v3560_v57  ;;  %v4879_v60 = vmul.f32 %v3090_v37, %v4707_v12  ;;  %v4888_v57 = vmul.f32 %v3122_v14, %v4851_v26  ;;  %v2184_v37 = vsel %vm1864_vm5, 1, %v5872_v21 }
  0xe9   :  { %v3562_v59 = vpack.c.bf16 %v4862_v1, %v4859_v25  ;;  %v4881_v46 = vpop.permute.xlu1 %1751 }
  0xea   :  { %5879 = vst [vmem:[#allocation43_spill] sm:$0xff] %v4881_v46  ;;  %v4883_v53 = vpop.permute.xlu0 %1746  ;;  %2287 = vperm.xlu1 %3621, %v2200_v19   ;;  %v4904_v19 = vmul.f32 %v3095_v2, %v4715_v29  ;;  %v4914_v47 = vmul.f32 %v3126_v27, %v4881_v46  ;;  %v3159_v2 = vld [vmem:[%s5789_s4 + $0x28] sm:$0xff]  }
  0xeb   :  { %5880 = vst [vmem:[#allocation44_spill] sm:$0xff] %v4883_v53  ;;  %v4891_v56 = vmul.f32 %v3123_v54, %v4883_v53  ;;  %2284 = vperm.xlu0 %3620, %v2199_v49   ;;  %3563 = vmatprep.subr.bf16.mxu0 %v3562_v59  ;;  %v3568_v54 = vpack.c.bf16 %v4876_v48, %v4879_v60  ;;  %v3167_v27 = vld [vmem:[%s5789_s4 + $0x68] sm:$0xff]   ;;  %v3098_v20 = vunpack.c.l.bf16 %v3159_v2 }
  0xec   :  { %3565 = vmatpush3.bf16.msra.mxu0 %v3564_v31  ;;  %5881 = vst [vmem:[#allocation45_spill] sm:$0xff] %v4904_v19  ;;  %v2202_v31 = vsel %vm1882_vm8, 1, %v5872_v21  ;;  %v3572_v45 = vpack.c.bf16 %v4904_v19, %v4911_v43  ;;  %v3130_v50 = vunpack.c.l.bf16 %v3167_v27 }
  0xed   :  { %v3566_v14 = vpack.c.bf16 %v4891_v56, %v4888_v57  ;;  %v4906_v38 = vpop.permute.xlu1 %2031 }
  0xee   :  { %v4908_v49 = vpop.permute.xlu0 %1756  ;;  %2239 = vperm.xlu1 %3621, %v2184_v37   ;;  %v2398_v37 = vadd.f32 %v4782_v41, %v4792_v61 }
  0xef   :  { %5882 = vst [vmem:[#allocation46_spill] sm:$0xff] %v4908_v49  ;;  %v4917_v59 = vmul.f32 %v3127_v11, %v4908_v49  ;;  %2236 = vperm.xlu0 %3620, %v2183_v13   ;;  %3567 = vmatprep.subr.bf16.mxu0 %v3566_v14  ;;  %v2185_v49 = vsel %vm1865_vm11, 1, %v5872_v21 }
  0xf0   :  { %3569 = vmatpush3.bf16.msra.mxu0 %v3568_v54  ;;  %v2399_v29 = vadd.f32 %v2398_v37, %v4815_v15  ;;  %v2186_v54 = vsel %vm1866_vm10, 1, %v5872_v21  ;;  %v3131_v37 = vunpack.c.h.bf16 %v3167_v27 }
  0xf1   :  { %5883 = vst [vmem:[#allocation47_spill] sm:$0xff] %v4917_v59  ;;  %v3570_v11 = vpack.c.bf16 %v4917_v59, %v4914_v47  ;;  %v1952_v13 = vpop.permute.xlu1 %1951 }
  0xf2   :  { %v4935_v14 = vpop.permute.xlu0 %2036  ;;  %3814 = vrcp.f32 %v1952_v13  ;;  %2293 = vperm.xlu1 %3621, %v2202_v31   ;;  %v3013_v31 = vld [vmem:[%s5790_s3] sm:$0xff]   ;;  %v2400_v63 = vadd.f32 %v2399_v29, %v4812_v22  ;;  %v2204_v13 = vsel %vm1884_vm12, 1, %v5872_v21 }
  0xf3   :  { %2290 = vperm.xlu0 %3620, %v2201_v8   ;;  %3571 = vmatprep.subr.bf16.mxu0 %v3570_v11  ;;  %v3099_v8 = vunpack.c.h.bf16 %v3159_v2  ;;  %v4954_v11 = vmul.f32 %v3098_v20, %v4739_v55  ;;  %v3015_v18 = vunpack.c.h.bf16 %v3013_v31 }
  0xf4   :  { %3573 = vmatpush3.bf16.msra.mxu0 %v3572_v45  ;;  %v2203_v45 = vsel %vm1883_vm13, 1, %v5872_v21  ;;  %v2401_v53 = vadd.f32 %v2400_v63, %v4856_v40 }
  0xf5   :  { %v4946_v46 = vpop.permute.xlu1 %1761  ;;  %5885 = vst [vmem:[#allocation49_spill] sm:$0xff] %v4954_v11 }
  0xf6   :  { %5884 = vst [vmem:[#allocation48_spill] sm:$0xff] %v4946_v46  ;;  %v4948_v26 = vpop.permute.xlu0 %1956  ;;  %v4957_v39 = vmul.f32 %v3130_v50, %v4946_v46  ;;  %2245 = vperm.xlu1 %3621, %v2186_v54   ;;  %v3014_v50 = vunpack.c.l.bf16 %v3013_v31  ;;  %v4988_v31 = vld [vmem:[%s5791_s6] ss:$0 sm:$0xff] }
  0xf7   :  { %2242 = vperm.xlu0 %3620, %v2185_v49   ;;  %v3186_v2 = vpop.f32.mrb[0].mxu0  ;;  %v4969_v49 = vmul.f32 %v3099_v8, %v4737_v7  ;;  %v2188_v8 = vsel %vm1868_vm14, 1, %v5872_v21  ;;  %3816 = vrcp.f32 %v4948_v26 }
  0xf8   :  { %5886 = vst [vmem:[#allocation50_spill] sm:$0xff] %v4957_v39  ;;  %v3298_v55 = vpop.f32.mrb[0].mxu1  ;;  %v3187_v46 = vpop.f32.mrb[1].mxu0 }
  0xf9   :  { %v3299_v54 = vpop.f32.mrb[1].mxu1  ;;  %5887 = vst [vmem:[#allocation51_spill] sm:$0xff] %v4969_v49  ;;  %v3188_v29 = vadd.f32 %v3187_v46, %v3186_v2  ;;  %v4971_v12 = vpop.permute.xlu1 %2041  ;;  %v3576_v52 = vpack.c.bf16 %v4969_v49, %v4954_v11 }
  0xfa   :  { %v3300_v27 = vadd.f32 %v3299_v54, %v3298_v55  ;;  %v4973_v32 = vpop.permute.xlu0 %1766  ;;  %2299 = vperm.xlu1 %3621, %v2204_v13   ;;  %v3189_v62 = vpop.f32.mrb[2].mxu0  ;;  %v2187_v55 = vsel %vm1867_vm15, 1, %v5872_v21  ;;  %v3140_v21 = vld [vmem:[%s5790_s3 + $0x8] sm:$0xff]  }
  0xfb   :  { %5888 = vst [vmem:[#allocation52_spill] sm:$0xff] %v4973_v32  ;;  %2296 = vperm.xlu0 %3620, %v2203_v45   ;;  %v4977_v20 = vmul.f32 %v3131_v37, %v4973_v32  ;;  %v3301_v33 = vpop.f32.mrb[2].mxu1  ;;  %v1206_v2 = vadd.f32 %v3188_v29, %v3014_v50  ;;  %v3190_v13 = vpop.f32.mrb[3].mxu0 }
  0xfc   :  { %v3815_v46 = vpop.eup %3814  ;;  %v3302_v45 = vpop.f32.mrb[3].mxu1  ;;  %v3191_v37 = vadd.f32 %v3190_v13, %v3189_v62  ;;  %v2402_v62 = vadd.f32 %v2401_v53, %v4846_v42 }
  0xfd   :  { %5889 = vst [vmem:[#allocation53_spill] sm:$0xff] %v4977_v20  ;;  %v4990_v63 = vmul.f32 %v3815_v46, %v3300_v27  ;;  %v4992_v54 = vadd.f32 %v3302_v45, %v3301_v33  ;;  %v3574_v51 = vpack.c.bf16 %v4977_v20, %v4957_v39  ;;  %v1430_v50 = vmul.f32 %v4362_v4, %v1206_v2  ;;  %v5002_v29 = vpop.permute.xlu1 %1961  ;;  %v3168_v46 = vld [vmem:[%s5789_s4 + $0x70] sm:$0xff]  }
  0xfe   :  { %v5004_v7 = vpop.permute.xlu0 %2046  ;;  %2251 = vperm.xlu1 %3621, %v2188_v8   ;;  %v1207_v27 = vadd.f32 %v3191_v37, %v3015_v18  ;;  %v3018_v45 = vunpack.c.l.bf16 %v3140_v21  ;;  %3818 = vrcp.f32 %v5002_v29 }
  0xff   :  { %5890 = vst [vmem:[#allocation54_spill] sm:$0xff] %v5004_v7  ;;  %2248 = vperm.xlu0 %3620, %v2187_v55   ;;  %3575 = vmatprep.subr.bf16.mxu0 %v3574_v51  ;;  %v1469_v13 = vadd.f32 %v4988_v31, %v1430_v50  ;;  %v3192_v4 = vpop.f32.mrb[4].mxu0  ;;  %v3134_v51 = vunpack.c.l.bf16 %v3168_v46  ;;  %v5893_v50 = vmov 0.0  }
 0x100   :  { %v3304_v2 = vpop.f32.mrb[4].mxu1  ;;  %3577 = vmatpush3.bf16.msra.mxu0 %v3576_v52  ;;  %v1431_v8 = vmul.f32 %v4381_v10, %v1207_v27  ;;  %v3193_v55 = vpop.f32.mrb[5].mxu0  ;;  %77 = vst [vmem:[%s5793_s13] sm:$0x1] %v5893_v50  ;;  %v2403_v10 = vadd.f32 %v2402_v62, %v4879_v60  ;;  %v3160_v52 = vld [vmem:[%s5789_s4 + $0x30] sm:$0xff]  }
 0x101   :  { %v3305_v32 = vpop.f32.mrb[5].mxu1  ;;  %1501 = vst [vmem:[%s5792_s9] sm:$0xff] %v1469_v13  ;;  %v3194_v53 = vadd.f32 %v3193_v55, %v3192_v4  ;;  %v5019_v37 = vpop.permute.xlu1 %1771  ;;  %v3019_v4 = vunpack.c.h.bf16 %v3140_v21  ;;  %v3141_v62 = vld [vmem:[%s5790_s3 + $0x10] sm:$0xff]  }
 0x102   :  { %v5017_v18 = vadd.f32 %v3305_v32, %v3304_v2  ;;  %5892 = vst [vmem:[#allocation56_spill] sm:$0xff] %v5019_v37  ;;  %v5021_v33 = vpop.permute.xlu0 %1966  ;;  %v1470_v27 = vadd.f32 %v4988_v31, %v1431_v8  ;;  %v3195_v32 = vpop.f32.mrb[6].mxu0  ;;  %v3135_v2 = vunpack.c.h.bf16 %v3168_v46  ;;  %v3103_v46 = vunpack.c.h.bf16 %v3160_v52 }
 0x103   :  { %v3307_v13 = vpop.f32.mrb[6].mxu1  ;;  %v1208_v55 = vadd.f32 %v3194_v53, %v3018_v45  ;;  %v3196_v7 = vpop.f32.mrb[7].mxu0  ;;  %v2404_v45 = vadd.f32 %v2403_v10, %v4876_v48  ;;  %v5047_v53 = vmul.f32 %v3134_v51, %v5019_v37  ;;  %3820 = vrcp.f32 %v5021_v33 }
 0x104   :  { %5891 = vst [vmem:[#allocation55_spill] sm:$0xff] %v5017_v18  ;;  %v3308_v20 = vpop.f32.mrb[7].mxu1  ;;  %1502 = vst [vmem:[%s5792_s9 + $0x8] sm:$0xff] %v1470_v27  ;;  %v3197_v50 = vadd.f32 %v3196_v7, %v3195_v32  ;;  %v3102_v18 = vunpack.c.l.bf16 %v3160_v52  ;;  %3822 = vrcp.f32 %v4906_v38 }
 0x105   :  { %v5035_v39 = vadd.f32 %v3308_v20, %v3307_v13  ;;  %v1432_v8 = vmul.f32 %v4360_v3, %v1208_v55  ;;  %v5041_v59 = vpop.permute.xlu1 %2051  ;;  %3824 = vrcp.f32 %v4935_v14 }
 0x106   :  { %5895 = vst [vmem:[#allocation58_spill] sm:$0xff] %v5041_v59  ;;  %v5043_v21 = vpop.permute.xlu0 %1776  ;;  %v1209_v7 = vadd.f32 %v3197_v50, %v3019_v4  ;;  %v3023_v50 = vunpack.c.h.bf16 %v3141_v62  ;;  %3826 = vrcp.f32 %v4971_v12  ;;  %v5915_v12 = vld [vmem:[#allocation50_spill] sm:$0xff] }
 0x107   :  { %5894 = vst [vmem:[#allocation57_spill] sm:$0xff] %v5035_v39  ;;  %5896 = vst [vmem:[#allocation59_spill] sm:$0xff] %v5043_v21  ;;  %v5050_v20 = vmul.f32 %v3135_v2, %v5043_v21  ;;  %v1471_v27 = vadd.f32 %v4988_v31, %v1432_v8  ;;  %v3198_v32 = vpop.f32.mrb[8].mxu0  ;;  %v3022_v39 = vunpack.c.l.bf16 %v3141_v62  ;;  %v2405_v8 = vadd.f32 %v2404_v45, %v4911_v43 }
 0x108   :  { %v3310_v13 = vpop.f32.mrb[8].mxu1  ;;  %v1433_v3 = vmul.f32 %v4379_v9, %v1209_v7  ;;  %v3199_v55 = vpop.f32.mrb[9].mxu0  ;;  %v5067_v9 = vmul.f32 %v3102_v18, %v4755_v58 }
 0x109   :  { %v3311_v59 = vpop.f32.mrb[9].mxu1  ;;  %v3578_v52 = vpack.c.bf16 %v5050_v20, %v5047_v53  ;;  %1503 = vst [vmem:[%s5792_s9 + $0x10] sm:$0xff] %v1471_v27  ;;  %v3200_v51 = vadd.f32 %v3199_v55, %v3198_v32  ;;  %v5061_v4 = vpop.permute.xlu1 %1696 }
 0x10a   :  { %v5059_v10 = vadd.f32 %v3311_v59, %v3310_v13  ;;  %5898 = vst [vmem:[#allocation61_spill] sm:$0xff] %v5061_v4  ;;  %v5063_v2 = vpop.permute.xlu0 %2056  ;;  %v1472_v7 = vadd.f32 %v4988_v31, %v1433_v3  ;;  %v5071_v37 = vmul.f32 %v3103_v46, %v5061_v4  ;;  %v3201_v21 = vpop.f32.mrb[10].mxu0  ;;  %v3142_v46 = vld [vmem:[%s5790_s3 + $0x18] sm:$0xff]  }
 0x10b   :  { %5899 = vst [vmem:[#allocation62_spill] sm:$0xff] %v5063_v2  ;;  %v3313_v27 = vpop.f32.mrb[10].mxu1  ;;  %3579 = vmatprep.subr.bf16.mxu0 %v3578_v52  ;;  %v1210_v59 = vadd.f32 %v3200_v51, %v3022_v39  ;;  %v3202_v32 = vpop.f32.mrb[11].mxu0  ;;  %v2406_v51 = vadd.f32 %v2405_v8, %v4904_v19  ;;  %v3026_v4 = vunpack.c.l.bf16 %v3142_v46  ;;  %v3027_v2 = vunpack.c.h.bf16 %v3142_v46 }
 0x10c   :  { %5897 = vst [vmem:[#allocation60_spill] sm:$0xff] %v5059_v10  ;;  %v3314_v13 = vpop.f32.mrb[11].mxu1  ;;  %1504 = vst [vmem:[%s5792_s9 + $0x18] sm:$0xff] %v1472_v7  ;;  %v3580_v18 = vpack.c.bf16 %v5071_v37, %v5067_v9  ;;  %v3203_v45 = vadd.f32 %v3202_v32, %v3201_v21  ;;  %v3169_v21 = vld [vmem:[%s5789_s4 + $0x78] sm:$0xff]  }
 0x10d   :  { %v1434_v3 = vmul.f32 %v4404_v17, %v1210_v59  ;;  %v5084_v39 = vadd.f32 %v3314_v13, %v3313_v27  ;;  %v5086_v55 = vpop.permute.xlu1 %1976 }
 0x10e   :  { %v5088_v52 = vpop.permute.xlu0 %1971  ;;  %v1211_v7 = vadd.f32 %v3203_v45, %v3023_v50  ;;  %3581 = vmatpush3.bf16.msra.mxu0 %v3580_v18  ;;  %v3138_v45 = vunpack.c.l.bf16 %v3169_v21  ;;  %v5913_v14 = vld [vmem:[#allocation57_spill] sm:$0xff]  ;;  %3828 = vrcp.f32 %v5086_v55 }
 0x10f   :  { %5900 = vst [vmem:[#allocation63_spill] sm:$0xff] %v5084_v39  ;;  %v1473_v32 = vadd.f32 %v4988_v31, %v1434_v3  ;;  %v3204_v62 = vpop.f32.mrb[12].mxu0  ;;  %v2407_v3 = vadd.f32 %v2406_v51, %v4954_v11  ;;  %v3143_v51 = vld [vmem:[%s5790_s3 + $0x20] sm:$0xff]   ;;  %3830 = vrcp.f32 %v5088_v52  ;;  %v5313_v52 = vld [vmem:[%s5790_s3 + $0x50] sm:$0xff]  }
 0x110   :  { %v3316_v58 = vpop.f32.mrb[12].mxu1  ;;  %v1435_v17 = vmul.f32 %v4401_v16, %v1211_v7  ;;  %v3205_v27 = vpop.f32.mrb[13].mxu0  ;;  %v3161_v16 = vld [vmem:[%s5789_s4 + $0x38] sm:$0xff]  }
 0x111   :  { %v3317_v59 = vpop.f32.mrb[13].mxu1  ;;  %1505 = vst [vmem:[%s5792_s9 + $0x20] sm:$0xff] %v1473_v32  ;;  %v3206_v8 = vadd.f32 %v3205_v27, %v3204_v62  ;;  %v5101_v13 = vpop.permute.xlu1 %1701  ;;  %v3139_v32 = vunpack.c.h.bf16 %v3169_v21  ;;  %v3106_v11 = vunpack.c.l.bf16 %v3161_v16 }
 0x112   :  { %v5099_v50 = vadd.f32 %v3317_v59, %v3316_v58  ;;  %5902 = vst [vmem:[#allocation65_spill] sm:$0xff] %v5101_v13  ;;  %v5103_v18 = vpop.permute.xlu0 %1781  ;;  %v1474_v10 = vadd.f32 %v4988_v31, %v1435_v17  ;;  %v3207_v7 = vpop.f32.mrb[14].mxu0 }
 0x113   :  { %5903 = vst [vmem:[#allocation66_spill] sm:$0xff] %v5103_v18  ;;  %v3319_v39 = vpop.f32.mrb[14].mxu1  ;;  %v1212_v62 = vadd.f32 %v3206_v8, %v3026_v4  ;;  %v3208_v58 = vpop.f32.mrb[15].mxu0  ;;  %v2408_v4 = vadd.f32 %v2407_v3, %v4969_v49  ;;  %v5125_v21 = vmul.f32 %v3138_v45, %v5103_v18  ;;  %v3107_v49 = vunpack.c.h.bf16 %v3161_v16 }
 0x114   :  { %5901 = vst [vmem:[#allocation64_spill] sm:$0xff] %v5099_v50  ;;  %v3320_v27 = vpop.f32.mrb[15].mxu1  ;;  %1506 = vst [vmem:[%s5792_s9 + $0x28] sm:$0xff] %v1474_v10  ;;  %v3209_v59 = vadd.f32 %v3208_v58, %v3207_v7  ;;  %v3624_v16 = vpack.i.bf16 %v4782_v41, %v4798_v0 }
 0x115   :  { %v5113_v50 = vadd.f32 %v3320_v27, %v3319_v39  ;;  %v1436_v17 = vmul.f32 %v4429_v24, %v1212_v62  ;;  %v5119_v19 = vpop.permute.xlu1 %2061  ;;  %v3030_v27 = vunpack.c.l.bf16 %v3143_v51 }
 0x116   :  { %v5121_v46 = vpop.permute.xlu0 %1786  ;;  %v1213_v10 = vadd.f32 %v3209_v59, %v3027_v2  ;;  %v3622_v2 = vpack.i.bf16 %v4792_v61, %v4795_v5 }
 0x117   :  { %5904 = vst [vmem:[#allocation67_spill] sm:$0xff] %v5113_v50  ;;  %5905 = vst [vmem:[#allocation68_spill] sm:$0xff] %v5121_v46  ;;  %v5128_v39 = vmul.f32 %v3139_v32, %v5121_v46  ;;  %v1475_v8 = vadd.f32 %v4988_v31, %v1436_v17  ;;  %v3210_v7 = vpop.f32.mrb[16].mxu0  ;;  %v2409_v17 = vadd.f32 %v2408_v4, %v5067_v9 }
 0x118   :  { %v3322_v58 = vpop.f32.mrb[16].mxu1  ;;  %v1437_v24 = vmul.f32 %v4427_v23, %v1213_v10  ;;  %v3211_v62 = vpop.f32.mrb[17].mxu0  ;;  %v3031_v23 = vunpack.c.h.bf16 %v3143_v51  ;;  %v5148_v10 = vmul.f32 %v3106_v11, %v5101_v13  ;;  %v3144_v11 = vld [vmem:[%s5790_s3 + $0x28] sm:$0xff]  }
 0x119   :  { %v3323_v50 = vpop.f32.mrb[17].mxu1  ;;  %v3582_v3 = vpack.c.bf16 %v5128_v39, %v5125_v21  ;;  %1507 = vst [vmem:[%s5792_s9 + $0x30] sm:$0xff] %v1475_v8  ;;  %v3212_v45 = vadd.f32 %v3211_v62, %v3210_v7  ;;  %v5142_v59 = vpop.permute.xlu1 %2254 }
 0x11a   :  { %v5140_v32 = vadd.f32 %v3323_v50, %v3322_v58  ;;  %v5144_v26 = vpop.permute.xlu0 %2066  ;;  %v1476_v18 = vadd.f32 %v4988_v31, %v1437_v24  ;;  %v3213_v61 = vpop.f32.mrb[18].mxu0  ;;  %v2410_v58 = vadd.f32 %v2409_v17, %v5071_v37  ;;  %vm2317_vm4 = vcmp.eq.s32.totalorder %v5142_v59, 1 }
 0x11b   :  { %v3325_v46 = vpop.f32.mrb[18].mxu1  ;;  %3583 = vmatprep.subr.bf16.mxu0 %v3582_v3  ;;  %v1214_v8 = vadd.f32 %v3212_v45, %v3030_v27  ;;  %v3214_v7 = vpop.f32.mrb[19].mxu0 }
 0x11c   :  { %v3326_v50 = vpop.f32.mrb[19].mxu1  ;;  %1508 = vst [vmem:[%s5792_s9 + $0x38] sm:$0xff] %v1476_v18  ;;  %v3215_v51 = vadd.f32 %v3214_v7, %v3213_v61  ;;  %v2411_v3 = vadd.f32 %v2410_v58, %v5148_v10  ;;  %v3034_v61 = vunpack.c.l.bf16 %v3144_v11 }
 0x11d   :  { %3623 = vxpose.xlu0.b32.start [1/16] %v3622_v2, 128  ;;  %v5155_v4 = vadd.f32 %v3326_v50, %v3325_v46  ;;  %v1438_v27 = vmul.f32 %v4447_v30, %v1214_v8  ;;  %v5163_v24 = vpop.permute.xlu1 %1706 }
 0x11e   :  { %5906 = vst [vmem:[#allocation69_spill] sm:$0xff] %v5163_v24  ;;  %v5165_v62 = vpop.permute.xlu0 %2257  ;;  %v1215_v2 = vadd.f32 %v3215_v51, %v3031_v23  ;;  %v5169_v18 = vmul.f32 %v3107_v49, %v5163_v24  ;;  %v3626_v23 = vpack.i.bf16 %v4815_v15, %v4827_v44 }
 0x11f   :  { %v1477_v46 = vadd.f32 %v4988_v31, %v1438_v27  ;;  %v3216_v45 = vpop.f32.mrb[20].mxu0  ;;  %v3817_v27 = vpop.eup %3816  ;;  %vm2318_vm6 = vcmp.eq.s32.totalorder %v5165_v62, 1  ;;  %v5926_v62 = vld [vmem:[#allocation35_spill] sm:$0xff] }
 0x120   :  { %v3328_v17 = vpop.f32.mrb[20].mxu1  ;;  %v1439_v41 = vmul.f32 %v4440_v28, %v1215_v2  ;;  %v2412_v30 = vadd.f32 %v2411_v3, %v5169_v18  ;;  %v3584_v8 = vpack.c.bf16 %v5169_v18, %v5148_v10  ;;  %v3217_v7 = vpop.f32.mrb[21].mxu0 }
 0x121   :  { %3625 = vxpose.xlu0.b32.cont [2/16] %v3624_v16, 128  ;;  %v3329_v50 = vpop.f32.mrb[21].mxu1  ;;  %1509 = vst [vmem:[%s5792_s9 + $0x40] sm:$0xff] %v1477_v46  ;;  %v3218_v49 = vadd.f32 %v3217_v7, %v3216_v45  ;;  %v5183_v51 = vpop.permute.xlu1 %1986  ;;  %v5190_v16 = vld [vmem:[%s5790_s3 + $0x30] sm:$0xff]   ;;  %v3035_v46 = vunpack.c.h.bf16 %v3144_v11  ;;  %v2112_v11 = vmul.f32 %v3817_v27, %v4992_v54 }
 0x122   :  { %v5181_v58 = vadd.f32 %v3329_v50, %v3328_v17  ;;  %v5185_v28 = vpop.permute.xlu0 %1981  ;;  %v1478_v3 = vadd.f32 %v4988_v31, %v1439_v41  ;;  %v2413_v15 = vadd.f32 %v2412_v30, %v4795_v5  ;;  %v3219_v2 = vpop.f32.mrb[22].mxu0  ;;  %3585 = vmatpush3.bf16.msra.mxu0 %v3584_v8  ;;  %v3038_v41 = vunpack.c.l.bf16 %v5190_v16 }
 0x123   :  { %v3331_v13 = vpop.f32.mrb[22].mxu1  ;;  %v1216_v45 = vadd.f32 %v3218_v49, %v3034_v61  ;;  %v3220_v17 = vpop.f32.mrb[23].mxu0  ;;  %v3628_v5 = vpack.i.bf16 %v4812_v22, %v4830_v34 }
 0x124   :  { %5907 = vst [vmem:[#allocation70_spill] sm:$0xff] %v5181_v58  ;;  %v3332_v7 = vpop.f32.mrb[23].mxu1  ;;  %1510 = vst [vmem:[%s5792_s9 + $0x48] sm:$0xff] %v1478_v3  ;;  %v2414_v50 = vadd.f32 %v2413_v15, %v4798_v0  ;;  %v3221_v24 = vadd.f32 %v3220_v17, %v3219_v2  ;;  %v3630_v2 = vpack.i.bf16 %v4856_v40, %v4859_v25 }
 0x125   :  { %3627 = vxpose.xlu0.b32.cont [3/16] %v3626_v23, 128  ;;  %v5198_v58 = vadd.f32 %v3332_v7, %v3331_v13  ;;  %v1440_v61 = vmul.f32 %v4466_v36, %v1216_v45  ;;  %v2210_v30 = vpop.permute.xlu1 %2209 }
 0x126   :  { %v2207_v8 = vpop.permute.xlu0 %2206  ;;  %v2415_v23 = vadd.f32 %v2414_v50, %v4827_v44  ;;  %v1217_v49 = vadd.f32 %v3221_v24, %v3035_v46  ;;  %vm2302_vm0 = vcmp.eq.s32.totalorder %v2210_v30, 1  ;;  %v5908_v44 = vld [vmem:[#allocation24_spill] sm:$0xff] }
 0x127   :  { %vm2301_vm2 = vcmp.eq.s32.totalorder %v2207_v8, 1  ;;  %v1479_v0 = vadd.f32 %v4988_v31, %v1440_v61  ;;  %v2334_v13 = vsel %vm2302_vm0, %v2112_v11, 0.0  ;;  %v3222_v3 = vpop.f32.mrb[24].mxu0 }
 0x128   :  { %v2333_v22 = vsel %vm2301_vm2, %v4990_v63, 0.0  ;;  %v3334_v54 = vpop.f32.mrb[24].mxu1  ;;  %v2416_v29 = vadd.f32 %v2415_v23, %v4830_v34  ;;  %v1441_v36 = vmul.f32 %v4464_v35, %v1217_v49  ;;  %v5213_v27 = vmul.f32 %v2334_v13, %v4651_v6  ;;  %v3223_v15 = vpop.f32.mrb[25].mxu0  ;;  %v3146_v23 = vld [vmem:[%s5790_s3 + $0x38] sm:$0xff]  }
 0x129   :  { %3629 = vxpose.xlu0.b32.cont [4/16] %v3628_v5, 128  ;;  %v5216_v24 = vmul.f32 %v2333_v22, %v5908_v44  ;;  %v3335_v33 = vpop.f32.mrb[25].mxu1  ;;  %1511 = vst [vmem:[%s5792_s9 + $0x50] sm:$0xff] %v1479_v0  ;;  %v3224_v63 = vadd.f32 %v3223_v15, %v3222_v3  ;;  %v5225_v34 = vpop.permute.xlu1 %2076  ;;  %v3039_v6 = vunpack.c.h.bf16 %v5190_v16  ;;  %v3632_v49 = vpack.i.bf16 %v4846_v42, %v4862_v1 }
 0x12a   :  { %v5223_v46 = vadd.f32 %v3335_v33, %v3334_v54  ;;  %v5227_v35 = vpop.permute.xlu0 %2071  ;;  %v2417_v45 = vadd.f32 %v2416_v29, %v4859_v25  ;;  %v1480_v17 = vadd.f32 %v4988_v31, %v1441_v36  ;;  %v3225_v50 = vpop.f32.mrb[26].mxu0  ;;  %v3042_v33 = vunpack.c.l.bf16 %v3146_v23 }
 0x12b   :  { %v5234_v40 = vadd.f32 %v5213_v27, %v5216_v24  ;;  %v3337_v5 = vpop.f32.mrb[26].mxu1  ;;  %v1218_v11 = vadd.f32 %v3224_v63, %v3038_v41  ;;  %v3226_v61 = vpop.f32.mrb[27].mxu0  ;;  %v5909_v41 = vld [vmem:[#allocation5_spill] sm:$0xff] }
 0x12c   :  { %v3338_v30 = vpop.f32.mrb[27].mxu1  ;;  %v2418_v8 = vadd.f32 %v2417_v45, %v4862_v1  ;;  %1512 = vst [vmem:[%s5792_s9 + $0x58] sm:$0xff] %v1480_v17  ;;  %v3227_v25 = vadd.f32 %v3226_v61, %v3225_v50  ;;  %v3819_v29 = vpop.eup %3818  ;;  %v5259_v1 = vld [vmem:[%s5790_s3 + $0x40] sm:$0xff]   ;;  %v5267_v17 = vld [vmem:[%s5790_s3 + $0x48] sm:$0xff]  }
 0x12d   :  { %3631 = vxpose.xlu0.b32.cont [5/16] %v3630_v2, 128  ;;  %v5242_v16 = vadd.f32 %v3338_v30, %v3337_v5  ;;  %v1442_v0 = vmul.f32 %v5909_v41, %v1218_v11  ;;  %v5250_v13 = vpop.permute.xlu1 %2263  ;;  %v5910_v2 = vld [vmem:[#allocation4_spill] sm:$0xff]  ;;  %v3821_v50 = vpop.eup %3820  ;;  %v3634_v5 = vpack.i.bf16 %v4879_v60, %v4888_v57  ;;  %v3046_v60 = vunpack.c.l.bf16 %v5259_v1 }
 0x12e   :  { %v5252_v22 = vpop.permute.xlu0 %2260  ;;  %v2419_v3 = vadd.f32 %v2418_v8, %v4888_v57  ;;  %v1219_v54 = vadd.f32 %v3227_v25, %v3039_v6  ;;  %v3043_v8 = vunpack.c.h.bf16 %v3146_v23  ;;  %v3047_v57 = vunpack.c.h.bf16 %v5259_v1  ;;  %v5925_v1 = vld [vmem:[#allocation8_spill] sm:$0xff] }
 0x12f   :  { %v1481_v36 = vadd.f32 %v4988_v31, %v1442_v0  ;;  %v3228_v44 = vpop.f32.mrb[28].mxu0  ;;  %vm2319_vm5 = vcmp.eq.s32.totalorder %v5252_v22, 1  ;;  %vm2320_vm7 = vcmp.eq.s32.totalorder %v5250_v13, 1  ;;  %v5934_v22 = vunpack.c.h.bf16 %v5267_v17 }
 0x130   :  { %v3340_v15 = vpop.f32.mrb[28].mxu1  ;;  %v2420_v42 = vadd.f32 %v2419_v3, %v4891_v56  ;;  %v1443_v63 = vmul.f32 %v5910_v2, %v1219_v54  ;;  %v3229_v45 = vpop.f32.mrb[29].mxu0  ;;  %v3636_v3 = vpack.i.bf16 %v4876_v48, %v4891_v56  ;;  %v5912_v56 = vld [vmem:[#allocation55_spill] sm:$0xff] }
 0x131   :  { %3633 = vxpose.xlu0.b32.cont [6/16] %v3632_v49, 128  ;;  %v3341_v6 = vpop.f32.mrb[29].mxu1  ;;  %1513 = vst [vmem:[%s5792_s9 + $0x60] sm:$0xff] %v1481_v36  ;;  %v3230_v38 = vadd.f32 %v3229_v45, %v3228_v44  ;;  %v5276_v61 = vpop.permute.xlu1 %1996  ;;  %v2114_v48 = vmul.f32 %v3819_v29, %v5912_v56  ;;  %v5914_v45 = vld [vmem:[#allocation7_spill] sm:$0xff]  ;;  %v5918_v56 = vld [vmem:[#allocation25_spill] sm:$0xff] }
 0x132   :  { %v5274_v11 = vadd.f32 %v3341_v6, %v3340_v15  ;;  %v5278_v30 = vpop.permute.xlu0 %1991  ;;  %v2421_v25 = vadd.f32 %v2420_v42, %v4914_v47  ;;  %v1482_v49 = vadd.f32 %v4988_v31, %v1443_v63  ;;  %v3231_v41 = vpop.f32.mrb[30].mxu0  ;;  %v5911_v15 = vld [vmem:[#allocation47_spill] sm:$0xff] }
 0x133   :  { %v3343_v0 = vpop.f32.mrb[30].mxu1  ;;  %v1220_v54 = vadd.f32 %v3230_v38, %v3042_v33  ;;  %v3232_v36 = vpop.f32.mrb[31].mxu0  ;;  %v2116_v33 = vmul.f32 %v3821_v50, %v5913_v14  ;;  %v5916_v50 = vld [vmem:[#allocation53_spill] sm:$0xff] }
 0x134   :  { %v3344_v44 = vpop.f32.mrb[31].mxu1  ;;  %v2422_v42 = vadd.f32 %v2421_v25, %v5911_v15  ;;  %1514 = vst [vmem:[%s5792_s9 + $0x68] sm:$0xff] %v1482_v49  ;;  %v3233_v2 = vadd.f32 %v3232_v36, %v3231_v41 }
 0x135   :  { %3635 = vxpose.xlu0.b32.cont [7/16] %v3634_v5, 128  ;;  %v5293_v63 = vadd.f32 %v3344_v44, %v3343_v0  ;;  %v1444_v6 = vmul.f32 %v5914_v45, %v1220_v54  ;;  %v2216_v5 = vpop.permute.xlu1 %2215  ;;  %v5917_v44 = vld [vmem:[#allocation6_spill] sm:$0xff] }
 0x136   :  { %v2213_v38 = vpop.permute.xlu0 %2212  ;;  %v2423_v7 = vadd.f32 %v2422_v42, %v5915_v12  ;;  %v1221_v25 = vadd.f32 %v3233_v2, %v3043_v8  ;;  %vm2304_vm1 = vcmp.eq.s32.totalorder %v2216_v5, 1  ;;  %v5919_v42 = vld [vmem:[#allocation26_spill] sm:$0xff] }
 0x137   :  { %vm2303_vm3 = vcmp.eq.s32.totalorder %v2213_v38, 1  ;;  %v1483_v49 = vadd.f32 %v4988_v31, %v1444_v6  ;;  %v2336_v41 = vsel %vm2304_vm1, %v2116_v33, 0.0  ;;  %v3234_v29 = vpop.f32.mrb[32].mxu0  ;;  %v3823_v38 = vpop.eup %3822 }
 0x138   :  { %v2335_v0 = vsel %vm2303_vm3, %v2114_v48, 0.0  ;;  %v3346_v36 = vpop.f32.mrb[32].mxu1  ;;  %v2424_v55 = vadd.f32 %v2423_v7, %v5916_v50  ;;  %v1445_v54 = vmul.f32 %v5917_v44, %v1221_v25  ;;  %v5305_v14 = vmul.f32 %v2336_v41, %v5918_v56  ;;  %v3235_v2 = vpop.f32.mrb[33].mxu0 }
 0x139   :  { %3637 = vxpose.xlu0.b32.cont [8/16] %v3636_v3, 128  ;;  %v5308_v8 = vmul.f32 %v2335_v0, %v5919_v42  ;;  %v3347_v45 = vpop.f32.mrb[33].mxu1  ;;  %v3638_v3 = vpack.i.bf16 %v4911_v43, %v4914_v47  ;;  %1515 = vst [vmem:[%s5792_s9 + $0x70] sm:$0xff] %v1483_v49  ;;  %v3236_v7 = vadd.f32 %v3235_v2, %v3234_v29  ;;  %v5320_v33 = vpop.permute.xlu1 %2086  ;;  %v5920_v29 = vld [vmem:[#allocation54_spill] sm:$0xff] }
 0x13a   :  { %v3348_v48 = vadd.f32 %v3347_v45, %v3346_v36  ;;  %v5322_v6 = vpop.permute.xlu0 %2081  ;;  %v2425_v25 = vadd.f32 %v2424_v55, %v5047_v53  ;;  %v1484_v41 = vadd.f32 %v4988_v31, %v1445_v54  ;;  %v3237_v49 = vpop.f32.mrb[34].mxu0  ;;  %3832 = vrcp.f32 %v5920_v29  ;;  %v5921_v29 = vld [vmem:[#allocation45_spill] sm:$0xff]  ;;  %v5924_v45 = vld [vmem:[#allocation62_spill] sm:$0xff] }
 0x13b   :  { %v2439_v43 = vadd.f32 %v5234_v40, %v5308_v8  ;;  %v3349_v0 = vpop.f32.mrb[34].mxu1  ;;  %v1222_v36 = vadd.f32 %v3236_v7, %v3046_v60  ;;  %v3238_v56 = vpop.f32.mrb[35].mxu0  ;;  %v3640_v60 = vpack.i.bf16 %v5921_v29, %v5911_v15  ;;  %v5922_v7 = vld [vmem:[#allocation9_spill] sm:$0xff] }
 0x13c   :  { %v2142_v44 = vmul.f32 %v3823_v38, %v3348_v48  ;;  %v3350_v42 = vpop.f32.mrb[35].mxu1  ;;  %v2426_v55 = vadd.f32 %v2425_v25, %v5050_v20  ;;  %1516 = vst [vmem:[%s5792_s9 + $0x78] sm:$0xff] %v1484_v41  ;;  %v3239_v40 = vadd.f32 %v3238_v56, %v3237_v49  ;;  %v3825_v47 = vpop.eup %3824 }
 0x13d   :  { %3639 = vxpose.xlu0.b32.cont [9/16] %v3638_v3, 128  ;;  %v3351_v54 = vadd.f32 %v3350_v42, %v3349_v0  ;;  %v1446_v3 = vmul.f32 %v5922_v7, %v1222_v36  ;;  %v5342_v48 = vpop.permute.xlu1 %2269  ;;  %v5347_v25 = vadd.f32 %v2439_v43, %v5305_v14  ;;  %v3827_v41 = vpop.eup %3826  ;;  %v5923_v36 = vld [vmem:[#allocation58_spill] sm:$0xff] }
 0x13e   :  { %v5344_v38 = vpop.permute.xlu0 %2266  ;;  %v2427_v49 = vadd.f32 %v2426_v55, %v5125_v21  ;;  %v2349_v0 = vsel %vm2317_vm4, %v2142_v44, 0.0  ;;  %v1223_v56 = vadd.f32 %v3239_v40, %v3047_v57  ;;  %v3829_v15 = vpop.eup %3828  ;;  %3834 = vrcp.f32 %v5923_v36 }
 0x13f   :  { %v2144_v42 = vmul.f32 %v3825_v47, %v3351_v54  ;;  %v1485_v29 = vadd.f32 %v4988_v31, %v1446_v3  ;;  %v3240_v43 = vpop.f32.mrb[36].mxu0  ;;  %3836 = vrcp.f32 %v5924_v45  ;;  %v3831_v54 = vpop.eup %3830  ;;  %v5364_v36 = vmul.f32 %v2349_v0, %v5926_v62  ;;  %v5927_v3 = vld [vmem:[#allocation38_spill] sm:$0xff] }
 0x140   :  { %v3352_v7 = vpop.f32.mrb[36].mxu1  ;;  %v2428_v44 = vadd.f32 %v2427_v49, %v5128_v39  ;;  %v1447_v57 = vmul.f32 %v5925_v1, %v1223_v56  ;;  %v3241_v55 = vpop.f32.mrb[37].mxu0  ;;  %3838 = vrcp.f32 %v5119_v19  ;;  %v5929_v0 = vunpack.c.l.bf16 %v5267_v17 }
 0x141   :  { %3641 = vxpose.xlu0.b32.cont [10/16] %v3640_v60, 128  ;;  %v2350_v47 = vsel %vm2318_vm6, %v2144_v42, 0.0  ;;  %v3353_v40 = vpop.f32.mrb[37].mxu1  ;;  %1517 = vst [vmem:[%s5792_s9 + $0x80] sm:$0xff] %v1485_v29  ;;  %v3242_v60 = vadd.f32 %v3241_v55, %v3240_v43  ;;  %v5369_v2 = vpop.permute.xlu1 %2006  ;;  %v5928_v29 = vld [vmem:[#allocation63_spill] sm:$0xff]  ;;  %3840 = vrcp.f32 %v5183_v51  ;;  %vm2321_vm10 = vcmp.eq.s32.totalorder %v5344_v38, 1 }
 0x142   :  { %v5367_v59 = vmul.f32 %v2350_v47, %v5927_v3  ;;  %v3354_v45 = vadd.f32 %v3353_v40, %v3352_v7  ;;  %v5371_v49 = vpop.permute.xlu0 %2001  ;;  %v2429_v56 = vrot.slane %v2428_v44, 4  ;;  %v1486_v42 = vadd.f32 %v4988_v31, %v1447_v57  ;;  %v3243_v1 = vpop.f32.mrb[38].mxu0  ;;  %v5930_v40 = vld [vmem:[#allocation49_spill] sm:$0xff] }
 0x143   :  { %v3355_v5 = vpop.f32.mrb[38].mxu1  ;;  %v2120_v23 = vmul.f32 %v3829_v15, %v5928_v29  ;;  %v1224_v47 = vadd.f32 %v3242_v60, %v5929_v0  ;;  %v3244_v7 = vpop.f32.mrb[39].mxu0  ;;  %v5931_v62 = vpack.i.bf16 %v5930_v40, %v5915_v12  ;;  %3842 = vrcp.f32 %v5185_v28  ;;  %v5933_v0 = vld [vmem:[#allocation60_spill] sm:$0xff] }
 0x144   :  { %v2146_v43 = vmul.f32 %v3827_v41, %v3354_v45  ;;  %v3356_v55 = vpop.f32.mrb[39].mxu1  ;;  %v3586_v19 = vpack.c.bf16 %v5367_v59, %v5364_v36  ;;  %v2430_v57 = vadd.f32 %v2429_v56, %v2428_v44  ;;  %1518 = vst [vmem:[%s5792_s9 + $0x88] sm:$0xff] %v1486_v42  ;;  %v3245_v51 = vadd.f32 %v3244_v7, %v3243_v1  ;;  %v3833_v3 = vpop.eup %3832  ;;  %v5932_v41 = vld [vmem:[#allocation11_spill] sm:$0xff]  ;;  %v5936_v1 = vld [vmem:[#allocation37_spill] sm:$0xff] }
 0x145   :  { %3643 = vxpose.xlu0.b32.cont [11/16] %v5931_v62, 128  ;;  %v3357_v15 = vadd.f32 %v3356_v55, %v3355_v5  ;;  %v1448_v60 = vmul.f32 %v5932_v41, %v1224_v47  ;;  %v2222_v12 = vpop.permute.xlu1 %2221  ;;  %v2118_v40 = vmul.f32 %v3831_v54, %v5933_v0  ;;  %v5935_v5 = vpack.c.bf16 %v5213_v27, %v5216_v24  ;;  %v5937_v7 = vld [vmem:[#allocation51_spill] sm:$0xff]  ;;  %v5939_v55 = vld [vmem:[#allocation10_spill] sm:$0xff]  ;;  %v5940_v41 = vld [vmem:[#allocation40_spill] sm:$0xff] }
 0x146   :  { %v2351_v45 = vsel %vm2319_vm5, %v2146_v43, 0.0  ;;  %3587 = vmatprep.subr.bf16.mxu1 %v3586_v19  ;;  %v2219_v29 = vpop.permute.xlu0 %2218  ;;  %v2431_v44 = vrot.slane %v2430_v57, 2  ;;  %v1225_v56 = vadd.f32 %v3245_v51, %v5934_v22  ;;  %vm2306_vm8 = vcmp.eq.s32.totalorder %v2222_v12, 1 }
 0x147   :  { %v2148_v42 = vmul.f32 %v3833_v3, %v3357_v15  ;;  %3589 = vmatpush3.bf16.msra.mxu1 %v5935_v5  ;;  %v1487_v28 = vadd.f32 %v4988_v31, %v1448_v60  ;;  %v5399_v47 = vmul.f32 %v2351_v45, %v5936_v1  ;;  %vm2305_vm9 = vcmp.eq.s32.totalorder %v2219_v29, 1  ;;  %v3246_v43 = vpop.f32.mrb[40].mxu0  ;;  %v5408_v15 = vld [vmem:[%s5790_s3 + $0x58] sm:$0xff]  }
 0x148   :  { %v3358_v54 = vpop.f32.mrb[40].mxu1  ;;  %v5938_v13 = vpack.i.bf16 %v5937_v7, %v5916_v50  ;;  %v2432_v17 = vadd.f32 %v2431_v44, %v2430_v57  ;;  %v1449_v62 = vmul.f32 %v5939_v55, %v1225_v56  ;;  %v2338_v51 = vsel %vm2306_vm8, %v2120_v23, 0.0  ;;  %v3247_v27 = vpop.f32.mrb[41].mxu0  ;;  %v5941_v57 = vld [vmem:[#allocation27_spill] sm:$0xff]  ;;  %v5942_v56 = vld [vmem:[#allocation28_spill] sm:$0xff] }
 0x149   :  { %v2352_v19 = vsel %vm2320_vm7, %v2148_v42, 0.0  ;;  %v3359_v24 = vpop.f32.mrb[41].mxu1  ;;  %v3835_v3 = vpop.eup %3834  ;;  %1519 = vst [vmem:[%s5792_s9 + $0x90] sm:$0xff] %v1487_v28  ;;  %v5417_v60 = vmul.f32 %v2338_v51, %v5941_v57  ;;  %v2337_v45 = vsel %vm2305_vm9, %v2118_v40, 0.0  ;;  %v3248_v23 = vadd.f32 %v3247_v27, %v3246_v43  ;;  %v2397_v40 = vld [vmem:[%s5788_s12] sm:$0x1] }
 0x14a   :  { %3645 = vxpose.xlu0.b32.cont [12/16] %v5938_v13, 128  ;;  %v5414_v50 = vmul.f32 %v2352_v19, %v5940_v41  ;;  %v5419_v12 = vpop.permute.xlu1 %2096  ;;  %v5421_v29 = vpop.permute.xlu0 %2091  ;;  %v2433_v44 = vrot.slane %v2432_v17, 1  ;;  %v1488_v22 = vadd.f32 %v4988_v31, %v1449_v62  ;;  %v5425_v42 = vmul.f32 %v2337_v45, %v5942_v56  ;;  %v5945_v57 = vld [vmem:[#allocation13_spill] sm:$0xff] }
 0x14b   :  { %v3837_v0 = vpop.eup %3836  ;;  %v3360_v5 = vadd.f32 %v3359_v24, %v3358_v54  ;;  %v3249_v28 = vpop.f32.mrb[42].mxu0  ;;  %3844 = vrcp.f32 %v5144_v26  ;;  %v5943_v43 = vunpack.c.l.bf16 %v5313_v52  ;;  %v5944_v62 = vpack.i.bf16 %v5067_v9, %v5047_v53  ;;  %v5442_v26 = vld [vmem:[%s5790_s3 + $0x60] sm:$0xff]  }
 0x14c   :  { %v3361_v1 = vpop.f32.mrb[42].mxu1  ;;  %v3250_v13 = vpop.f32.mrb[43].mxu0  ;;  %v3590_v54 = vpack.c.bf16 %v5414_v50, %v5399_v47  ;;  %v3058_v19 = vunpack.c.l.bf16 %v5408_v15  ;;  %v2434_v27 = vadd.f32 %v2433_v44, %v2432_v17  ;;  %1520 = vst [vmem:[%s5792_s9 + $0x98] sm:$0xff] %v1488_v22  ;;  %v2441_v53 = vadd.f32 %v5347_v25, %v5425_v42 }
 0x14d   :  { %v1226_v7 = vadd.f32 %v3248_v23, %v5943_v43  ;;  %v3362_v55 = vpop.f32.mrb[43].mxu1  ;;  %v3839_v51 = vpop.eup %3838  ;;  %v3596_v9 = vpack.c.bf16 %v5417_v60, %v5425_v42  ;;  %v2150_v24 = vmul.f32 %v3835_v3, %v3360_v5  ;;  %v3251_v23 = vadd.f32 %v3250_v13, %v3249_v28  ;;  %v5958_v42 = vld [vmem:[#allocation30_spill] sm:$0xff] }
 0x14e   :  { %3647 = vxpose.xlu0.b32.cont [13/16] %v5944_v62, 128  ;;  %v3841_v41 = vpop.eup %3840  ;;  %v3363_v56 = vadd.f32 %v3362_v55, %v3361_v1  ;;  %3591 = vmatprep.subr.bf16.mxu1 %v3590_v54  ;;  %v5452_v43 = vpop.permute.xlu1 %2275  ;;  %v3059_v44 = vunpack.c.h.bf16 %v5408_v15  ;;  %v3650_v22 = vpack.i.bf16 %v5148_v10, %v5125_v21  ;;  %v2435_v62 = vadd.f32 %v2434_v27, %v2397_v40  ;;  %v5951_v27 = vld [vmem:[#allocation42_spill] sm:$0xff] }
 0x14f   :  { %v1450_v45 = vmul.f32 %v5945_v57, %v1226_v7  ;;  %v2273_v17 = vpop.permute.xlu0 %2272  ;;  %v5946_v25 = vpack.c.bf16 %v5305_v14, %v5308_v8  ;;  %v3062_v3 = vunpack.c.l.bf16 %v5442_v26  ;;  %v3843_v5 = vpop.eup %3842  ;;  %v2353_v1 = vsel %vm2321_vm10, %v2150_v24, 0.0 }
 0x150   :  { %v5947_v7 = vunpack.c.h.bf16 %v5313_v52  ;;  %v2152_v15 = vmul.f32 %v3837_v0, %v3363_v56  ;;  %v3252_v55 = vpop.f32.mrb[44].mxu0  ;;  %v3364_v54 = vpop.f32.mrb[44].mxu1  ;;  %v5948_v21 = vpack.i.bf16 %v5071_v37, %v5050_v20  ;;  %v3652_v10 = vpack.i.bf16 %v5169_v18, %v5128_v39  ;;  %2436 = vst [vmem:[%s5788_s12] sm:$0x1] %v2435_v62  ;;  %v5949_v37 = vld [vmem:[#allocation12_spill] sm:$0xff] }
 0x151   :  { %3593 = vmatpush3.bf16.msra.mxu1 %v5946_v25  ;;  %v1489_v28 = vadd.f32 %v4988_v31, %v1450_v45  ;;  %3846 = vrcp.f32 %v5225_v34  ;;  %vm2322_vm11 = vcmp.eq.s32.totalorder %v5342_v48, 1  ;;  %v3253_v14 = vpop.f32.mrb[45].mxu0  ;;  %v3365_v8 = vpop.f32.mrb[45].mxu1  ;;  %v5476_v52 = vadd.f32 %v2441_v53, %v5417_v60  ;;  %v5950_v34 = vld [vmem:[#allocation39_spill] sm:$0xff] }
 0x152   :  { %v1227_v13 = vadd.f32 %v3251_v23, %v5947_v7  ;;  %3649 = vxpose.xlu0.b32.cont [14/16] %v5948_v21, 128  ;;  %v2354_v39 = vsel %vm2322_vm11, %v2152_v15, 0.0  ;;  %v3254_v18 = vadd.f32 %v3253_v14, %v3252_v55  ;;  %v3366_v38 = vadd.f32 %v3365_v8, %v3364_v54  ;;  %v5482_v0 = vpop.permute.xlu1 %2016  ;;  %v3255_v24 = vpop.f32.mrb[46].mxu0  ;;  %v5952_v45 = vld [vmem:[#allocation67_spill] sm:$0xff] }
 0x153   :  { %1521 = vst [vmem:[%s5792_s9 + $0xa0] sm:$0xff] %v1489_v28  ;;  %v5484_v40 = vpop.permute.xlu0 %2011  ;;  %3848 = vrcp.f32 %v5227_v35  ;;  %v5488_v48 = vmul.f32 %v2353_v1, %v5950_v34  ;;  %v5491_v53 = vmul.f32 %v2354_v39, %v5951_v27  ;;  %v3367_v57 = vpop.f32.mrb[46].mxu1  ;;  %v2124_v23 = vmul.f32 %v3841_v41, %v5952_v45  ;;  %v5954_v41 = vld [vmem:[#allocation64_spill] sm:$0xff] }
 0x154   :  { %v1451_v20 = vmul.f32 %v5949_v37, %v1227_v13  ;;  %3850 = vrcp.f32 %v5276_v61  ;;  %v1228_v62 = vadd.f32 %v3254_v18, %v3058_v19  ;;  %v2154_v25 = vmul.f32 %v3839_v51, %v3366_v38  ;;  %v3256_v28 = vpop.f32.mrb[47].mxu0  ;;  %v3368_v7 = vpop.f32.mrb[47].mxu1  ;;  %v5957_v27 = vld [vmem:[#allocation44_spill] sm:$0xff] }
 0x155   :  { %3852 = vrcp.f32 %v5278_v30  ;;  %v3257_v35 = vadd.f32 %v3256_v28, %v3255_v24  ;;  %v3369_v1 = vadd.f32 %v3368_v7, %v3367_v57  ;;  %v3594_v13 = vpack.c.bf16 %v5491_v53, %v5488_v48  ;;  %v3845_v15 = vpop.eup %3844 }
 0x156   :  { %v1490_v56 = vadd.f32 %v4988_v31, %v1451_v20  ;;  %3651 = vxpose.xlu0.b32.cont [15/16] %v3650_v22, 128  ;;  %3854 = vrcp.f32 %v5369_v2  ;;  %vm2324_vm12 = vcmp.eq.s32.totalorder %v5452_v43, 1  ;;  %v5953_v31 = vld [vmem:[#allocation15_spill] sm:$0xff]  ;;  %v2228_v19 = vpop.permute.xlu1 %2227  ;;  %v2122_v30 = vmul.f32 %v3843_v5, %v5954_v41  ;;  %v5509_v2 = vld [vmem:[%s5791_s6] ss:$0 sm:$0xff]  ;;  %v5956_v20 = vld [vmem:[#allocation29_spill] sm:$0xff] }
 0x157   :  { %v1452_v61 = vmul.f32 %v5953_v31, %v1228_v62  ;;  %v2225_v51 = vpop.permute.xlu0 %2224  ;;  %vm2323_vm13 = vcmp.eq.s32.totalorder %v2273_v17, 1  ;;  %v1229_v22 = vadd.f32 %v3257_v35, %v3059_v44  ;;  %v2156_v55 = vmul.f32 %v3845_v15, %v3369_v1  ;;  %3595 = vmatprep.subr.bf16.mxu1 %v3594_v13  ;;  %v3258_v5 = vpop.f32.mrb[48].mxu0  ;;  %v5955_v44 = vld [vmem:[#allocation14_spill] sm:$0xff] }
 0x158   :  { %1522 = vst [vmem:[%s5792_s9 + $0xa8] sm:$0xff] %v1490_v56  ;;  %vm2308_vm14 = vcmp.eq.s32.totalorder %v2228_v19, 1  ;;  %v2355_v21 = vsel %vm2323_vm13, %v2154_v25, 0.0  ;;  %vm2307_vm15 = vcmp.eq.s32.totalorder %v2225_v51, 1  ;;  %3597 = vmatpush3.bf16.msra.mxu1 %v3596_v9  ;;  %v3370_v17 = vpop.f32.mrb[48].mxu1  ;;  %v3259_v38 = vpop.f32.mrb[49].mxu0  ;;  %3856 = vrcp.f32 %v5371_v49 }
 0x159   :  { %v1491_v54 = vadd.f32 %v5509_v2, %v1452_v61  ;;  %v2340_v14 = vsel %vm2308_vm14, %v2124_v23, 0.0  ;;  %v1453_v8 = vmul.f32 %v5955_v44, %v1229_v22  ;;  %v2356_v37 = vsel %vm2324_vm12, %v2156_v55, 0.0  ;;  %v3371_v34 = vpop.f32.mrb[49].mxu1  ;;  %v5959_v23 = vld [vmem:[#allocation41_spill] sm:$0xff]  ;;  %v3261_v25 = vpop.f32.mrb[50].mxu0 }
 0x15a   :  { %3653 = vxpose.xlu0.b32.end [16/16] %v3652_v10, 128  ;;  %v2372_v39 = vmul.f32 %v2340_v14, %v5956_v20  ;;  %v2339_v18 = vsel %vm2307_vm15, %v2122_v30, 0.0  ;;  %v5523_v60 = vmul.f32 %v2356_v37, %v5957_v27  ;;  %v3260_v10 = vadd.f32 %v3259_v38, %v3258_v5  ;;  %v5526_v57 = vpop.permute.xlu1 %2106  ;;  %v3373_v28 = vpop.f32.mrb[50].mxu1  ;;  %v5556_v20 = vld [vmem:[%s5790_s3 + $0x70] sm:$0xff]  }
 0x15b   :  { %1523 = vst [vmem:[%s5792_s9 + $0xb0] sm:$0xff] %v1491_v54  ;;  %v2371_v9 = vmul.f32 %v2339_v18, %v5958_v42  ;;  %v3372_v24 = vadd.f32 %v3371_v34, %v3370_v17  ;;  %v5528_v43 = vpop.permute.xlu0 %2101  ;;  %v3847_v45 = vpop.eup %3846  ;;  %v5532_v56 = vmul.f32 %v2355_v21, %v5959_v23  ;;  %v1492_v62 = vadd.f32 %v5509_v2, %v1453_v8  ;;  %v5962_v34 = vld [vmem:[#allocation43_spill] sm:$0xff] }
 0x15c   :  { %v3063_v7 = vunpack.c.h.bf16 %v5442_v26  ;;  %v1230_v13 = vadd.f32 %v3260_v10, %v3062_v3  ;;  %v3262_v15 = vpop.f32.mrb[51].mxu0  ;;  %v3374_v31 = vpop.f32.mrb[51].mxu1  ;;  %3858 = vrcp.f32 %v5320_v33  ;;  %v5960_v3 = vld [vmem:[#allocation17_spill] sm:$0xff]  ;;  %v5565_v10 = vld [vmem:[%s5790_s3 + $0x78] sm:$0xff]  }
 0x15d   :  { %v2443_v35 = vadd.f32 %v5476_v52, %v2371_v9  ;;  %v3600_v1 = vpack.c.bf16 %v2372_v39, %v2371_v9  ;;  %v3849_v61 = vpop.eup %3848  ;;  %1524 = vst [vmem:[%s5792_s9 + $0xb8] sm:$0xff] %v1492_v62  ;;  %v3263_v49 = vadd.f32 %v3262_v15, %v3261_v25  ;;  %v3375_v19 = vadd.f32 %v3374_v31, %v3373_v28  ;;  %v3152_v52 = vld [vmem:[%s5790_s3 + $0x68] sm:$0xff]  }
 0x15e   :  { %v3598_v51 = vpack.c.bf16 %v5523_v60, %v5532_v56  ;;  %v3851_v26 = vpop.eup %3850  ;;  %3860 = vrcp.f32 %v5322_v6  ;;  %v1454_v41 = vmul.f32 %v5960_v3, %v1230_v13  ;;  %v2158_v30 = vmul.f32 %v3849_v61, %v3372_v24  ;;  %v2282_v33 = vpop.permute.xlu1 %2281  ;;  %v5963_v24 = vld [vmem:[#allocation46_spill] sm:$0xff] }
 0x15f   :  { %v2279_v22 = vpop.permute.xlu0 %2278  ;;  %v5550_v55 = vadd.f32 %v2443_v35, %v2372_v39  ;;  %v3853_v54 = vpop.eup %3852  ;;  %v1231_v21 = vadd.f32 %v3263_v49, %v3063_v7  ;;  %v2160_v14 = vmul.f32 %v3847_v45, %v3375_v19  ;;  %vm2326_vm0 = vcmp.eq.s32.totalorder %v2282_v33, 1  ;;  %v5961_v39 = vld [vmem:[#allocation16_spill] sm:$0xff] }
 0x160   :  { %3599 = vmatprep.subr.bf16.mxu1 %v3598_v51  ;;  %vm2325_vm2 = vcmp.eq.s32.totalorder %v2279_v22, 1  ;;  %v3855_v5 = vpop.eup %3854  ;;  %v1493_v17 = vadd.f32 %v5509_v2, %v1454_v41  ;;  %v3264_v8 = vpop.f32.mrb[52].mxu0  ;;  %v3066_v37 = vunpack.c.l.bf16 %v3152_v52  ;;  %v3067_v13 = vunpack.c.h.bf16 %v3152_v52 }
 0x161   :  { %v2357_v44 = vsel %vm2325_vm2, %v2158_v30, 0.0  ;;  %3601 = vmatpush3.bf16.msra.mxu1 %v3600_v1  ;;  %v3376_v6 = vpop.f32.mrb[52].mxu1  ;;  %v1455_v18 = vmul.f32 %v5961_v39, %v1231_v21  ;;  %v2358_v38 = vsel %vm2326_vm0, %v2160_v14, 0.0  ;;  %v3265_v42 = vpop.f32.mrb[53].mxu0  ;;  %v3070_v15 = vunpack.c.l.bf16 %v5556_v20  ;;  %v5964_v21 = vld [vmem:[#allocation19_spill] sm:$0xff] }
 0x162   :  { %v5560_v27 = vmul.f32 %v2357_v44, %v5962_v34  ;;  %v3377_v9 = vpop.f32.mrb[53].mxu1  ;;  %1525 = vst [vmem:[%s5792_s9 + $0xc0] sm:$0xff] %v1493_v17  ;;  %v5571_v45 = vmul.f32 %v2358_v38, %v5963_v24  ;;  %v3266_v23 = vadd.f32 %v3265_v42, %v3264_v8  ;;  %v5573_v25 = vpop.permute.xlu1 %2026  ;;  %v3071_v31 = vunpack.c.h.bf16 %v5556_v20  ;;  %v5965_v34 = vld [vmem:[#allocation70_spill] sm:$0xff] }
 0x163   :  { %v3378_v62 = vadd.f32 %v3377_v9, %v3376_v6  ;;  %v5575_v28 = vpop.permute.xlu0 %2021  ;;  %v1494_v7 = vadd.f32 %v5509_v2, %v1455_v18  ;;  %v3267_v35 = vpop.f32.mrb[54].mxu0  ;;  %v3074_v3 = vunpack.c.l.bf16 %v5565_v10  ;;  %v3075_v41 = vunpack.c.h.bf16 %v5565_v10  ;;  %v5968_v9 = vld [vmem:[#allocation32_spill] sm:$0xff] }
 0x164   :  { %v3379_v1 = vpop.f32.mrb[54].mxu1  ;;  %v1232_v61 = vadd.f32 %v3266_v23, %v3066_v37  ;;  %v3268_v49 = vpop.f32.mrb[55].mxu0  ;;  %v3602_v51 = vpack.c.bf16 %v5571_v45, %v5560_v27  ;;  %3862 = vrcp.f32 %v5419_v12  ;;  %v2128_v22 = vmul.f32 %v3851_v26, %v5155_v4 }
 0x165   :  { %v3380_v19 = vpop.f32.mrb[55].mxu1  ;;  %v3857_v30 = vpop.eup %3856  ;;  %1526 = vst [vmem:[%s5792_s9 + $0xc8] sm:$0xff] %v1494_v7  ;;  %v3269_v52 = vadd.f32 %v3268_v49, %v3267_v35  ;;  %3864 = vrcp.f32 %v5421_v29  ;;  %v2126_v8 = vmul.f32 %v3853_v54, %v5140_v32  ;;  %v2132_v6 = vmul.f32 %v3855_v5, %v5198_v58  ;;  %v5966_v32 = vld [vmem:[#allocation18_spill] sm:$0xff]  ;;  %v5967_v58 = vld [vmem:[#allocation31_spill] sm:$0xff] }
 0x166   :  { %v3381_v33 = vadd.f32 %v3380_v19, %v3379_v1  ;;  %v1456_v14 = vmul.f32 %v5964_v21, %v1232_v61  ;;  %3603 = vmatprep.subr.bf16.mxu1 %v3602_v51  ;;  %v2234_v17 = vpop.permute.xlu1 %2233  ;;  %v3859_v12 = vpop.eup %3858  ;;  %3866 = vrcp.f32 %v5482_v0  ;;  %v2130_v42 = vmul.f32 %v3857_v30, %v5965_v34 }
 0x167   :  { %v2231_v44 = vpop.permute.xlu0 %2230  ;;  %v1233_v37 = vadd.f32 %v3269_v52, %v3067_v13  ;;  %vm2310_vm1 = vcmp.eq.s32.totalorder %v2234_v17, 1  ;;  %v3270_v18 = vpop.f32.mrb[56].mxu0  ;;  %3868 = vrcp.f32 %v5484_v40 }
 0x168   :  { %vm2309_vm3 = vcmp.eq.s32.totalorder %v2231_v44, 1  ;;  %v3861_v39 = vpop.eup %3860  ;;  %v1495_v4 = vadd.f32 %v5509_v2, %v1456_v14  ;;  %v2342_v26 = vsel %vm2310_vm1, %v2128_v22, 0.0  ;;  %v3382_v38 = vpop.f32.mrb[56].mxu1  ;;  %v2164_v35 = vmul.f32 %v3859_v12, %v3381_v33  ;;  %v5969_v33 = vld [vmem:[#allocation52_spill] sm:$0xff]  ;;  %v5970_v12 = vld [vmem:[#allocation21_spill] sm:$0xff] }
 0x169   :  { %v2341_v29 = vsel %vm2309_vm3, %v2126_v8, 0.0  ;;  %v1457_v54 = vmul.f32 %v5966_v32, %v1233_v37  ;;  %v2374_v5 = vmul.f32 %v2342_v26, %v5967_v58  ;;  %v3271_v24 = vpop.f32.mrb[57].mxu0  ;;  %v3383_v23 = vpop.f32.mrb[57].mxu1  ;;  %v2162_v7 = vmul.f32 %v3861_v39, %v3378_v62 }
 0x16a   :  { %v2373_v0 = vmul.f32 %v2341_v29, %v5968_v9  ;;  %1527 = vst [vmem:[%s5792_s9 + $0xd0] sm:$0xff] %v1495_v4  ;;  %v3272_v1 = vadd.f32 %v3271_v24, %v3270_v18  ;;  %v3384_v13 = vadd.f32 %v3383_v23, %v3382_v38  ;;  %v2288_v61 = vpop.permute.xlu1 %2287  ;;  %v3273_v30 = vpop.f32.mrb[58].mxu0  ;;  %3870 = vrcp.f32 %v5526_v57  ;;  %v5973_v24 = vld [vmem:[#allocation33_spill] sm:$0xff] }
 0x16b   :  { %v2285_v49 = vpop.permute.xlu0 %2284  ;;  %v1496_v40 = vadd.f32 %v5509_v2, %v1457_v54  ;;  %vm2328_vm4 = vcmp.eq.s32.totalorder %v2288_v61, 1  ;;  %v3385_v52 = vpop.f32.mrb[58].mxu1  ;;  %3872 = vrcp.f32 %v5528_v43 }
 0x16c   :  { %v2445_v19 = vadd.f32 %v5550_v55, %v2373_v0  ;;  %v3604_v51 = vpack.c.bf16 %v2374_v5, %v2373_v0  ;;  %v1234_v22 = vadd.f32 %v3272_v1, %v3070_v15  ;;  %v2360_v21 = vsel %vm2328_vm4, %v2164_v35, 0.0  ;;  %v3274_v14 = vpop.f32.mrb[59].mxu0  ;;  %v3386_v62 = vpop.f32.mrb[59].mxu1  ;;  %v5971_v15 = vld [vmem:[#allocation48_spill] sm:$0xff] }
 0x16d   :  { %vm2327_vm6 = vcmp.eq.s32.totalorder %v2285_v49, 1  ;;  %1528 = vst [vmem:[%s5792_s9 + $0xd8] sm:$0xff] %v1496_v40  ;;  %v5610_v17 = vmul.f32 %v2360_v21, %v5969_v33  ;;  %v3275_v55 = vadd.f32 %v3274_v14, %v3273_v30  ;;  %v3387_v8 = vadd.f32 %v3386_v62, %v3385_v52 }
 0x16e   :  { %v2359_v44 = vsel %vm2327_vm6, %v2162_v7, 0.0  ;;  %3605 = vmatpush3.bf16.msra.mxu1 %v3604_v51  ;;  %v1458_v57 = vmul.f32 %v5970_v12, %v1234_v22  ;;  %v2240_v39 = vpop.permute.xlu1 %2239  ;;  %v2446_v26 = vadd.f32 %v2445_v19, %v2374_v5  ;;  %v3863_v29 = vpop.eup %3862  ;;  %3874 = vrcp.f32 %v5573_v25  ;;  %v5972_v5 = vld [vmem:[#allocation20_spill] sm:$0xff] }
 0x16f   :  { %v5615_v37 = vmul.f32 %v2359_v44, %v5971_v15  ;;  %v2237_v4 = vpop.permute.xlu0 %2236  ;;  %v1235_v18 = vadd.f32 %v3275_v55, %v3071_v31  ;;  %vm2312_vm5 = vcmp.eq.s32.totalorder %v2240_v39, 1  ;;  %v3865_v38 = vpop.eup %3864  ;;  %3876 = vrcp.f32 %v5575_v28  ;;  %v5974_v31 = vld [vmem:[#allocation34_spill] sm:$0xff]  ;;  %v5975_v44 = vld [vmem:[#allocation59_spill] sm:$0xff] }
 0x170   :  { %vm2311_vm7 = vcmp.eq.s32.totalorder %v2237_v4, 1  ;;  %v1497_v34 = vadd.f32 %v5509_v2, %v1458_v57  ;;  %v2344_v43 = vsel %vm2312_vm5, %v2132_v6, 0.0  ;;  %v3276_v54 = vpop.f32.mrb[60].mxu0  ;;  %v3388_v58 = vpop.f32.mrb[60].mxu1  ;;  %v2166_v6 = vmul.f32 %v3865_v38, %v3384_v13  ;;  %v5976_v39 = vld [vmem:[#allocation23_spill] sm:$0xff]  ;;  %v5977_v4 = vld [vmem:[#allocation56_spill] sm:$0xff] }
 0x171   :  { %v2343_v32 = vsel %vm2311_vm7, %v2130_v42, 0.0  ;;  %v3606_v9 = vpack.c.bf16 %v5610_v17, %v5615_v37  ;;  %v3867_v0 = vpop.eup %3866  ;;  %v1459_v25 = vmul.f32 %v5972_v5, %v1235_v18  ;;  %v2376_v20 = vmul.f32 %v2344_v43, %v5973_v24  ;;  %v3277_v7 = vpop.f32.mrb[61].mxu0  ;;  %v5978_v5 = vld [vmem:[#allocation22_spill] sm:$0xff]  ;;  %v5979_v24 = vld [vmem:[#allocation61_spill] sm:$0xff] }
 0x172   :  { %v2375_v23 = vmul.f32 %v2343_v32, %v5974_v31  ;;  %v3389_v35 = vpop.f32.mrb[61].mxu1  ;;  %1529 = vst [vmem:[%s5792_s9 + $0xe0] sm:$0xff] %v1497_v34  ;;  %v2168_v42 = vmul.f32 %v3863_v29, %v3387_v8  ;;  %v3278_v1 = vadd.f32 %v3277_v7, %v3276_v54  ;;  %v2294_v49 = vpop.permute.xlu1 %2293  ;;  %v2136_v33 = vmul.f32 %v3867_v0, %v5242_v16 }
 0x173   :  { %v3390_v61 = vadd.f32 %v3389_v35, %v3388_v58  ;;  %3607 = vmatprep.subr.bf16.mxu1 %v3606_v9  ;;  %v2291_v40 = vpop.permute.xlu0 %2290  ;;  %v3869_v28 = vpop.eup %3868  ;;  %v1498_v19 = vadd.f32 %v5509_v2, %v1459_v25  ;;  %vm2330_vm8 = vcmp.eq.s32.totalorder %v2294_v49, 1 }
 0x174   :  { %v2447_v51 = vadd.f32 %v2446_v26, %v2375_v23  ;;  %v3608_v30 = vpack.c.bf16 %v2376_v20, %v2375_v23  ;;  %v3279_v52 = vpop.f32.mrb[62].mxu0  ;;  %v3391_v22 = vpop.f32.mrb[62].mxu1  ;;  %v1236_v21 = vadd.f32 %v3278_v1, %v3074_v3  ;;  %v2362_v14 = vsel %vm2330_vm8, %v2168_v42, 0.0 }
 0x175   :  { %vm2329_vm9 = vcmp.eq.s32.totalorder %v2291_v40, 1  ;;  %v3280_v13 = vpop.f32.mrb[63].mxu0  ;;  %v3392_v62 = vpop.f32.mrb[63].mxu1  ;;  %1530 = vst [vmem:[%s5792_s9 + $0xe8] sm:$0xff] %v1498_v19  ;;  %v5638_v55 = vmul.f32 %v2362_v14, %v5975_v44  ;;  %v2134_v16 = vmul.f32 %v3869_v28, %v5223_v46  ;;  %v5980_v46 = vld [vmem:[#allocation36_spill] sm:$0xff] }
 0x176   :  { %v2361_v8 = vsel %vm2329_vm9, %v2166_v6, 0.0  ;;  %v3281_v12 = vadd.f32 %v3280_v13, %v3279_v52  ;;  %v3393_v57 = vadd.f32 %v3392_v62, %v3391_v22  ;;  %3609 = vmatpush3.bf16.msra.mxu1 %v3608_v30  ;;  %v3871_v15 = vpop.eup %3870  ;;  %v1460_v3 = vmul.f32 %v5976_v39, %v1236_v21  ;;  %v2246_v29 = vpop.permute.xlu1 %2245  ;;  %v5981_v40 = vld [vmem:[#allocation68_spill] sm:$0xff] }
 0x177   :  { %v5642_v26 = vmul.f32 %v2361_v8, %v5977_v4  ;;  %v2243_v18 = vpop.permute.xlu0 %2242  ;;  %v2448_v38 = vadd.f32 %v2447_v51, %v2376_v20  ;;  %vm2314_vm10 = vcmp.eq.s32.totalorder %v2246_v29, 1  ;;  %v3873_v43 = vpop.eup %3872  ;;  %v5982_v51 = vld [vmem:[#allocation66_spill] sm:$0xff]  ;;  %v5984_v8 = vld [vmem:[#allocation65_spill] sm:$0xff] }
 0x178   :  { %v1237_v34 = vadd.f32 %v3281_v12, %v3075_v41  ;;  %vm2313_vm11 = vcmp.eq.s32.totalorder %v2243_v18, 1  ;;  %v1499_v32 = vadd.f32 %v5509_v2, %v1460_v3  ;;  %v2346_v54 = vsel %vm2314_vm10, %v2136_v33, 0.0  ;;  %v3875_v0 = vpop.eup %3874  ;;  %v5983_v33 = vld [vmem:[#allocation69_spill] sm:$0xff] }
 0x179   :  { %v2345_v58 = vsel %vm2313_vm11, %v2134_v16, 0.0  ;;  %v3610_v9 = vpack.c.bf16 %v5638_v55, %v5642_v26  ;;  %v2378_v31 = vmul.f32 %v2346_v54, %v5979_v24  ;;  %v2170_v10 = vmul.f32 %v3873_v43, %v3390_v61  ;;  %v3877_v35 = vpop.eup %3876 }
 0x17a   :  { %v1461_v25 = vmul.f32 %v5978_v5, %v1237_v34  ;;  %v2377_v20 = vmul.f32 %v2345_v58, %v5980_v46  ;;  %1531 = vst [vmem:[%s5792_s9 + $0xf0] sm:$0xff] %v1499_v32  ;;  %v2172_v41 = vmul.f32 %v3871_v15, %v3393_v57  ;;  %v2300_v23 = vpop.permute.xlu1 %2299  ;;  %v2140_v22 = vmul.f32 %v3875_v0, %v5293_v63 }
 0x17b   :  { %3611 = vmatprep.subr.bf16.mxu1 %v3610_v9  ;;  %v2297_v7 = vpop.permute.xlu0 %2296  ;;  %vm2332_vm12 = vcmp.eq.s32.totalorder %v2300_v23, 1  ;;  %v2138_v21 = vmul.f32 %v3877_v35, %v5274_v11 }
 0x17c   :  { %v1500_v6 = vadd.f32 %v5509_v2, %v1461_v25  ;;  %v2449_v42 = vadd.f32 %v2448_v38, %v2377_v20  ;;  %v3612_v1 = vpack.c.bf16 %v2378_v31, %v2377_v20  ;;  %v2364_v49 = vsel %vm2332_vm12, %v2172_v41, 0.0  ;;  %v2437_v41 = vld [vmem:[%s5793_s13] sm:$0x1] }
 0x17d   :  { %vm2331_vm13 = vcmp.eq.s32.totalorder %v2297_v7, 1  ;;  %v2396_v28 = vmul.f32 %v2364_v49, %v5981_v40 }
 0x17e   :  { %1532 = vst [vmem:[%s5792_s9 + $0xf8] sm:$0xff] %v1500_v6  ;;  %v2363_v19 = vsel %vm2331_vm13, %v2170_v10, 0.0  ;;  %3613 = vmatpush3.bf16.msra.mxu1 %v3612_v1  ;;  %v2450_v61 = vadd.f32 %v2449_v42, %v2378_v31  ;;  %v2252_v52 = vpop.permute.xlu1 %2251 }
 0x17f   :  { %v2395_v30 = vmul.f32 %v2363_v19, %v5982_v51  ;;  %v2249_v2 = vpop.permute.xlu0 %2248  ;;  %vm2316_vm14 = vcmp.eq.s32.totalorder %v2252_v52, 1 }
 0x180   :  { %vm2315_vm15 = vcmp.eq.s32.totalorder %v2249_v2, 1  ;;  %v2348_v14 = vsel %vm2316_vm14, %v2140_v22, 0.0 }
 0x181   :  { %v2347_v13 = vsel %vm2315_vm15, %v2138_v21, 0.0  ;;  %v3614_v62 = vpack.c.bf16 %v2396_v28, %v2395_v30  ;;  %v2380_v44 = vmul.f32 %v2348_v14, %v5983_v33 }
 0x182   :  { %v2379_v12 = vmul.f32 %v2347_v13, %v5984_v8 }
 0x183   :  { %3615 = vmatprep.subr.bf16.mxu1 %v3614_v62 }
 0x184   :  { %v2451_v57 = vadd.f32 %v2450_v61, %v2379_v12  ;;  %v3616_v15 = vpack.c.bf16 %v2380_v44, %v2379_v12 }
 0x186   :  { %v2452_v39 = vadd.f32 %v2451_v57, %v2380_v44  ;;  %3617 = vmatpush3.bf16.msra.mxu1 %v3616_v15 }
 0x188   :  { %v2453_v3 = vadd.f32 %v2452_v39, %v5364_v36 }
 0x18a   :  { %v2454_v63 = vadd.f32 %v2453_v3, %v5367_v59 }
 0x18c   :  { %v2455_v11 = vadd.f32 %v2454_v63, %v5399_v47 }
 0x18e   :  { %v2456_v4 = vadd.f32 %v2455_v11, %v5414_v50 }
 0x190   :  { %v2457_v29 = vadd.f32 %v2456_v4, %v5488_v48 }
 0x192   :  { %v2458_v18 = vadd.f32 %v2457_v29, %v5491_v53 }
 0x194   :  { %v2459_v16 = vadd.f32 %v2458_v18, %v5532_v56 }
 0x196   :  { %v2460_v38 = vadd.f32 %v2459_v16, %v5523_v60 }
 0x198   :  { %v2461_v34 = vadd.f32 %v2460_v38, %v5560_v27 }
 0x19a   :  { %v2462_v43 = vadd.f32 %v2461_v34, %v5571_v45 }
 0x19c   :  { %v2463_v36 = vadd.f32 %v2462_v43, %v5615_v37 }
 0x19e   :  { %v3654_v32 = vpop.trf.xlu0  ;;  %v2464_v59 = vadd.f32 %v2463_v36, %v5610_v17 }
 0x19f   :  { %v3658_v47 = vunpack.i.h.bf16 %v3654_v32  ;;  %v3655_v54 = vunpack.i.l.bf16 %v3654_v32 }
 0x1a0   :  { %v2465_v50 = vadd.f32 %v2464_v59, %v5642_v26 }
 0x1a1   :  { %2621 = vmatprep.mubr.f32.mxu0 %v3655_v54  ;;  %2814 = vmatprep.mubr.f32.mxu1 %v3655_v54 }
 0x1a2   :  { %v3659_v48 = vpop.trf.xlu0  ;;  %v2466_v53 = vadd.f32 %v2465_v50, %v5638_v55  ;;  %2622 = vmatmul.mubr.f32.vlgmr.msra.gmra.mrb[64].mxu0 %v3658_v47  ;;  %2815 = vmatmul.mubr.f32.vlgmr.msra.gmra.mrb[64].mxu1 %v3658_v47 }
 0x1a3   :  { %v3660_v60 = vunpack.i.l.bf16 %v3659_v48  ;;  %v3663_v56 = vunpack.i.h.bf16 %v3659_v48 }
 0x1a4   :  { %v2467_v27 = vadd.f32 %v2466_v53, %v2395_v30 }
 0x1a5   :  { %2626 = vmatprep.mubr.f32.mxu0 %v3660_v60  ;;  %2819 = vmatprep.mubr.f32.mxu1 %v3660_v60 }
 0x1a6   :  { %v3664_v45 = vpop.trf.xlu0  ;;  %v2468_v37 = vadd.f32 %v2467_v27, %v2396_v28  ;;  %2627 = vmatmul.mubr.f32.gmra.mrb[66].mxu0 %v3663_v56  ;;  %2820 = vmatmul.mubr.f32.gmra.mrb[66].mxu1 %v3663_v56 }
 0x1a7   :  { %v3665_v17 = vunpack.i.l.bf16 %v3664_v45  ;;  %v3668_v58 = vunpack.i.h.bf16 %v3664_v45 }
 0x1a8   :  { %v2469_v9 = vrot.slane %v2468_v37, 4 }
 0x1a9   :  { %2631 = vmatprep.mubr.f32.mxu0 %v3665_v17  ;;  %2824 = vmatprep.mubr.f32.mxu1 %v3665_v17 }
 0x1aa   :  { %v3669_v26 = vpop.trf.xlu0  ;;  %v2470_v0 = vadd.f32 %v2469_v9, %v2468_v37  ;;  %2632 = vmatmul.mubr.f32.gmra.mrb[68].mxu0 %v3668_v58  ;;  %2825 = vmatmul.mubr.f32.gmra.mrb[68].mxu1 %v3668_v58 }
 0x1ab   :  { %v3670_v55 = vunpack.i.l.bf16 %v3669_v26  ;;  %v3673_v5 = vunpack.i.h.bf16 %v3669_v26 }
 0x1ac   :  { %v2471_v25 = vrot.slane %v2470_v0, 2 }
 0x1ad   :  { %2636 = vmatprep.mubr.f32.mxu0 %v3670_v55  ;;  %2829 = vmatprep.mubr.f32.mxu1 %v3670_v55 }
 0x1ae   :  { %v3674_v24 = vpop.trf.xlu0  ;;  %v2472_v31 = vadd.f32 %v2471_v25, %v2470_v0  ;;  %2637 = vmatmul.mubr.f32.gmra.mrb[70].mxu0 %v3673_v5  ;;  %2830 = vmatmul.mubr.f32.gmra.mrb[70].mxu1 %v3673_v5 }
 0x1af   :  { %v3675_v46 = vunpack.i.l.bf16 %v3674_v24  ;;  %v3678_v20 = vunpack.i.h.bf16 %v3674_v24 }
 0x1b0   :  { %v2473_v10 = vrot.slane %v2472_v31, 1 }
 0x1b1   :  { %2641 = vmatprep.mubr.f32.mxu0 %v3675_v46  ;;  %2834 = vmatprep.mubr.f32.mxu1 %v3675_v46 }
 0x1b2   :  { %v3679_v23 = vpop.trf.xlu0  ;;  %v2474_v7 = vadd.f32 %v2473_v10, %v2472_v31  ;;  %2642 = vmatmul.mubr.f32.gmra.mrb[72].mxu0 %v3678_v20  ;;  %2835 = vmatmul.mubr.f32.gmra.mrb[72].mxu1 %v3678_v20 }
 0x1b3   :  { %v3680_v35 = vunpack.i.l.bf16 %v3679_v23  ;;  %v3683_v6 = vunpack.i.h.bf16 %v3679_v23 }
 0x1b4   :  { %v2475_v42 = vadd.f32 %v2474_v7, %v2437_v41 }
 0x1b5   :  { %2646 = vmatprep.mubr.f32.mxu0 %v3680_v35  ;;  %2839 = vmatprep.mubr.f32.mxu1 %v3680_v35 }
 0x1b6   :  { %v3684_v1 = vpop.trf.xlu0  ;;  %2476 = vst [vmem:[%s5793_s13] sm:$0x1] %v2475_v42  ;;  %2647 = vmatmul.mubr.f32.gmra.mrb[74].mxu0 %v3683_v6  ;;  %2840 = vmatmul.mubr.f32.gmra.mrb[74].mxu1 %v3683_v6 }
 0x1b7   :  { %v3685_v49 = vunpack.i.l.bf16 %v3684_v1  ;;  %v3688_v40 = vunpack.i.h.bf16 %v3684_v1 }
 0x1b9   :  { %2651 = vmatprep.mubr.f32.mxu0 %v3685_v49  ;;  %2844 = vmatprep.mubr.f32.mxu1 %v3685_v49 }
 0x1ba   :  { %v3689_v28 = vpop.trf.xlu0  ;;  %2652 = vmatmul.mubr.f32.gmra.mrb[76].mxu0 %v3688_v40  ;;  %2845 = vmatmul.mubr.f32.gmra.mrb[76].mxu1 %v3688_v40 }
 0x1bb   :  { %v3690_v19 = vunpack.i.l.bf16 %v3689_v28  ;;  %v3693_v61 = vunpack.i.h.bf16 %v3689_v28 }
 0x1bd   :  { %2656 = vmatprep.mubr.f32.mxu0 %v3690_v19  ;;  %2849 = vmatprep.mubr.f32.mxu1 %v3690_v19 }
 0x1be   :  { %v3694_v51 = vpop.trf.xlu0  ;;  %2657 = vmatmul.mubr.f32.gmra.mrb[78].mxu0 %v3693_v61  ;;  %2850 = vmatmul.mubr.f32.gmra.mrb[78].mxu1 %v3693_v61 }
 0x1bf   :  { %v3695_v30 = vunpack.i.l.bf16 %v3694_v51  ;;  %v3698_v52 = vunpack.i.h.bf16 %v3694_v51 }
 0x1c1   :  { %2661 = vmatprep.mubr.f32.mxu0 %v3695_v30  ;;  %2854 = vmatprep.mubr.f32.mxu1 %v3695_v30 }
 0x1c2   :  { %v3699_v22 = vpop.trf.xlu0  ;;  %2662 = vmatmul.mubr.f32.gmra.mrb[80].mxu0 %v3698_v52  ;;  %2855 = vmatmul.mubr.f32.gmra.mrb[80].mxu1 %v3698_v52 }
 0x1c3   :  { %v3700_v2 = vunpack.i.l.bf16 %v3699_v22  ;;  %v3703_v21 = vunpack.i.h.bf16 %v3699_v22 }
 0x1c5   :  { %2666 = vmatprep.mubr.f32.mxu0 %v3700_v2  ;;  %2859 = vmatprep.mubr.f32.mxu1 %v3700_v2 }
 0x1c6   :  { %v3704_v14 = vpop.trf.xlu0  ;;  %2667 = vmatmul.mubr.f32.gmra.mrb[82].mxu0 %v3703_v21  ;;  %2860 = vmatmul.mubr.f32.gmra.mrb[82].mxu1 %v3703_v21 }
 0x1c7   :  { %v3705_v13 = vunpack.i.l.bf16 %v3704_v14  ;;  %v3708_v62 = vunpack.i.h.bf16 %v3704_v14 }
 0x1c9   :  { %2671 = vmatprep.mubr.f32.mxu0 %v3705_v13  ;;  %2864 = vmatprep.mubr.f32.mxu1 %v3705_v13 }
 0x1ca   :  { %v3709_v33 = vpop.trf.xlu0  ;;  %2672 = vmatmul.mubr.f32.gmra.mrb[84].mxu0 %v3708_v62  ;;  %2865 = vmatmul.mubr.f32.gmra.mrb[84].mxu1 %v3708_v62 }
 0x1cb   :  { %v3710_v44 = vunpack.i.l.bf16 %v3709_v33  ;;  %v3713_v8 = vunpack.i.h.bf16 %v3709_v33 }
 0x1cd   :  { %2676 = vmatprep.mubr.f32.mxu0 %v3710_v44  ;;  %2869 = vmatprep.mubr.f32.mxu1 %v3710_v44 }
 0x1ce   :  { %v3714_v12 = vpop.trf.xlu0  ;;  %2677 = vmatmul.mubr.f32.gmra.mrb[86].mxu0 %v3713_v8  ;;  %2870 = vmatmul.mubr.f32.gmra.mrb[86].mxu1 %v3713_v8 }
 0x1cf   :  { %v3715_v57 = vunpack.i.l.bf16 %v3714_v12  ;;  %v3718_v15 = vunpack.i.h.bf16 %v3714_v12 }
 0x1d1   :  { %2681 = vmatprep.mubr.f32.mxu0 %v3715_v57  ;;  %2874 = vmatprep.mubr.f32.mxu1 %v3715_v57 }
 0x1d2   :  { %v3719_v39 = vpop.trf.xlu0  ;;  %2682 = vmatmul.mubr.f32.gmra.mrb[88].mxu0 %v3718_v15  ;;  %2875 = vmatmul.mubr.f32.gmra.mrb[88].mxu1 %v3718_v15 }
 0x1d3   :  { %v3720_v3 = vunpack.i.l.bf16 %v3719_v39  ;;  %v3723_v63 = vunpack.i.h.bf16 %v3719_v39 }
 0x1d5   :  { %2686 = vmatprep.mubr.f32.mxu0 %v3720_v3  ;;  %2879 = vmatprep.mubr.f32.mxu1 %v3720_v3 }
 0x1d6   :  { %v3724_v11 = vpop.trf.xlu0  ;;  %2687 = vmatmul.mubr.f32.gmra.mrb[90].mxu0 %v3723_v63  ;;  %2880 = vmatmul.mubr.f32.gmra.mrb[90].mxu1 %v3723_v63 }
 0x1d7   :  { %v3725_v4 = vunpack.i.l.bf16 %v3724_v11  ;;  %v3728_v29 = vunpack.i.h.bf16 %v3724_v11 }
 0x1d9   :  { %2691 = vmatprep.mubr.f32.mxu0 %v3725_v4  ;;  %2884 = vmatprep.mubr.f32.mxu1 %v3725_v4 }
 0x1da   :  { %v3729_v18 = vpop.trf.xlu0  ;;  %2692 = vmatmul.mubr.f32.gmra.mrb[92].mxu0 %v3728_v29  ;;  %2885 = vmatmul.mubr.f32.gmra.mrb[92].mxu1 %v3728_v29 }
 0x1db   :  { %v3733_v16 = vunpack.i.h.bf16 %v3729_v18  ;;  %v3730_v38 = vunpack.i.l.bf16 %v3729_v18 }
 0x1dd   :  { %2696 = vmatprep.mubr.f32.mxu0 %v3730_v38  ;;  %2889 = vmatprep.mubr.f32.mxu1 %v3730_v38 }
 0x1de   :  { %2697 = vmatmul.mubr.f32.gmra.mrb[94].mxu0 %v3733_v16  ;;  %2890 = vmatmul.mubr.f32.gmra.mrb[94].mxu1 %v3733_v16 }
 0x275   :  { %v3426_v34 = vpop.f32.mrb[64].mxu0  ;;  %v3506_v43 = vpop.f32.mrb[64].mxu1 }
 0x276   :  { %v3427_v36 = vpop.f32.mrb[65].mxu0  ;;  %v3507_v32 = vpop.f32.mrb[65].mxu1 }
 0x277   :  { %v3428_v59 = vadd.f32 %v3427_v36, %v3426_v34  ;;  %v3508_v47 = vadd.f32 %v3507_v32, %v3506_v43 }
 0x279   :  { %v3429_v54 = vpop.f32.mrb[66].mxu0  ;;  %v3509_v50 = vpop.f32.mrb[66].mxu1  ;;  %2718 = vst [vmem:[%s5794_s10] sm:$0xff] %v3428_v59  ;;  %2911 = vst [vmem:[%s5795_s11] sm:$0xff] %v3508_v47 }
 0x27a   :  { %v3430_v48 = vpop.f32.mrb[67].mxu0  ;;  %v3510_v53 = vpop.f32.mrb[67].mxu1 }
 0x27b   :  { %v3431_v60 = vadd.f32 %v3430_v48, %v3429_v54  ;;  %v3511_v56 = vadd.f32 %v3510_v53, %v3509_v50 }
 0x27d   :  { %v3432_v27 = vpop.f32.mrb[68].mxu0  ;;  %v3512_v45 = vpop.f32.mrb[68].mxu1  ;;  %2719 = vst [vmem:[%s5794_s10 + $0x8] sm:$0xff] %v3431_v60  ;;  %2912 = vst [vmem:[%s5795_s11 + $0x8] sm:$0xff] %v3511_v56 }
 0x27e   :  { %v3433_v37 = vpop.f32.mrb[69].mxu0  ;;  %v3513_v17 = vpop.f32.mrb[69].mxu1 }
 0x27f   :  { %v3434_v58 = vadd.f32 %v3433_v37, %v3432_v27  ;;  %v3514_v9 = vadd.f32 %v3513_v17, %v3512_v45 }
 0x281   :  { %v3435_v26 = vpop.f32.mrb[70].mxu0  ;;  %v3515_v0 = vpop.f32.mrb[70].mxu1  ;;  %2720 = vst [vmem:[%s5794_s10 + $0x10] sm:$0xff] %v3434_v58  ;;  %2913 = vst [vmem:[%s5795_s11 + $0x10] sm:$0xff] %v3514_v9 }
 0x282   :  { %v3436_v55 = vpop.f32.mrb[71].mxu0  ;;  %v3516_v5 = vpop.f32.mrb[71].mxu1 }
 0x283   :  { %v3437_v25 = vadd.f32 %v3436_v55, %v3435_v26  ;;  %v3517_v24 = vadd.f32 %v3516_v5, %v3515_v0 }
 0x285   :  { %v3438_v31 = vpop.f32.mrb[72].mxu0  ;;  %v3518_v46 = vpop.f32.mrb[72].mxu1  ;;  %2721 = vst [vmem:[%s5794_s10 + $0x18] sm:$0xff] %v3437_v25  ;;  %2914 = vst [vmem:[%s5795_s11 + $0x18] sm:$0xff] %v3517_v24 }
 0x286   :  { %v3439_v20 = vpop.f32.mrb[73].mxu0  ;;  %v3519_v10 = vpop.f32.mrb[73].mxu1 }
 0x287   :  { %v3440_v41 = vadd.f32 %v3439_v20, %v3438_v31  ;;  %v3520_v23 = vadd.f32 %v3519_v10, %v3518_v46 }
 0x289   :  { %v3441_v7 = vpop.f32.mrb[74].mxu0  ;;  %v3521_v35 = vpop.f32.mrb[74].mxu1  ;;  %2722 = vst [vmem:[%s5794_s10 + $0x20] sm:$0xff] %v3440_v41  ;;  %2915 = vst [vmem:[%s5795_s11 + $0x20] sm:$0xff] %v3520_v23 }
 0x28a   :  { %v3442_v6 = vpop.f32.mrb[75].mxu0  ;;  %v3522_v42 = vpop.f32.mrb[75].mxu1 }
 0x28b   :  { %v3443_v1 = vadd.f32 %v3442_v6, %v3441_v7  ;;  %v3523_v49 = vadd.f32 %v3522_v42, %v3521_v35 }
 0x28d   :  { %v3444_v40 = vpop.f32.mrb[76].mxu0  ;;  %v3524_v28 = vpop.f32.mrb[76].mxu1  ;;  %2723 = vst [vmem:[%s5794_s10 + $0x28] sm:$0xff] %v3443_v1  ;;  %2916 = vst [vmem:[%s5795_s11 + $0x28] sm:$0xff] %v3523_v49 }
 0x28e   :  { %v3445_v19 = vpop.f32.mrb[77].mxu0  ;;  %v3525_v61 = vpop.f32.mrb[77].mxu1 }
 0x28f   :  { %v3446_v51 = vadd.f32 %v3445_v19, %v3444_v40  ;;  %v3526_v30 = vadd.f32 %v3525_v61, %v3524_v28 }
 0x291   :  { %v3447_v52 = vpop.f32.mrb[78].mxu0  ;;  %v3527_v22 = vpop.f32.mrb[78].mxu1  ;;  %2724 = vst [vmem:[%s5794_s10 + $0x30] sm:$0xff] %v3446_v51  ;;  %2917 = vst [vmem:[%s5795_s11 + $0x30] sm:$0xff] %v3526_v30 }
 0x292   :  { %v3448_v2 = vpop.f32.mrb[79].mxu0  ;;  %v3528_v21 = vpop.f32.mrb[79].mxu1 }
 0x293   :  { %v3449_v14 = vadd.f32 %v3448_v2, %v3447_v52  ;;  %v3529_v13 = vadd.f32 %v3528_v21, %v3527_v22 }
 0x295   :  { %v3450_v62 = vpop.f32.mrb[80].mxu0  ;;  %v3530_v33 = vpop.f32.mrb[80].mxu1  ;;  %2725 = vst [vmem:[%s5794_s10 + $0x38] sm:$0xff] %v3449_v14  ;;  %2918 = vst [vmem:[%s5795_s11 + $0x38] sm:$0xff] %v3529_v13 }
 0x296   :  { %v3451_v44 = vpop.f32.mrb[81].mxu0  ;;  %v3531_v8 = vpop.f32.mrb[81].mxu1 }
 0x297   :  { %v3452_v12 = vadd.f32 %v3451_v44, %v3450_v62  ;;  %v3532_v57 = vadd.f32 %v3531_v8, %v3530_v33 }
 0x299   :  { %v3453_v15 = vpop.f32.mrb[82].mxu0  ;;  %v3533_v39 = vpop.f32.mrb[82].mxu1  ;;  %2726 = vst [vmem:[%s5794_s10 + $0x40] sm:$0xff] %v3452_v12  ;;  %2919 = vst [vmem:[%s5795_s11 + $0x40] sm:$0xff] %v3532_v57 }
 0x29a   :  { %v3454_v3 = vpop.f32.mrb[83].mxu0  ;;  %v3534_v63 = vpop.f32.mrb[83].mxu1 }
 0x29b   :  { %v3455_v11 = vadd.f32 %v3454_v3, %v3453_v15  ;;  %v3535_v4 = vadd.f32 %v3534_v63, %v3533_v39 }
 0x29d   :  { %v3456_v29 = vpop.f32.mrb[84].mxu0  ;;  %v3536_v18 = vpop.f32.mrb[84].mxu1  ;;  %2727 = vst [vmem:[%s5794_s10 + $0x48] sm:$0xff] %v3455_v11  ;;  %2920 = vst [vmem:[%s5795_s11 + $0x48] sm:$0xff] %v3535_v4 }
 0x29e   :  { %v3457_v16 = vpop.f32.mrb[85].mxu0  ;;  %v3537_v38 = vpop.f32.mrb[85].mxu1 }
 0x29f   :  { %v3458_v34 = vadd.f32 %v3457_v16, %v3456_v29  ;;  %v3538_v43 = vadd.f32 %v3537_v38, %v3536_v18 }
 0x2a1   :  { %v3459_v36 = vpop.f32.mrb[86].mxu0  ;;  %v3539_v32 = vpop.f32.mrb[86].mxu1  ;;  %2728 = vst [vmem:[%s5794_s10 + $0x50] sm:$0xff] %v3458_v34  ;;  %2921 = vst [vmem:[%s5795_s11 + $0x50] sm:$0xff] %v3538_v43 }
 0x2a2   :  { %v3460_v59 = vpop.f32.mrb[87].mxu0  ;;  %v3540_v47 = vpop.f32.mrb[87].mxu1 }
 0x2a3   :  { %v3461_v54 = vadd.f32 %v3460_v59, %v3459_v36  ;;  %v3541_v50 = vadd.f32 %v3540_v47, %v3539_v32 }
 0x2a5   :  { %v3462_v48 = vpop.f32.mrb[88].mxu0  ;;  %v3542_v53 = vpop.f32.mrb[88].mxu1  ;;  %2729 = vst [vmem:[%s5794_s10 + $0x58] sm:$0xff] %v3461_v54  ;;  %2922 = vst [vmem:[%s5795_s11 + $0x58] sm:$0xff] %v3541_v50 }
 0x2a6   :  { %v3463_v60 = vpop.f32.mrb[89].mxu0  ;;  %v3543_v56 = vpop.f32.mrb[89].mxu1 }
 0x2a7   :  { %v3464_v27 = vadd.f32 %v3463_v60, %v3462_v48  ;;  %v3544_v45 = vadd.f32 %v3543_v56, %v3542_v53 }
 0x2a9   :  { %v3465_v37 = vpop.f32.mrb[90].mxu0  ;;  %v3545_v17 = vpop.f32.mrb[90].mxu1  ;;  %2730 = vst [vmem:[%s5794_s10 + $0x60] sm:$0xff] %v3464_v27  ;;  %2923 = vst [vmem:[%s5795_s11 + $0x60] sm:$0xff] %v3544_v45 }
 0x2aa   :  { %v3466_v58 = vpop.f32.mrb[91].mxu0  ;;  %v3546_v9 = vpop.f32.mrb[91].mxu1 }
 0x2ab   :  { %v3467_v26 = vadd.f32 %v3466_v58, %v3465_v37  ;;  %v3547_v0 = vadd.f32 %v3546_v9, %v3545_v17 }
 0x2ad   :  { %v3468_v55 = vpop.f32.mrb[92].mxu0  ;;  %v3548_v5 = vpop.f32.mrb[92].mxu1  ;;  %2731 = vst [vmem:[%s5794_s10 + $0x68] sm:$0xff] %v3467_v26  ;;  %2924 = vst [vmem:[%s5795_s11 + $0x68] sm:$0xff] %v3547_v0 }
 0x2ae   :  { %v3469_v25 = vpop.f32.mrb[93].mxu0  ;;  %v3549_v24 = vpop.f32.mrb[93].mxu1 }
 0x2af   :  { %v3470_v31 = vadd.f32 %v3469_v25, %v3468_v55  ;;  %v3550_v46 = vadd.f32 %v3549_v24, %v3548_v5 }
 0x2b1   :  { %v3471_v20 = vpop.f32.mrb[94].mxu0  ;;  %v3551_v10 = vpop.f32.mrb[94].mxu1  ;;  %2732 = vst [vmem:[%s5794_s10 + $0x70] sm:$0xff] %v3470_v31  ;;  %2925 = vst [vmem:[%s5795_s11 + $0x70] sm:$0xff] %v3550_v46 }
 0x2b2   :  { %v3472_v41 = vpop.f32.mrb[95].mxu0  ;;  %v3552_v23 = vpop.f32.mrb[95].mxu1 }
 0x2b3   :  { %v3473_v7 = vadd.f32 %v3472_v41, %v3471_v20  ;;  %v3553_v35 = vadd.f32 %v3552_v23, %v3551_v10 }
 0x2b5   :  { %2733 = vst [vmem:[%s5794_s10 + $0x78] sm:$0xff] %v3473_v7  ;;  %2926 = vst [vmem:[%s5795_s11 + $0x78] sm:$0xff] %v3553_v35 }

// kernel: _device_forward.15
= control target key start
LH: loop header
LB: loop body
LE: loop exit
PB: predicated region body
PF: predicated region fallthrough
CT: control target
= control target key end

     0   :  { %11 = vsyncpa [#allocation3], 0  ;;  %s2334_s21 = smov 0   ;;  %s3656_s0 = inlined_call_operand.vmem [shape: f32[768,128], index: 0, kind: input, shape index: {}]   ;;  %s3657_s1 = inlined_call_operand.vmem [shape: f32[768,128], index: 1, kind: input, shape index: {}]   ;;  %s3658_s2 = inlined_call_operand.vmem [shape: f32[768,128], index: 2, kind: input, shape index: {}]   ;;  %s3659_s3 = inlined_call_operand.vmem [shape: f32[768,128], index: 3, kind: input, shape index: {}]   ;;  %s3660_s4 = inlined_call_operand.vmem [shape: f32[768,1], index: 4, kind: input, shape index: {}]   ;;  %s3661_s5 = inlined_call_operand.vmem [shape: f32[1,128], index: 5, kind: input, shape index: {}]   ;;  %s3662_s6 = inlined_call_operand.hbm [shape: f32[1,1], index: 6, kind: output, shape index: {}]  }
   0x1 LB: > { %s2340_s22 = sadd.s32 4294967295, %s2294_s21   ;;  %p1900_p0 = scmp.ge.s32.totalorder %s2294_s21, 1  ;;  %s2294_s21 = sphi %s2334_s21, %s17_s21  }
   0x2   : > { %p253_p1 = scmp.lt.s32.totalorder %s2294_s21, 4 }
   0x4   : > { %p254_p2 = pnand %p1900_p0, %p253_p1 }
   0x6   : > { %257 = sbr.rel (%p254_p2) target bundleno = 837 (0x345), region = 44 }
   0xd   : > { %s1901_s23 = sshll.u32 %s2340_s22, 5  ;;  %p1911_p4 = scmp.ne.s32.totalorder %s2340_s22, 0 }
   0xe   : > { %p299_p3 = scmp.lt.s32.totalorder %s1901_s23, 95  ;;  %vm332_vm0 = vcmask (!%p1911_p4), 0   ;;  %v2296_v0 = vmov (!%p1911_p4), 0.0  }
   0xf   : > { %331 = sbr.rel (%p1911_p4) target bundleno = 22 (0x16), region = 48  ;;  %333 = vst.msk [vmem:[#allocation2] sm:$0x1] (!%p1911_p4), %vm332_vm0, %v2296_v0 }
  0x10   : > { %s3805_s23 = smov (!%p299_p3, %s1901_s23), 95 }
  0x11   : > { %s1902_s24 = sshll.u32 %s3805_s23, 3 }
  0x12   : > { %s2348_s27 = scalar_lea.vmem %s3656_s0, %s1902_s24  ;;  %s2353_s30 = scalar_lea.vmem %s3657_s1, %s1902_s24 }
  0x13   : > { %s2358_s9 = scalar_lea.vmem %s3658_s2, %s1902_s24  ;;  %s2363_s12 = scalar_lea.vmem %s3659_s3, %s1902_s24 }
  0x14   : > { %s2368_s15 = scalar_lea.vmem %s3660_s4, %s1902_s24 }
  0x16 PF: > { %v334_v1 = vld [vmem:[%s3661_s5] sm:$0x1]  ;;  %v338_v2 = vld [vmem:[%s2348_s27 + $0x10] sm:$0xff]  ;;  %v593_v4 = vlaneseq  ;;  %v339_v8 = vld [vmem:[%s2348_s27 + $0x18] sm:$0xff]  ;;  %v2297_v9 = vmov 0   ;;  %vm1793_vm3 = vcmask 0  }
  0x17   : > { %v370_v3 = vld [vmem:[%s2353_s30 + $0x10] sm:$0xff]  ;;  %vm335_vm1 = vcmp.gt.f32.partialorder %v334_v1, 0.0  ;;  %v336_v6 = vld [vmem:[%s2348_s27] sm:$0xff]  ;;  %1937 = vset.pattern.permute.xlu1 %v2297_v9  ;;  %1936 = vset.pattern.permute.xlu0 %v2297_v9  ;;  %v371_v12 = vld [vmem:[%s2353_s30 + $0x18] sm:$0xff]  ;;  %p1912_p5 = scmp.ne.s32.totalorder %s2340_s22, 2 }
  0x18   : > { %v402_v5 = vsub.f32 %v338_v2, %v370_v3  ;;  %v368_v7 = vld [vmem:[%s2353_s30] sm:$0xff]  ;;  %v594_v10 = vshrl.u32 %v593_v4, 7  ;;  %v337_v13 = vld [vmem:[%s2348_s27 + $0x8] sm:$0xff]  ;;  %v592_v15 = vsel %vm335_vm1, 1, %v2297_v9  ;;  %v403_v16 = vsub.f32 %v339_v8, %v371_v12  ;;  %v343_v27 = vld [vmem:[%s2348_s27 + $0x38] sm:$0xff] }
  0x19   : > { %v400_v11 = vsub.f32 %v336_v6, %v368_v7  ;;  %v369_v14 = vld [vmem:[%s2353_s30 + $0x8] sm:$0xff]  ;;  %v340_v21 = vld [vmem:[%s2348_s27 + $0x20] sm:$0xff]  ;;  %v375_v28 = vld [vmem:[%s2353_s30 + $0x38] sm:$0xff] }
  0x1a   : > { %v401_v17 = vsub.f32 %v337_v13, %v369_v14  ;;  %v341_v18 = vld [vmem:[%s2348_s27 + $0x28] sm:$0xff]  ;;  %v595_v20 = vsub.s32 0, %v594_v10  ;;  %v372_v22 = vld [vmem:[%s2353_s30 + $0x20] sm:$0xff]  ;;  %v434_v23 = vand.u32 2147483647, %v402_v5  ;;  %v342_v32 = vld [vmem:[%s2348_s27 + $0x30] sm:$0xff]  ;;  %v407_v37 = vsub.f32 %v343_v27, %v375_v28 }
  0x1b   : > { %v373_v19 = vld [vmem:[%s2353_s30 + $0x28] sm:$0xff]  ;;  %v432_v24 = vand.u32 2147483647, %v400_v11  ;;  %v435_v29 = vand.u32 2147483647, %v403_v16  ;;  %v404_v31 = vsub.f32 %v340_v21, %v372_v22  ;;  %v374_v33 = vld [vmem:[%s2353_s30 + $0x30] sm:$0xff] }
  0x1c   : > { %v2386_v25 = vrot.slane %v592_v15, %v595_v20  ;;  %v405_v26 = vsub.f32 %v341_v18, %v373_v19  ;;  %v433_v30 = vand.u32 2147483647, %v401_v17  ;;  %v406_v38 = vsub.f32 %v342_v32, %v374_v33  ;;  %v345_v39 = vld [vmem:[%s2348_s27 + $0x48] sm:$0xff]  ;;  %v344_v44 = vld [vmem:[%s2348_s27 + $0x40] sm:$0xff]  ;;  %v347_v48 = vld [vmem:[%s2348_s27 + $0x58] sm:$0xff] }
  0x1d   : > { %v436_v42 = vand.u32 2147483647, %v404_v31  ;;  %v377_v43 = vld [vmem:[%s2353_s30 + $0x48] sm:$0xff]  ;;  %v376_v45 = vld [vmem:[%s2353_s30 + $0x40] sm:$0xff]  ;;  %v439_v46 = vand.u32 2147483647, %v407_v37 }
  0x1e   : > { %vm597_vm2 = vcmp.eq.s32.totalorder %v2386_v25, 1  ;;  %v437_v36 = vand.u32 2147483647, %v405_v26  ;;  %v438_v47 = vand.u32 2147483647, %v406_v38  ;;  %v379_v49 = vld [vmem:[%s2353_s30 + $0x58] sm:$0xff]  ;;  %v409_v52 = vsub.f32 %v345_v39, %v377_v43 }
  0x1f   : > { %v2395_v34 = vsel %vm597_vm2, %v434_v23, -1e+30  ;;  %v2399_v35 = vsel %vm597_vm2, %v432_v24, -1e+30  ;;  %v2406_v40 = vsel %vm597_vm2, %v435_v29, -1e+30  ;;  %v408_v53 = vsub.f32 %v344_v44, %v376_v45 }
  0x20   : > { %634 = vmax.xlane.f32.xlu1 %v2395_v34  ;;  %630 = vmax.xlane.f32.xlu0 %v2399_v35  ;;  %v2410_v41 = vsel %vm597_vm2, %v433_v30, -1e+30  ;;  %v2421_v50 = vsel %vm597_vm2, %v437_v36, -1e+30  ;;  %v2425_v51 = vsel %vm597_vm2, %v436_v42, -1e+30  ;;  %v411_v58 = vsub.f32 %v347_v48, %v379_v49 }
  0x21   : > { %v346_v54 = vld [vmem:[%s2348_s27 + $0x50] sm:$0xff]  ;;  %v2433_v56 = vsel %vm597_vm2, %v439_v46, -1e+30  ;;  %v2437_v57 = vsel %vm597_vm2, %v438_v47, -1e+30  ;;  %v349_v62 = vld [vmem:[%s2348_s27 + $0x68] sm:$0xff] }
  0x22   : > { %v378_v55 = vld [vmem:[%s2353_s30 + $0x50] sm:$0xff]  ;;  %v441_v60 = vand.u32 2147483647, %v409_v52  ;;  %v440_v61 = vand.u32 2147483647, %v408_v53  ;;  %v381_v63 = vld [vmem:[%s2353_s30 + $0x68] sm:$0xff] }
  0x23   : > { %v410_v59 = vsub.f32 %v346_v54, %v378_v55  ;;  %v348_v0 = vld [vmem:[%s2348_s27 + $0x60] sm:$0xff]  ;;  %v443_v2 = vand.u32 2147483647, %v411_v58  ;;  %v413_v4 = vsub.f32 %v349_v62, %v381_v63  ;;  %v351_v8 = vld [vmem:[%s2348_s27 + $0x78] sm:$0xff]  ;;  %v350_v10 = vld [vmem:[%s2348_s27 + $0x70] sm:$0xff] }
  0x24   : > { %636 = vmax.xlane.f32.xlu1 %v2406_v40  ;;  %632 = vmax.xlane.f32.xlu0 %v2410_v41  ;;  %v380_v1 = vld [vmem:[%s2353_s30 + $0x60] sm:$0xff]  ;;  %v2447_v5 = vsel %vm597_vm2, %v441_v60, -1e+30  ;;  %v2451_v6 = vsel %vm597_vm2, %v440_v61, -1e+30  ;;  %v383_v9 = vld [vmem:[%s2353_s30 + $0x78] sm:$0xff] }
  0x25   : > { %v442_v3 = vand.u32 2147483647, %v410_v59  ;;  %v412_v7 = vsub.f32 %v348_v0, %v380_v1  ;;  %v382_v11 = vld [vmem:[%s2353_s30 + $0x70] sm:$0xff]  ;;  %v2461_v12 = vsel %vm597_vm2, %v443_v2, -1e+30  ;;  %v415_v14 = vsub.f32 %v351_v8, %v383_v9  ;;  %v353_v18 = vld [vmem:[%s2348_s27 + $0x88] sm:$0xff] }
  0x26   : > { %v445_v13 = vand.u32 2147483647, %v413_v4  ;;  %v414_v17 = vsub.f32 %v350_v10, %v382_v11  ;;  %v385_v19 = vld [vmem:[%s2353_s30 + $0x88] sm:$0xff]  ;;  %v352_v20 = vld [vmem:[%s2348_s27 + $0x80] sm:$0xff]  ;;  %v354_v31 = vld [vmem:[%s2348_s27 + $0x90] sm:$0xff] }
  0x27   : > { %v2465_v15 = vsel %vm597_vm2, %v442_v3, -1e+30  ;;  %v444_v16 = vand.u32 2147483647, %v412_v7  ;;  %v384_v21 = vld [vmem:[%s2353_s30 + $0x80] sm:$0xff]  ;;  %v417_v24 = vsub.f32 %v353_v18, %v385_v19  ;;  %v386_v32 = vld [vmem:[%s2353_s30 + $0x90] sm:$0xff] }
  0x28   : > { %640 = vmax.xlane.f32.xlu1 %v2421_v50  ;;  %638 = vmax.xlane.f32.xlu0 %v2425_v51  ;;  %v2475_v22 = vsel %vm597_vm2, %v445_v13, -1e+30  ;;  %v447_v23 = vand.u32 2147483647, %v415_v14  ;;  %v446_v27 = vand.u32 2147483647, %v414_v17  ;;  %v416_v28 = vsub.f32 %v352_v20, %v384_v21 }
  0x29   : > { %v2479_v26 = vsel %vm597_vm2, %v444_v16, -1e+30  ;;  %v464_v29 = vld [vmem:[%s2358_s9] sm:$0xff]  ;;  %v449_v36 = vand.u32 2147483647, %v417_v24  ;;  %v418_v42 = vsub.f32 %v354_v31, %v386_v32  ;;  %v465_v43 = vld [vmem:[%s2358_s9 + $0x8] sm:$0xff] }
  0x2a   : > { %v496_v30 = vld [vmem:[%s2363_s12] sm:$0xff]  ;;  %v2489_v33 = vsel %vm597_vm2, %v447_v23, -1e+30  ;;  %v2493_v38 = vsel %vm597_vm2, %v446_v27, -1e+30  ;;  %v497_v44 = vld [vmem:[%s2363_s12 + $0x8] sm:$0xff] }
  0x2b   : > { %v528_v37 = vsub.f32 %v464_v29, %v496_v30  ;;  %v448_v39 = vand.u32 2147483647, %v416_v28  ;;  %v466_v45 = vld [vmem:[%s2358_s9 + $0x10] sm:$0xff]  ;;  %v2503_v47 = vsel %vm597_vm2, %v449_v36, -1e+30  ;;  %v529_v49 = vsub.f32 %v465_v43, %v497_v44  ;;  %v467_v55 = vld [vmem:[%s2358_s9 + $0x18] sm:$0xff] }
  0x2c   : > { %644 = vmax.xlane.f32.xlu1 %v2433_v56  ;;  %642 = vmax.xlane.f32.xlu0 %v2437_v57  ;;  %v498_v46 = vld [vmem:[%s2363_s12 + $0x10] sm:$0xff]  ;;  %v450_v53 = vand.u32 2147483647, %v418_v42  ;;  %v499_v58 = vld [vmem:[%s2363_s12 + $0x18] sm:$0xff]  ;;  %v468_v59 = vld [vmem:[%s2358_s9 + $0x20] sm:$0xff] }
  0x2d   : > { %v560_v48 = vand.u32 2147483647, %v528_v37  ;;  %v2507_v52 = vsel %vm597_vm2, %v448_v39, -1e+30  ;;  %v530_v54 = vsub.f32 %v466_v45, %v498_v46  ;;  %v500_v60 = vld [vmem:[%s2363_s12 + $0x20] sm:$0xff]  ;;  %v531_v63 = vsub.f32 %v467_v55, %v499_v58  ;;  %v469_v3 = vld [vmem:[%s2358_s9 + $0x28] sm:$0xff] }
  0x2e   : > { %v561_v62 = vand.u32 2147483647, %v529_v49  ;;  %v2521_v0 = vsel %vm597_vm2, %v450_v53, -1e+30  ;;  %v532_v2 = vsub.f32 %v468_v59, %v500_v60  ;;  %v501_v4 = vld [vmem:[%s2363_s12 + $0x28] sm:$0xff]  ;;  %v470_v7 = vld [vmem:[%s2358_s9 + $0x30] sm:$0xff] }
  0x2f   : > { %v2517_v61 = vsel %vm597_vm2, %v560_v48, -1e+30  ;;  %v562_v1 = vand.u32 2147483647, %v530_v54  ;;  %v502_v8 = vld [vmem:[%s2363_s12 + $0x30] sm:$0xff]  ;;  %v533_v11 = vsub.f32 %v469_v3, %v501_v4  ;;  %v471_v17 = vld [vmem:[%s2358_s9 + $0x38] sm:$0xff] }
  0x30   : > { %648 = vmax.xlane.f32.xlu1 %v2447_v5  ;;  %646 = vmax.xlane.f32.xlu0 %v2451_v6  ;;  %v2531_v9 = vsel %vm597_vm2, %v561_v62, -1e+30  ;;  %v563_v10 = vand.u32 2147483647, %v531_v63  ;;  %v564_v14 = vand.u32 2147483647, %v532_v2  ;;  %v534_v16 = vsub.f32 %v470_v7, %v502_v8 }
  0x31   : > { %v2535_v13 = vsel %vm597_vm2, %v562_v1, -1e+30  ;;  %v503_v18 = vld [vmem:[%s2363_s12 + $0x38] sm:$0xff]  ;;  %v472_v19 = vld [vmem:[%s2358_s9 + $0x40] sm:$0xff]  ;;  %v565_v23 = vand.u32 2147483647, %v533_v11 }
  0x32   : > { %v504_v20 = vld [vmem:[%s2363_s12 + $0x40] sm:$0xff]  ;;  %v2545_v21 = vsel %vm597_vm2, %v563_v10, -1e+30  ;;  %v535_v24 = vsub.f32 %v471_v17, %v503_v18  ;;  %v2549_v27 = vsel %vm597_vm2, %v564_v14, -1e+30  ;;  %v473_v30 = vld [vmem:[%s2358_s9 + $0x48] sm:$0xff] }
  0x33   : > { %v566_v28 = vand.u32 2147483647, %v534_v16  ;;  %v536_v29 = vsub.f32 %v472_v19, %v504_v20  ;;  %v505_v31 = vld [vmem:[%s2363_s12 + $0x48] sm:$0xff]  ;;  %v474_v32 = vld [vmem:[%s2358_s9 + $0x50] sm:$0xff]  ;;  %v2559_v37 = vsel %vm597_vm2, %v565_v23, -1e+30 }
  0x34   : > { %652 = vmax.xlane.f32.xlu1 %v2461_v12  ;;  %650 = vmax.xlane.f32.xlu0 %v2465_v15  ;;  %v506_v36 = vld [vmem:[%s2363_s12 + $0x50] sm:$0xff]  ;;  %v567_v39 = vand.u32 2147483647, %v535_v24  ;;  %v537_v42 = vsub.f32 %v473_v30, %v505_v31  ;;  %v475_v46 = vld [vmem:[%s2358_s9 + $0x58] sm:$0xff]  ;;  %v476_v49 = vld [vmem:[%s2358_s9 + $0x60] sm:$0xff] }
  0x35   : > { %v2563_v43 = vsel %vm597_vm2, %v566_v28, -1e+30  ;;  %v568_v44 = vand.u32 2147483647, %v536_v29  ;;  %v538_v45 = vsub.f32 %v474_v32, %v506_v36  ;;  %v507_v48 = vld [vmem:[%s2363_s12 + $0x58] sm:$0xff]  ;;  %v508_v53 = vld [vmem:[%s2363_s12 + $0x60] sm:$0xff] }
  0x36   : > { %v2573_v54 = vsel %vm597_vm2, %v567_v39, -1e+30  ;;  %v569_v55 = vand.u32 2147483647, %v537_v42  ;;  %v539_v58 = vsub.f32 %v475_v46, %v507_v48  ;;  %v540_v62 = vsub.f32 %v476_v49, %v508_v53  ;;  %v355_v63 = vld [vmem:[%s2348_s27 + $0x98] sm:$0xff]  ;;  %v477_v2 = vld [vmem:[%s2358_s9 + $0x68] sm:$0xff] }
  0x37   : > { %v2577_v59 = vsel %vm597_vm2, %v568_v44, -1e+30  ;;  %v570_v60 = vand.u32 2147483647, %v538_v45  ;;  %v387_v1 = vld [vmem:[%s2353_s30 + $0x98] sm:$0xff]  ;;  %v509_v3 = vld [vmem:[%s2363_s12 + $0x68] sm:$0xff] }
  0x38   : > { %656 = vmax.xlane.f32.xlu1 %v2475_v22  ;;  %654 = vmax.xlane.f32.xlu0 %v2479_v26  ;;  %v2587_v4 = vsel %vm597_vm2, %v569_v55, -1e+30  ;;  %v571_v7 = vand.u32 2147483647, %v539_v58  ;;  %v419_v8 = vsub.f32 %v355_v63, %v387_v1  ;;  %v572_v11 = vand.u32 2147483647, %v540_v62 }
  0x39   : > { %v2591_v10 = vsel %vm597_vm2, %v570_v60, -1e+30  ;;  %v541_v14 = vsub.f32 %v477_v2, %v509_v3  ;;  %v356_v16 = vld [vmem:[%s2348_s27 + $0xa0] sm:$0xff]  ;;  %v478_v18 = vld [vmem:[%s2358_s9 + $0x70] sm:$0xff]  ;;  %v357_v31 = vld [vmem:[%s2348_s27 + $0xa8] sm:$0xff] }
  0x3a   : > { %v388_v17 = vld [vmem:[%s2353_s30 + $0xa0] sm:$0xff]  ;;  %v510_v19 = vld [vmem:[%s2363_s12 + $0x70] sm:$0xff]  ;;  %v2601_v20 = vsel %vm597_vm2, %v571_v7, -1e+30  ;;  %v451_v23 = vand.u32 2147483647, %v419_v8 }
  0x3b   : > { %v420_v24 = vsub.f32 %v356_v16, %v388_v17  ;;  %v2605_v28 = vsel %vm597_vm2, %v572_v11, -1e+30  ;;  %v573_v29 = vand.u32 2147483647, %v541_v14  ;;  %v542_v30 = vsub.f32 %v478_v18, %v510_v19  ;;  %v389_v32 = vld [vmem:[%s2353_s30 + $0xa8] sm:$0xff]  ;;  %v479_v36 = vld [vmem:[%s2358_s9 + $0x78] sm:$0xff] }
  0x3c   : > { %660 = vmax.xlane.f32.xlu1 %v2489_v33  ;;  %658 = vmax.xlane.f32.xlu0 %v2493_v38  ;;  %v511_v39 = vld [vmem:[%s2363_s12 + $0x78] sm:$0xff]  ;;  %v2615_v42 = vsel %vm597_vm2, %v451_v23, -1e+30  ;;  %v421_v45 = vsub.f32 %v357_v31, %v389_v32  ;;  %v358_v53 = vld [vmem:[%s2348_s27 + $0xb0] sm:$0xff]  ;;  %v480_v58 = vld [vmem:[%s2358_s9 + $0x80] sm:$0xff] }
  0x3d   : > { %v452_v44 = vand.u32 2147483647, %v420_v24  ;;  %v2619_v46 = vsel %vm597_vm2, %v573_v29, -1e+30  ;;  %v574_v48 = vand.u32 2147483647, %v542_v30  ;;  %v543_v49 = vsub.f32 %v479_v36, %v511_v39 }
  0x3e   : > { %v390_v55 = vld [vmem:[%s2353_s30 + $0xb0] sm:$0xff]  ;;  %v512_v60 = vld [vmem:[%s2363_s12 + $0x80] sm:$0xff]  ;;  %v453_v63 = vand.u32 2147483647, %v421_v45  ;;  %v359_v8 = vld [vmem:[%s2348_s27 + $0xb8] sm:$0xff] }
  0x3f   : > { %v2629_v62 = vsel %vm597_vm2, %v452_v44, -1e+30  ;;  %v422_v1 = vsub.f32 %v358_v53, %v390_v55  ;;  %v2633_v2 = vsel %vm597_vm2, %v574_v48, -1e+30  ;;  %v575_v3 = vand.u32 2147483647, %v543_v49 }
  0x40   : > { %664 = vmax.xlane.f32.xlu1 %v2503_v47  ;;  %662 = vmax.xlane.f32.xlu0 %v2507_v52  ;;  %v544_v7 = vsub.f32 %v480_v58, %v512_v60  ;;  %v391_v11 = vld [vmem:[%s2353_s30 + $0xb8] sm:$0xff]  ;;  %v481_v14 = vld [vmem:[%s2358_s9 + $0x88] sm:$0xff]  ;;  %v2643_v17 = vsel %vm597_vm2, %v453_v63, -1e+30  ;;  %v360_v30 = vld [vmem:[%s2348_s27 + $0xc0] sm:$0xff] }
  0x41   : > { %v513_v16 = vld [vmem:[%s2363_s12 + $0x88] sm:$0xff]  ;;  %v454_v18 = vand.u32 2147483647, %v422_v1  ;;  %v423_v19 = vsub.f32 %v359_v8, %v391_v11  ;;  %v2647_v23 = vsel %vm597_vm2, %v575_v3, -1e+30  ;;  %v392_v31 = vld [vmem:[%s2353_s30 + $0xc0] sm:$0xff] }
  0x42   : > { %v576_v24 = vand.u32 2147483647, %v544_v7  ;;  %v545_v29 = vsub.f32 %v481_v14, %v513_v16  ;;  %v482_v32 = vld [vmem:[%s2358_s9 + $0x90] sm:$0xff]  ;;  %v424_v45 = vsub.f32 %v360_v30, %v392_v31  ;;  %v361_v55 = vld [vmem:[%s2348_s27 + $0xc8] sm:$0xff]  ;;  %v483_v60 = vld [vmem:[%s2358_s9 + $0x98] sm:$0xff] }
  0x43   : > { %v514_v36 = vld [vmem:[%s2363_s12 + $0x90] sm:$0xff]  ;;  %v2657_v39 = vsel %vm597_vm2, %v454_v18, -1e+30  ;;  %v455_v44 = vand.u32 2147483647, %v423_v19  ;;  %v393_v58 = vld [vmem:[%s2353_s30 + $0xc8] sm:$0xff] }
  0x44   : > { %1014 = vmax.xlane.f32.xlu1 %v2517_v61  ;;  %666 = vmax.xlane.f32.xlu0 %v2521_v0  ;;  %v2661_v48 = vsel %vm597_vm2, %v576_v24, -1e+30  ;;  %v577_v49 = vand.u32 2147483647, %v545_v29  ;;  %v546_v53 = vsub.f32 %v482_v32, %v514_v36  ;;  %v515_v63 = vld [vmem:[%s2363_s12 + $0x98] sm:$0xff]  ;;  %v425_v7 = vsub.f32 %v361_v55, %v393_v58  ;;  %v362_v16 = vld [vmem:[%s2348_s27 + $0xd0] sm:$0xff] }
  0x45   : > { %v2671_v1 = vsel %vm597_vm2, %v455_v44, -1e+30  ;;  %v456_v3 = vand.u32 2147483647, %v424_v45  ;;  %v547_v14 = vsub.f32 %v483_v60, %v515_v63  ;;  %v394_v18 = vld [vmem:[%s2353_s30 + $0xd0] sm:$0xff]  ;;  %v484_v19 = vld [vmem:[%s2358_s9 + $0xa0] sm:$0xff] }
  0x46   : > { %v2675_v8 = vsel %vm597_vm2, %v577_v49, -1e+30  ;;  %v578_v11 = vand.u32 2147483647, %v546_v53  ;;  %v516_v24 = vld [vmem:[%s2363_s12 + $0xa0] sm:$0xff]  ;;  %v426_v31 = vsub.f32 %v362_v16, %v394_v18  ;;  %v363_v45 = vld [vmem:[%s2348_s27 + $0xd8] sm:$0xff] }
  0x47   : > { %v2685_v29 = vsel %vm597_vm2, %v456_v3, -1e+30  ;;  %v457_v30 = vand.u32 2147483647, %v425_v7  ;;  %v579_v36 = vand.u32 2147483647, %v547_v14  ;;  %v548_v44 = vsub.f32 %v484_v19, %v516_v24 }
  0x48   : > { %1016 = vmax.xlane.f32.xlu0 %v2531_v9  ;;  %1018 = vmax.xlane.f32.xlu1 %v2535_v13  ;;  %v2689_v32 = vsel %vm597_vm2, %v578_v11, -1e+30  ;;  %v395_v49 = vld [vmem:[%s2353_s30 + $0xd8] sm:$0xff]  ;;  %v485_v53 = vld [vmem:[%s2358_s9 + $0xa8] sm:$0xff]  ;;  %v458_v60 = vand.u32 2147483647, %v426_v31 }
  0x49   : > { %3708 = vst [vmem:[#allocation5_spill] sm:$0xff] %v2689_v32  ;;  %v517_v55 = vld [vmem:[%s2363_s12 + $0xa8] sm:$0xff]  ;;  %v2699_v58 = vsel %vm597_vm2, %v457_v30, -1e+30  ;;  %v427_v63 = vsub.f32 %v363_v45, %v395_v49  ;;  %v2703_v3 = vsel %vm597_vm2, %v579_v36, -1e+30 }
  0x4a   : > { %3709 = vst [vmem:[#allocation6_spill] sm:$0xff] %v2699_v58  ;;  %3710 = vst [vmem:[#allocation7_spill] sm:$0xff] %v2703_v3  ;;  %v580_v7 = vand.u32 2147483647, %v548_v44  ;;  %v549_v11 = vsub.f32 %v485_v53, %v517_v55  ;;  %v364_v14 = vld [vmem:[%s2348_s27 + $0xe0] sm:$0xff]  ;;  %v486_v18 = vld [vmem:[%s2358_s9 + $0xb0] sm:$0xff] }
  0x4b   : > { %v396_v16 = vld [vmem:[%s2353_s30 + $0xe0] sm:$0xff]  ;;  %v518_v19 = vld [vmem:[%s2363_s12 + $0xb0] sm:$0xff]  ;;  %v2713_v24 = vsel %vm597_vm2, %v458_v60, -1e+30  ;;  %v459_v30 = vand.u32 2147483647, %v427_v63 }
  0x4c   : > { %1020 = vmax.xlane.f32.xlu0 %v2545_v21  ;;  %1022 = vmax.xlane.f32.xlu1 %v2549_v27  ;;  %3711 = vst [vmem:[#allocation8_spill] sm:$0xff] %v2713_v24  ;;  %v428_v31 = vsub.f32 %v364_v14, %v396_v16  ;;  %v2717_v36 = vsel %vm597_vm2, %v580_v7, -1e+30  ;;  %v581_v44 = vand.u32 2147483647, %v549_v11  ;;  %v550_v45 = vsub.f32 %v486_v18, %v518_v19  ;;  %v365_v49 = vld [vmem:[%s2348_s27 + $0xe8] sm:$0xff] }
  0x4d   : > { %3712 = vst [vmem:[#allocation9_spill] sm:$0xff] %v2717_v36  ;;  %v397_v53 = vld [vmem:[%s2353_s30 + $0xe8] sm:$0xff]  ;;  %v487_v55 = vld [vmem:[%s2358_s9 + $0xb8] sm:$0xff]  ;;  %v2727_v60 = vsel %vm597_vm2, %v459_v30, -1e+30  ;;  %v366_v18 = vld [vmem:[%s2348_s27 + $0xf0] sm:$0xff] }
  0x4e   : > { %3713 = vst [vmem:[#allocation10_spill] sm:$0xff] %v2727_v60  ;;  %v460_v63 = vand.u32 2147483647, %v428_v31  ;;  %v429_v7 = vsub.f32 %v365_v49, %v397_v53  ;;  %v2731_v11 = vsel %vm597_vm2, %v581_v44, -1e+30  ;;  %v398_v19 = vld [vmem:[%s2353_s30 + $0xf0] sm:$0xff] }
  0x4f   : > { %3714 = vst [vmem:[#allocation11_spill] sm:$0xff] %v2731_v11  ;;  %v582_v14 = vand.u32 2147483647, %v550_v45  ;;  %v430_v44 = vsub.f32 %v366_v18, %v398_v19  ;;  %v367_v53 = vld [vmem:[%s2348_s27 + $0xf8] sm:$0xff] }
  0x50   : > { %1024 = vmax.xlane.f32.xlu0 %v2559_v37  ;;  %1026 = vmax.xlane.f32.xlu1 %v2563_v43  ;;  %v2741_v30 = vsel %vm597_vm2, %v460_v63, -1e+30  ;;  %v461_v31 = vand.u32 2147483647, %v429_v7  ;;  %v491_v18 = vld [vmem:[%s2358_s9 + $0xd8] sm:$0xff] }
  0x51   : > { %3715 = vst [vmem:[#allocation12_spill] sm:$0xff] %v2741_v30  ;;  %v2745_v45 = vsel %vm597_vm2, %v582_v14, -1e+30  ;;  %v462_v7 = vand.u32 2147483647, %v430_v44  ;;  %v523_v19 = vld [vmem:[%s2363_s12 + $0xd8] sm:$0xff] }
  0x52   : > { %3716 = vst [vmem:[#allocation13_spill] sm:$0xff] %v2745_v45  ;;  %v2755_v63 = vsel %vm597_vm2, %v461_v31, -1e+30 }
  0x53   : > { %3717 = vst [vmem:[#allocation14_spill] sm:$0xff] %v2755_v63  ;;  %v2769_v31 = vsel %vm597_vm2, %v462_v7, -1e+30 }
  0x54   : > { %1028 = vmax.xlane.f32.xlu0 %v2573_v54  ;;  %1030 = vmax.xlane.f32.xlu1 %v2577_v59 }
  0x58   : > { %1032 = vmax.xlane.f32.xlu0 %v2587_v4  ;;  %1034 = vmax.xlane.f32.xlu1 %v2591_v10 }
  0x5c   : > { %1036 = vmax.xlane.f32.xlu0 %v2601_v20  ;;  %1038 = vmax.xlane.f32.xlu1 %v2605_v28 }
  0x60   : > { %668 = vmax.xlane.f32.xlu1 %v2615_v42  ;;  %1040 = vmax.xlane.f32.xlu0 %v2619_v46 }
  0x64   : > { %670 = vmax.xlane.f32.xlu1 %v2629_v62  ;;  %1042 = vmax.xlane.f32.xlu0 %v2633_v2 }
  0x68   : > { %672 = vmax.xlane.f32.xlu1 %v2643_v17  ;;  %1044 = vmax.xlane.f32.xlu0 %v2647_v23 }
  0x6c   : > { %674 = vmax.xlane.f32.xlu1 %v2657_v39  ;;  %1046 = vmax.xlane.f32.xlu0 %v2661_v48 }
  0x70   : > { %676 = vmax.xlane.f32.xlu1 %v2671_v1  ;;  %1048 = vmax.xlane.f32.xlu0 %v2675_v8 }
  0x74   : > { %678 = vmax.xlane.f32.xlu1 %v2685_v29  ;;  %1050 = vmax.xlane.f32.xlu0 %v2689_v32  ;;  %v527_v32 = vld [vmem:[%s2363_s12 + $0xf8] sm:$0xff] }
  0x78   : > { %680 = vmax.xlane.f32.xlu1 %v2699_v58  ;;  %1052 = vmax.xlane.f32.xlu0 %v2703_v3  ;;  %v519_v3 = vld [vmem:[%s2363_s12 + $0xb8] sm:$0xff] }
  0x79   : > { %v551_v16 = vsub.f32 %v487_v55, %v519_v3  ;;  %v399_v55 = vld [vmem:[%s2353_s30 + $0xf8] sm:$0xff] }
  0x7a   : > { %v431_v14 = vsub.f32 %v367_v53, %v399_v55  ;;  %v493_v53 = vld [vmem:[%s2358_s9 + $0xe8] sm:$0xff]  ;;  %v495_v58 = vld [vmem:[%s2358_s9 + $0xf8] sm:$0xff] }
  0x7b   : > { %v583_v3 = vand.u32 2147483647, %v551_v16  ;;  %v525_v55 = vld [vmem:[%s2363_s12 + $0xe8] sm:$0xff] }
  0x7c   : > { %682 = vmax.xlane.f32.xlu1 %v2713_v24  ;;  %1054 = vmax.xlane.f32.xlu0 %v2717_v36  ;;  %v488_v24 = vld [vmem:[%s2358_s9 + $0xc0] sm:$0xff]  ;;  %v463_v44 = vand.u32 2147483647, %v431_v14 }
  0x7d   : > { %v520_v36 = vld [vmem:[%s2363_s12 + $0xc0] sm:$0xff]  ;;  %v2759_v16 = vsel %vm597_vm2, %v583_v3, -1e+30  ;;  %v555_v3 = vsub.f32 %v491_v18, %v523_v19  ;;  %v494_v18 = vld [vmem:[%s2358_s9 + $0xf0] sm:$0xff] }
  0x7e   : > { %v552_v49 = vsub.f32 %v488_v24, %v520_v36  ;;  %3718 = vst [vmem:[#allocation15_spill] sm:$0xff] %v2759_v16  ;;  %v2783_v7 = vsel %vm597_vm2, %v463_v44, -1e+30  ;;  %v526_v19 = vld [vmem:[%s2363_s12 + $0xf0] sm:$0xff] }
  0x7f   : > { %v587_v14 = vand.u32 2147483647, %v555_v3  ;;  %v558_v3 = vsub.f32 %v494_v18, %v526_v19 }
  0x80   : > { %684 = vmax.xlane.f32.xlu1 %v2727_v60  ;;  %1056 = vmax.xlane.f32.xlu0 %v2731_v11  ;;  %v489_v60 = vld [vmem:[%s2358_s9 + $0xc8] sm:$0xff]  ;;  %v584_v24 = vand.u32 2147483647, %v552_v49 }
  0x81   : > { %v521_v11 = vld [vmem:[%s2363_s12 + $0xc8] sm:$0xff]  ;;  %v2797_v44 = vsel %vm597_vm2, %v587_v14, -1e+30 }
  0x82   : > { %v553_v36 = vsub.f32 %v489_v60, %v521_v11  ;;  %v2773_v49 = vsel %vm597_vm2, %v584_v24, -1e+30 }
  0x84   : > { %686 = vmax.xlane.f32.xlu1 %v2741_v30  ;;  %1058 = vmax.xlane.f32.xlu0 %v2745_v45  ;;  %v490_v30 = vld [vmem:[%s2358_s9 + $0xd0] sm:$0xff]  ;;  %v585_v60 = vand.u32 2147483647, %v553_v36 }
  0x85   : > { %v522_v45 = vld [vmem:[%s2363_s12 + $0xd0] sm:$0xff] }
  0x86   : > { %v554_v11 = vsub.f32 %v490_v30, %v522_v45  ;;  %v2787_v24 = vsel %vm597_vm2, %v585_v60, -1e+30  ;;  %v557_v30 = vsub.f32 %v493_v53, %v525_v55 }
  0x88   : > { %688 = vmax.xlane.f32.xlu1 %v2755_v63  ;;  %1060 = vmax.xlane.f32.xlu0 %v2759_v16  ;;  %v492_v63 = vld [vmem:[%s2358_s9 + $0xe0] sm:$0xff]  ;;  %v586_v36 = vand.u32 2147483647, %v554_v11  ;;  %v589_v11 = vand.u32 2147483647, %v557_v30 }
  0x89   : > { %v524_v16 = vld [vmem:[%s2363_s12 + $0xe0] sm:$0xff] }
  0x8a   : > { %v556_v45 = vsub.f32 %v492_v63, %v524_v16  ;;  %v2801_v60 = vsel %vm597_vm2, %v586_v36, -1e+30  ;;  %v559_v63 = vsub.f32 %v495_v58, %v527_v32  ;;  %v590_v16 = vand.u32 2147483647, %v558_v3 }
  0x8b   : > { %v2807_v55 = vsel %vm597_vm2, %v589_v11, -1e+30 }
  0x8c   : > { %690 = vmax.xlane.f32.xlu1 %v2769_v31  ;;  %1062 = vmax.xlane.f32.xlu0 %v2773_v49  ;;  %v588_v53 = vand.u32 2147483647, %v556_v45  ;;  %3719 = vst [vmem:[#allocation16_spill] sm:$0xff] %v2807_v55  ;;  %v591_v18 = vand.u32 2147483647, %v559_v63 }
  0x8d   : > { %v2817_v32 = vsel %vm597_vm2, %v590_v16, -1e+30 }
  0x8e   : > { %v2811_v14 = vsel %vm597_vm2, %v588_v53, -1e+30  ;;  %3721 = vst [vmem:[#allocation18_spill] sm:$0xff] %v2817_v32  ;;  %v2821_v58 = vsel %vm597_vm2, %v591_v18, -1e+30 }
  0x8f   : > { %3720 = vst [vmem:[#allocation17_spill] sm:$0xff] %v2811_v14  ;;  %3722 = vst [vmem:[#allocation19_spill] sm:$0xff] %v2821_v58 }
  0x90   : > { %692 = vmax.xlane.f32.xlu1 %v2783_v7  ;;  %1064 = vmax.xlane.f32.xlu0 %v2787_v24 }
  0x94   : > { %1068 = vmax.xlane.f32.xlu1 %v2797_v44  ;;  %1066 = vmax.xlane.f32.xlu0 %v2801_v60 }
  0x98   : > { %1072 = vmax.xlane.f32.xlu1 %v2807_v55  ;;  %1070 = vmax.xlane.f32.xlu0 %v2811_v14 }
  0x9c   : > { %1074 = vmax.xlane.f32.xlu0 %v2817_v32  ;;  %1076 = vmax.xlane.f32.xlu1 %v2821_v58 }
  0xad   : > { %v635_v36 = vpop.xlane.xlu1 %634  ;;  %v631_v30 = vpop.xlane.xlu0 %630 }
  0xae   : > { %v2826_v45 = vsub.f32 %v2395_v34, %v635_v36  ;;  %v2829_v19 = vsub.f32 %v2399_v35, %v631_v30 }
  0xb0   : > { %3723 = vst [vmem:[#allocation20_spill] sm:$0xff] %v2826_v45  ;;  %3724 = vst [vmem:[#allocation21_spill] sm:$0xff] %v2829_v19  ;;  %v730_v3 = vmul.f32 1.442695, %v2826_v45  ;;  %v726_v11 = vmul.f32 1.442695, %v2829_v19 }
  0xb1   : > { %v637_v53 = vpop.xlane.xlu1 %636  ;;  %v633_v63 = vpop.xlane.xlu0 %632 }
  0xb2   : > { %1938 = vpow2.f32 %v730_v3  ;;  %v2834_v16 = vsub.f32 %v2406_v40, %v637_v53  ;;  %v2837_v18 = vsub.f32 %v2410_v41, %v633_v63 }
  0xb3   : > { %1940 = vpow2.f32 %v726_v11 }
  0xb4   : > { %3725 = vst [vmem:[#allocation22_spill] sm:$0xff] %v2834_v16  ;;  %3726 = vst [vmem:[#allocation23_spill] sm:$0xff] %v2837_v18  ;;  %v732_v34 = vmul.f32 1.442695, %v2834_v16  ;;  %v728_v36 = vmul.f32 1.442695, %v2837_v18 }
  0xb5   : > { %v641_v35 = vpop.xlane.xlu1 %640  ;;  %v639_v30 = vpop.xlane.xlu0 %638 }
  0xb6   : > { %1942 = vpow2.f32 %v732_v34  ;;  %v2842_v58 = vsub.f32 %v2421_v50, %v641_v35  ;;  %v2845_v45 = vsub.f32 %v2425_v51, %v639_v30 }
  0xb7   : > { %1944 = vpow2.f32 %v728_v36 }
  0xb8   : > { %3727 = vst [vmem:[#allocation24_spill] sm:$0xff] %v2842_v58  ;;  %3728 = vst [vmem:[#allocation25_spill] sm:$0xff] %v2845_v45  ;;  %v736_v40 = vmul.f32 1.442695, %v2842_v58  ;;  %v734_v41 = vmul.f32 1.442695, %v2845_v45 }
  0xb9   : > { %v645_v3 = vpop.xlane.xlu1 %644  ;;  %v643_v11 = vpop.xlane.xlu0 %642 }
  0xba   : > { %1946 = vpow2.f32 %v736_v40  ;;  %v2850_v53 = vsub.f32 %v2437_v57, %v643_v11 }
  0xbb   : > { %1948 = vpow2.f32 %v734_v41 }
  0xbc   : > { %3729 = vst [vmem:[#allocation26_spill] sm:$0xff] %v2850_v53  ;;  %v1939_v63 = vpop.eup %1938  ;;  %v738_v34 = vmul.f32 1.442695, %v2850_v53 }
  0xbd   : > { %v1941_v50 = vpop.eup %1940  ;;  %v649_v35 = vpop.xlane.xlu1 %648  ;;  %v792_v30 = vsel %vm597_vm2, %v1939_v63, 0.0 }
  0xbe   : > { %v647_v16 = vpop.xlane.xlu0 %646  ;;  %v790_v51 = vsel %vm597_vm2, %v1941_v50, 0.0  ;;  %1950 = vpow2.f32 %v738_v34 }
  0xbf   : > { %822 = vadd.xlane.f32.xlu0 %v790_v51  ;;  %v2887_v14 = vsub.f32 %v2451_v6, %v647_v16 }
  0xc0   : > { %v1943_v36 = vpop.eup %1942 }
  0xc1   : > { %v1945_v40 = vpop.eup %1944  ;;  %v653_v58 = vpop.xlane.xlu1 %652  ;;  %v793_v18 = vsel %vm597_vm2, %v1943_v36, 0.0 }
  0xc2   : > { %v651_v57 = vpop.xlane.xlu0 %650  ;;  %v791_v41 = vsel %vm597_vm2, %v1945_v40, 0.0 }
  0xc3   : > { %826 = vadd.xlane.f32.xlu0 %v792_v30  ;;  %824 = vadd.xlane.f32.xlu1 %v791_v41 }
  0xc4   : > { %v1947_v11 = vpop.eup %1946 }
  0xc5   : > { %v1949_v53 = vpop.eup %1948  ;;  %v2861_v50 = vpop.xlane.xlu1 %656  ;;  %v795_v63 = vsel %vm597_vm2, %v1947_v11, 0.0 }
  0xc6   : > { %v655_v34 = vpop.xlane.xlu0 %654  ;;  %v794_v51 = vsel %vm597_vm2, %v1949_v53, 0.0 }
  0xc7   : > { %828 = vadd.xlane.f32.xlu1 %v793_v18  ;;  %830 = vadd.xlane.f32.xlu0 %v794_v51  ;;  %v2878_v18 = vsub.f32 %v2433_v56, %v645_v3  ;;  %v742_v3 = vmul.f32 1.442695, %v2887_v14 }
  0xc8   : > { %v1951_v45 = vpop.eup %1950 }
  0xc9   : > { %v2867_v40 = vpop.xlane.xlu1 %660  ;;  %v796_v36 = vsel %vm597_vm2, %v1951_v45, 0.0  ;;  %3730 = vst [vmem:[#allocation27_spill] sm:$0xff] %v2878_v18  ;;  %v740_v32 = vmul.f32 1.442695, %v2878_v18 }
  0xca   : > { %v2869_v30 = vpop.xlane.xlu0 %658 }
  0xcb   : > { %832 = vadd.xlane.f32.xlu1 %v795_v63  ;;  %834 = vadd.xlane.f32.xlu0 %v796_v36 }
  0xcd   : > { %v2873_v41 = vpop.xlane.xlu1 %664 }
  0xce   : > { %v2875_v19 = vpop.xlane.xlu0 %662 }
  0xd1   : > { %v1015_v53 = vpop.xlane.xlu1 %1014 }
  0xd2   : > { %v2880_v51 = vpop.xlane.xlu0 %666  ;;  %v2883_v11 = vsub.f32 %v2517_v61, %v1015_v53  ;;  %v2897_v61 = vsub.f32 %v2447_v5, %v649_v35  ;;  %v2910_v5 = vsub.f32 %v2465_v15, %v651_v57 }
  0xd4   : > { %v1110_v45 = vmul.f32 1.442695, %v2883_v11 }
  0xd5   : > { %v1019_v36 = vpop.xlane.xlu1 %1018 }
  0xd6   : > { %v1017_v63 = vpop.xlane.xlu0 %1016  ;;  %1952 = vpow2.f32 %v1110_v45  ;;  %v2894_v56 = vsub.f32 %v2535_v13, %v1019_v36  ;;  %v744_v13 = vmul.f32 1.442695, %v2897_v61 }
  0xd7   : > { %v2891_v55 = vsub.f32 %v2531_v9, %v1017_v63  ;;  %1954 = vpow2.f32 %v740_v32 }
  0xd8   : > { %v1114_v16 = vmul.f32 1.442695, %v2894_v56 }
  0xd9   : > { %v1112_v6 = vmul.f32 1.442695, %v2891_v55  ;;  %v1023_v18 = vpop.xlane.xlu1 %1022 }
  0xda   : > { %v1021_v53 = vpop.xlane.xlu0 %1020  ;;  %v2906_v9 = vsub.f32 %v2549_v27, %v1023_v18  ;;  %v2918_v27 = vsub.f32 %v2461_v12, %v653_v58  ;;  %v746_v18 = vmul.f32 1.442695, %v2910_v5  ;;  %v2929_v12 = vsub.f32 %v2479_v26, %v655_v34 }
  0xdb   : > { %1956 = vpow2.f32 %v1112_v6  ;;  %v2903_v45 = vsub.f32 %v2545_v21, %v1021_v53 }
  0xdc   : > { %1958 = vpow2.f32 %v1114_v16  ;;  %v1118_v36 = vmul.f32 1.442695, %v2906_v9 }
  0xdd   : > { %1960 = vpow2.f32 %v742_v3  ;;  %v1116_v32 = vmul.f32 1.442695, %v2903_v45  ;;  %v1027_v63 = vpop.xlane.xlu1 %1026 }
  0xde   : > { %v1025_v35 = vpop.xlane.xlu0 %1024 }
  0xdf   : > { %1962 = vpow2.f32 %v1116_v32  ;;  %v2915_v21 = vsub.f32 %v2559_v37, %v1025_v35  ;;  %v2925_v37 = vsub.f32 %v2563_v43, %v1027_v63 }
  0xe0   : > { %v1953_v6 = vpop.eup %1952  ;;  %1964 = vpow2.f32 %v744_v13  ;;  %v748_v13 = vmul.f32 1.442695, %v2918_v27 }
  0xe1   : > { %3731 = vst [vmem:[#allocation28_spill] sm:$0xff] %v2915_v21  ;;  %v1955_v3 = vpop.eup %1954  ;;  %v1174_v15 = vsel %vm597_vm2, %v1953_v6, 0.0  ;;  %v1031_v16 = vpop.xlane.xlu1 %1030  ;;  %1966 = vpow2.f32 %v1118_v36  ;;  %v1120_v53 = vmul.f32 1.442695, %v2915_v21  ;;  %v1122_v43 = vmul.f32 1.442695, %v2925_v37 }
  0xe2   : > { %v1029_v57 = vpop.xlane.xlu0 %1028  ;;  %1206 = vadd.xlane.f32.xlu1 %v1174_v15  ;;  %1968 = vpow2.f32 %v746_v18  ;;  %v797_v35 = vsel %vm597_vm2, %v1955_v3, 0.0  ;;  %v2943_v18 = vsub.f32 %v2475_v22, %v2861_v50  ;;  %v750_v3 = vmul.f32 1.442695, %v2929_v12 }
  0xe3   : > { %1970 = vpow2.f32 %v1120_v53  ;;  %v2937_v63 = vsub.f32 %v2573_v54, %v1029_v57  ;;  %v2950_v57 = vsub.f32 %v2577_v59, %v1031_v16 }
  0xe4   : > { %1972 = vpow2.f32 %v748_v13  ;;  %v752_v13 = vmul.f32 1.442695, %v2943_v18 }
  0xe5   : > { %v1957_v32 = vpop.eup %1956  ;;  %v1035_v15 = vpop.xlane.xlu1 %1034  ;;  %1974 = vpow2.f32 %v1122_v43  ;;  %v1124_v54 = vmul.f32 1.442695, %v2937_v63  ;;  %v1126_v59 = vmul.f32 1.442695, %v2950_v57 }
  0xe6   : > { %v1959_v58 = vpop.eup %1958  ;;  %v1175_v36 = vsel %vm597_vm2, %v1957_v32, 0.0  ;;  %v1033_v6 = vpop.xlane.xlu0 %1032  ;;  %836 = vadd.xlane.f32.xlu1 %v797_v35  ;;  %1976 = vpow2.f32 %v750_v3 }
  0xe7   : > { %v1961_v21 = vpop.eup %1960  ;;  %1208 = vadd.xlane.f32.xlu0 %v1175_v36  ;;  %v1176_v26 = vsel %vm597_vm2, %v1959_v58, 0.0  ;;  %1978 = vpow2.f32 %v1124_v54  ;;  %v2965_v16 = vsub.f32 %v2587_v4, %v1033_v6  ;;  %v2980_v6 = vsub.f32 %v2591_v10, %v1035_v15 }
  0xe8   : > { %v798_v53 = vsel %vm597_vm2, %v1961_v21, 0.0  ;;  %v2957_v21 = vsub.f32 %v2493_v38, %v2869_v30  ;;  %1980 = vpow2.f32 %v752_v13  ;;  %v2971_v30 = vsub.f32 %v2489_v33, %v2867_v40 }
  0xe9   : > { %v1963_v34 = vpop.eup %1962  ;;  %v1039_v35 = vpop.xlane.xlu1 %1038  ;;  %1982 = vpow2.f32 %v1126_v59  ;;  %v1128_v4 = vmul.f32 1.442695, %v2965_v16  ;;  %v2987_v13 = vsub.f32 %v2507_v52, %v2875_v19  ;;  %v1130_v10 = vmul.f32 1.442695, %v2980_v6 }
  0xea   : > { %v1037_v32 = vpop.xlane.xlu0 %1036  ;;  %v1965_v36 = vpop.eup %1964  ;;  %838 = vadd.xlane.f32.xlu1 %v798_v53  ;;  %v1177_v22 = vsel %vm597_vm2, %v1963_v34, 0.0  ;;  %v754_v3 = vmul.f32 1.442695, %v2957_v21  ;;  %v3001_v19 = vsub.f32 %v2503_v47, %v2873_v41 }
  0xeb   : > { %1210 = vadd.xlane.f32.xlu0 %v1176_v26  ;;  %v1967_v50 = vpop.eup %1966  ;;  %v799_v58 = vsel %vm597_vm2, %v1965_v36, 0.0  ;;  %v2995_v15 = vsub.f32 %v2601_v20, %v1037_v32  ;;  %v3010_v32 = vsub.f32 %v2605_v28, %v1039_v35 }
  0xec   : > { %v1969_v53 = vpop.eup %1968  ;;  %v1178_v34 = vsel %vm597_vm2, %v1967_v50, 0.0  ;;  %v756_v50 = vmul.f32 1.442695, %v2971_v30  ;;  %1984 = vpow2.f32 %v754_v3  ;;  %v758_v3 = vmul.f32 1.442695, %v2987_v13 }
  0xed   : > { %v669_v43 = vpop.xlane.xlu1 %668  ;;  %v1971_v38 = vpop.eup %1970  ;;  %v800_v36 = vsel %vm597_vm2, %v1969_v53, 0.0  ;;  %1986 = vpow2.f32 %v1128_v4  ;;  %v1132_v20 = vmul.f32 1.442695, %v2995_v15 }
  0xee   : > { %v2961_v26 = vpop.xlane.xlu0 %1040  ;;  %840 = vadd.xlane.f32.xlu1 %v799_v58  ;;  %v1973_v58 = vpop.eup %1972  ;;  %v1179_v33 = vsel %vm597_vm2, %v1971_v38, 0.0  ;;  %1988 = vpow2.f32 %v756_v50  ;;  %v3017_v50 = vsub.f32 %v2521_v0, %v2880_v51 }
  0xef   : > { %1212 = vadd.xlane.f32.xlu0 %v1177_v22  ;;  %v1975_v40 = vpop.eup %1974  ;;  %v801_v53 = vsel %vm597_vm2, %v1973_v58, 0.0  ;;  %1990 = vpow2.f32 %v1130_v10  ;;  %v3022_v10 = vsub.f32 %v2615_v42, %v669_v43 }
  0xf0   : > { %v1180_v38 = vsel %vm597_vm2, %v1975_v40, 0.0  ;;  %v760_v40 = vmul.f32 1.442695, %v3001_v19  ;;  %1992 = vpow2.f32 %v758_v3  ;;  %v3029_v3 = vsub.f32 %v2619_v46, %v2961_v26 }
  0xf1   : > { %v671_v54 = vpop.xlane.xlu1 %670  ;;  %1994 = vpow2.f32 %v1132_v20  ;;  %v762_v42 = vmul.f32 1.442695, %v3017_v50 }
  0xf2   : > { %v2976_v22 = vpop.xlane.xlu0 %1042  ;;  %842 = vadd.xlane.f32.xlu1 %v800_v36  ;;  %v1977_v36 = vpop.eup %1976  ;;  %1996 = vpow2.f32 %v760_v40  ;;  %v1136_v46 = vmul.f32 1.442695, %v3029_v3 }
  0xf3   : > { %1214 = vadd.xlane.f32.xlu0 %v1178_v34  ;;  %v1979_v52 = vpop.eup %1978  ;;  %v802_v58 = vsel %vm597_vm2, %v1977_v36, 0.0  ;;  %v3043_v26 = vsub.f32 %v2633_v2, %v2976_v22 }
  0xf4   : > { %v1181_v47 = vsel %vm597_vm2, %v1979_v52, 0.0  ;;  %v1134_v52 = vmul.f32 1.442695, %v3010_v32 }
  0xf5   : > { %v673_v59 = vpop.xlane.xlu1 %672  ;;  %v1138_v2 = vmul.f32 1.442695, %v3043_v26 }
  0xf6   : > { %v2991_v34 = vpop.xlane.xlu0 %1044  ;;  %844 = vadd.xlane.f32.xlu1 %v801_v53  ;;  %v1981_v53 = vpop.eup %1980  ;;  %1998 = vpow2.f32 %v1134_v52 }
  0xf7   : > { %1216 = vadd.xlane.f32.xlu0 %v1179_v33  ;;  %v1983_v41 = vpop.eup %1982  ;;  %v803_v36 = vsel %vm597_vm2, %v1981_v53, 0.0  ;;  %v3038_v53 = vsub.f32 %v2629_v62, %v671_v54  ;;  %2000 = vpow2.f32 %v762_v42  ;;  %v3056_v22 = vsub.f32 %v2647_v23, %v2991_v34 }
  0xf8   : > { %v1985_v35 = vpop.eup %1984  ;;  %v1182_v0 = vsel %vm597_vm2, %v1983_v41, 0.0 }
  0xf9   : > { %v675_v4 = vpop.xlane.xlu1 %674  ;;  %v1987_v51 = vpop.eup %1986  ;;  %v804_v43 = vsel %vm597_vm2, %v1985_v35, 0.0  ;;  %v766_v54 = vmul.f32 1.442695, %v3038_v53  ;;  %v3051_v35 = vsub.f32 %v2643_v17, %v673_v59  ;;  %v1140_v23 = vmul.f32 1.442695, %v3056_v22 }
  0xfa   : > { %v3006_v33 = vpop.xlane.xlu0 %1046  ;;  %846 = vadd.xlane.f32.xlu1 %v802_v58  ;;  %v764_v58 = vmul.f32 1.442695, %v3022_v10  ;;  %v1183_v41 = vsel %vm597_vm2, %v1987_v51, 0.0 }
  0xfb   : > { %1218 = vadd.xlane.f32.xlu0 %v1180_v38  ;;  %v768_v59 = vmul.f32 1.442695, %v3051_v35  ;;  %v3069_v34 = vsub.f32 %v2661_v48, %v3006_v33 }
  0xfc   : > { %2002 = vpow2.f32 %v764_v58  ;;  %v3064_v58 = vsub.f32 %v2657_v39, %v675_v4 }
  0xfd   : > { %v677_v38 = vpop.xlane.xlu1 %676  ;;  %2004 = vpow2.f32 %v1136_v46  ;;  %v1142_v48 = vmul.f32 1.442695, %v3069_v34 }
  0xfe   : > { %v3024_v28 = vpop.xlane.xlu0 %1048  ;;  %848 = vadd.xlane.f32.xlu1 %v803_v36  ;;  %v1989_v36 = vpop.eup %1988  ;;  %2006 = vpow2.f32 %v766_v54  ;;  %3732 = vst [vmem:[#allocation29_spill] sm:$0xff] %v3064_v58  ;;  %v770_v4 = vmul.f32 1.442695, %v3064_v58  ;;  %v3077_v54 = vsub.f32 %v2671_v1, %v677_v38 }
  0xff   : > { %1220 = vadd.xlane.f32.xlu0 %v1181_v47  ;;  %v1991_v40 = vpop.eup %1990  ;;  %v805_v62 = vsel %vm597_vm2, %v1989_v36, 0.0  ;;  %2008 = vpow2.f32 %v1138_v2  ;;  %v3082_v33 = vsub.f32 %v2675_v8, %v3024_v28  ;;  %v3735_v28 = vld [vmem:[#allocation5_spill] sm:$0xff] }
 0x100   : > { %v1184_v51 = vsel %vm597_vm2, %v1991_v40, 0.0  ;;  %2010 = vpow2.f32 %v768_v59  ;;  %3733 = vst [vmem:[#allocation30_spill] sm:$0xff] %v3077_v54  ;;  %v772_v38 = vmul.f32 1.442695, %v3077_v54 }
 0x101   : > { %v679_v20 = vpop.xlane.xlu1 %678  ;;  %2012 = vpow2.f32 %v1140_v23  ;;  %v1144_v8 = vmul.f32 1.442695, %v3082_v33 }
 0x102   : > { %v1051_v47 = vpop.xlane.xlu0 %1050  ;;  %850 = vadd.xlane.f32.xlu1 %v804_v43  ;;  %v1993_v43 = vpop.eup %1992  ;;  %2014 = vpow2.f32 %v770_v4 }
 0x103   : > { %1222 = vadd.xlane.f32.xlu0 %v1182_v0  ;;  %v1995_v42 = vpop.eup %1994  ;;  %v806_v17 = vsel %vm597_vm2, %v1993_v43, 0.0  ;;  %2016 = vpow2.f32 %v1142_v48  ;;  %v3094_v23 = vsub.f32 %v3735_v28, %v1051_v47 }
 0x104   : > { %v1185_v40 = vsel %vm597_vm2, %v1995_v42, 0.0  ;;  %2018 = vpow2.f32 %v772_v38 }
 0x105   : > { %v681_v52 = vpop.xlane.xlu1 %680  ;;  %2020 = vpow2.f32 %v1144_v8  ;;  %v1146_v47 = vmul.f32 1.442695, %v3094_v23 }
 0x106   : > { %v1053_v0 = vpop.xlane.xlu0 %1052  ;;  %852 = vadd.xlane.f32.xlu1 %v805_v62 }
 0x107   : > { %1224 = vadd.xlane.f32.xlu0 %v1183_v41  ;;  %v1997_v41 = vpop.eup %1996 }
 0x108   : > { %v1999_v62 = vpop.eup %1998  ;;  %v807_v39 = vsel %vm597_vm2, %v1997_v41, 0.0  ;;  %v3090_v41 = vsub.f32 %v2685_v29, %v679_v20  ;;  %v3736_v20 = vld [vmem:[#allocation6_spill] sm:$0xff] }
 0x109   : > { %v683_v36 = vpop.xlane.xlu1 %682  ;;  %v2001_v2 = vpop.eup %2000  ;;  %v3102_v48 = vsub.f32 %v3736_v20, %v681_v52  ;;  %v3739_v20 = vld [vmem:[#allocation8_spill] sm:$0xff] }
 0x10a   : > { %v1055_v46 = vpop.xlane.xlu0 %1054  ;;  %854 = vadd.xlane.f32.xlu1 %v806_v17  ;;  %v2003_v42 = vpop.eup %2002  ;;  %v1186_v17 = vsel %vm597_vm2, %v1999_v62, 0.0  ;;  %v808_v1 = vsel %vm597_vm2, %v2001_v2, 0.0  ;;  %3734 = vst [vmem:[#allocation31_spill] sm:$0xff] %v3090_v41  ;;  %v774_v29 = vmul.f32 1.442695, %v3090_v41  ;;  %v3114_v8 = vsub.f32 %v3739_v20, %v683_v36 }
 0x10b   : > { %1226 = vadd.xlane.f32.xlu0 %v1184_v51  ;;  %v2005_v59 = vpop.eup %2004  ;;  %v809_v62 = vsel %vm597_vm2, %v2003_v42, 0.0  ;;  %3737 = vst [vmem:[#allocation5_spill] sm:$0xff] %v3102_v48  ;;  %v776_v52 = vmul.f32 1.442695, %v3102_v48 }
 0x10c   : > { %2022 = vpow2.f32 %v774_v29  ;;  %3740 = vst [vmem:[#allocation6_spill] sm:$0xff] %v3114_v8  ;;  %v778_v36 = vmul.f32 1.442695, %v3114_v8 }
 0x10d   : > { %v685_v51 = vpop.xlane.xlu1 %684  ;;  %2024 = vpow2.f32 %v1146_v47  ;;  %v3742_v47 = vld [vmem:[#allocation10_spill] sm:$0xff] }
 0x10e   : > { %v1057_v43 = vpop.xlane.xlu0 %1056  ;;  %856 = vadd.xlane.f32.xlu1 %v807_v39  ;;  %v1187_v39 = vsel %vm597_vm2, %v2005_v59, 0.0  ;;  %2026 = vpow2.f32 %v776_v52 }
 0x10f   : > { %1228 = vadd.xlane.f32.xlu0 %v1185_v40  ;;  %v2007_v40 = vpop.eup %2006 }
 0x110   : > { %v2009_v2 = vpop.eup %2008  ;;  %v810_v59 = vsel %vm597_vm2, %v2007_v40, 0.0 }
 0x111   : > { %v687_v54 = vpop.xlane.xlu1 %686  ;;  %v2011_v42 = vpop.eup %2010  ;;  %v1188_v38 = vsel %vm597_vm2, %v2009_v2, 0.0 }
 0x112   : > { %858 = vadd.xlane.f32.xlu1 %v808_v1  ;;  %v1059_v4 = vpop.xlane.xlu0 %1058  ;;  %v2013_v28 = vpop.eup %2012  ;;  %v811_v2 = vsel %vm597_vm2, %v2011_v42, 0.0 }
 0x113   : > { %1230 = vadd.xlane.f32.xlu0 %v1186_v17  ;;  %v3738_v17 = vld [vmem:[#allocation7_spill] sm:$0xff]  ;;  %v2015_v41 = vpop.eup %2014  ;;  %v1189_v29 = vsel %vm597_vm2, %v2013_v28, 0.0 }
 0x114   : > { %v3106_v1 = vsub.f32 %v3738_v17, %v1053_v0  ;;  %v2017_v48 = vpop.eup %2016  ;;  %v812_v42 = vsel %vm597_vm2, %v2015_v41, 0.0 }
 0x115   : > { %v689_v40 = vpop.xlane.xlu1 %688  ;;  %v1190_v28 = vsel %vm597_vm2, %v2017_v48, 0.0 }
 0x116   : > { %860 = vadd.xlane.f32.xlu1 %v809_v62  ;;  %v1061_v62 = vpop.xlane.xlu0 %1060  ;;  %v1148_v0 = vmul.f32 1.442695, %v3106_v1 }
 0x117   : > { %1232 = vadd.xlane.f32.xlu0 %v1187_v39  ;;  %v3741_v39 = vld [vmem:[#allocation9_spill] sm:$0xff] }
 0x118   : > { %v3118_v17 = vsub.f32 %v3741_v39, %v1055_v46  ;;  %2028 = vpow2.f32 %v1148_v0  ;;  %v2019_v39 = vpop.eup %2018  ;;  %v3746_v0 = vld [vmem:[#allocation12_spill] sm:$0xff] }
 0x119   : > { %v2021_v8 = vpop.eup %2020  ;;  %v691_v58 = vpop.xlane.xlu1 %690  ;;  %2030 = vpow2.f32 %v778_v36  ;;  %v813_v48 = vsel %vm597_vm2, %v2019_v39, 0.0 }
 0x11a   : > { %862 = vadd.xlane.f32.xlu1 %v810_v59  ;;  %v3126_v59 = vsub.f32 %v3742_v47, %v685_v51  ;;  %v1150_v46 = vmul.f32 1.442695, %v3118_v17  ;;  %v1063_v52 = vpop.xlane.xlu0 %1062  ;;  %v2023_v41 = vpop.eup %2022  ;;  %v1191_v36 = vsel %vm597_vm2, %v2021_v8, 0.0 }
 0x11b   : > { %1234 = vadd.xlane.f32.xlu0 %v1188_v38  ;;  %v3744_v38 = vld [vmem:[#allocation11_spill] sm:$0xff]  ;;  %v814_v8 = vsel %vm597_vm2, %v2023_v41, 0.0 }
 0x11c   : > { %3743 = vst [vmem:[#allocation7_spill] sm:$0xff] %v3126_v59  ;;  %v3130_v20 = vsub.f32 %v3744_v38, %v1057_v43  ;;  %v780_v51 = vmul.f32 1.442695, %v3126_v59  ;;  %2032 = vpow2.f32 %v1150_v46  ;;  %v2025_v38 = vpop.eup %2024 }
 0x11d   : > { %v693_v39 = vpop.xlane.xlu1 %692 }
 0x11e   : > { %1236 = vadd.xlane.f32.xlu1 %v1189_v29  ;;  %3745 = vst [vmem:[#allocation8_spill] sm:$0xff] %v3130_v20  ;;  %v1152_v43 = vmul.f32 1.442695, %v3130_v20  ;;  %v3748_v29 = vld [vmem:[#allocation13_spill] sm:$0xff]  ;;  %2034 = vpow2.f32 %v780_v51  ;;  %v2027_v20 = vpop.eup %2026  ;;  %v1192_v51 = vsel %vm597_vm2, %v2025_v38, 0.0 }
 0x11f   : > { %864 = vadd.xlane.f32.xlu0 %v811_v2  ;;  %v3138_v2 = vsub.f32 %v3746_v0, %v687_v54  ;;  %v3142_v47 = vsub.f32 %v3748_v29, %v1059_v4  ;;  %v3750_v0 = vld [vmem:[#allocation14_spill] sm:$0xff]  ;;  %v815_v41 = vsel %vm597_vm2, %v2027_v20, 0.0 }
 0x120   : > { %v3150_v46 = vsub.f32 %v3750_v0, %v689_v40  ;;  %2036 = vpow2.f32 %v1152_v43  ;;  %v3162_v43 = vsub.f32 %v2769_v31, %v691_v58  ;;  %v3174_v58 = vsub.f32 %v2783_v7, %v693_v39 }
 0x121   : > { %3747 = vst [vmem:[#allocation9_spill] sm:$0xff] %v3138_v2  ;;  %3749 = vst [vmem:[#allocation10_spill] sm:$0xff] %v3142_v47  ;;  %v782_v54 = vmul.f32 1.442695, %v3138_v2  ;;  %v1154_v4 = vmul.f32 1.442695, %v3142_v47 }
 0x122   : > { %1238 = vadd.xlane.f32.xlu1 %v1190_v28  ;;  %3751 = vst [vmem:[#allocation11_spill] sm:$0xff] %v3150_v46  ;;  %v3752_v28 = vld [vmem:[#allocation15_spill] sm:$0xff]  ;;  %v2029_v2 = vpop.eup %2028  ;;  %v784_v40 = vmul.f32 1.442695, %v3150_v46  ;;  %3754 = vst [vmem:[#allocation13_spill] sm:$0xff] %v3162_v43 }
 0x123   : > { %866 = vadd.xlane.f32.xlu0 %v812_v42  ;;  %v1065_v42 = vpop.xlane.xlu0 %1064  ;;  %v3154_v29 = vsub.f32 %v3752_v28, %v1061_v62  ;;  %2038 = vpow2.f32 %v782_v54  ;;  %v1193_v38 = vsel %vm597_vm2, %v2029_v2, 0.0  ;;  %v1069_v28 = vpop.xlane.xlu1 %1068  ;;  %v786_v31 = vmul.f32 1.442695, %v3162_v43  ;;  %3756 = vst [vmem:[#allocation15_spill] sm:$0xff] %v3174_v58 }
 0x124   : > { %2040 = vpow2.f32 %v1154_v4  ;;  %v788_v7 = vmul.f32 1.442695, %v3174_v58  ;;  %v3186_v39 = vsub.f32 %v2797_v44, %v1069_v28 }
 0x125   : > { %3753 = vst [vmem:[#allocation12_spill] sm:$0xff] %v3154_v29  ;;  %v1156_v62 = vmul.f32 1.442695, %v3154_v29  ;;  %2042 = vpow2.f32 %v784_v40 }
 0x126   : > { %868 = vadd.xlane.f32.xlu1 %v813_v48  ;;  %v3166_v48 = vsub.f32 %v2773_v49, %v1063_v52  ;;  %v3178_v52 = vsub.f32 %v2787_v24, %v1065_v42  ;;  %3758 = vst [vmem:[#allocation33_spill] sm:$0xff] %v3186_v39  ;;  %v1164_v44 = vmul.f32 1.442695, %v3186_v39 }
 0x127   : > { %1240 = vadd.xlane.f32.xlu0 %v1191_v36  ;;  %v2031_v36 = vpop.eup %2030  ;;  %v1067_v54 = vpop.xlane.xlu0 %1066  ;;  %2044 = vpow2.f32 %v1156_v62 }
 0x128   : > { %3755 = vst [vmem:[#allocation14_spill] sm:$0xff] %v3166_v48  ;;  %v2033_v0 = vpop.eup %2032  ;;  %v1158_v49 = vmul.f32 1.442695, %v3166_v48  ;;  %3757 = vst [vmem:[#allocation32_spill] sm:$0xff] %v3178_v52  ;;  %v816_v2 = vsel %vm597_vm2, %v2031_v36, 0.0  ;;  %2046 = vpow2.f32 %v786_v31  ;;  %v3190_v42 = vsub.f32 %v2801_v60, %v1067_v54  ;;  %v1073_v40 = vpop.xlane.xlu1 %1072  ;;  %v3762_v54 = vld [vmem:[#allocation17_spill] sm:$0xff] }
 0x129   : > { %v2035_v20 = vpop.eup %2034  ;;  %v1194_v4 = vsel %vm597_vm2, %v2033_v0, 0.0  ;;  %v1160_v24 = vmul.f32 1.442695, %v3178_v52  ;;  %v3760_v0 = vld [vmem:[#allocation16_spill] sm:$0xff] }
 0x12a   : > { %1242 = vadd.xlane.f32.xlu1 %v1192_v51  ;;  %2048 = vpow2.f32 %v1158_v49  ;;  %3759 = vst [vmem:[#allocation34_spill] sm:$0xff] %v3190_v42  ;;  %v817_v36 = vsel %vm597_vm2, %v2035_v20, 0.0  ;;  %v3198_v28 = vsub.f32 %v3760_v0, %v1073_v40  ;;  %v1162_v60 = vmul.f32 1.442695, %v3190_v42  ;;  %v3764_v40 = vld [vmem:[#allocation18_spill] sm:$0xff] }
 0x12b   : > { %870 = vadd.xlane.f32.xlu0 %v814_v8  ;;  %v2037_v8 = vpop.eup %2036  ;;  %v1071_v51 = vpop.xlane.xlu0 %1070  ;;  %2050 = vpow2.f32 %v788_v7  ;;  %v1379_v42 = vld [vmem:[%s2368_s15 + $0x68] sm:$0xff] }
 0x12c   : > { %3761 = vst [vmem:[#allocation16_spill] sm:$0xff] %v3198_v28  ;;  %2052 = vpow2.f32 %v1160_v24  ;;  %v3202_v31 = vsub.f32 %v3762_v54, %v1071_v51  ;;  %v1168_v7 = vmul.f32 1.442695, %v3198_v28  ;;  %v1375_v28 = vld [vmem:[%s2368_s15 + $0x48] sm:$0xff] }
 0x12d   : > { %v2039_v62 = vpop.eup %2038  ;;  %2054 = vpow2.f32 %v1164_v44 }
 0x12e   : > { %872 = vadd.xlane.f32.xlu1 %v815_v41  ;;  %v1195_v41 = vsel %vm597_vm2, %v2037_v8, 0.0  ;;  %3763 = vst [vmem:[#allocation17_spill] sm:$0xff] %v3202_v31  ;;  %v818_v20 = vsel %vm597_vm2, %v2039_v62, 0.0  ;;  %2056 = vpow2.f32 %v1162_v60  ;;  %v1166_v24 = vmul.f32 1.442695, %v3202_v31 }
 0x12f   : > { %1244 = vadd.xlane.f32.xlu0 %v1193_v38  ;;  %v2041_v38 = vpop.eup %2040  ;;  %2058 = vpow2.f32 %v1168_v7 }
 0x130   : > { %v2043_v49 = vpop.eup %2042  ;;  %2060 = vpow2.f32 %v1166_v24 }
 0x131   : > { %v2045_v8 = vpop.eup %2044  ;;  %v819_v62 = vsel %vm597_vm2, %v2043_v49, 0.0 }
 0x132   : > { %1246 = vadd.xlane.f32.xlu1 %v1194_v4  ;;  %v1075_v4 = vpop.xlane.xlu0 %1074 }
 0x133   : > { %874 = vadd.xlane.f32.xlu0 %v816_v2  ;;  %v1196_v2 = vsel %vm597_vm2, %v2041_v38, 0.0  ;;  %v3211_v51 = vsub.f32 %v3764_v40, %v1075_v4 }
 0x135   : > { %3765 = vst [vmem:[#allocation18_spill] sm:$0xff] %v3211_v51  ;;  %v1170_v44 = vmul.f32 1.442695, %v3211_v51  ;;  %v1374_v51 = vld [vmem:[%s2368_s15 + $0x40] sm:$0xff] }
 0x136   : > { %876 = vadd.xlane.f32.xlu1 %v817_v36  ;;  %v2047_v36 = vpop.eup %2046 }
 0x137   : > { %1248 = vadd.xlane.f32.xlu0 %v1195_v41  ;;  %v1197_v41 = vsel %vm597_vm2, %v2045_v8, 0.0  ;;  %v2049_v38 = vpop.eup %2048  ;;  %v820_v60 = vsel %vm597_vm2, %v2047_v36, 0.0  ;;  %2062 = vpow2.f32 %v1170_v44 }
 0x138   : > { %v2051_v0 = vpop.eup %2050  ;;  %v1198_v54 = vsel %vm597_vm2, %v2049_v38, 0.0 }
 0x13a   : > { %1250 = vadd.xlane.f32.xlu1 %v1196_v2  ;;  %v821_v2 = vsel %vm597_vm2, %v2051_v0, 0.0  ;;  %v3236_v0 = vpop.xlane.xlu1 %1076 }
 0x13b   : > { %878 = vadd.xlane.f32.xlu0 %v818_v20  ;;  %v2053_v20 = vpop.eup %2052 }
 0x13c   : > { %v2055_v49 = vpop.eup %2054  ;;  %v1199_v4 = vsel %vm597_vm2, %v2053_v20, 0.0  ;;  %v1367_v20 = vld [vmem:[%s2368_s15 + $0x8] sm:$0xff] }
 0x13d   : > { %v2057_v8 = vpop.eup %2056  ;;  %v1201_v24 = vsel %vm597_vm2, %v2055_v49, 0.0  ;;  %v1366_v49 = vld [vmem:[%s2368_s15] sm:$0xff] }
 0x13e   : > { %880 = vadd.xlane.f32.xlu1 %v819_v62  ;;  %v2059_v7 = vpop.eup %2058  ;;  %v1200_v40 = vsel %vm597_vm2, %v2057_v8, 0.0 }
 0x13f   : > { %1252 = vadd.xlane.f32.xlu0 %v1197_v41  ;;  %v2061_v36 = vpop.eup %2060  ;;  %v1203_v62 = vsel %vm597_vm2, %v2059_v7, 0.0  ;;  %v1369_v7 = vld [vmem:[%s2368_s15 + $0x18] sm:$0xff] }
 0x140   : > { %v1202_v41 = vsel %vm597_vm2, %v2061_v36, 0.0 }
 0x141   : > { %v2063_v38 = vpop.eup %2062 }
 0x142   : > { %1254 = vadd.xlane.f32.xlu1 %v1198_v54  ;;  %v1204_v44 = vsel %vm597_vm2, %v2063_v38, 0.0 }
 0x143   : > { %882 = vadd.xlane.f32.xlu0 %v820_v60 }
 0x146   : > { %884 = vadd.xlane.f32.xlu1 %v821_v2 }
 0x147   : > { %1256 = vadd.xlane.f32.xlu0 %v1199_v4  ;;  %v1368_v4 = vld [vmem:[%s2368_s15 + $0x10] sm:$0xff] }
 0x14a   : > { %1258 = vadd.xlane.f32.xlu1 %v1200_v40  ;;  %v1370_v40 = vld [vmem:[%s2368_s15 + $0x20] sm:$0xff] }
 0x14b   : > { %1260 = vadd.xlane.f32.xlu0 %v1201_v24 }
 0x14c   : > { %v823_v60 = vpop.xlane.xlu0 %822 }
 0x14d   : > { %2064 = vlog2.f32 %v823_v60  ;;  %v1373_v60 = vld [vmem:[%s2368_s15 + $0x38] sm:$0xff] }
 0x14e   : > { %1262 = vadd.xlane.f32.xlu1 %v1202_v41 }
 0x14f   : > { %1264 = vadd.xlane.f32.xlu0 %v1203_v62  ;;  %v1371_v62 = vld [vmem:[%s2368_s15 + $0x28] sm:$0xff] }
 0x150   : > { %v3238_v54 = vpop.xlane.xlu1 %824  ;;  %v827_v2 = vpop.xlane.xlu0 %826 }
 0x151   : > { %2066 = vlog2.f32 %v827_v2 }
 0x152   : > { %1266 = vadd.xlane.f32.xlu1 %v1204_v44  ;;  %v1372_v44 = vld [vmem:[%s2368_s15 + $0x30] sm:$0xff] }
 0x154   : > { %v3243_v8 = vpop.xlane.xlu1 %828  ;;  %v831_v36 = vpop.xlane.xlu0 %830 }
 0x155   : > { %2068 = vlog2.f32 %v831_v36 }
 0x157   : > { %v2065_v24 = vpop.eup %2064 }
 0x158   : > { %v887_v41 = vmul.f32 0.6931472, %v2065_v24  ;;  %v3248_v38 = vpop.xlane.xlu1 %832 }
 0x15b   : > { %v2067_v2 = vpop.eup %2066 }
 0x15c   : > { %v891_v31 = vmul.f32 0.6931472, %v2067_v2  ;;  %v1378_v2 = vld [vmem:[%s2368_s15 + $0x60] sm:$0xff] }
 0x163   : > { %1565 = vperm.xlu1 %1937, %v1367_v20   ;;  %v3766_v20 = vld [vmem:[#allocation21_spill] sm:$0xff] }
 0x165   : > { %1560 = vperm.xlu0 %1936, %v1366_v49   ;;  %v950_v49 = vsub.f32 %v3766_v20, %v887_v41  ;;  %v1377_v41 = vld [vmem:[%s2368_s15 + $0x58] sm:$0xff] }
 0x166   : > { %v3767_v20 = vld [vmem:[#allocation20_spill] sm:$0xff] }
 0x167   : > { %1570 = vperm.xlu1 %1937, %v1368_v4   ;;  %v835_v4 = vpop.xlane.xlu0 %834  ;;  %v1398_v24 = vmul.f32 1.442695, %v950_v49  ;;  %v952_v39 = vsub.f32 %v3767_v20, %v891_v31  ;;  %v1380_v31 = vld [vmem:[%s2368_s15 + $0x70] sm:$0xff]  ;;  %v1381_v20 = vld [vmem:[%s2368_s15 + $0x78] sm:$0xff] }
 0x169   : > { %1575 = vperm.xlu0 %1936, %v1369_v7   ;;  %v1402_v52 = vmul.f32 1.442695, %v952_v39 }
 0x16b   : > { %1580 = vperm.xlu1 %1937, %v1370_v40  }
 0x16d   : > { %1585 = vperm.xlu0 %1936, %v1371_v62   ;;  %v1376_v62 = vld [vmem:[%s2368_s15 + $0x50] sm:$0xff] }
 0x16f   : > { %v1207_v7 = vpop.xlane.xlu1 %1206  ;;  %1590 = vperm.xlu1 %1937, %v1372_v44   ;;  %v2069_v44 = vpop.eup %2068 }
 0x170   : > { %2070 = vlog2.f32 %v1207_v7  ;;  %v895_v58 = vmul.f32 0.6931472, %v2069_v44 }
 0x171   : > { %1595 = vperm.xlu0 %1936, %v1373_v60   ;;  %2072 = vlog2.f32 %v835_v4 }
 0x172   : > { %2074 = vpow2.f32 %v1398_v24 }
 0x173   : > { %v837_v40 = vpop.xlane.xlu1 %836  ;;  %1600 = vperm.xlu1 %1937, %v1374_v51  }
 0x174   : > { %v3255_v36 = vpop.xlane.xlu0 %1208 }
 0x175   : > { %1605 = vperm.xlu0 %1936, %v1375_v28  }
 0x177   : > { %v839_v7 = vpop.xlane.xlu1 %838  ;;  %1610 = vperm.xlu1 %1937, %v1376_v62  }
 0x178   : > { %v1211_v60 = vpop.xlane.xlu0 %1210 }
 0x179   : > { %1615 = vperm.xlu0 %1936, %v1377_v41   ;;  %2076 = vlog2.f32 %v1211_v60  ;;  %v3768_v41 = vld [vmem:[#allocation25_spill] sm:$0xff] }
 0x17a   : > { %v2071_v51 = vpop.eup %2070  ;;  %2078 = vlog2.f32 %v837_v40  ;;  %v954_v60 = vsub.f32 %v3768_v41, %v895_v58 }
 0x17b   : > { %v1271_v28 = vmul.f32 0.6931472, %v2071_v51  ;;  %v841_v4 = vpop.xlane.xlu1 %840  ;;  %1620 = vperm.xlu1 %1937, %v1378_v2   ;;  %2080 = vpow2.f32 %v1402_v52  ;;  %v2073_v43 = vpop.eup %2072  ;;  %v1382_v2 = vld [vmem:[%s2368_s15 + $0x80] sm:$0xff] }
 0x17c   : > { %v3262_v24 = vpop.xlane.xlu0 %1212  ;;  %2082 = vlog2.f32 %v839_v7  ;;  %v2075_v51 = vpop.eup %2074  ;;  %v1406_v29 = vmul.f32 1.442695, %v954_v60 }
 0x17d   : > { %1625 = vperm.xlu0 %1936, %v1379_v42   ;;  %v1334_v62 = vsub.f32 %v2883_v11, %v1271_v28  ;;  %v1383_v42 = vld [vmem:[%s2368_s15 + $0x88] sm:$0xff]  ;;  %v899_v28 = vmul.f32 0.6931472, %v2073_v43 }
 0x17f   : > { %v843_v48 = vpop.xlane.xlu1 %842  ;;  %1630 = vperm.xlu1 %1937, %v1380_v31   ;;  %v1462_v44 = vsub.f32 %v950_v49, %v1334_v62  ;;  %v1384_v49 = vld [vmem:[%s2368_s15 + $0x90] sm:$0xff] }
 0x180   : > { %v1215_v40 = vpop.xlane.xlu0 %1214 }
 0x181   : > { %1635 = vperm.xlu0 %1936, %v1381_v20   ;;  %2084 = vlog2.f32 %v1215_v40  ;;  %v3270_v46 = vmul.f32 %v2075_v51, %v1462_v44  ;;  %v3769_v20 = vld [vmem:[#allocation26_spill] sm:$0xff]  ;;  %v1385_v51 = vld [vmem:[%s2368_s15 + $0x98] sm:$0xff] }
 0x182   : > { %2086 = vlog2.f32 %v841_v4  ;;  %v3277_v41 = vsub.f32 %v3769_v20, %v899_v28  ;;  %v1386_v20 = vld [vmem:[%s2368_s15 + $0xa0] sm:$0xff] }
 0x183   : > { %v2077_v11 = vpop.eup %2076  ;;  %v845_v52 = vpop.xlane.xlu1 %844  ;;  %1640 = vperm.xlu1 %1937, %v1382_v2   ;;  %2088 = vpow2.f32 %v1406_v29 }
 0x184   : > { %v3272_v58 = vpop.xlane.xlu0 %1216  ;;  %v2079_v7 = vpop.eup %2078  ;;  %v1275_v31 = vmul.f32 0.6931472, %v2077_v11  ;;  %2090 = vlog2.f32 %v843_v48  ;;  %v1410_v29 = vmul.f32 1.442695, %v3277_v41 }
 0x185   : > { %1645 = vperm.xlu0 %1936, %v1383_v42   ;;  %v901_v40 = vmul.f32 0.6931472, %v2079_v7  ;;  %v2081_v4 = vpop.eup %2080 }
 0x186   : > { %v1336_v62 = vsub.f32 %v2894_v56, %v1275_v31  ;;  %v2083_v47 = vpop.eup %2082  ;;  %v3770_v56 = vld [vmem:[#allocation27_spill] sm:$0xff] }
 0x187   : > { %v847_v44 = vpop.xlane.xlu1 %846  ;;  %1650 = vperm.xlu1 %1937, %v1384_v49   ;;  %v3284_v31 = vsub.f32 %v3770_v56, %v901_v40  ;;  %v903_v7 = vmul.f32 0.6931472, %v2083_v47 }
 0x188   : > { %v1219_v43 = vpop.xlane.xlu0 %1218  ;;  %v1464_v2 = vsub.f32 %v952_v39, %v1336_v62  ;;  %v3771_v39 = vld [vmem:[#allocation19_spill] sm:$0xff] }
 0x189   : > { %2092 = vlog2.f32 %v1219_v43  ;;  %v3289_v62 = vsub.f32 %v3771_v39, %v3236_v0  ;;  %v1412_v40 = vmul.f32 1.442695, %v3284_v31  ;;  %v3296_v47 = vsub.f32 %v2887_v14, %v903_v7 }
 0x18a   : > { %v3280_v11 = vmul.f32 %v2081_v4, %v1464_v2  ;;  %2094 = vlog2.f32 %v845_v52 }
 0x18b   : > { %v2085_v42 = vpop.eup %2084  ;;  %v849_v28 = vpop.xlane.xlu1 %848  ;;  %1655 = vperm.xlu1 %1937, %v1385_v51   ;;  %3772 = vst [vmem:[#allocation21_spill] sm:$0xff] %v3289_v62  ;;  %v1414_v14 = vmul.f32 1.442695, %v3296_v47 }
 0x18c   : > { %v1221_v48 = vpop.xlane.xlu0 %1220  ;;  %v1279_v49 = vmul.f32 0.6931472, %v2085_v42  ;;  %v2087_v59 = vpop.eup %2086  ;;  %v1388_v42 = vld [vmem:[%s2368_s15 + $0xb0] sm:$0xff] }
 0x18d   : > { %2096 = vlog2.f32 %v1221_v48  ;;  %v2089_v51 = vpop.eup %2088  ;;  %v905_v2 = vmul.f32 0.6931472, %v2087_v59 }
 0x18e   : > { %v1338_v43 = vsub.f32 %v2906_v9, %v1279_v49  ;;  %2098 = vpow2.f32 %v1410_v29  ;;  %v2091_v56 = vpop.eup %2090  ;;  %v1172_v9 = vmul.f32 1.442695, %v3289_v62 }
 0x18f   : > { %v3293_v4 = vpop.xlane.xlu1 %850  ;;  %1660 = vperm.xlu1 %1937, %v1386_v20   ;;  %2100 = vlog2.f32 %v847_v44  ;;  %v3304_v59 = vsub.f32 %v2897_v61, %v905_v2  ;;  %v907_v44 = vmul.f32 0.6931472, %v2091_v56  ;;  %v1390_v2 = vld [vmem:[%s2368_s15 + $0xc0] sm:$0xff] }
 0x190   : > { %v1223_v52 = vpop.xlane.xlu0 %1222  ;;  %v1466_v0 = vsub.f32 %v954_v60, %v1338_v43  ;;  %2102 = vlog2.f32 %v849_v28  ;;  %v1389_v60 = vld [vmem:[%s2368_s15 + $0xb8] sm:$0xff] }
 0x191   : > { %2104 = vlog2.f32 %v1223_v52 }
 0x192   : > { %v3300_v29 = vmul.f32 %v2089_v51, %v1466_v0  ;;  %2106 = vpow2.f32 %v1412_v40  ;;  %v1416_v40 = vmul.f32 1.442695, %v3304_v59 }
 0x193   : > { %v853_v48 = vpop.xlane.xlu1 %852  ;;  %1670 = vperm.xlu1 %1937, %v1388_v42   ;;  %v2093_v20 = vpop.eup %2092  ;;  %2108 = vpow2.f32 %v1172_v9  ;;  %v3310_v42 = vsub.f32 %v2910_v5, %v907_v44 }
 0x194   : > { %v1225_v49 = vpop.xlane.xlu0 %1224  ;;  %v2095_v7 = vpop.eup %2094  ;;  %v1283_v39 = vmul.f32 0.6931472, %v2093_v20 }
 0x195   : > { %2110 = vlog2.f32 %v1225_v49  ;;  %v909_v61 = vmul.f32 0.6931472, %v2095_v7  ;;  %v1418_v5 = vmul.f32 1.442695, %v3310_v42  ;;  %v1391_v7 = vld [vmem:[%s2368_s15 + $0xc8] sm:$0xff] }
 0x196   : > { %v1340_v28 = vsub.f32 %v2925_v37, %v1283_v39  ;;  %2112 = vpow2.f32 %v1414_v14 }
 0x197   : > { %v855_v43 = vpop.xlane.xlu1 %854  ;;  %1675 = vperm.xlu1 %1937, %v1389_v60   ;;  %v2097_v51 = vpop.eup %2096  ;;  %2114 = vlog2.f32 %v853_v48  ;;  %v3319_v44 = vsub.f32 %v2918_v27, %v909_v61 }
 0x198   : > { %v1227_v52 = vpop.xlane.xlu0 %1226  ;;  %v2099_v0 = vpop.eup %2098  ;;  %v1285_v56 = vmul.f32 0.6931472, %v2097_v51  ;;  %v1468_v37 = vsub.f32 %v3277_v41, %v1340_v28 }
 0x199   : > { %v2101_v9 = vpop.eup %2100  ;;  %2116 = vlog2.f32 %v1227_v52 }
 0x19a   : > { %v2103_v49 = vpop.eup %2102  ;;  %v1341_v20 = vsub.f32 %v2937_v63, %v1285_v56  ;;  %2118 = vpow2.f32 %v1416_v40  ;;  %v3322_v48 = vmul.f32 %v2099_v0, %v1468_v37  ;;  %v911_v52 = vmul.f32 0.6931472, %v2101_v9  ;;  %v1392_v37 = vld [vmem:[%s2368_s15 + $0xd0] sm:$0xff] }
 0x19b   : > { %v3315_v60 = vpop.xlane.xlu1 %856  ;;  %1680 = vperm.xlu1 %1937, %v1390_v2   ;;  %v2105_v39 = vpop.eup %2104  ;;  %2120 = vlog2.f32 %v855_v43  ;;  %v913_v2 = vmul.f32 0.6931472, %v2103_v49  ;;  %v1420_v0 = vmul.f32 1.442695, %v3319_v44 }
 0x19c   : > { %v1229_v14 = vpop.xlane.xlu0 %1228  ;;  %v1287_v41 = vmul.f32 0.6931472, %v2105_v39  ;;  %v1469_v63 = vsub.f32 %v3284_v31, %v1341_v20  ;;  %v2107_v28 = vpop.eup %2106  ;;  %v962_v43 = vsub.f32 %v2929_v12, %v911_v52  ;;  %v1394_v52 = vld [vmem:[%s2368_s15 + $0xe0] sm:$0xff] }
 0x19d   : > { %2122 = vlog2.f32 %v1229_v14  ;;  %v2109_v51 = vpop.eup %2108  ;;  %v3335_v14 = vsub.f32 %v2943_v18, %v913_v2 }
 0x19e   : > { %v1342_v40 = vsub.f32 %v2950_v57, %v1287_v41  ;;  %v3326_v27 = vmul.f32 %v2107_v28, %v1469_v63  ;;  %2124 = vpow2.f32 %v1418_v5  ;;  %v1205_v49 = vsel %vm597_vm2, %v2109_v51, 0.0 }
 0x19f   : > { %v859_v56 = vpop.xlane.xlu1 %858  ;;  %1685 = vperm.xlu1 %1937, %v1391_v7   ;;  %v2111_v61 = vpop.eup %2110  ;;  %v1422_v41 = vmul.f32 1.442695, %v962_v43 }
 0x1a0   : > { %v1231_v62 = vpop.xlane.xlu0 %1230  ;;  %v1289_v31 = vmul.f32 0.6931472, %v2111_v61  ;;  %v2113_v9 = vpop.eup %2112  ;;  %v1470_v57 = vsub.f32 %v3296_v47, %v1342_v40 }
 0x1a1   : > { %2126 = vlog2.f32 %v1231_v62  ;;  %v2115_v20 = vpop.eup %2114 }
 0x1a2   : > { %v1343_v39 = vsub.f32 %v2965_v16, %v1289_v31  ;;  %2128 = vpow2.f32 %v1420_v0  ;;  %v3341_v62 = vmul.f32 %v2113_v9, %v1470_v57  ;;  %v1424_v16 = vmul.f32 1.442695, %v3335_v14  ;;  %v1396_v31 = vld [vmem:[%s2368_s15 + $0xf0] sm:$0xff] }
 0x1a3   : > { %v3338_v7 = vpop.xlane.xlu1 %860  ;;  %1690 = vperm.xlu1 %1937, %v1392_v37   ;;  %v2117_v12 = vpop.eup %2116  ;;  %2130 = vlog2.f32 %v859_v56  ;;  %v917_v51 = vmul.f32 0.6931472, %v2115_v20 }
 0x1a4   : > { %1268 = vadd.xlane.f32.xlu0 %v1205_v49  ;;  %v1233_v5 = vpop.xlane.xlu0 %1232  ;;  %v1291_v63 = vmul.f32 0.6931472, %v2117_v12  ;;  %v1471_v47 = vsub.f32 %v3304_v59, %v1343_v39  ;;  %v2119_v18 = vpop.eup %2118 }
 0x1a5   : > { %2132 = vlog2.f32 %v1233_v5  ;;  %v2121_v28 = vpop.eup %2120  ;;  %v965_v49 = vsub.f32 %v2971_v30, %v917_v51 }
 0x1a6   : > { %v1344_v2 = vsub.f32 %v2980_v6, %v1291_v63  ;;  %v3348_v0 = vmul.f32 %v2119_v18, %v1471_v47  ;;  %2134 = vpow2.f32 %v1422_v41  ;;  %v919_v57 = vmul.f32 0.6931472, %v2121_v28 }
 0x1a7   : > { %v863_v40 = vpop.xlane.xlu1 %862  ;;  %1700 = vperm.xlu1 %1937, %v1394_v52   ;;  %v2123_v37 = vpop.eup %2122  ;;  %2136 = vpow2.f32 %v1424_v16  ;;  %v1428_v47 = vmul.f32 1.442695, %v965_v49 }
 0x1a8   : > { %v3346_v61 = vpop.xlane.xlu0 %1234  ;;  %v1293_v56 = vmul.f32 0.6931472, %v2123_v37  ;;  %v1472_v59 = vsub.f32 %v3310_v42, %v1344_v2  ;;  %v2125_v9 = vpop.eup %2124  ;;  %v966_v30 = vsub.f32 %v2987_v13, %v919_v57 }
 0x1aa   : > { %v1345_v20 = vsub.f32 %v2995_v15, %v1293_v56  ;;  %v3356_v12 = vmul.f32 %v2125_v9, %v1472_v59 }
 0x1ab   : > { %v1237_v6 = vpop.xlane.xlu1 %1236  ;;  %1710 = vperm.xlu1 %1937, %v1396_v31   ;;  %v2127_v5 = vpop.eup %2126 }
 0x1ac   : > { %v3354_v39 = vpop.xlane.xlu0 %864  ;;  %2138 = vlog2.f32 %v1237_v6  ;;  %v1295_v52 = vmul.f32 0.6931472, %v2127_v5  ;;  %v1473_v41 = vsub.f32 %v3319_v44, %v1345_v20  ;;  %v2129_v42 = vpop.eup %2128  ;;  %v1430_v44 = vmul.f32 1.442695, %v966_v30  ;;  %v1387_v6 = vld [vmem:[%s2368_s15 + $0xa8] sm:$0xff] }
 0x1ad   : > { %2140 = vlog2.f32 %v863_v40  ;;  %v2131_v63 = vpop.eup %2130 }
 0x1ae   : > { %v1346_v18 = vsub.f32 %v3010_v32, %v1295_v52  ;;  %v3363_v16 = vmul.f32 %v2129_v42, %v1473_v41  ;;  %v923_v31 = vmul.f32 0.6931472, %v2131_v63 }
 0x1af   : > { %v1239_v15 = vpop.xlane.xlu1 %1238  ;;  %v2133_v51 = vpop.eup %2132 }
 0x1b0   : > { %v3361_v28 = vpop.xlane.xlu0 %866  ;;  %2142 = vlog2.f32 %v1239_v15  ;;  %v1297_v2 = vmul.f32 0.6931472, %v2133_v51  ;;  %v1474_v37 = vsub.f32 %v962_v43, %v1346_v18  ;;  %v2135_v40 = vpop.eup %2134  ;;  %v968_v43 = vsub.f32 %v3017_v50, %v923_v31  ;;  %v1395_v31 = vld [vmem:[%s2368_s15 + $0xe8] sm:$0xff] }
 0x1b1   : > { %2144 = vpow2.f32 %v1428_v47  ;;  %v2137_v9 = vpop.eup %2136 }
 0x1b2   : > { %v1347_v56 = vsub.f32 %v3029_v3, %v1297_v2  ;;  %v3370_v32 = vmul.f32 %v2135_v40, %v1474_v37  ;;  %2146 = vpow2.f32 %v1430_v44  ;;  %v1434_v15 = vmul.f32 1.442695, %v968_v43 }
 0x1b3   : > { %v3366_v59 = vpop.xlane.xlu1 %868 }
 0x1b4   : > { %v3368_v13 = vpop.xlane.xlu0 %1240  ;;  %v1475_v57 = vsub.f32 %v3335_v14, %v1347_v56  ;;  %v1393_v14 = vld [vmem:[%s2368_s15 + $0xd8] sm:$0xff] }
 0x1b6   : > { %v2139_v20 = vpop.eup %2138  ;;  %v3377_v3 = vmul.f32 %v2137_v9, %v1475_v57 }
 0x1b7   : > { %v2141_v5 = vpop.eup %2140  ;;  %v1301_v52 = vmul.f32 0.6931472, %v2139_v20  ;;  %v1243_v41 = vpop.xlane.xlu1 %1242 }
 0x1b8   : > { %v3375_v42 = vpop.xlane.xlu0 %870  ;;  %2148 = vlog2.f32 %v1243_v41  ;;  %v927_v18 = vmul.f32 0.6931472, %v2141_v5  ;;  %v1397_v5 = vld [vmem:[%s2368_s15 + $0xf8] sm:$0xff] }
 0x1b9   : > { %v1349_v63 = vsub.f32 %v3056_v22, %v1301_v52  ;;  %2150 = vlog2.f32 %v3238_v54 }
 0x1ba   : > { %1665 = vperm.xlu0 %1936, %v1387_v6   ;;  %v2143_v47 = vpop.eup %2142  ;;  %v970_v22 = vsub.f32 %v3038_v53, %v927_v18  ;;  %2152 = vpow2.f32 %v1434_v15 }
 0x1bb   : > { %v1303_v51 = vmul.f32 0.6931472, %v2143_v47  ;;  %v3382_v2 = vpop.xlane.xlu1 %872  ;;  %v1477_v37 = vsub.f32 %v965_v49, %v1349_v63  ;;  %v2145_v40 = vpop.eup %2144 }
 0x1bc   : > { %v3384_v50 = vpop.xlane.xlu0 %1244  ;;  %v2147_v20 = vpop.eup %2146  ;;  %v1438_v6 = vmul.f32 1.442695, %v970_v22 }
 0x1bd   : > { %v1350_v44 = vsub.f32 %v3069_v34, %v1303_v51  ;;  %v3389_v56 = vmul.f32 %v2145_v40, %v1477_v37 }
 0x1be   : > { %1695 = vperm.xlu0 %1936, %v1393_v14  }
 0x1bf   : > { %v1247_v9 = vpop.xlane.xlu1 %1246  ;;  %v1478_v57 = vsub.f32 %v966_v30, %v1350_v44 }
 0x1c0   : > { %v3391_v54 = vpop.xlane.xlu0 %874  ;;  %2154 = vlog2.f32 %v1247_v9 }
 0x1c1   : > { %2156 = vlog2.f32 %v3243_v8  ;;  %v3395_v34 = vmul.f32 %v2147_v20, %v1478_v57 }
 0x1c2   : > { %1705 = vperm.xlu0 %1936, %v1395_v31   ;;  %v2149_v49 = vpop.eup %2148  ;;  %2158 = vlog2.f32 %v3248_v38 }
 0x1c3   : > { %v1307_v52 = vmul.f32 0.6931472, %v2149_v49  ;;  %v3397_v53 = vpop.xlane.xlu1 %876  ;;  %v2151_v63 = vpop.eup %2150  ;;  %2160 = vlog2.f32 %v3255_v36  ;;  %v3773_v36 = vld [vmem:[#allocation23_spill] sm:$0xff] }
 0x1c4   : > { %v3399_v41 = vpop.xlane.xlu0 %1248  ;;  %2162 = vpow2.f32 %v1438_v6  ;;  %v889_v14 = vmul.f32 0.6931472, %v2151_v63  ;;  %v2153_v15 = vpop.eup %2152 }
 0x1c5   : > { %v1352_v30 = vsub.f32 %v3094_v23, %v1307_v52  ;;  %2164 = vlog2.f32 %v3262_v24 }
 0x1c6   : > { %1715 = vperm.xlu0 %1936, %v1397_v5   ;;  %v951_v23 = vsub.f32 %v3773_v36, %v889_v14  ;;  %2166 = vlog2.f32 %v3272_v58  ;;  %v3776_v36 = vld [vmem:[#allocation24_spill] sm:$0xff] }
 0x1c7   : > { %v3404_v8 = vpop.xlane.xlu1 %1250  ;;  %v1480_v18 = vsub.f32 %v968_v43, %v1352_v30 }
 0x1c8   : > { %v3406_v47 = vpop.xlane.xlu0 %878  ;;  %v1400_v63 = vmul.f32 1.442695, %v951_v23 }
 0x1c9   : > { %v3408_v37 = vmul.f32 %v2153_v15, %v1480_v18  ;;  %v3775_v18 = vld [vmem:[#allocation22_spill] sm:$0xff] }
 0x1ca   : > { %v2155_v51 = vpop.eup %2154  ;;  %2168 = vpow2.f32 %v1400_v63 }
 0x1cb   : > { %v2157_v40 = vpop.eup %2156  ;;  %v1311_v44 = vmul.f32 0.6931472, %v2155_v51  ;;  %v3410_v38 = vpop.xlane.xlu1 %880  ;;  %2170 = vlog2.f32 %v3293_v4 }
 0x1cc   : > { %v3412_v31 = vpop.xlane.xlu0 %1252  ;;  %v2159_v57 = vpop.eup %2158  ;;  %v893_v20 = vmul.f32 0.6931472, %v2157_v40 }
 0x1cd   : > { %v1354_v9 = vsub.f32 %v3118_v17, %v1311_v44  ;;  %v2161_v43 = vpop.eup %2160  ;;  %v897_v15 = vmul.f32 0.6931472, %v2159_v57 }
 0x1ce   : > { %v2163_v52 = vpop.eup %2162  ;;  %v953_v14 = vsub.f32 %v3775_v18, %v893_v20  ;;  %v1273_v24 = vmul.f32 0.6931472, %v2161_v43 }
 0x1cf   : > { %v3417_v49 = vpop.xlane.xlu1 %1254  ;;  %v1482_v5 = vsub.f32 %v970_v22, %v1354_v9  ;;  %v2165_v40 = vpop.eup %2164 }
 0x1d0   : > { %v3419_v6 = vpop.xlane.xlu0 %882  ;;  %v1404_v44 = vmul.f32 1.442695, %v953_v14  ;;  %v1335_v22 = vsub.f32 %v2891_v55, %v1273_v24  ;;  %v1277_v9 = vmul.f32 0.6931472, %v2165_v40  ;;  %v2167_v57 = vpop.eup %2166 }
 0x1d1   : > { %3774 = vst [vmem:[#allocation20_spill] sm:$0xff] %v3419_v6  ;;  %v3422_v30 = vmul.f32 %v2163_v52, %v1482_v5  ;;  %v955_v6 = vsub.f32 %v3776_v36, %v897_v15  ;;  %v1281_v18 = vmul.f32 0.6931472, %v2167_v57  ;;  %v3779_v36 = vld [vmem:[#allocation28_spill] sm:$0xff] }
 0x1d2   : > { %2172 = vpow2.f32 %v1404_v44  ;;  %v1463_v52 = vsub.f32 %v951_v23, %v1335_v22  ;;  %v1337_v63 = vsub.f32 %v2903_v45, %v1277_v9 }
 0x1d3   : > { %v3425_v51 = vpop.xlane.xlu1 %884  ;;  %v1408_v20 = vmul.f32 1.442695, %v955_v6  ;;  %2174 = vlog2.f32 %v3315_v60  ;;  %v1526_v60 = vsel %vm597_vm2, %v3270_v46, 0.0 }
 0x1d4   : > { %v3427_v17 = vpop.xlane.xlu0 %1256  ;;  %v2169_v15 = vpop.eup %2168  ;;  %v1465_v44 = vsub.f32 %v953_v14, %v1337_v63 }
 0x1d5   : > { %2176 = vpow2.f32 %v1408_v20  ;;  %v1495_v24 = vmul.f32 %v2169_v15, %v1463_v52  ;;  %v2171_v40 = vpop.eup %2170 }
 0x1d6   : > { %2178 = vlog2.f32 %v3346_v61  ;;  %v915_v57 = vmul.f32 0.6931472, %v2171_v40 }
 0x1d7   : > { %v3432_v58 = vpop.xlane.xlu1 %1258  ;;  %2180 = vlog2.f32 %v3338_v7  ;;  %v1527_v45 = vsel %vm597_vm2, %v1495_v24, 0.0  ;;  %v1528_v7 = vsel %vm597_vm2, %v3280_v11, 0.0 }
 0x1d8   : > { %v3434_v5 = vpop.xlane.xlu0 %1260  ;;  %2182 = vlog2.f32 %v3368_v13 }
 0x1d9   : > { %3777 = vst [vmem:[#allocation25_spill] sm:$0xff] %v3434_v5  ;;  %v1339_v5 = vsub.f32 %v3779_v36, %v1281_v18  ;;  %2184 = vlog2.f32 %v3384_v50 }
 0x1db   : > { %v3436_v43 = vpop.xlane.xlu1 %1262  ;;  %v1467_v18 = vsub.f32 %v955_v6, %v1339_v5 }
 0x1dc   : > { %v3440_v55 = vpop.xlane.xlu0 %1264  ;;  %v2173_v9 = vpop.eup %2172 }
 0x1dd   : > { %v1497_v15 = vmul.f32 %v2173_v9, %v1465_v44  ;;  %v2175_v63 = vpop.eup %2174 }
 0x1de   : > { %v921_v44 = vmul.f32 0.6931472, %v2175_v63 }
 0x1df   : > { %v3442_v4 = vpop.xlane.xlu1 %1266  ;;  %v2177_v24 = vpop.eup %2176  ;;  %v1529_v40 = vsel %vm597_vm2, %v1497_v15, 0.0 }
 0x1e0   : > { %3778 = vst [vmem:[#allocation26_spill] sm:$0xff] %v3442_v4  ;;  %v964_v4 = vsub.f32 %v2957_v21, %v915_v57 }
 0x1e2   : > { %v1426_v9 = vmul.f32 1.442695, %v964_v4 }
 0x1e3   : > { %v1566_v23 = vpop.permute.xlu1 %1565 }
 0x1e4   : > { %v1561_v22 = vpop.permute.xlu0 %1560  ;;  %v1719_v20 = vmul.f32 %v1566_v23, %v1527_v45  ;;  %v1499_v23 = vmul.f32 %v2177_v24, %v1467_v18  ;;  %2186 = vpow2.f32 %v1426_v9 }
 0x1e5   : > { %v1718_v52 = vmul.f32 %v1561_v22, %v1526_v60  ;;  %v1530_v60 = vsel %vm597_vm2, %v3300_v29, 0.0  ;;  %v2179_v22 = vpop.eup %2178  ;;  %v1532_v29 = vsel %vm597_vm2, %v3322_v48, 0.0  ;;  %v1534_v48 = vsel %vm597_vm2, %v3341_v62, 0.0 }
 0x1e6   : > { %v2181_v57 = vpop.eup %2180  ;;  %v1531_v13 = vsel %vm597_vm2, %v1499_v23, 0.0 }
 0x1e7   : > { %v1750_v14 = vadd.f32 %v1719_v20, %v1718_v52  ;;  %v1571_v61 = vpop.permute.xlu1 %1570  ;;  %v967_v52 = vsub.f32 %v3001_v19, %v921_v44  ;;  %v2183_v19 = vpop.eup %2182 }
 0x1e8   : > { %v1576_v36 = vpop.permute.xlu0 %1575  ;;  %v1720_v46 = vmul.f32 %v1571_v61, %v1528_v7  ;;  %v925_v7 = vmul.f32 0.6931472, %v2181_v57 }
 0x1e9   : > { %v1721_v5 = vmul.f32 %v1576_v36, %v1529_v40  ;;  %v1432_v40 = vmul.f32 1.442695, %v967_v52 }
 0x1ea   : > { %v1751_v6 = vadd.f32 %v1750_v14, %v1720_v46  ;;  %v1299_v14 = vmul.f32 0.6931472, %v2179_v22  ;;  %v1533_v46 = vsel %vm597_vm2, %v3326_v27, 0.0  ;;  %v1305_v22 = vmul.f32 0.6931472, %v2183_v19 }
 0x1eb   : > { %v1581_v45 = vpop.permute.xlu1 %1580  ;;  %v1535_v27 = vsel %vm597_vm2, %v3348_v0, 0.0  ;;  %2188 = vpow2.f32 %v1432_v40  ;;  %v1537_v0 = vsel %vm597_vm2, %v3363_v16, 0.0 }
 0x1ec   : > { %v1586_v11 = vpop.permute.xlu0 %1585  ;;  %v1752_v20 = vadd.f32 %v1751_v6, %v1721_v5  ;;  %v1722_v21 = vmul.f32 %v1581_v45, %v1530_v60  ;;  %v1348_v44 = vsub.f32 %v3043_v26, %v1299_v14  ;;  %v969_v45 = vsub.f32 %v3022_v10, %v925_v7 }
 0x1ed   : > { %v1723_v18 = vmul.f32 %v1586_v11, %v1531_v13  ;;  %v1536_v26 = vsel %vm597_vm2, %v3356_v12, 0.0  ;;  %v2185_v13 = vpop.eup %2184  ;;  %v1351_v14 = vsub.f32 %v3082_v33, %v1305_v22  ;;  %v1538_v12 = vsel %vm597_vm2, %v3370_v32, 0.0 }
 0x1ee   : > { %v1753_v15 = vadd.f32 %v1752_v20, %v1722_v21  ;;  %v1476_v62 = vsub.f32 %v964_v4, %v1348_v44  ;;  %v1309_v7 = vmul.f32 0.6931472, %v2185_v13  ;;  %v1539_v33 = vsel %vm597_vm2, %v3377_v3, 0.0 }
 0x1ef   : > { %v1591_v63 = vpop.permute.xlu1 %1590  ;;  %v1479_v40 = vsub.f32 %v967_v52, %v1351_v14  ;;  %v1542_v52 = vsel %vm597_vm2, %v3395_v34, 0.0 }
 0x1f0   : > { %v1596_v61 = vpop.permute.xlu0 %1595  ;;  %v1754_v36 = vadd.f32 %v1753_v15, %v1723_v18  ;;  %v1724_v24 = vmul.f32 %v1591_v63, %v1532_v29  ;;  %v1436_v15 = vmul.f32 1.442695, %v969_v45  ;;  %v2187_v63 = vpop.eup %2186 }
 0x1f1   : > { %v1725_v23 = vmul.f32 %v1596_v61, %v1533_v46 }
 0x1f2   : > { %v1755_v50 = vadd.f32 %v1754_v36, %v1724_v24  ;;  %v1508_v24 = vmul.f32 %v2187_v63, %v1476_v62  ;;  %2190 = vpow2.f32 %v1436_v15 }
 0x1f3   : > { %v1601_v6 = vpop.permute.xlu1 %1600  ;;  %2192 = vlog2.f32 %v3354_v39 }
 0x1f4   : > { %v1606_v5 = vpop.permute.xlu0 %1605  ;;  %v1756_v60 = vadd.f32 %v1755_v50, %v1725_v23  ;;  %v1726_v11 = vmul.f32 %v1601_v6, %v1534_v48  ;;  %v1353_v23 = vsub.f32 %v3106_v1, %v1309_v7  ;;  %v1540_v6 = vsel %vm597_vm2, %v1508_v24, 0.0 }
 0x1f5   : > { %v1727_v20 = vmul.f32 %v1606_v5, %v1535_v27  ;;  %v2189_v32 = vpop.eup %2188  ;;  %v1546_v7 = vsel %vm597_vm2, %v3422_v30, 0.0  ;;  %2194 = vlog2.f32 %v3361_v28  ;;  %v3780_v30 = vld [vmem:[#allocation20_spill] sm:$0xff] }
 0x1f6   : > { %v1757_v9 = vadd.f32 %v1756_v60, %v1726_v11  ;;  %v1541_v11 = vsel %vm597_vm2, %v3389_v56, 0.0  ;;  %v1511_v22 = vmul.f32 %v2189_v32, %v1479_v40  ;;  %v1544_v56 = vsel %vm597_vm2, %v3408_v37, 0.0 }
 0x1f7   : > { %v1611_v21 = vpop.permute.xlu1 %1610  ;;  %2196 = vlog2.f32 %v3366_v59 }
 0x1f8   : > { %v1616_v57 = vpop.permute.xlu0 %1615  ;;  %v1758_v10 = vadd.f32 %v1757_v9, %v1727_v20  ;;  %v1728_v18 = vmul.f32 %v1611_v21, %v1536_v26  ;;  %v1481_v20 = vsub.f32 %v969_v45, %v1353_v23  ;;  %2198 = vlog2.f32 %v3375_v42  ;;  %v3783_v23 = vld [vmem:[#allocation31_spill] sm:$0xff] }
 0x1f9   : > { %v1729_v61 = vmul.f32 %v1616_v57, %v1537_v0  ;;  %v1543_v57 = vsel %vm597_vm2, %v1511_v22, 0.0  ;;  %2200 = vlog2.f32 %v3382_v2 }
 0x1fa   : > { %v1759_v29 = vadd.f32 %v1758_v10, %v1728_v18  ;;  %2202 = vlog2.f32 %v3391_v54 }
 0x1fb   : > { %v1621_v36 = vpop.permute.xlu1 %1620  ;;  %2204 = vlog2.f32 %v3397_v53 }
 0x1fc   : > { %v1626_v4 = vpop.permute.xlu0 %1625  ;;  %v1760_v46 = vadd.f32 %v1759_v29, %v1729_v61  ;;  %v1730_v19 = vmul.f32 %v1621_v36, %v1538_v12  ;;  %v2191_v62 = vpop.eup %2190  ;;  %2206 = vlog2.f32 %v3399_v41 }
 0x1fd   : > { %v1731_v50 = vmul.f32 %v1626_v4, %v1539_v33  ;;  %v1513_v18 = vmul.f32 %v2191_v62, %v1481_v20  ;;  %v2193_v4 = vpop.eup %2192  ;;  %2208 = vlog2.f32 %v3404_v8  ;;  %v3781_v8 = vld [vmem:[#allocation29_spill] sm:$0xff]  ;;  %v3786_v20 = vld [vmem:[#allocation6_spill] sm:$0xff] }
 0x1fe   : > { %v1761_v16 = vadd.f32 %v1760_v46, %v1730_v19  ;;  %v929_v39 = vmul.f32 0.6931472, %v2193_v4  ;;  %2210 = vlog2.f32 %v3406_v47  ;;  %v3782_v19 = vld [vmem:[#allocation30_spill] sm:$0xff] }
 0x1ff   : > { %v1631_v44 = vpop.permute.xlu1 %1630  ;;  %v1545_v45 = vsel %vm597_vm2, %v1513_v18, 0.0  ;;  %v2195_v24 = vpop.eup %2194  ;;  %2212 = vlog2.f32 %v3412_v31 }
 0x200   : > { %v1636_v48 = vpop.permute.xlu0 %1635  ;;  %v1762_v5 = vadd.f32 %v1761_v16, %v1731_v50  ;;  %v1732_v60 = vmul.f32 %v1631_v44, %v1540_v6  ;;  %v3525_v59 = vsub.f32 %v3051_v35, %v929_v39  ;;  %v931_v42 = vmul.f32 0.6931472, %v2195_v24 }
 0x201   : > { %v1733_v3 = vmul.f32 %v1636_v48, %v1541_v11  ;;  %v2197_v28 = vpop.eup %2196  ;;  %2214 = vlog2.f32 %v3410_v38  ;;  %v3784_v48 = vld [vmem:[#allocation25_spill] sm:$0xff] }
 0x202   : > { %v1763_v27 = vadd.f32 %v1762_v5, %v1732_v60  ;;  %v2199_v2 = vpop.eup %2198  ;;  %v933_v54 = vmul.f32 0.6931472, %v2197_v28  ;;  %2216 = vlog2.f32 %v3417_v49  ;;  %v1440_v41 = vmul.f32 1.442695, %v3525_v59  ;;  %v3785_v5 = vld [vmem:[#allocation5_spill] sm:$0xff] }
 0x203   : > { %v1641_v1 = vpop.permute.xlu1 %1640  ;;  %v2201_v53 = vpop.eup %2200  ;;  %2218 = vlog2.f32 %v3780_v30  ;;  %v972_v46 = vsub.f32 %v3781_v8, %v931_v42  ;;  %v935_v47 = vmul.f32 0.6931472, %v2199_v2 }
 0x204   : > { %v1646_v9 = vpop.permute.xlu0 %1645  ;;  %v1764_v21 = vadd.f32 %v1763_v27, %v1733_v3  ;;  %v1734_v26 = vmul.f32 %v1641_v1, %v1542_v52  ;;  %2220 = vlog2.f32 %v3425_v51  ;;  %v2203_v35 = vpop.eup %2202  ;;  %v3536_v33 = vsub.f32 %v3782_v19, %v933_v54  ;;  %v3795_v19 = vld [vmem:[#allocation13_spill] sm:$0xff] }
 0x205   : > { %v1735_v15 = vmul.f32 %v1646_v9, %v1543_v57  ;;  %2222 = vlog2.f32 %v3427_v17  ;;  %v2205_v31 = vpop.eup %2204  ;;  %v937_v38 = vmul.f32 0.6931472, %v2201_v53  ;;  %v1442_v50 = vmul.f32 1.442695, %v972_v46 }
 0x206   : > { %v1765_v13 = vadd.f32 %v1764_v21, %v1734_v26  ;;  %v2207_v49 = vpop.eup %2206  ;;  %2224 = vlog2.f32 %v3432_v58  ;;  %v3542_v44 = vsub.f32 %v3783_v23, %v935_v47  ;;  %v939_v6 = vmul.f32 0.6931472, %v2203_v35  ;;  %v3794_v47 = vld [vmem:[#allocation14_spill] sm:$0xff]  ;;  %v3796_v23 = vld [vmem:[#allocation15_spill] sm:$0xff] }
 0x207   : > { %v1651_v10 = vpop.permute.xlu1 %1650  ;;  %v2209_v16 = vpop.eup %2208  ;;  %2226 = vpow2.f32 %v1440_v41  ;;  %v1444_v32 = vmul.f32 1.442695, %v3536_v33  ;;  %v3547_v60 = vsub.f32 %v3785_v5, %v937_v38  ;;  %v941_v11 = vmul.f32 0.6931472, %v2205_v31  ;;  %v3793_v41 = vld [vmem:[#allocation11_spill] sm:$0xff] }
 0x208   : > { %v1766_v14 = vadd.f32 %v1765_v13, %v1735_v15  ;;  %v1736_v0 = vmul.f32 %v1651_v10, %v1544_v56  ;;  %v2211_v51 = vpop.eup %2210  ;;  %2228 = vlog2.f32 %v3784_v48  ;;  %v1313_v22 = vmul.f32 0.6931472, %v2207_v49  ;;  %v3787_v15 = vld [vmem:[#allocation7_spill] sm:$0xff]  ;;  %v3788_v56 = vld [vmem:[#allocation8_spill] sm:$0xff] }
 0x209   : > { %v2213_v17 = vpop.eup %2212  ;;  %v1315_v58 = vmul.f32 0.6931472, %v2209_v16  ;;  %2230 = vlog2.f32 %v3436_v43  ;;  %v1446_v52 = vmul.f32 1.442695, %v3542_v44  ;;  %v3554_v21 = vsub.f32 %v3786_v20, %v939_v6  ;;  %v3797_v48 = vld [vmem:[#allocation32_spill] sm:$0xff] }
 0x20a   : > { %v1767_v34 = vadd.f32 %v1766_v14, %v1736_v0  ;;  %2232 = vpow2.f32 %v1442_v50  ;;  %v943_v26 = vmul.f32 0.6931472, %v2211_v51  ;;  %v1317_v57 = vmul.f32 0.6931472, %v2213_v17  ;;  %v3789_v14 = vld [vmem:[#allocation10_spill] sm:$0xff] }
 0x20b   : > { %v1656_v63 = vpop.permute.xlu1 %1655  ;;  %v2215_v27 = vpop.eup %2214  ;;  %2234 = vlog2.f32 %v3440_v55  ;;  %v1448_v13 = vmul.f32 1.442695, %v3547_v60  ;;  %v3559_v43 = vsub.f32 %v3787_v15, %v941_v11  ;;  %v1355_v10 = vsub.f32 %v3788_v56, %v1313_v22  ;;  %v3799_v15 = vld [vmem:[#allocation33_spill] sm:$0xff] }
 0x20c   : > { %v1737_v29 = vmul.f32 %v1656_v63, %v1545_v45  ;;  %v2217_v3 = vpop.eup %2216  ;;  %2236 = vpow2.f32 %v1444_v32  ;;  %v1356_v0 = vsub.f32 %v3789_v14, %v1315_v58  ;;  %v3790_v45 = vld [vmem:[#allocation26_spill] sm:$0xff]  ;;  %v1450_v55 = vmul.f32 1.442695, %v3554_v21 }
 0x20d   : > { %v2219_v9 = vpop.eup %2218  ;;  %v1319_v63 = vmul.f32 0.6931472, %v2217_v3  ;;  %2238 = vlog2.f32 %v3790_v45  ;;  %v1452_v28 = vmul.f32 1.442695, %v3559_v43  ;;  %v1483_v53 = vsub.f32 %v3525_v59, %v1355_v10 }
 0x20e   : > { %v1768_v61 = vadd.f32 %v1767_v34, %v1737_v29  ;;  %v2221_v62 = vpop.eup %2220  ;;  %v945_v34 = vmul.f32 0.6931472, %v2215_v27  ;;  %2240 = vpow2.f32 %v1446_v52  ;;  %v947_v29 = vmul.f32 0.6931472, %v2219_v9  ;;  %v3798_v52 = vld [vmem:[#allocation34_spill] sm:$0xff] }
 0x20f   : > { %v1661_v36 = vpop.permute.xlu1 %1660  ;;  %v2223_v18 = vpop.eup %2222  ;;  %v949_v39 = vmul.f32 0.6931472, %v2221_v62  ;;  %2242 = vpow2.f32 %v1448_v13  ;;  %v1358_v35 = vsub.f32 %v3794_v47, %v1319_v63  ;;  %v1484_v31 = vsub.f32 %v972_v46, %v1356_v0 }
 0x210   : > { %v1738_v12 = vmul.f32 %v1661_v36, %v1546_v7  ;;  %v3791_v7 = vld [vmem:[#allocation9_spill] sm:$0xff]  ;;  %v1321_v42 = vmul.f32 0.6931472, %v2223_v18  ;;  %v3574_v8 = vsub.f32 %v3793_v41, %v945_v34  ;;  %v3578_v38 = vsub.f32 %v3795_v19, %v947_v29 }
 0x211   : > { %v3566_v36 = vsub.f32 %v3791_v7, %v943_v26  ;;  %v3582_v51 = vsub.f32 %v3796_v23, %v949_v39  ;;  %v1486_v27 = vsub.f32 %v3542_v44, %v1358_v35  ;;  %v3800_v29 = vld [vmem:[#allocation17_spill] sm:$0xff] }
 0x212   : > { %v3514_v37 = vadd.f32 %v1768_v61, %v1738_v12  ;;  %v2225_v61 = vpop.eup %2224  ;;  %v3792_v12 = vld [vmem:[#allocation12_spill] sm:$0xff]  ;;  %v1359_v17 = vsub.f32 %v3797_v48, %v1321_v42  ;;  %v1456_v11 = vmul.f32 1.442695, %v3574_v8  ;;  %v1458_v3 = vmul.f32 1.442695, %v3578_v38 }
 0x213   : > { %v3538_v40 = vpop.permute.xlu1 %1670  ;;  %v1357_v4 = vsub.f32 %v3792_v12, %v1317_v57  ;;  %v2227_v24 = vpop.eup %2226  ;;  %v1323_v49 = vmul.f32 0.6931472, %v2225_v61  ;;  %v1454_v50 = vmul.f32 1.442695, %v3566_v36  ;;  %v1460_v57 = vmul.f32 1.442695, %v3582_v51 }
 0x214   : > { %v2229_v30 = vpop.eup %2228  ;;  %v1515_v5 = vmul.f32 %v2227_v24, %v1483_v53  ;;  %v1487_v18 = vsub.f32 %v3547_v60, %v1359_v17  ;;  %v3801_v24 = vld [vmem:[#allocation16_spill] sm:$0xff] }
 0x215   : > { %v2231_v16 = vpop.eup %2230  ;;  %v1485_v59 = vsub.f32 %v3536_v33, %v1357_v4  ;;  %v1325_v32 = vmul.f32 0.6931472, %v2229_v30  ;;  %v1360_v9 = vsub.f32 %v3798_v52, %v1323_v49 }
 0x216   : > { %v2233_v6 = vpop.eup %2232  ;;  %v1327_v20 = vmul.f32 0.6931472, %v2231_v16  ;;  %v1547_v44 = vsel %vm597_vm2, %v1515_v5, 0.0 }
 0x217   : > { %v3551_v1 = vpop.permute.xlu1 %1675  ;;  %v2235_v46 = vpop.eup %2234  ;;  %v1516_v22 = vmul.f32 %v2233_v6, %v1484_v31  ;;  %v1361_v56 = vsub.f32 %v3799_v15, %v1325_v32  ;;  %v1488_v7 = vsub.f32 %v3554_v21, %v1360_v9 }
 0x218   : > { %v2237_v58 = vpop.eup %2236  ;;  %v1329_v10 = vmul.f32 0.6931472, %v2235_v46  ;;  %v1362_v61 = vsub.f32 %v3800_v29, %v1327_v20 }
 0x219   : > { %v2239_v33 = vpop.eup %2238  ;;  %v1517_v62 = vmul.f32 %v2237_v58, %v1485_v59  ;;  %v1548_v0 = vsel %vm597_vm2, %v1516_v22, 0.0  ;;  %v1489_v30 = vsub.f32 %v3559_v43, %v1361_v56 }
 0x21a   : > { %v2241_v13 = vpop.eup %2240  ;;  %v1740_v60 = vmul.f32 %v3538_v40, %v1548_v0  ;;  %v3802_v40 = vld [vmem:[#allocation18_spill] sm:$0xff]  ;;  %v1490_v49 = vsub.f32 %v3566_v36, %v1362_v61 }
 0x21b   : > { %v3570_v2 = vpop.permute.xlu1 %1680  ;;  %v1518_v34 = vmul.f32 %v2241_v13, %v1486_v27  ;;  %v2243_v45 = vpop.eup %2242  ;;  %v1549_v4 = vsel %vm597_vm2, %v1517_v62, 0.0 }
 0x21c   : > { %v1519_v42 = vmul.f32 %v2243_v45, %v1487_v18  ;;  %v1741_v47 = vmul.f32 %v3551_v1, %v1549_v4 }
 0x21d   : > { %v1550_v21 = vsel %vm597_vm2, %v1518_v34, 0.0 }
 0x21e   : > { %v1742_v59 = vmul.f32 %v3570_v2, %v1550_v21  ;;  %v1551_v43 = vsel %vm597_vm2, %v1519_v42, 0.0  ;;  %v1790_v42 = vld [vmem:[#allocation2] sm:$0x1] }
 0x21f   : > { %v1686_v26 = vpop.permute.xlu1 %1685 }
 0x220   : > { %v1743_v32 = vmul.f32 %v1686_v26, %v1551_v43 }
 0x231   : > { %v1269_v54 = vpop.xlane.xlu0 %1268 }
 0x232   : > { %2244 = vlog2.f32 %v1269_v54  ;;  %v1691_v54 = vpop.permute.xlu1 %1690 }
 0x233   : > { %2246 = vpow2.f32 %v1450_v55  ;;  %v1331_v55 = vmul.f32 0.6931472, %v2239_v33 }
 0x234   : > { %2248 = vpow2.f32 %v1452_v28  ;;  %v1363_v28 = vsub.f32 %v3801_v24, %v1329_v10 }
 0x235   : > { %2250 = vpow2.f32 %v1454_v50  ;;  %v1364_v31 = vsub.f32 %v3802_v40, %v1331_v55 }
 0x236   : > { %2252 = vpow2.f32 %v1456_v11  ;;  %v1491_v48 = vsub.f32 %v3574_v8, %v1363_v28  ;;  %v1701_v36 = vpop.permute.xlu1 %1700 }
 0x237   : > { %2254 = vpow2.f32 %v1458_v3  ;;  %v1492_v22 = vsub.f32 %v3578_v38, %v1364_v31 }
 0x238   : > { %2256 = vpow2.f32 %v1460_v57 }
 0x239   : > { %v1666_v14 = vpop.permute.xlu0 %1665 }
 0x23a   : > { %v1739_v63 = vmul.f32 %v1666_v14, %v1547_v44 }
 0x23c   : > { %v2245_v12 = vpop.eup %2244  ;;  %v1770_v39 = vadd.f32 %v3514_v37, %v1739_v63  ;;  %v3803_v37 = vld [vmem:[#allocation21_spill] sm:$0xff] }
 0x23d   : > { %v1333_v53 = vmul.f32 0.6931472, %v2245_v12  ;;  %v2247_v41 = vpop.eup %2246  ;;  %v1696_v50 = vpop.permute.xlu0 %1695 }
 0x23e   : > { %v1771_v35 = vadd.f32 %v1770_v39, %v1740_v60  ;;  %v1520_v19 = vmul.f32 %v2247_v41, %v1488_v7  ;;  %v2249_v23 = vpop.eup %2248 }
 0x23f   : > { %v1365_v16 = vsub.f32 %v3803_v37, %v1333_v53  ;;  %v1521_v1 = vmul.f32 %v2249_v23, %v1489_v30  ;;  %v2251_v17 = vpop.eup %2250 }
 0x240   : > { %v1772_v6 = vadd.f32 %v1771_v35, %v1741_v47  ;;  %v1552_v46 = vsel %vm597_vm2, %v1520_v19, 0.0  ;;  %v1522_v11 = vmul.f32 %v2251_v17, %v1490_v49  ;;  %v2253_v2 = vpop.eup %2252 }
 0x241   : > { %v1493_v27 = vsub.f32 %v3582_v51, %v1365_v16  ;;  %v1744_v58 = vmul.f32 %v1691_v54, %v1552_v46  ;;  %v2255_v52 = vpop.eup %2254  ;;  %v1553_v9 = vsel %vm597_vm2, %v1521_v1, 0.0  ;;  %v1523_v8 = vmul.f32 %v2253_v2, %v1491_v48  ;;  %v1706_v20 = vpop.permute.xlu0 %1705 }
 0x242   : > { %v1773_v5 = vadd.f32 %v1772_v6, %v1742_v59  ;;  %v2257_v26 = vpop.eup %2256  ;;  %v1745_v57 = vmul.f32 %v1696_v50, %v1553_v9  ;;  %v1554_v62 = vsel %vm597_vm2, %v1522_v11, 0.0  ;;  %v1524_v13 = vmul.f32 %v2255_v52, %v1492_v22  ;;  %v1711_v51 = vpop.permute.xlu1 %1710 }
 0x243   : > { %v1525_v15 = vmul.f32 %v2257_v26, %v1493_v27  ;;  %v1746_v38 = vmul.f32 %v1701_v36, %v1554_v62  ;;  %v1555_v10 = vsel %vm597_vm2, %v1523_v8, 0.0 }
 0x244   : > { %v1774_v3 = vadd.f32 %v1773_v5, %v1743_v32  ;;  %v1747_v44 = vmul.f32 %v1706_v20, %v1555_v10  ;;  %v1556_v14 = vsel %vm597_vm2, %v1524_v13, 0.0 }
 0x245   : > { %v1557_v0 = vsel %vm597_vm2, %v1525_v15, 0.0  ;;  %v1716_v34 = vpop.permute.xlu0 %1715  ;;  %v1748_v63 = vmul.f32 %v1711_v51, %v1556_v14 }
 0x246   : > { %v1775_v33 = vadd.f32 %v1774_v3, %v1744_v58  ;;  %v1749_v61 = vmul.f32 %v1716_v34, %v1557_v0 }
 0x248   : > { %v1776_v56 = vadd.f32 %v1775_v33, %v1745_v57 }
 0x24a   : > { %v1777_v18 = vadd.f32 %v1776_v56, %v1746_v38 }
 0x24c   : > { %v1778_v45 = vadd.f32 %v1777_v18, %v1747_v44 }
 0x24e   : > { %v1779_v29 = vadd.f32 %v1778_v45, %v1748_v63 }
 0x250   : > { %v1780_v55 = vadd.f32 %v1779_v29, %v1749_v61 }
 0x252   : > { %1781 = vadd.xlane.f32.xlu1 %v1780_v55 }
 0x2df   : > { %v1782_v7 = vpop.xlane.xlu1 %1781 }
 0x2e0   : > { %v1783_v12 = vrot.slane %v1782_v7, 4 }
 0x2e2   : > { %v1784_v60 = vadd.f32 %v1783_v12, %v1782_v7 }
 0x2e4   : > { %v1785_v4 = vrot.slane %v1784_v60, 2 }
 0x2e6   : > { %v1786_v39 = vadd.f32 %v1785_v4, %v1784_v60 }
 0x2e8   : > { %v1787_v24 = vrot.slane %v1786_v39, 1 }
 0x2ea   : > { %v1788_v28 = vadd.f32 %v1787_v24, %v1786_v39 }
 0x2ec   : > { %1917 = vpush %v1788_v28 }
 0x31b   : > { %1798 = sbr.rel (%p1912_p5) target bundleno = 812 (0x32c), region = 52 }
 0x31d   : > { %s1918_s18 = spop %1917 }
 0x31e   : > { %v1791_v54 = vstv %s1918_s18 }
 0x31f   : > { %v1792_v25 = vadd.f32 %v1791_v54, %v1790_v42 }
 0x321   : > { %1794 = vst.msk [vmem:[#allocation2] sm:$0x1] %vm1793_vm3, %v1792_v25 }
 0x328   : > { %v1799_v53 = vld [vmem:[#allocation2] sm:$0x1] }
 0x329   : > { %v1801_v30 = vmul.f32 0.0016393443, %v1799_v53 }
 0x32b   : > { %1802 = vst.msk [vmem:[#allocation2] sm:$0x1] %vm1793_vm3, %v1801_v30 }
 0x32c PF: > { %p1923_p6 = scmp.eq.s32.totalorder %s2340_s22, 2  ;;  %s2298_s19 = smov [#allocation2]  }
 0x32d   : > { %s1810_s20 = sshll.u32 %s2298_s19, 4  ;;  %s1811_s20 = int_to_ptr.vmem [resolvable:$true] %s1810_s20 }
 0x32e   : > { %s2258_s23 = scalar_lea.vmem %s1811_s20, 16  ;;  %s2264_s24 = scalar_lea.vmem %s1811_s20, 32 }
 0x32f   : > { %p2259_p7 = scmp.ne.s32.totalorder %s1811_s20, %s2258_s23  ;;  %p2265_p10 = scmp.lt.s32.totalorder %s1811_s20, %s1811_s20 }
 0x330   : > { %p2266_p11 = scmp.lt.s32.totalorder %s2264_s24, %s2258_s23 }
 0x331   : > { %p2260_p8 = pnand %p2259_p7, %p1923_p6 }
 0x332   : > { %p2267_p12 = por %p2266_p11, %p2265_p10 }
 0x333   : > { %p2261_p9 = pneg %p2260_p8 }
 0x335   : > { %p2268_p13 = pnand %p2267_p12, %p2261_p9 }
 0x337   : > { %2271 = shalt.err (!%p2268_p13)
}
 0x338   : > { %s2272_s27 = scalar_lea.hbm %s3662_s6, 16 }
 0x339   : > { %p2273_p0 = scmp.ne.s32.totalorder %s3662_s6, %s2272_s27  ;;  %p2278_p3 = scmp.lt.u32.totalorder %s2272_s27, %s3662_s6 }
 0x33b   : > { %p2274_p1 = pnand %p2273_p0, %p1923_p6 }
 0x33d   : > { %p2275_p2 = pneg %p2274_p1 }
 0x33f   : > { %p2280_p4 = pnand %p2278_p3, %p2275_p2 }
 0x341   : > { %2283 = shalt.err (!%p2280_p4)
}
 0x342   : > { %1920 = dma.vmem_to_hbm [thread:$0]  (%p1923_p6), %s1811_s20, 16, %s3662_s6, [#allocation3]  }
 0x343   : > { %2289 = dma.done.wait (%p1923_p6), [#allocation3], 16  }
 0x344   : > { %2291 = vsyncadd (%p1923_p6), [#allocation3], 4294967280 }
 0x345 PF: > { %s17_s21 = sadd.s32 1, %s2294_s21  }
 0x346   : > { %p14_p5 = scmp.ge.s32.totalorder %s17_s21, 5  }
 0x348   :  { %16 = sbr.rel (!%p14_p5) target bundleno = 1 (0x1), region = 91 }
 0x34f   :  { %1823 = vsyncpa [#allocation3], 1 }
 0x350   :  { %1825 = vsyncpa [#allocation3 + $0x1], 1 }

</bundles_post_ra>
